<compile_context>
chip_gen: v7x
topology: tpu7x:2x2x1
jax: 0.10.0
libtpu: 0.0.40
codegen_flags: <defaults>
</compile_context>

<pallas_src>
import functools

import numpy as np
import jax
import jax.numpy as jnp
from jax.experimental import pallas as pl
from jax.experimental.pallas import tpu as pltpu

EPS = 1e-5  # BatchNorm eps


# -----------------------------------------------------------------------------
# Fused ASPP kernel: grid = (N, K) with K = Cin tiles (reduction, last axis).
# -----------------------------------------------------------------------------
def _aspp_fused_kernel(xp_ref, w1_ref, w2_ref, w3_ref, w4_ref, wc_ref,
                       shift_ref, bias_ref, o_ref, acc_ref, *, H, W, D, dils):
    k = pl.program_id(1)

    @pl.when(k == 0)
    def _init():
        acc_ref[...] = jnp.zeros_like(acc_ref)

    Ck = xp_ref.shape[-1]
    HW = H * W

    # ---- branch 1: 1x1 conv (single centered view of the padded block) -----
    center = xp_ref[0, D:D + H, D:D + W, :].reshape(HW, Ck)
    acc_ref[0] = acc_ref[0] + jnp.dot(
        center, w1_ref[...], preferred_element_type=jnp.float32)

    # ---- branches 2-4: dilated 3x3 convs ------------------------------------
    # kw (W / sublane-axis) shift hoisted: 3 column-shifted loads per branch;
    # the kh shift indexes the leading H axis of the loaded slab (free).
    for b, (w_ref, d) in enumerate(zip((w2_ref, w3_ref, w4_ref), dils)):
        off = D - d
        part = jnp.zeros((HW, acc_ref.shape[-1]), jnp.float32)
        for kw in range(3):
            c0 = off + kw * d
            col = xp_ref[0, :, c0:c0 + W, :]                 # (Hp, W, Ck)
            for kh in range(3):
                r0 = off + kh * d
                tap = col[r0:r0 + H].reshape(HW, Ck)         # leading-axis slice
                part = part + jnp.dot(
                    tap, w_ref[kh * 3 + kw], preferred_element_type=jnp.float32)
        acc_ref[b + 1] = acc_ref[b + 1] + part

    # ---- finalize: per-branch BN+ReLU, fused concat + final 1x1 conv --------
    @pl.when(k == pl.num_programs(1) - 1)
    def _finalize():
        out_c = o_ref.shape[-1]
        shift = shift_ref[...]                               # (1, mid) f32
        y = jnp.zeros((HW, out_c), jnp.float32)
        for b in range(4):
            h = jnp.maximum(acc_ref[b] + shift, 0.0).astype(jnp.bfloat16)
            y = y + jnp.dot(h, wc_ref[b], preferred_element_type=jnp.float32)
        # bias carries: final-BN shift + global-avg-pool branch contribution.
        y = y + bias_ref[0]                                  # (1, out_c)
        o_ref[...] = jnp.maximum(y, 0.0).reshape(1, H, W, out_c).astype(o_ref.dtype)


# -----------------------------------------------------------------------------
# ASPP forward (layout plumbing, BN folding and the tiny GAP branch in JAX)
# -----------------------------------------------------------------------------
def aspp_forward(x_nchw, params, mid, out_c, dilations=(1, 6, 12, 18),
                 cin_tile=256):
    N, Cin, H, W = x_nchw.shape
    d_list = tuple(dilations[1:4])
    D = max(d_list)

    xh = jnp.transpose(x_nchw, (0, 2, 3, 1)).astype(jnp.float32)   # NHWC

    # BatchNorm in eval mode with init running stats (mean=0, var=1, g=1, b=0).
    scale_mid = jnp.full((mid,), 1.0 / np.sqrt(1.0 + EPS), jnp.float32)
    shift_mid = jnp.zeros((mid,), jnp.float32)
    scale_out = jnp.full((out_c,), 1.0 / np.sqrt(1.0 + EPS), jnp.float32)
    shift_out = jnp.zeros((out_c,), jnp.float32)

    # Fold BN scales into conv weights (per output channel).
    w1f = params["w1"] * scale_mid[None, :]
    w2f = params["w2"] * scale_mid[None, None, :]
    w3f = params["w3"] * scale_mid[None, None, :]
    w4f = params["w4"] * scale_mid[None, None, :]
    wgf = params["wg"] * scale_mid[None, :]
    wcf = params["wc"] * scale_out[None, :]                        # (5*mid, out_c)

    # Global-average-pool branch in plain JAX (negligible FLOPs); its effect on
    # the final conv is a per-image bias row -> folded into the kernel bias.
    g = jnp.mean(xh, axis=(1, 2))                                  # (N, Cin)
    x5v = jnp.maximum(g @ wgf + shift_mid[None, :], 0.0)           # (N, mid)
    bias = x5v @ wcf[4 * mid:] + shift_out[None, :]                # (N, out_c)
    bias3 = bias.reshape(N, 1, out_c).astype(jnp.float32)

    # Cin reduction tiling keeps the per-step VMEM footprint small.
    Ck = min(Cin, cin_tile)
    K = pl.cdiv(Cin, Ck)
    cpad = K * Ck - Cin

    # Pad: spatial halo = max dilation, channels to a multiple of Ck; cast the
    # MXU operands to bf16 (accumulation stays f32 inside the kernel).
    xp = jnp.pad(xh, ((0, 0), (D, D), (D, D), (0, cpad))).astype(jnp.bfloat16)
    Hp, Wp = H + 2 * D, W + 2 * D
    w1b = jnp.pad(w1f, ((0, cpad), (0, 0))).astype(jnp.bfloat16)
    w2b = jnp.pad(w2f, ((0, 0), (0, cpad), (0, 0))).astype(jnp.bfloat16)
    w3b = jnp.pad(w3f, ((0, 0), (0, cpad), (0, 0))).astype(jnp.bfloat16)
    w4b = jnp.pad(w4f, ((0, 0), (0, cpad), (0, 0))).astype(jnp.bfloat16)
    wcb = wcf[:4 * mid].reshape(4, mid, out_c).astype(jnp.bfloat16)
    shift_mid2 = shift_mid.reshape(1, mid)

    kern = functools.partial(_aspp_fused_kernel, H=H, W=W, D=D, dils=d_list)

    out_nhwc = pl.pallas_call(
        kern,
        out_shape=jax.ShapeDtypeStruct((N, H, W, out_c), jnp.float32),
        grid_spec=pltpu.PrefetchScalarGridSpec(
            num_scalar_prefetch=0,
            grid=(N, K),
            in_specs=[
                pl.BlockSpec((1, Hp, Wp, Ck), lambda n, k: (n, 0, 0, k)),
                pl.BlockSpec((Ck, mid), lambda n, k: (k, 0)),
                pl.BlockSpec((9, Ck, mid), lambda n, k: (0, k, 0)),
                pl.BlockSpec((9, Ck, mid), lambda n, k: (0, k, 0)),
                pl.BlockSpec((9, Ck, mid), lambda n, k: (0, k, 0)),
                pl.BlockSpec((4, mid, out_c), lambda n, k: (0, 0, 0)),
                pl.BlockSpec((1, mid), lambda n, k: (0, 0)),
                pl.BlockSpec((1, 1, out_c), lambda n, k: (n, 0, 0)),
            ],
            out_specs=pl.BlockSpec((1, H, W, out_c), lambda n, k: (n, 0, 0, 0)),
            scratch_shapes=[pltpu.VMEM((4, H * W, mid), jnp.float32)],
        ),
        compiler_params=pltpu.CompilerParams(
            dimension_semantics=("parallel", "arbitrary")),
    )(xp, w1b, w2b, w3b, w4b, wcb, shift_mid2, bias3)

    # TODO(synk): Dropout(0.5) is train-time stochastic; eval-mode identity here.
    return jnp.transpose(out_nhwc, (0, 3, 1, 2))                   # -> NCHW


# -----------------------------------------------------------------------------
# Deterministic parameter init (kaiming_normal_, fan_in, like the module)
# -----------------------------------------------------------------------------
def init_params(key, inplanes, mid, out_c):
    keys = jax.random.split(key, 6)

    def kaiming(k, shape, fan_in):
        return jax.random.normal(k, shape, jnp.float32) * np.sqrt(2.0 / fan_in)

    return {
        # 1x1 conv (aspp1): (Cin, mid)
        "w1": kaiming(keys[0], (inplanes, mid), inplanes),
        # 3x3 dilated convs stored as (9 taps, Cin, mid); tap k = kh*3 + kw
        "w2": kaiming(keys[1], (9, inplanes, mid), inplanes * 9),
        "w3": kaiming(keys[2], (9, inplanes, mid), inplanes * 9),
        "w4": kaiming(keys[3], (9, inplanes, mid), inplanes * 9),
        # global-avg-pool 1x1 conv : (Cin, mid)
        "wg": kaiming(keys[4], (inplanes, mid), inplanes),
        # final 1x1 conv over concatenated channels : (5*mid, out_c)
        "wc": kaiming(keys[5], (5 * mid, out_c), 5 * mid),
    }


# -----------------------------------------------------------------------------
# Pure-JAX f32 reference for correctness check
# -----------------------------------------------------------------------------
def aspp_reference(x, params, mid, out_c, dilations):
    eps_scale = 1.0 / np.sqrt(1.0 + EPS)

    def bn_relu(y):
        return jnp.maximum(y * eps_scale, 0.0)

    dn = ("NCHW", "OIHW", "NCHW")
    N, Cin, H, W = x.shape

    w1 = params["w1"].T[:, :, None, None]
    x1 = bn_relu(jax.lax.conv_general_dilated(x, w1, (1, 1), [(0, 0), (0, 0)],
                                              dimension_numbers=dn))

    def branch(w9, d):
        w = jnp.transpose(w9.reshape(3, 3, Cin, mid), (3, 2, 0, 1))
        y = jax.lax.conv_general_dilated(x, w, (1, 1), [(d, d), (d, d)],
                                         rhs_dilation=(d, d),
                                         dimension_numbers=dn)
        return bn_relu(y)

    x2 = branch(params["w2"], dilations[1])
    x3 = branch(params["w3"], dilations[2])
    x4 = branch(params["w4"], dilations[3])

    g = jnp.mean(x, axis=(2, 3))                 # (N, Cin)
    x5v = bn_relu(g @ params["wg"])              # (N, mid)
    x5 = jnp.broadcast_to(x5v[:, :, None, None], (N, mid, H, W))

    cat = jnp.concatenate([x1, x2, x3, x4, x5], axis=1)
    wc = params["wc"].T[:, :, None, None]
    y = jax.lax.conv_general_dilated(cat, wc, (1, 1), [(0, 0), (0, 0)],
                                     dimension_numbers=dn)
    return bn_relu(y)


if __name__ == "__main__":
    # Small shapes consistent with the module (channels scaled down 2048->32,
    # 256->16; same 2:1 ratio and structure).
    N, Cin, H, W = 2, 32, 16, 16
    mid, out_c = 16, 16
    dilations = (1, 6, 12, 18)  # output_stride = 16

    key = jax.random.PRNGKey(0)
    kx, kp = jax.random.split(key)
    x = jax.random.normal(kx, (N, Cin, H, W), jnp.float32)
    params = init_params(kp, Cin, mid, out_c)

    fwd = jax.jit(functools.partial(aspp_forward, mid=mid, out_c=out_c,
                                    dilations=dilations))
    out = jax.block_until_ready(fwd(x, params))
    ref = jax.block_until_ready(aspp_reference(x, params, mid, out_c, dilations))

    assert out.shape == (N, out_c, H, W), out.shape
    # bf16 MXU operands with f32 accumulation -> compare at loose tolerance.
    np.testing.assert_allclose(np.asarray(out), np.asarray(ref),
                               rtol=5e-2, atol=5e-2)
    print("KERNEL_OK")
</pallas_src>

<mosaic_0001>
module attributes {stable_mosaic.version = 11 : i64} {
  func.func @_aspp_fused_kernel(%arg0: i32, %arg1: i32, %arg2: memref<1x52x52x32xbf16, #tpu.memory_space<vmem>>, %arg3: memref<32x16xbf16, #tpu.memory_space<vmem>>, %arg4: memref<9x32x16xbf16, #tpu.memory_space<vmem>>, %arg5: memref<9x32x16xbf16, #tpu.memory_space<vmem>>, %arg6: memref<9x32x16xbf16, #tpu.memory_space<vmem>>, %arg7: memref<4x16x16xbf16, #tpu.memory_space<vmem>>, %arg8: memref<1x16xf32, #tpu.memory_space<vmem>>, %arg9: memref<1x1x16xf32, #tpu.memory_space<vmem>>, %arg10: memref<1x16x16x16xf32, #tpu.memory_space<vmem>>, %arg11: memref<4x256x16xf32, #tpu.memory_space<vmem>>) attributes {dimension_semantics = [#tpu.dimension_semantics<parallel>, #tpu.dimension_semantics<arbitrary>], iteration_bounds = array<i64: 2, 1>, scalar_prefetch = 0 : i64, scratch_operands = 1 : i64, tpu.core_type = #tpu.core_type<tc>, window_params = [{transform_indices = @transform_0, window_bounds = array<i64: 1, 52, 52, 32>}, {transform_indices = @transform_1, window_bounds = array<i64: 32, 16>}, {transform_indices = @transform_2, window_bounds = array<i64: 9, 32, 16>}, {transform_indices = @transform_3, window_bounds = array<i64: 9, 32, 16>}, {transform_indices = @transform_4, window_bounds = array<i64: 9, 32, 16>}, {pipeline_mode = #tpu.pipeline_mode<synchronous>, transform_indices = @transform_5, window_bounds = array<i64: 4, 16, 16>}, {pipeline_mode = #tpu.pipeline_mode<synchronous>, transform_indices = @transform_6, window_bounds = array<i64: 1, 16>}, {transform_indices = @transform_7, window_bounds = array<i64: 1, 1, 16>}, {transform_indices = @transform_8, window_bounds = array<i64: 1, 16, 16, 16>}]} {
    %c0_i32 = arith.constant 0 : i32
    %0 = arith.cmpi eq, %arg1, %c0_i32 : i32
    %1 = arith.extui %0 : i1 to i32
    %c0_i32_0 = arith.constant 0 : i32
    %2 = arith.cmpi ne, %1, %c0_i32_0 : i32
    scf.if %2 {
      %cst_166 = arith.constant 0.000000e+00 : f32
      %218 = vector.broadcast %cst_166 : f32 to vector<4x256x16xf32>
      %c0_167 = arith.constant 0 : index
      %c0_168 = arith.constant 0 : index
      %c0_169 = arith.constant 0 : index
      %219 = vector.load %arg11[%c0_167, %c0_168, %c0_169] : memref<4x256x16xf32, #tpu.memory_space<vmem>>, vector<4x256x16xf32>
      tpu.vector_store %arg11[%c0_167, %c0_168, %c0_169], %218 {strides = array<i32>} : memref<4x256x16xf32, #tpu.memory_space<vmem>>, vector<4x256x16xf32>,
    } else {
    }
    %c0 = arith.constant 0 : index
    %c18 = arith.constant 18 : index
    %c18_1 = arith.constant 18 : index
    %c0_2 = arith.constant 0 : index
    %3 = vector.load %arg2[%c0, %c18, %c18_1, %c0_2] : memref<1x52x52x32xbf16, #tpu.memory_space<vmem>>, vector<1x16x16x32xbf16>
    %4 = vector.shape_cast %3 : vector<1x16x16x32xbf16> to vector<16x16x32xbf16>
    %5 = vector.shape_cast %4 : vector<16x16x32xbf16> to vector<256x32xbf16>
    %c0_3 = arith.constant 0 : index
    %c0_4 = arith.constant 0 : index
    %c0_5 = arith.constant 0 : index
    %6 = vector.load %arg11[%c0_3, %c0_4, %c0_5] : memref<4x256x16xf32, #tpu.memory_space<vmem>>, vector<1x256x16xf32>
    %7 = vector.shape_cast %6 : vector<1x256x16xf32> to vector<256x16xf32>
    %c0_6 = arith.constant 0 : index
    %c0_7 = arith.constant 0 : index
    %8 = vector.load %arg3[%c0_6, %c0_7] : memref<32x16xbf16, #tpu.memory_space<vmem>>, vector<32x16xbf16>
    %cst = arith.constant dense<0.000000e+00> : vector<256x16xf32>
    %9 = tpu.matmul %5, %8, %cst {dimension_numbers = #tpu.dot_dimension_numbers<[1], [0], [0], [1], [0, 0, 1, 1], [], []>} : vector<256x32xbf16>, vector<32x16xbf16>, vector<256x16xf32> -> vector<256x16xf32>
    %10 = arith.addf %7, %9 : vector<256x16xf32>
    %c0_8 = arith.constant 0 : index
    %c0_9 = arith.constant 0 : index
    %c0_10 = arith.constant 0 : index
    %11 = vector.load %arg11[%c0_8, %c0_9, %c0_10] : memref<4x256x16xf32, #tpu.memory_space<vmem>>, vector<1x256x16xf32>
    %12 = vector.shape_cast %11 : vector<1x256x16xf32> to vector<256x16xf32>
    %13 = vector.shape_cast %10 : vector<256x16xf32> to vector<1x256x16xf32>
    tpu.vector_store %arg11[%c0_8, %c0_9, %c0_10], %13 {strides = array<i32>} : memref<4x256x16xf32, #tpu.memory_space<vmem>>, vector<1x256x16xf32>,
    %cst_11 = arith.constant 0.000000e+00 : f32
    %14 = vector.broadcast %cst_11 : f32 to vector<256x16xf32>
    %c0_12 = arith.constant 0 : index
    %c0_13 = arith.constant 0 : index
    %c12 = arith.constant 12 : index
    %c0_14 = arith.constant 0 : index
    %15 = vector.load %arg2[%c0_12, %c0_13, %c12, %c0_14] : memref<1x52x52x32xbf16, #tpu.memory_space<vmem>>, vector<1x52x16x32xbf16>
    %16 = vector.shape_cast %15 : vector<1x52x16x32xbf16> to vector<52x16x32xbf16>
    %17 = vector.extract_strided_slice %16 {offsets = [12, 0, 0], sizes = [16, 16, 32], strides = [1, 1, 1]} : vector<52x16x32xbf16> to vector<16x16x32xbf16>
    %18 = vector.shape_cast %17 : vector<16x16x32xbf16> to vector<256x32xbf16>
    %c0_15 = arith.constant 0 : index
    %c0_16 = arith.constant 0 : index
    %c0_17 = arith.constant 0 : index
    %19 = vector.load %arg4[%c0_15, %c0_16, %c0_17] : memref<9x32x16xbf16, #tpu.memory_space<vmem>>, vector<1x32x16xbf16>
    %20 = vector.shape_cast %19 : vector<1x32x16xbf16> to vector<32x16xbf16>
    %cst_18 = arith.constant dense<0.000000e+00> : vector<256x16xf32>
    %21 = tpu.matmul %18, %20, %cst_18 {dimension_numbers = #tpu.dot_dimension_numbers<[1], [0], [0], [1], [0, 0, 1, 1], [], []>} : vector<256x32xbf16>, vector<32x16xbf16>, vector<256x16xf32> -> vector<256x16xf32>
    %22 = arith.addf %14, %21 : vector<256x16xf32>
    %23 = vector.extract_strided_slice %16 {offsets = [18, 0, 0], sizes = [16, 16, 32], strides = [1, 1, 1]} : vector<52x16x32xbf16> to vector<16x16x32xbf16>
    %24 = vector.shape_cast %23 : vector<16x16x32xbf16> to vector<256x32xbf16>
    %c3 = arith.constant 3 : index
    %c0_19 = arith.constant 0 : index
    %c0_20 = arith.constant 0 : index
    %25 = vector.load %arg4[%c3, %c0_19, %c0_20] : memref<9x32x16xbf16, #tpu.memory_space<vmem>>, vector<1x32x16xbf16>
    %26 = vector.shape_cast %25 : vector<1x32x16xbf16> to vector<32x16xbf16>
    %cst_21 = arith.constant dense<0.000000e+00> : vector<256x16xf32>
    %27 = tpu.matmul %24, %26, %cst_21 {dimension_numbers = #tpu.dot_dimension_numbers<[1], [0], [0], [1], [0, 0, 1, 1], [], []>} : vector<256x32xbf16>, vector<32x16xbf16>, vector<256x16xf32> -> vector<256x16xf32>
    %28 = arith.addf %22, %27 : vector<256x16xf32>
    %29 = vector.extract_strided_slice %16 {offsets = [24, 0, 0], sizes = [16, 16, 32], strides = [1, 1, 1]} : vector<52x16x32xbf16> to vector<16x16x32xbf16>
    %30 = vector.shape_cast %29 : vector<16x16x32xbf16> to vector<256x32xbf16>
    %c6 = arith.constant 6 : index
    %c0_22 = arith.constant 0 : index
    %c0_23 = arith.constant 0 : index
    %31 = vector.load %arg4[%c6, %c0_22, %c0_23] : memref<9x32x16xbf16, #tpu.memory_space<vmem>>, vector<1x32x16xbf16>
    %32 = vector.shape_cast %31 : vector<1x32x16xbf16> to vector<32x16xbf16>
    %cst_24 = arith.constant dense<0.000000e+00> : vector<256x16xf32>
    %33 = tpu.matmul %30, %32, %cst_24 {dimension_numbers = #tpu.dot_dimension_numbers<[1], [0], [0], [1], [0, 0, 1, 1], [], []>} : vector<256x32xbf16>, vector<32x16xbf16>, vector<256x16xf32> -> vector<256x16xf32>
    %34 = arith.addf %28, %33 : vector<256x16xf32>
    %c0_25 = arith.constant 0 : index
    %c0_26 = arith.constant 0 : index
    %c18_27 = arith.constant 18 : index
    %c0_28 = arith.constant 0 : index
    %35 = vector.load %arg2[%c0_25, %c0_26, %c18_27, %c0_28] : memref<1x52x52x32xbf16, #tpu.memory_space<vmem>>, vector<1x52x16x32xbf16>
    %36 = vector.shape_cast %35 : vector<1x52x16x32xbf16> to vector<52x16x32xbf16>
    %37 = vector.extract_strided_slice %36 {offsets = [12, 0, 0], sizes = [16, 16, 32], strides = [1, 1, 1]} : vector<52x16x32xbf16> to vector<16x16x32xbf16>
    %38 = vector.shape_cast %37 : vector<16x16x32xbf16> to vector<256x32xbf16>
    %c1 = arith.constant 1 : index
    %c0_29 = arith.constant 0 : index
    %c0_30 = arith.constant 0 : index
    %39 = vector.load %arg4[%c1, %c0_29, %c0_30] : memref<9x32x16xbf16, #tpu.memory_space<vmem>>, vector<1x32x16xbf16>
    %40 = vector.shape_cast %39 : vector<1x32x16xbf16> to vector<32x16xbf16>
    %cst_31 = arith.constant dense<0.000000e+00> : vector<256x16xf32>
    %41 = tpu.matmul %38, %40, %cst_31 {dimension_numbers = #tpu.dot_dimension_numbers<[1], [0], [0], [1], [0, 0, 1, 1], [], []>} : vector<256x32xbf16>, vector<32x16xbf16>, vector<256x16xf32> -> vector<256x16xf32>
    %42 = arith.addf %34, %41 : vector<256x16xf32>
    %43 = vector.extract_strided_slice %36 {offsets = [18, 0, 0], sizes = [16, 16, 32], strides = [1, 1, 1]} : vector<52x16x32xbf16> to vector<16x16x32xbf16>
    %44 = vector.shape_cast %43 : vector<16x16x32xbf16> to vector<256x32xbf16>
    %c4 = arith.constant 4 : index
    %c0_32 = arith.constant 0 : index
    %c0_33 = arith.constant 0 : index
    %45 = vector.load %arg4[%c4, %c0_32, %c0_33] : memref<9x32x16xbf16, #tpu.memory_space<vmem>>, vector<1x32x16xbf16>
    %46 = vector.shape_cast %45 : vector<1x32x16xbf16> to vector<32x16xbf16>
    %cst_34 = arith.constant dense<0.000000e+00> : vector<256x16xf32>
    %47 = tpu.matmul %44, %46, %cst_34 {dimension_numbers = #tpu.dot_dimension_numbers<[1], [0], [0], [1], [0, 0, 1, 1], [], []>} : vector<256x32xbf16>, vector<32x16xbf16>, vector<256x16xf32> -> vector<256x16xf32>
    %48 = arith.addf %42, %47 : vector<256x16xf32>
    %49 = vector.extract_strided_slice %36 {offsets = [24, 0, 0], sizes = [16, 16, 32], strides = [1, 1, 1]} : vector<52x16x32xbf16> to vector<16x16x32xbf16>
    %50 = vector.shape_cast %49 : vector<16x16x32xbf16> to vector<256x32xbf16>
    %c7 = arith.constant 7 : index
    %c0_35 = arith.constant 0 : index
    %c0_36 = arith.constant 0 : index
    %51 = vector.load %arg4[%c7, %c0_35, %c0_36] : memref<9x32x16xbf16, #tpu.memory_space<vmem>>, vector<1x32x16xbf16>
    %52 = vector.shape_cast %51 : vector<1x32x16xbf16> to vector<32x16xbf16>
    %cst_37 = arith.constant dense<0.000000e+00> : vector<256x16xf32>
    %53 = tpu.matmul %50, %52, %cst_37 {dimension_numbers = #tpu.dot_dimension_numbers<[1], [0], [0], [1], [0, 0, 1, 1], [], []>} : vector<256x32xbf16>, vector<32x16xbf16>, vector<256x16xf32> -> vector<256x16xf32>
    %54 = arith.addf %48, %53 : vector<256x16xf32>
    %c0_38 = arith.constant 0 : index
    %c0_39 = arith.constant 0 : index
    %c24 = arith.constant 24 : index
    %c0_40 = arith.constant 0 : index
    %55 = vector.load %arg2[%c0_38, %c0_39, %c24, %c0_40] : memref<1x52x52x32xbf16, #tpu.memory_space<vmem>>, vector<1x52x16x32xbf16>
    %56 = vector.shape_cast %55 : vector<1x52x16x32xbf16> to vector<52x16x32xbf16>
    %57 = vector.extract_strided_slice %56 {offsets = [12, 0, 0], sizes = [16, 16, 32], strides = [1, 1, 1]} : vector<52x16x32xbf16> to vector<16x16x32xbf16>
    %58 = vector.shape_cast %57 : vector<16x16x32xbf16> to vector<256x32xbf16>
    %c2 = arith.constant 2 : index
    %c0_41 = arith.constant 0 : index
    %c0_42 = arith.constant 0 : index
    %59 = vector.load %arg4[%c2, %c0_41, %c0_42] : memref<9x32x16xbf16, #tpu.memory_space<vmem>>, vector<1x32x16xbf16>
    %60 = vector.shape_cast %59 : vector<1x32x16xbf16> to vector<32x16xbf16>
    %cst_43 = arith.constant dense<0.000000e+00> : vector<256x16xf32>
    %61 = tpu.matmul %58, %60, %cst_43 {dimension_numbers = #tpu.dot_dimension_numbers<[1], [0], [0], [1], [0, 0, 1, 1], [], []>} : vector<256x32xbf16>, vector<32x16xbf16>, vector<256x16xf32> -> vector<256x16xf32>
    %62 = arith.addf %54, %61 : vector<256x16xf32>
    %63 = vector.extract_strided_slice %56 {offsets = [18, 0, 0], sizes = [16, 16, 32], strides = [1, 1, 1]} : vector<52x16x32xbf16> to vector<16x16x32xbf16>
    %64 = vector.shape_cast %63 : vector<16x16x32xbf16> to vector<256x32xbf16>
    %c5 = arith.constant 5 : index
    %c0_44 = arith.constant 0 : index
    %c0_45 = arith.constant 0 : index
    %65 = vector.load %arg4[%c5, %c0_44, %c0_45] : memref<9x32x16xbf16, #tpu.memory_space<vmem>>, vector<1x32x16xbf16>
    %66 = vector.shape_cast %65 : vector<1x32x16xbf16> to vector<32x16xbf16>
    %cst_46 = arith.constant dense<0.000000e+00> : vector<256x16xf32>
    %67 = tpu.matmul %64, %66, %cst_46 {dimension_numbers = #tpu.dot_dimension_numbers<[1], [0], [0], [1], [0, 0, 1, 1], [], []>} : vector<256x32xbf16>, vector<32x16xbf16>, vector<256x16xf32> -> vector<256x16xf32>
    %68 = arith.addf %62, %67 : vector<256x16xf32>
    %69 = vector.extract_strided_slice %56 {offsets = [24, 0, 0], sizes = [16, 16, 32], strides = [1, 1, 1]} : vector<52x16x32xbf16> to vector<16x16x32xbf16>
    %70 = vector.shape_cast %69 : vector<16x16x32xbf16> to vector<256x32xbf16>
    %c8 = arith.constant 8 : index
    %c0_47 = arith.constant 0 : index
    %c0_48 = arith.constant 0 : index
    %71 = vector.load %arg4[%c8, %c0_47, %c0_48] : memref<9x32x16xbf16, #tpu.memory_space<vmem>>, vector<1x32x16xbf16>
    %72 = vector.shape_cast %71 : vector<1x32x16xbf16> to vector<32x16xbf16>
    %cst_49 = arith.constant dense<0.000000e+00> : vector<256x16xf32>
    %73 = tpu.matmul %70, %72, %cst_49 {dimension_numbers = #tpu.dot_dimension_numbers<[1], [0], [0], [1], [0, 0, 1, 1], [], []>} : vector<256x32xbf16>, vector<32x16xbf16>, vector<256x16xf32> -> vector<256x16xf32>
    %74 = arith.addf %68, %73 : vector<256x16xf32>
    %c1_50 = arith.constant 1 : index
    %c0_51 = arith.constant 0 : index
    %c0_52 = arith.constant 0 : index
    %75 = vector.load %arg11[%c1_50, %c0_51, %c0_52] : memref<4x256x16xf32, #tpu.memory_space<vmem>>, vector<1x256x16xf32>
    %76 = vector.shape_cast %75 : vector<1x256x16xf32> to vector<256x16xf32>
    %77 = arith.addf %76, %74 : vector<256x16xf32>
    %c1_53 = arith.constant 1 : index
    %c0_54 = arith.constant 0 : index
    %c0_55 = arith.constant 0 : index
    %78 = vector.load %arg11[%c1_53, %c0_54, %c0_55] : memref<4x256x16xf32, #tpu.memory_space<vmem>>, vector<1x256x16xf32>
    %79 = vector.shape_cast %78 : vector<1x256x16xf32> to vector<256x16xf32>
    %80 = vector.shape_cast %77 : vector<256x16xf32> to vector<1x256x16xf32>
    tpu.vector_store %arg11[%c1_53, %c0_54, %c0_55], %80 {strides = array<i32>} : memref<4x256x16xf32, #tpu.memory_space<vmem>>, vector<1x256x16xf32>,
    %cst_56 = arith.constant 0.000000e+00 : f32
    %81 = vector.broadcast %cst_56 : f32 to vector<256x16xf32>
    %c0_57 = arith.constant 0 : index
    %c0_58 = arith.constant 0 : index
    %c6_59 = arith.constant 6 : index
    %c0_60 = arith.constant 0 : index
    %82 = vector.load %arg2[%c0_57, %c0_58, %c6_59, %c0_60] : memref<1x52x52x32xbf16, #tpu.memory_space<vmem>>, vector<1x52x16x32xbf16>
    %83 = vector.shape_cast %82 : vector<1x52x16x32xbf16> to vector<52x16x32xbf16>
    %84 = vector.extract_strided_slice %83 {offsets = [6, 0, 0], sizes = [16, 16, 32], strides = [1, 1, 1]} : vector<52x16x32xbf16> to vector<16x16x32xbf16>
    %85 = vector.shape_cast %84 : vector<16x16x32xbf16> to vector<256x32xbf16>
    %c0_61 = arith.constant 0 : index
    %c0_62 = arith.constant 0 : index
    %c0_63 = arith.constant 0 : index
    %86 = vector.load %arg5[%c0_61, %c0_62, %c0_63] : memref<9x32x16xbf16, #tpu.memory_space<vmem>>, vector<1x32x16xbf16>
    %87 = vector.shape_cast %86 : vector<1x32x16xbf16> to vector<32x16xbf16>
    %cst_64 = arith.constant dense<0.000000e+00> : vector<256x16xf32>
    %88 = tpu.matmul %85, %87, %cst_64 {dimension_numbers = #tpu.dot_dimension_numbers<[1], [0], [0], [1], [0, 0, 1, 1], [], []>} : vector<256x32xbf16>, vector<32x16xbf16>, vector<256x16xf32> -> vector<256x16xf32>
    %89 = arith.addf %81, %88 : vector<256x16xf32>
    %90 = vector.extract_strided_slice %83 {offsets = [18, 0, 0], sizes = [16, 16, 32], strides = [1, 1, 1]} : vector<52x16x32xbf16> to vector<16x16x32xbf16>
    %91 = vector.shape_cast %90 : vector<16x16x32xbf16> to vector<256x32xbf16>
    %c3_65 = arith.constant 3 : index
    %c0_66 = arith.constant 0 : index
    %c0_67 = arith.constant 0 : index
    %92 = vector.load %arg5[%c3_65, %c0_66, %c0_67] : memref<9x32x16xbf16, #tpu.memory_space<vmem>>, vector<1x32x16xbf16>
    %93 = vector.shape_cast %92 : vector<1x32x16xbf16> to vector<32x16xbf16>
    %cst_68 = arith.constant dense<0.000000e+00> : vector<256x16xf32>
    %94 = tpu.matmul %91, %93, %cst_68 {dimension_numbers = #tpu.dot_dimension_numbers<[1], [0], [0], [1], [0, 0, 1, 1], [], []>} : vector<256x32xbf16>, vector<32x16xbf16>, vector<256x16xf32> -> vector<256x16xf32>
    %95 = arith.addf %89, %94 : vector<256x16xf32>
    %96 = vector.extract_strided_slice %83 {offsets = [30, 0, 0], sizes = [16, 16, 32], strides = [1, 1, 1]} : vector<52x16x32xbf16> to vector<16x16x32xbf16>
    %97 = vector.shape_cast %96 : vector<16x16x32xbf16> to vector<256x32xbf16>
    %c6_69 = arith.constant 6 : index
    %c0_70 = arith.constant 0 : index
    %c0_71 = arith.constant 0 : index
    %98 = vector.load %arg5[%c6_69, %c0_70, %c0_71] : memref<9x32x16xbf16, #tpu.memory_space<vmem>>, vector<1x32x16xbf16>
    %99 = vector.shape_cast %98 : vector<1x32x16xbf16> to vector<32x16xbf16>
    %cst_72 = arith.constant dense<0.000000e+00> : vector<256x16xf32>
    %100 = tpu.matmul %97, %99, %cst_72 {dimension_numbers = #tpu.dot_dimension_numbers<[1], [0], [0], [1], [0, 0, 1, 1], [], []>} : vector<256x32xbf16>, vector<32x16xbf16>, vector<256x16xf32> -> vector<256x16xf32>
    %101 = arith.addf %95, %100 : vector<256x16xf32>
    %c0_73 = arith.constant 0 : index
    %c0_74 = arith.constant 0 : index
    %c18_75 = arith.constant 18 : index
    %c0_76 = arith.constant 0 : index
    %102 = vector.load %arg2[%c0_73, %c0_74, %c18_75, %c0_76] : memref<1x52x52x32xbf16, #tpu.memory_space<vmem>>, vector<1x52x16x32xbf16>
    %103 = vector.shape_cast %102 : vector<1x52x16x32xbf16> to vector<52x16x32xbf16>
    %104 = vector.extract_strided_slice %103 {offsets = [6, 0, 0], sizes = [16, 16, 32], strides = [1, 1, 1]} : vector<52x16x32xbf16> to vector<16x16x32xbf16>
    %105 = vector.shape_cast %104 : vector<16x16x32xbf16> to vector<256x32xbf16>
    %c1_77 = arith.constant 1 : index
    %c0_78 = arith.constant 0 : index
    %c0_79 = arith.constant 0 : index
    %106 = vector.load %arg5[%c1_77, %c0_78, %c0_79] : memref<9x32x16xbf16, #tpu.memory_space<vmem>>, vector<1x32x16xbf16>
    %107 = vector.shape_cast %106 : vector<1x32x16xbf16> to vector<32x16xbf16>
    %cst_80 = arith.constant dense<0.000000e+00> : vector<256x16xf32>
    %108 = tpu.matmul %105, %107, %cst_80 {dimension_numbers = #tpu.dot_dimension_numbers<[1], [0], [0], [1], [0, 0, 1, 1], [], []>} : vector<256x32xbf16>, vector<32x16xbf16>, vector<256x16xf32> -> vector<256x16xf32>
    %109 = arith.addf %101, %108 : vector<256x16xf32>
    %110 = vector.extract_strided_slice %103 {offsets = [18, 0, 0], sizes = [16, 16, 32], strides = [1, 1, 1]} : vector<52x16x32xbf16> to vector<16x16x32xbf16>
    %111 = vector.shape_cast %110 : vector<16x16x32xbf16> to vector<256x32xbf16>
    %c4_81 = arith.constant 4 : index
    %c0_82 = arith.constant 0 : index
    %c0_83 = arith.constant 0 : index
    %112 = vector.load %arg5[%c4_81, %c0_82, %c0_83] : memref<9x32x16xbf16, #tpu.memory_space<vmem>>, vector<1x32x16xbf16>
    %113 = vector.shape_cast %112 : vector<1x32x16xbf16> to vector<32x16xbf16>
    %cst_84 = arith.constant dense<0.000000e+00> : vector<256x16xf32>
    %114 = tpu.matmul %111, %113, %cst_84 {dimension_numbers = #tpu.dot_dimension_numbers<[1], [0], [0], [1], [0, 0, 1, 1], [], []>} : vector<256x32xbf16>, vector<32x16xbf16>, vector<256x16xf32> -> vector<256x16xf32>
    %115 = arith.addf %109, %114 : vector<256x16xf32>
    %116 = vector.extract_strided_slice %103 {offsets = [30, 0, 0], sizes = [16, 16, 32], strides = [1, 1, 1]} : vector<52x16x32xbf16> to vector<16x16x32xbf16>
    %117 = vector.shape_cast %116 : vector<16x16x32xbf16> to vector<256x32xbf16>
    %c7_85 = arith.constant 7 : index
    %c0_86 = arith.constant 0 : index
    %c0_87 = arith.constant 0 : index
    %118 = vector.load %arg5[%c7_85, %c0_86, %c0_87] : memref<9x32x16xbf16, #tpu.memory_space<vmem>>, vector<1x32x16xbf16>
    %119 = vector.shape_cast %118 : vector<1x32x16xbf16> to vector<32x16xbf16>
    %cst_88 = arith.constant dense<0.000000e+00> : vector<256x16xf32>
    %120 = tpu.matmul %117, %119, %cst_88 {dimension_numbers = #tpu.dot_dimension_numbers<[1], [0], [0], [1], [0, 0, 1, 1], [], []>} : vector<256x32xbf16>, vector<32x16xbf16>, vector<256x16xf32> -> vector<256x16xf32>
    %121 = arith.addf %115, %120 : vector<256x16xf32>
    %c0_89 = arith.constant 0 : index
    %c0_90 = arith.constant 0 : index
    %c30 = arith.constant 30 : index
    %c0_91 = arith.constant 0 : index
    %122 = vector.load %arg2[%c0_89, %c0_90, %c30, %c0_91] : memref<1x52x52x32xbf16, #tpu.memory_space<vmem>>, vector<1x52x16x32xbf16>
    %123 = vector.shape_cast %122 : vector<1x52x16x32xbf16> to vector<52x16x32xbf16>
    %124 = vector.extract_strided_slice %123 {offsets = [6, 0, 0], sizes = [16, 16, 32], strides = [1, 1, 1]} : vector<52x16x32xbf16> to vector<16x16x32xbf16>
    %125 = vector.shape_cast %124 : vector<16x16x32xbf16> to vector<256x32xbf16>
    %c2_92 = arith.constant 2 : index
    %c0_93 = arith.constant 0 : index
    %c0_94 = arith.constant 0 : index
    %126 = vector.load %arg5[%c2_92, %c0_93, %c0_94] : memref<9x32x16xbf16, #tpu.memory_space<vmem>>, vector<1x32x16xbf16>
    %127 = vector.shape_cast %126 : vector<1x32x16xbf16> to vector<32x16xbf16>
    %cst_95 = arith.constant dense<0.000000e+00> : vector<256x16xf32>
    %128 = tpu.matmul %125, %127, %cst_95 {dimension_numbers = #tpu.dot_dimension_numbers<[1], [0], [0], [1], [0, 0, 1, 1], [], []>} : vector<256x32xbf16>, vector<32x16xbf16>, vector<256x16xf32> -> vector<256x16xf32>
    %129 = arith.addf %121, %128 : vector<256x16xf32>
    %130 = vector.extract_strided_slice %123 {offsets = [18, 0, 0], sizes = [16, 16, 32], strides = [1, 1, 1]} : vector<52x16x32xbf16> to vector<16x16x32xbf16>
    %131 = vector.shape_cast %130 : vector<16x16x32xbf16> to vector<256x32xbf16>
    %c5_96 = arith.constant 5 : index
    %c0_97 = arith.constant 0 : index
    %c0_98 = arith.constant 0 : index
    %132 = vector.load %arg5[%c5_96, %c0_97, %c0_98] : memref<9x32x16xbf16, #tpu.memory_space<vmem>>, vector<1x32x16xbf16>
    %133 = vector.shape_cast %132 : vector<1x32x16xbf16> to vector<32x16xbf16>
    %cst_99 = arith.constant dense<0.000000e+00> : vector<256x16xf32>
    %134 = tpu.matmul %131, %133, %cst_99 {dimension_numbers = #tpu.dot_dimension_numbers<[1], [0], [0], [1], [0, 0, 1, 1], [], []>} : vector<256x32xbf16>, vector<32x16xbf16>, vector<256x16xf32> -> vector<256x16xf32>
    %135 = arith.addf %129, %134 : vector<256x16xf32>
    %136 = vector.extract_strided_slice %123 {offsets = [30, 0, 0], sizes = [16, 16, 32], strides = [1, 1, 1]} : vector<52x16x32xbf16> to vector<16x16x32xbf16>
    %137 = vector.shape_cast %136 : vector<16x16x32xbf16> to vector<256x32xbf16>
    %c8_100 = arith.constant 8 : index
    %c0_101 = arith.constant 0 : index
    %c0_102 = arith.constant 0 : index
    %138 = vector.load %arg5[%c8_100, %c0_101, %c0_102] : memref<9x32x16xbf16, #tpu.memory_space<vmem>>, vector<1x32x16xbf16>
    %139 = vector.shape_cast %138 : vector<1x32x16xbf16> to vector<32x16xbf16>
    %cst_103 = arith.constant dense<0.000000e+00> : vector<256x16xf32>
    %140 = tpu.matmul %137, %139, %cst_103 {dimension_numbers = #tpu.dot_dimension_numbers<[1], [0], [0], [1], [0, 0, 1, 1], [], []>} : vector<256x32xbf16>, vector<32x16xbf16>, vector<256x16xf32> -> vector<256x16xf32>
    %141 = arith.addf %135, %140 : vector<256x16xf32>
    %c2_104 = arith.constant 2 : index
    %c0_105 = arith.constant 0 : index
    %c0_106 = arith.constant 0 : index
    %142 = vector.load %arg11[%c2_104, %c0_105, %c0_106] : memref<4x256x16xf32, #tpu.memory_space<vmem>>, vector<1x256x16xf32>
    %143 = vector.shape_cast %142 : vector<1x256x16xf32> to vector<256x16xf32>
    %144 = arith.addf %143, %141 : vector<256x16xf32>
    %c2_107 = arith.constant 2 : index
    %c0_108 = arith.constant 0 : index
    %c0_109 = arith.constant 0 : index
    %145 = vector.load %arg11[%c2_107, %c0_108, %c0_109] : memref<4x256x16xf32, #tpu.memory_space<vmem>>, vector<1x256x16xf32>
    %146 = vector.shape_cast %145 : vector<1x256x16xf32> to vector<256x16xf32>
    %147 = vector.shape_cast %144 : vector<256x16xf32> to vector<1x256x16xf32>
    tpu.vector_store %arg11[%c2_107, %c0_108, %c0_109], %147 {strides = array<i32>} : memref<4x256x16xf32, #tpu.memory_space<vmem>>, vector<1x256x16xf32>,
    %cst_110 = arith.constant 0.000000e+00 : f32
    %148 = vector.broadcast %cst_110 : f32 to vector<256x16xf32>
    %c0_111 = arith.constant 0 : index
    %c0_112 = arith.constant 0 : index
    %c0_113 = arith.constant 0 : index
    %c0_114 = arith.constant 0 : index
    %149 = vector.load %arg2[%c0_111, %c0_112, %c0_113, %c0_114] : memref<1x52x52x32xbf16, #tpu.memory_space<vmem>>, vector<1x52x16x32xbf16>
    %150 = vector.shape_cast %149 : vector<1x52x16x32xbf16> to vector<52x16x32xbf16>
    %151 = vector.extract_strided_slice %150 {offsets = [0, 0, 0], sizes = [16, 16, 32], strides = [1, 1, 1]} : vector<52x16x32xbf16> to vector<16x16x32xbf16>
    %152 = vector.shape_cast %151 : vector<16x16x32xbf16> to vector<256x32xbf16>
    %c0_115 = arith.constant 0 : index
    %c0_116 = arith.constant 0 : index
    %c0_117 = arith.constant 0 : index
    %153 = vector.load %arg6[%c0_115, %c0_116, %c0_117] : memref<9x32x16xbf16, #tpu.memory_space<vmem>>, vector<1x32x16xbf16>
    %154 = vector.shape_cast %153 : vector<1x32x16xbf16> to vector<32x16xbf16>
    %cst_118 = arith.constant dense<0.000000e+00> : vector<256x16xf32>
    %155 = tpu.matmul %152, %154, %cst_118 {dimension_numbers = #tpu.dot_dimension_numbers<[1], [0], [0], [1], [0, 0, 1, 1], [], []>} : vector<256x32xbf16>, vector<32x16xbf16>, vector<256x16xf32> -> vector<256x16xf32>
    %156 = arith.addf %148, %155 : vector<256x16xf32>
    %157 = vector.extract_strided_slice %150 {offsets = [18, 0, 0], sizes = [16, 16, 32], strides = [1, 1, 1]} : vector<52x16x32xbf16> to vector<16x16x32xbf16>
    %158 = vector.shape_cast %157 : vector<16x16x32xbf16> to vector<256x32xbf16>
    %c3_119 = arith.constant 3 : index
    %c0_120 = arith.constant 0 : index
    %c0_121 = arith.constant 0 : index
    %159 = vector.load %arg6[%c3_119, %c0_120, %c0_121] : memref<9x32x16xbf16, #tpu.memory_space<vmem>>, vector<1x32x16xbf16>
    %160 = vector.shape_cast %159 : vector<1x32x16xbf16> to vector<32x16xbf16>
    %cst_122 = arith.constant dense<0.000000e+00> : vector<256x16xf32>
    %161 = tpu.matmul %158, %160, %cst_122 {dimension_numbers = #tpu.dot_dimension_numbers<[1], [0], [0], [1], [0, 0, 1, 1], [], []>} : vector<256x32xbf16>, vector<32x16xbf16>, vector<256x16xf32> -> vector<256x16xf32>
    %162 = arith.addf %156, %161 : vector<256x16xf32>
    %163 = vector.extract_strided_slice %150 {offsets = [36, 0, 0], sizes = [16, 16, 32], strides = [1, 1, 1]} : vector<52x16x32xbf16> to vector<16x16x32xbf16>
    %164 = vector.shape_cast %163 : vector<16x16x32xbf16> to vector<256x32xbf16>
    %c6_123 = arith.constant 6 : index
    %c0_124 = arith.constant 0 : index
    %c0_125 = arith.constant 0 : index
    %165 = vector.load %arg6[%c6_123, %c0_124, %c0_125] : memref<9x32x16xbf16, #tpu.memory_space<vmem>>, vector<1x32x16xbf16>
    %166 = vector.shape_cast %165 : vector<1x32x16xbf16> to vector<32x16xbf16>
    %cst_126 = arith.constant dense<0.000000e+00> : vector<256x16xf32>
    %167 = tpu.matmul %164, %166, %cst_126 {dimension_numbers = #tpu.dot_dimension_numbers<[1], [0], [0], [1], [0, 0, 1, 1], [], []>} : vector<256x32xbf16>, vector<32x16xbf16>, vector<256x16xf32> -> vector<256x16xf32>
    %168 = arith.addf %162, %167 : vector<256x16xf32>
    %c0_127 = arith.constant 0 : index
    %c0_128 = arith.constant 0 : index
    %c18_129 = arith.constant 18 : index
    %c0_130 = arith.constant 0 : index
    %169 = vector.load %arg2[%c0_127, %c0_128, %c18_129, %c0_130] : memref<1x52x52x32xbf16, #tpu.memory_space<vmem>>, vector<1x52x16x32xbf16>
    %170 = vector.shape_cast %169 : vector<1x52x16x32xbf16> to vector<52x16x32xbf16>
    %171 = vector.extract_strided_slice %170 {offsets = [0, 0, 0], sizes = [16, 16, 32], strides = [1, 1, 1]} : vector<52x16x32xbf16> to vector<16x16x32xbf16>
    %172 = vector.shape_cast %171 : vector<16x16x32xbf16> to vector<256x32xbf16>
    %c1_131 = arith.constant 1 : index
    %c0_132 = arith.constant 0 : index
    %c0_133 = arith.constant 0 : index
    %173 = vector.load %arg6[%c1_131, %c0_132, %c0_133] : memref<9x32x16xbf16, #tpu.memory_space<vmem>>, vector<1x32x16xbf16>
    %174 = vector.shape_cast %173 : vector<1x32x16xbf16> to vector<32x16xbf16>
    %cst_134 = arith.constant dense<0.000000e+00> : vector<256x16xf32>
    %175 = tpu.matmul %172, %174, %cst_134 {dimension_numbers = #tpu.dot_dimension_numbers<[1], [0], [0], [1], [0, 0, 1, 1], [], []>} : vector<256x32xbf16>, vector<32x16xbf16>, vector<256x16xf32> -> vector<256x16xf32>
    %176 = arith.addf %168, %175 : vector<256x16xf32>
    %177 = vector.extract_strided_slice %170 {offsets = [18, 0, 0], sizes = [16, 16, 32], strides = [1, 1, 1]} : vector<52x16x32xbf16> to vector<16x16x32xbf16>
    %178 = vector.shape_cast %177 : vector<16x16x32xbf16> to vector<256x32xbf16>
    %c4_135 = arith.constant 4 : index
    %c0_136 = arith.constant 0 : index
    %c0_137 = arith.constant 0 : index
    %179 = vector.load %arg6[%c4_135, %c0_136, %c0_137] : memref<9x32x16xbf16, #tpu.memory_space<vmem>>, vector<1x32x16xbf16>
    %180 = vector.shape_cast %179 : vector<1x32x16xbf16> to vector<32x16xbf16>
    %cst_138 = arith.constant dense<0.000000e+00> : vector<256x16xf32>
    %181 = tpu.matmul %178, %180, %cst_138 {dimension_numbers = #tpu.dot_dimension_numbers<[1], [0], [0], [1], [0, 0, 1, 1], [], []>} : vector<256x32xbf16>, vector<32x16xbf16>, vector<256x16xf32> -> vector<256x16xf32>
    %182 = arith.addf %176, %181 : vector<256x16xf32>
    %183 = vector.extract_strided_slice %170 {offsets = [36, 0, 0], sizes = [16, 16, 32], strides = [1, 1, 1]} : vector<52x16x32xbf16> to vector<16x16x32xbf16>
    %184 = vector.shape_cast %183 : vector<16x16x32xbf16> to vector<256x32xbf16>
    %c7_139 = arith.constant 7 : index
    %c0_140 = arith.constant 0 : index
    %c0_141 = arith.constant 0 : index
    %185 = vector.load %arg6[%c7_139, %c0_140, %c0_141] : memref<9x32x16xbf16, #tpu.memory_space<vmem>>, vector<1x32x16xbf16>
    %186 = vector.shape_cast %185 : vector<1x32x16xbf16> to vector<32x16xbf16>
    %cst_142 = arith.constant dense<0.000000e+00> : vector<256x16xf32>
    %187 = tpu.matmul %184, %186, %cst_142 {dimension_numbers = #tpu.dot_dimension_numbers<[1], [0], [0], [1], [0, 0, 1, 1], [], []>} : vector<256x32xbf16>, vector<32x16xbf16>, vector<256x16xf32> -> vector<256x16xf32>
    %188 = arith.addf %182, %187 : vector<256x16xf32>
    %c0_143 = arith.constant 0 : index
    %c0_144 = arith.constant 0 : index
    %c36 = arith.constant 36 : index
    %c0_145 = arith.constant 0 : index
    %189 = vector.load %arg2[%c0_143, %c0_144, %c36, %c0_145] : memref<1x52x52x32xbf16, #tpu.memory_space<vmem>>, vector<1x52x16x32xbf16>
    %190 = vector.shape_cast %189 : vector<1x52x16x32xbf16> to vector<52x16x32xbf16>
    %191 = vector.extract_strided_slice %190 {offsets = [0, 0, 0], sizes = [16, 16, 32], strides = [1, 1, 1]} : vector<52x16x32xbf16> to vector<16x16x32xbf16>
    %192 = vector.shape_cast %191 : vector<16x16x32xbf16> to vector<256x32xbf16>
    %c2_146 = arith.constant 2 : index
    %c0_147 = arith.constant 0 : index
    %c0_148 = arith.constant 0 : index
    %193 = vector.load %arg6[%c2_146, %c0_147, %c0_148] : memref<9x32x16xbf16, #tpu.memory_space<vmem>>, vector<1x32x16xbf16>
    %194 = vector.shape_cast %193 : vector<1x32x16xbf16> to vector<32x16xbf16>
    %cst_149 = arith.constant dense<0.000000e+00> : vector<256x16xf32>
    %195 = tpu.matmul %192, %194, %cst_149 {dimension_numbers = #tpu.dot_dimension_numbers<[1], [0], [0], [1], [0, 0, 1, 1], [], []>} : vector<256x32xbf16>, vector<32x16xbf16>, vector<256x16xf32> -> vector<256x16xf32>
    %196 = arith.addf %188, %195 : vector<256x16xf32>
    %197 = vector.extract_strided_slice %190 {offsets = [18, 0, 0], sizes = [16, 16, 32], strides = [1, 1, 1]} : vector<52x16x32xbf16> to vector<16x16x32xbf16>
    %198 = vector.shape_cast %197 : vector<16x16x32xbf16> to vector<256x32xbf16>
    %c5_150 = arith.constant 5 : index
    %c0_151 = arith.constant 0 : index
    %c0_152 = arith.constant 0 : index
    %199 = vector.load %arg6[%c5_150, %c0_151, %c0_152] : memref<9x32x16xbf16, #tpu.memory_space<vmem>>, vector<1x32x16xbf16>
    %200 = vector.shape_cast %199 : vector<1x32x16xbf16> to vector<32x16xbf16>
    %cst_153 = arith.constant dense<0.000000e+00> : vector<256x16xf32>
    %201 = tpu.matmul %198, %200, %cst_153 {dimension_numbers = #tpu.dot_dimension_numbers<[1], [0], [0], [1], [0, 0, 1, 1], [], []>} : vector<256x32xbf16>, vector<32x16xbf16>, vector<256x16xf32> -> vector<256x16xf32>
    %202 = arith.addf %196, %201 : vector<256x16xf32>
    %203 = vector.extract_strided_slice %190 {offsets = [36, 0, 0], sizes = [16, 16, 32], strides = [1, 1, 1]} : vector<52x16x32xbf16> to vector<16x16x32xbf16>
    %204 = vector.shape_cast %203 : vector<16x16x32xbf16> to vector<256x32xbf16>
    %c8_154 = arith.constant 8 : index
    %c0_155 = arith.constant 0 : index
    %c0_156 = arith.constant 0 : index
    %205 = vector.load %arg6[%c8_154, %c0_155, %c0_156] : memref<9x32x16xbf16, #tpu.memory_space<vmem>>, vector<1x32x16xbf16>
    %206 = vector.shape_cast %205 : vector<1x32x16xbf16> to vector<32x16xbf16>
    %cst_157 = arith.constant dense<0.000000e+00> : vector<256x16xf32>
    %207 = tpu.matmul %204, %206, %cst_157 {dimension_numbers = #tpu.dot_dimension_numbers<[1], [0], [0], [1], [0, 0, 1, 1], [], []>} : vector<256x32xbf16>, vector<32x16xbf16>, vector<256x16xf32> -> vector<256x16xf32>
    %208 = arith.addf %202, %207 : vector<256x16xf32>
    %c3_158 = arith.constant 3 : index
    %c0_159 = arith.constant 0 : index
    %c0_160 = arith.constant 0 : index
    %209 = vector.load %arg11[%c3_158, %c0_159, %c0_160] : memref<4x256x16xf32, #tpu.memory_space<vmem>>, vector<1x256x16xf32>
    %210 = vector.shape_cast %209 : vector<1x256x16xf32> to vector<256x16xf32>
    %211 = arith.addf %210, %208 : vector<256x16xf32>
    %c3_161 = arith.constant 3 : index
    %c0_162 = arith.constant 0 : index
    %c0_163 = arith.constant 0 : index
    %212 = vector.load %arg11[%c3_161, %c0_162, %c0_163] : memref<4x256x16xf32, #tpu.memory_space<vmem>>, vector<1x256x16xf32>
    %213 = vector.shape_cast %212 : vector<1x256x16xf32> to vector<256x16xf32>
    %214 = vector.shape_cast %211 : vector<256x16xf32> to vector<1x256x16xf32>
    tpu.vector_store %arg11[%c3_161, %c0_162, %c0_163], %214 {strides = array<i32>} : memref<4x256x16xf32, #tpu.memory_space<vmem>>, vector<1x256x16xf32>,
    %c0_i32_164 = arith.constant 0 : i32
    %215 = arith.cmpi eq, %arg1, %c0_i32_164 : i32
    %216 = arith.extui %215 : i1 to i32
    %c0_i32_165 = arith.constant 0 : i32
    %217 = arith.cmpi ne, %216, %c0_i32_165 : i32
    scf.if %217 {
      %c0_166 = arith.constant 0 : index
      %c0_167 = arith.constant 0 : index
      %218 = vector.load %arg8[%c0_166, %c0_167] : memref<1x16xf32, #tpu.memory_space<vmem>>, vector<1x16xf32>
      %cst_168 = arith.constant 0.000000e+00 : f32
      %219 = vector.broadcast %cst_168 : f32 to vector<256x16xf32>
      %c0_169 = arith.constant 0 : index
      %c0_170 = arith.constant 0 : index
      %c0_171 = arith.constant 0 : index
      %220 = vector.load %arg11[%c0_169, %c0_170, %c0_171] : memref<4x256x16xf32, #tpu.memory_space<vmem>>, vector<1x256x16xf32>
      %221 = vector.shape_cast %220 : vector<1x256x16xf32> to vector<256x16xf32>
      %222 = vector.broadcast %218 : vector<1x16xf32> to vector<256x16xf32>
      %223 = arith.addf %221, %222 : vector<256x16xf32>
      %cst_172 = arith.constant 0.000000e+00 : f32
      %224 = vector.broadcast %cst_172 : f32 to vector<256x16xf32>
      %225 = arith.maximumf %223, %224 : vector<256x16xf32>
      %226 = arith.truncf %225 : vector<256x16xf32> to vector<256x16xbf16>
      %c0_173 = arith.constant 0 : index
      %c0_174 = arith.constant 0 : index
      %c0_175 = arith.constant 0 : index
      %227 = vector.load %arg7[%c0_173, %c0_174, %c0_175] : memref<4x16x16xbf16, #tpu.memory_space<vmem>>, vector<1x16x16xbf16>
      %228 = vector.shape_cast %227 : vector<1x16x16xbf16> to vector<16x16xbf16>
      %cst_176 = arith.constant dense<0.000000e+00> : vector<256x16xf32>
      %229 = tpu.matmul %226, %228, %cst_176 {dimension_numbers = #tpu.dot_dimension_numbers<[1], [0], [0], [1], [0, 0, 1, 1], [], []>} : vector<256x16xbf16>, vector<16x16xbf16>, vector<256x16xf32> -> vector<256x16xf32>
      %230 = arith.addf %219, %229 : vector<256x16xf32>
      %c1_177 = arith.constant 1 : index
      %c0_178 = arith.constant 0 : index
      %c0_179 = arith.constant 0 : index
      %231 = vector.load %arg11[%c1_177, %c0_178, %c0_179] : memref<4x256x16xf32, #tpu.memory_space<vmem>>, vector<1x256x16xf32>
      %232 = vector.shape_cast %231 : vector<1x256x16xf32> to vector<256x16xf32>
      %233 = vector.broadcast %218 : vector<1x16xf32> to vector<256x16xf32>
      %234 = arith.addf %232, %233 : vector<256x16xf32>
      %cst_180 = arith.constant 0.000000e+00 : f32
      %235 = vector.broadcast %cst_180 : f32 to vector<256x16xf32>
      %236 = arith.maximumf %234, %235 : vector<256x16xf32>
      %237 = arith.truncf %236 : vector<256x16xf32> to vector<256x16xbf16>
      %c1_181 = arith.constant 1 : index
      %c0_182 = arith.constant 0 : index
      %c0_183 = arith.constant 0 : index
      %238 = vector.load %arg7[%c1_181, %c0_182, %c0_183] : memref<4x16x16xbf16, #tpu.memory_space<vmem>>, vector<1x16x16xbf16>
      %239 = vector.shape_cast %238 : vector<1x16x16xbf16> to vector<16x16xbf16>
      %cst_184 = arith.constant dense<0.000000e+00> : vector<256x16xf32>
      %240 = tpu.matmul %237, %239, %cst_184 {dimension_numbers = #tpu.dot_dimension_numbers<[1], [0], [0], [1], [0, 0, 1, 1], [], []>} : vector<256x16xbf16>, vector<16x16xbf16>, vector<256x16xf32> -> vector<256x16xf32>
      %241 = arith.addf %230, %240 : vector<256x16xf32>
      %c2_185 = arith.constant 2 : index
      %c0_186 = arith.constant 0 : index
      %c0_187 = arith.constant 0 : index
      %242 = vector.load %arg11[%c2_185, %c0_186, %c0_187] : memref<4x256x16xf32, #tpu.memory_space<vmem>>, vector<1x256x16xf32>
      %243 = vector.shape_cast %242 : vector<1x256x16xf32> to vector<256x16xf32>
      %244 = vector.broadcast %218 : vector<1x16xf32> to vector<256x16xf32>
      %245 = arith.addf %243, %244 : vector<256x16xf32>
      %cst_188 = arith.constant 0.000000e+00 : f32
      %246 = vector.broadcast %cst_188 : f32 to vector<256x16xf32>
      %247 = arith.maximumf %245, %246 : vector<256x16xf32>
      %248 = arith.truncf %247 : vector<256x16xf32> to vector<256x16xbf16>
      %c2_189 = arith.constant 2 : index
      %c0_190 = arith.constant 0 : index
      %c0_191 = arith.constant 0 : index
      %249 = vector.load %arg7[%c2_189, %c0_190, %c0_191] : memref<4x16x16xbf16, #tpu.memory_space<vmem>>, vector<1x16x16xbf16>
      %250 = vector.shape_cast %249 : vector<1x16x16xbf16> to vector<16x16xbf16>
      %cst_192 = arith.constant dense<0.000000e+00> : vector<256x16xf32>
      %251 = tpu.matmul %248, %250, %cst_192 {dimension_numbers = #tpu.dot_dimension_numbers<[1], [0], [0], [1], [0, 0, 1, 1], [], []>} : vector<256x16xbf16>, vector<16x16xbf16>, vector<256x16xf32> -> vector<256x16xf32>
      %252 = arith.addf %241, %251 : vector<256x16xf32>
      %c3_193 = arith.constant 3 : index
      %c0_194 = arith.constant 0 : index
      %c0_195 = arith.constant 0 : index
      %253 = vector.load %arg11[%c3_193, %c0_194, %c0_195] : memref<4x256x16xf32, #tpu.memory_space<vmem>>, vector<1x256x16xf32>
      %254 = vector.shape_cast %253 : vector<1x256x16xf32> to vector<256x16xf32>
      %255 = vector.broadcast %218 : vector<1x16xf32> to vector<256x16xf32>
      %256 = arith.addf %254, %255 : vector<256x16xf32>
      %cst_196 = arith.constant 0.000000e+00 : f32
      %257 = vector.broadcast %cst_196 : f32 to vector<256x16xf32>
      %258 = arith.maximumf %256, %257 : vector<256x16xf32>
      %259 = arith.truncf %258 : vector<256x16xf32> to vector<256x16xbf16>
      %c3_197 = arith.constant 3 : index
      %c0_198 = arith.constant 0 : index
      %c0_199 = arith.constant 0 : index
      %260 = vector.load %arg7[%c3_197, %c0_198, %c0_199] : memref<4x16x16xbf16, #tpu.memory_space<vmem>>, vector<1x16x16xbf16>
      %261 = vector.shape_cast %260 : vector<1x16x16xbf16> to vector<16x16xbf16>
      %cst_200 = arith.constant dense<0.000000e+00> : vector<256x16xf32>
      %262 = tpu.matmul %259, %261, %cst_200 {dimension_numbers = #tpu.dot_dimension_numbers<[1], [0], [0], [1], [0, 0, 1, 1], [], []>} : vector<256x16xbf16>, vector<16x16xbf16>, vector<256x16xf32> -> vector<256x16xf32>
      %263 = arith.addf %252, %262 : vector<256x16xf32>
      %c0_201 = arith.constant 0 : index
      %c0_202 = arith.constant 0 : index
      %c0_203 = arith.constant 0 : index
      %264 = vector.load %arg9[%c0_201, %c0_202, %c0_203] : memref<1x1x16xf32, #tpu.memory_space<vmem>>, vector<1x1x16xf32>
      %265 = vector.shape_cast %264 : vector<1x1x16xf32> to vector<1x16xf32>
      %266 = vector.broadcast %265 : vector<1x16xf32> to vector<256x16xf32>
      %267 = arith.addf %263, %266 : vector<256x16xf32>
      %cst_204 = arith.constant 0.000000e+00 : f32
      %268 = vector.broadcast %cst_204 : f32 to vector<256x16xf32>
      %269 = arith.maximumf %267, %268 : vector<256x16xf32>
      %270 = vector.shape_cast %269 : vector<256x16xf32> to vector<1x16x16x16xf32>
      %c0_205 = arith.constant 0 : index
      %c0_206 = arith.constant 0 : index
      %c0_207 = arith.constant 0 : index
      %c0_208 = arith.constant 0 : index
      %271 = vector.load %arg10[%c0_205, %c0_206, %c0_207, %c0_208] : memref<1x16x16x16xf32, #tpu.memory_space<vmem>>, vector<1x16x16x16xf32>
      tpu.vector_store %arg10[%c0_205, %c0_206, %c0_207, %c0_208], %270 {strides = array<i32>} : memref<1x16x16x16xf32, #tpu.memory_space<vmem>>, vector<1x16x16x16xf32>,
    } else {
    }
    return
  }
  func.func @transform_0(%arg0: i32, %arg1: i32) -> (i32, i32, i32, i32) {
    %c0_i32 = arith.constant 0 : i32
    %c0_i32_0 = arith.constant 0 : i32
    %c0_i32_1 = arith.constant 0 : i32
    return %arg0, %c0_i32, %c0_i32_0, %arg1 : i32, i32, i32, i32
  }
  func.func @transform_1(%arg0: i32, %arg1: i32) -> (i32, i32) {
    %c0_i32 = arith.constant 0 : i32
    %c0_i32_0 = arith.constant 0 : i32
    return %arg1, %c0_i32 : i32, i32
  }
  func.func @transform_2(%arg0: i32, %arg1: i32) -> (i32, i32, i32) {
    %c0_i32 = arith.constant 0 : i32
    %c0_i32_0 = arith.constant 0 : i32
    %c0_i32_1 = arith.constant 0 : i32
    return %c0_i32, %arg1, %c0_i32_0 : i32, i32, i32
  }
  func.func @transform_3(%arg0: i32, %arg1: i32) -> (i32, i32, i32) {
    %c0_i32 = arith.constant 0 : i32
    %c0_i32_0 = arith.constant 0 : i32
    %c0_i32_1 = arith.constant 0 : i32
    return %c0_i32, %arg1, %c0_i32_0 : i32, i32, i32
  }
  func.func @transform_4(%arg0: i32, %arg1: i32) -> (i32, i32, i32) {
    %c0_i32 = arith.constant 0 : i32
    %c0_i32_0 = arith.constant 0 : i32
    %c0_i32_1 = arith.constant 0 : i32
    return %c0_i32, %arg1, %c0_i32_0 : i32, i32, i32
  }
  func.func @transform_5(%arg0: i32, %arg1: i32) -> (i32, i32, i32) {
    %c0_i32 = arith.constant 0 : i32
    %c0_i32_0 = arith.constant 0 : i32
    %c0_i32_1 = arith.constant 0 : i32
    %c0_i32_2 = arith.constant 0 : i32
    return %c0_i32, %c0_i32_0, %c0_i32_1 : i32, i32, i32
  }
  func.func @transform_6(%arg0: i32, %arg1: i32) -> (i32, i32) {
    %c0_i32 = arith.constant 0 : i32
    %c0_i32_0 = arith.constant 0 : i32
    %c0_i32_1 = arith.constant 0 : i32
    return %c0_i32, %c0_i32_0 : i32, i32
  }
  func.func @transform_7(%arg0: i32, %arg1: i32) -> (i32, i32, i32) {
    %c0_i32 = arith.constant 0 : i32
    %c0_i32_0 = arith.constant 0 : i32
    %c0_i32_1 = arith.constant 0 : i32
    return %arg0, %c0_i32, %c0_i32_0 : i32, i32, i32
  }
  func.func @transform_8(%arg0: i32, %arg1: i32) -> (i32, i32, i32, i32) {
    %c0_i32 = arith.constant 0 : i32
    %c0_i32_0 = arith.constant 0 : i32
    %c0_i32_1 = arith.constant 0 : i32
    %c0_i32_2 = arith.constant 0 : i32
    return %arg0, %c0_i32, %c0_i32_0, %c0_i32_1 : i32, i32, i32, i32
  }
}

</mosaic_0001>

<bundles_post_ra>
// kernel: aspp_forward.1
= control target key start
LH: loop header
LB: loop body
LE: loop exit
PB: predicated region body
PF: predicated region fallthrough
CT: control target
= control target key end

     0   :  { %s18654_s27 = smov 0   ;;  %s18656_s28 = smov 0   ;;  %s22982_s0 = inlined_call_operand.vmem [shape: bf16[2,52,52,32], index: 0, kind: input, shape index: {}]   ;;  %s22983_s1 = inlined_call_operand.vmem [shape: bf16[32,16], index: 1, kind: input, shape index: {}]   ;;  %s22984_s2 = inlined_call_operand.vmem [shape: bf16[9,32,16], index: 2, kind: input, shape index: {}]   ;;  %s22985_s3 = inlined_call_operand.vmem [shape: bf16[9,32,16], index: 3, kind: input, shape index: {}]   ;;  %s22986_s4 = inlined_call_operand.vmem [shape: bf16[9,32,16], index: 4, kind: input, shape index: {}]   ;;  %s22987_s5 = inlined_call_operand.vmem [shape: bf16[4,16,16], index: 5, kind: input, shape index: {}]   ;;  %s22988_s6 = inlined_call_operand.vmem [shape: f32[1,16], index: 6, kind: input, shape index: {}]   ;;  %s22989_s7 = inlined_call_operand.vmem [shape: f32[2,1,16], index: 7, kind: input, shape index: {}]   ;;  %s22990_s8 = inlined_call_operand.vmem [shape: f32[2,16,16,16], index: 8, kind: output, shape index: {}]  }
   0x1   :  { %s18658_s29 = smov 0  }
   0x2 LB: > { %s30_s30 = sadd.s32 1, %s18602_s28  ;;  %p14435_p0 = scmp.ge.s32.totalorder %s18606_s29, 1  ;;  %s18606_s29 = sphi %s18658_s29, %s18_s29   ;;  %s18602_s28 = sphi %s18656_s28, %s23004_s28   ;;  %s18598_s27 = sphi %s18654_s27, %s23003_s27  }
   0x3   : > { %p32_p1 = scmp.ge.s32.totalorder %s30_s30, 2  ;;  %p331_p2 = scmp.lt.s32.totalorder %s18606_s29, 3 }
   0x5   : > { %s23006_s30 = smov (%p32_p1, %s30_s30), 0  ;;  %p332_p3 = pnand %p14435_p0, %p331_p2 }
   0x7   : > { %335 = sbr.rel (%p332_p3) target bundleno = 1512 (0x5e8), region = 52 }
   0xe   : > { %v18424_v0 = vld [vmem:[%s22984_s2 + $0x60] sm:$0xff]   ;;  %p391_p4 = scmp.lt.s32.totalorder %s18598_s27, 1  ;;  %vm662_vm0 = vcmask 1042432   ;;  %v18426_v2 = vld [vmem:[%s22984_s2 + $0x68] sm:$0xff]   ;;  %vm663_vm1 = vcmask 1046532   ;;  %v18690_v4 = vld [vmem:[%s22984_s2 + $0x10] sm:$0xff]  }
   0xf   : > { %v18425_v1 = vld [vmem:[%s22983_s1] sm:$0xff]   ;;  %16498 = vmatprep.subr.bf16.mxu1 %v18424_v0  ;;  %v18427_v3 = vld [vmem:[%s22983_s1 + $0x8] sm:$0xff]   ;;  %vm18697_vm2 = vmor %vm662_vm0, %vm663_vm1  ;;  %vm1280_vm3 = vcmask 1041408   ;;  %vm1281_vm4 = vcmask 1045508   ;;  %v22995_v16 = vmov 0  ;;  %vm873_vm6 = vcmask 261120  }
  0x10   : > { %s23008_s27 = smov (!%p391_p4, %s18598_s27), 1  ;;  %16390 = vmatprep.subr.bf16.mxu0 %v18425_v1  ;;  %16499 = vmatpush3.bf16.msra.mxu1 %v18424_v0  ;;  %v18709_v13 = vld [vmem:[%s22984_s2 + $0x30] sm:$0xff]   ;;  %vm18714_vm5 = vmor %vm1280_vm3, %vm1281_vm4  ;;  %v18431_v49 = vld [vmem:[%s22984_s2 + $0x38] sm:$0xff]   ;;  %vm4529_vm7 = vcmask 1040384   ;;  %vm4530_vm8 = vcmask 1044484   ;;  %vm436_vm10 = vcmask 130048  }
  0x11   : > { %16391 = vmatpush3.bf16.msra.mxu0 %v18425_v1  ;;  %16500 = vmatprep.subr.bf16.mxu1 %v18426_v2  ;;  %s18398_s17 = smul.u32 1456, %s23008_s27  ;;  %v22996_v16 = vsel %vm18714_vm5, 4294967295, %v22995_v16  ;;  %v18754_v55 = vld [vmem:[%s22984_s2 + $0x18] sm:$0xff]   ;;  %vm19448_vm9 = vmor %vm4529_vm7, %vm4530_vm8  ;;  %s425_s20 = scalar_lea.vmem %s22989_s7, %s23008_s27 }
  0x12   : > { %16392 = vmatprep.subr.bf16.mxu0 %v18427_v3  ;;  %22997 = vst [vmem:[#allocation3_spill] sm:$0xff] %v22996_v16  ;;  %s15817_s21 = sshll.u32 %s23008_s27, 8 }
  0x13   : > { %s18695_s22 = scalar_lea.vmem %s22982_s0, %s18398_s17  ;;  %s22876_s25 = scalar_lea.vmem %s22990_s8, %s15817_s21 }
  0x14   : > { %16501 = vmatpush3.bf16.msra.mxu1 %v18426_v2  ;;  %v14439_v6 = vld [vmem:[%s18695_s22 + $0x200] sm:$0xe]  ;;  %v14440_v7 = vld [vmem:[%s18695_s22 + $0x204] sm:$0xf]  ;;  %v14441_v8 = vld [vmem:[%s18695_s22 + $0x208] sm:$0x1] }
  0x15   : > { %16393 = vmatpush3.bf16.msra.mxu0 %v18427_v3  ;;  %v14487_v9 = vrot.slane %v14439_v6, 9  ;;  %v667_v10 = vrot.slane %v14440_v7, 5  ;;  %v670_v11 = vrot.slane %v14441_v8, 5  ;;  %v1184_v12 = vld [vmem:[%s18695_s22 + $0x2a4] sm:$0xc]  ;;  %16534 = vmatprep.subr.bf16.mxu1 %v18690_v4  ;;  %v18527_v16 = vld [vmem:[%s18695_s22 + $0x4d0] sm:$0xff]  }
  0x16   : > { %v1185_v14 = vld [vmem:[%s18695_s22 + $0x2a8] sm:$0xf]  ;;  %v1186_v15 = vld [vmem:[%s18695_s22 + $0x2ac] sm:$0x3]  ;;  %v14549_v17 = vrot.slane %v1184_v12, 10  ;;  %16426 = vmatprep.subr.bf16.mxu0 %v18709_v13 }
  0x17   : > { %v668_v18 = vsel %vm18697_vm2, %v14487_v9, %v667_v10  ;;  %v669_v19 = vrot.slane %v667_v10, 4  ;;  %v1369_v20 = vrot.slane %v1185_v14, 6  ;;  %v1372_v21 = vrot.slane %v1186_v15, 6  ;;  %v14442_v22 = vld [vmem:[%s18695_s22 + $0x21c] sm:$0xe] }
  0x18   : > { %v14443_v23 = vld [vmem:[%s18695_s22 + $0x220] sm:$0xf]  ;;  %v14444_v24 = vld [vmem:[%s18695_s22 + $0x224] sm:$0x1]  ;;  %v14488_v25 = vrot.slane %v14442_v22, 9 }
  0x19   : > { %v671_v26 = vsel %vm18697_vm2, %v669_v19, %v670_v11  ;;  %v1370_v27 = vsel %vm18714_vm5, %v14549_v17, %v1369_v20  ;;  %v1371_v28 = vrot.slane %v1369_v20, 4  ;;  %v674_v29 = vrot.slane %v14443_v23, 5  ;;  %v1187_v30 = vld [vmem:[%s18695_s22 + $0x2c0] sm:$0xc]  ;;  %v1188_v31 = vld [vmem:[%s18695_s22 + $0x2c4] sm:$0xf] }
  0x1a   : > { %v14503_v32 = vcombine.low %v668_v18, %v671_v26  ;;  %v677_v33 = vrot.slane %v14444_v24, 5  ;;  %v1189_v34 = vld [vmem:[%s18695_s22 + $0x2c8] sm:$0x3]  ;;  %v14550_v35 = vrot.slane %v1187_v30, 10  ;;  %v1376_v36 = vrot.slane %v1188_v31, 6  ;;  %v18781_v18 = vld [vmem:[%s22984_s2 + $0x40] sm:$0xff]  }
  0x1b   : > { %v1373_v37 = vsel %vm18714_vm5, %v1371_v28, %v1372_v21  ;;  %v675_v38 = vsel %vm18697_vm2, %v14488_v25, %v674_v29  ;;  %v676_v39 = vrot.slane %v674_v29, 4  ;;  %v1379_v40 = vrot.slane %v1189_v34, 6  ;;  %v14445_v41 = vld [vmem:[%s18695_s22 + $0x238] sm:$0xe]  ;;  %v14446_v42 = vld [vmem:[%s18695_s22 + $0x23c] sm:$0xf] }
  0x1c   : > { %16394 = vmatprep.mubr.msk.bf16.mxu0 %vm873_vm6, %v14503_v32  ;;  %v18738_v43 = vcombine.low %v1370_v27, %v1373_v37  ;;  %v1377_v44 = vsel %vm18714_vm5, %v14550_v35, %v1376_v36  ;;  %v1378_v45 = vrot.slane %v1376_v36, 4  ;;  %v14447_v46 = vld [vmem:[%s18695_s22 + $0x240] sm:$0x1]  ;;  %v14489_v47 = vrot.slane %v14445_v41, 9  ;;  %v1190_v48 = vld [vmem:[%s18695_s22 + $0x2dc] sm:$0xc] }
  0x1d   : > { %v678_v50 = vsel %vm18697_vm2, %v676_v39, %v677_v33  ;;  %v681_v51 = vrot.slane %v14446_v42, 5  ;;  %v684_v52 = vrot.slane %v14447_v46, 5  ;;  %v1191_v53 = vld [vmem:[%s18695_s22 + $0x2e0] sm:$0xf]  ;;  %v1192_v54 = vld [vmem:[%s18695_s22 + $0x2e4] sm:$0x3] }
  0x1e   : > { %16502 = vmatprep.mubr.msk.bf16.mxu1 %vm873_vm6, %v18738_v43  ;;  %v14504_v56 = vcombine.low %v675_v38, %v678_v50  ;;  %v1380_v57 = vsel %vm18714_vm5, %v1378_v45, %v1379_v40  ;;  %v14551_v58 = vrot.slane %v1190_v48, 10  ;;  %v1383_v59 = vrot.slane %v1191_v53, 6  ;;  %v14448_v60 = vld [vmem:[%s18695_s22 + $0x254] sm:$0xe]  ;;  %v14449_v61 = vld [vmem:[%s18695_s22 + $0x258] sm:$0xf] }
  0x1f   : > { %v18762_v62 = vcombine.low %v1377_v44, %v1380_v57  ;;  %v682_v63 = vsel %vm18697_vm2, %v14489_v47, %v681_v51  ;;  %v683_v0 = vrot.slane %v681_v51, 4  ;;  %v1386_v1 = vrot.slane %v1192_v54, 6  ;;  %v14450_v2 = vld [vmem:[%s18695_s22 + $0x25c] sm:$0x1]  ;;  %v1193_v3 = vld [vmem:[%s18695_s22 + $0x2f8] sm:$0xc] }
  0x20   : > { %16395 = vmatmul.mubr.msk.bf16.vlgmr.msra.gmra.mrb[0].mxu0 %vm873_vm6, %v14504_v56  ;;  %v1384_v6 = vsel %vm18714_vm5, %v14551_v58, %v1383_v59  ;;  %v1385_v7 = vrot.slane %v1383_v59, 4  ;;  %v14490_v8 = vrot.slane %v14448_v60, 9  ;;  %v688_v9 = vrot.slane %v14449_v61, 5  ;;  %v1194_v10 = vld [vmem:[%s18695_s22 + $0x2fc] sm:$0xf] }
  0x21   : > { %16503 = vmatmul.mubr.msk.bf16.vlgmr.msra.gmra.mrb[0].mxu1 %vm873_vm6, %v18762_v62  ;;  %v685_v11 = vsel %vm18697_vm2, %v683_v0, %v684_v52  ;;  %v691_v12 = vrot.slane %v14450_v2, 5  ;;  %v1195_v14 = vld [vmem:[%s18695_s22 + $0x300] sm:$0x3]  ;;  %v14552_v15 = vrot.slane %v1193_v3, 10  ;;  %v1390_v17 = vrot.slane %v1194_v10, 6  ;;  %16427 = vmatpush3.bf16.msra.mxu0 %v18709_v13 }
  0x22   : > { %16535 = vmatpush3.bf16.msra.mxu1 %v18690_v4  ;;  %v14505_v19 = vcombine.low %v682_v63, %v685_v11  ;;  %v1387_v20 = vsel %vm18714_vm5, %v1385_v7, %v1386_v1  ;;  %v689_v21 = vsel %vm18697_vm2, %v14490_v8, %v688_v9  ;;  %v690_v22 = vrot.slane %v688_v9, 4  ;;  %v14451_v23 = vld [vmem:[%s18695_s22 + $0x270] sm:$0xe]  ;;  %v14452_v24 = vld [vmem:[%s18695_s22 + $0x274] sm:$0xf]  ;;  %16428 = vmatprep.subr.bf16.mxu0 %v18431_v49  ;;  %v18793_v13 = vld [vmem:[%s22984_s2] sm:$0xff]  }
  0x23   : > { %v18795_v25 = vcombine.low %v1384_v6, %v1387_v20  ;;  %v1391_v4 = vsel %vm18714_vm5, %v14552_v15, %v1390_v17  ;;  %v1392_v26 = vrot.slane %v1390_v17, 4  ;;  %v1393_v27 = vrot.slane %v1195_v14, 6  ;;  %v14453_v28 = vld [vmem:[%s18695_s22 + $0x278] sm:$0x1]  ;;  %v1196_v29 = vld [vmem:[%s18695_s22 + $0x314] sm:$0xc]  ;;  %16536 = vmatprep.subr.bf16.mxu1 %v18754_v55 }
  0x24   : > { %16398 = vmatprep.mubr.msk.bf16.mxu0 %vm873_vm6, %v14505_v19  ;;  %v692_v30 = vsel %vm18697_vm2, %v690_v22, %v691_v12  ;;  %v14491_v31 = vrot.slane %v14451_v23, 9  ;;  %v695_v32 = vrot.slane %v14452_v24, 5  ;;  %v698_v33 = vrot.slane %v14453_v28, 5  ;;  %v1197_v34 = vld [vmem:[%s18695_s22 + $0x318] sm:$0xf] }
  0x25   : > { %16506 = vmatprep.mubr.msk.bf16.mxu1 %vm873_vm6, %v18795_v25  ;;  %v14506_v35 = vcombine.low %v689_v21, %v692_v30  ;;  %v1394_v36 = vsel %vm18714_vm5, %v1392_v26, %v1393_v27  ;;  %v1198_v37 = vld [vmem:[%s18695_s22 + $0x31c] sm:$0x3]  ;;  %v14553_v38 = vrot.slane %v1196_v29, 10  ;;  %v1419_v39 = vrot.slane %v1197_v34, 6  ;;  %v14454_v40 = vld [vmem:[%s18695_s22 + $0x28c] sm:$0xe]  ;;  %16429 = vmatpush3.bf16.msra.mxu0 %v18431_v49 }
  0x26   : > { %v18812_v41 = vcombine.low %v1391_v4, %v1394_v36  ;;  %v696_v42 = vsel %vm18697_vm2, %v14491_v31, %v695_v32  ;;  %v697_v44 = vrot.slane %v695_v32, 4  ;;  %v1422_v45 = vrot.slane %v1198_v37, 6  ;;  %v14455_v46 = vld [vmem:[%s18695_s22 + $0x290] sm:$0xf]  ;;  %v14456_v47 = vld [vmem:[%s18695_s22 + $0x294] sm:$0x1]  ;;  %16537 = vmatpush3.bf16.msra.mxu1 %v18754_v55  ;;  %16462 = vmatprep.subr.bf16.mxu0 %v18793_v13 }
  0x27   : > { %v1420_v48 = vsel %vm18714_vm5, %v14553_v38, %v1419_v39  ;;  %v1421_v50 = vrot.slane %v1419_v39, 4  ;;  %v14492_v49 = vrot.slane %v14454_v40, 9  ;;  %v702_v51 = vrot.slane %v14455_v46, 5  ;;  %v1199_v52 = vld [vmem:[%s18695_s22 + $0x330] sm:$0xc]  ;;  %16570 = vmatprep.subr.bf16.mxu1 %v18781_v18 }
  0x28   : > { %16399 = vmatmul.mubr.msk.bf16.gmra.mrb[4].mxu0 %vm873_vm6, %v14506_v35  ;;  %v699_v53 = vsel %vm18697_vm2, %v697_v44, %v698_v33  ;;  %v705_v54 = vrot.slane %v14456_v47, 5  ;;  %v1200_v55 = vld [vmem:[%s18695_s22 + $0x334] sm:$0xf]  ;;  %v1201_v56 = vld [vmem:[%s18695_s22 + $0x338] sm:$0x3]  ;;  %v14554_v57 = vrot.slane %v1199_v52, 10 }
  0x29   : > { %16507 = vmatmul.mubr.msk.bf16.gmra.mrb[4].mxu1 %vm873_vm6, %v18812_v41  ;;  %v14507_v58 = vcombine.low %v696_v42, %v699_v53  ;;  %v1423_v59 = vsel %vm18714_vm5, %v1421_v50, %v1422_v45  ;;  %v703_v60 = vsel %vm18697_vm2, %v14492_v49, %v702_v51  ;;  %v704_v61 = vrot.slane %v702_v51, 4  ;;  %v14457_v63 = vld [vmem:[%s18695_s22 + $0x2a8] sm:$0xe]  ;;  %v14458_v0 = vld [vmem:[%s18695_s22 + $0x2ac] sm:$0xf] }
  0x2a   : > { %v18837_v1 = vcombine.low %v1420_v48, %v1423_v59  ;;  %v1426_v2 = vrot.slane %v1200_v55, 6  ;;  %v1429_v3 = vrot.slane %v1201_v56, 6  ;;  %v14459_v6 = vld [vmem:[%s18695_s22 + $0x2b0] sm:$0x1]  ;;  %v14493_v7 = vrot.slane %v14457_v63, 9 }
  0x2b   : > { %16402 = vmatprep.mubr.msk.bf16.mxu0 %vm873_vm6, %v14507_v58  ;;  %v706_v8 = vsel %vm18697_vm2, %v704_v61, %v705_v54  ;;  %v709_v9 = vrot.slane %v14458_v0, 5  ;;  %v712_v10 = vrot.slane %v14459_v6, 5  ;;  %v1202_v11 = vld [vmem:[%s18695_s22 + $0x34c] sm:$0xc]  ;;  %v1203_v12 = vld [vmem:[%s18695_s22 + $0x350] sm:$0xf] }
  0x2c   : > { %16510 = vmatprep.mubr.msk.bf16.mxu1 %vm873_vm6, %v18837_v1  ;;  %v14508_v14 = vcombine.low %v703_v60, %v706_v8  ;;  %v1427_v15 = vsel %vm18714_vm5, %v14554_v57, %v1426_v2  ;;  %v1428_v17 = vrot.slane %v1426_v2, 4  ;;  %v1204_v19 = vld [vmem:[%s18695_s22 + $0x354] sm:$0x3]  ;;  %v14555_v20 = vrot.slane %v1202_v11, 10  ;;  %v14460_v21 = vld [vmem:[%s18695_s22 + $0x2c4] sm:$0xe] }
  0x2d   : > { %v710_v22 = vsel %vm18697_vm2, %v14493_v7, %v709_v9  ;;  %v711_v23 = vrot.slane %v709_v9, 4  ;;  %v1433_v24 = vrot.slane %v1203_v12, 6  ;;  %v1436_v4 = vrot.slane %v1204_v19, 6  ;;  %v14461_v26 = vld [vmem:[%s18695_s22 + $0x2c8] sm:$0xf] }
  0x2e   : > { %v1430_v27 = vsel %vm18714_vm5, %v1428_v17, %v1429_v3  ;;  %v14462_v28 = vld [vmem:[%s18695_s22 + $0x2cc] sm:$0x1]  ;;  %v14494_v29 = vrot.slane %v14460_v21, 9  ;;  %v716_v30 = vrot.slane %v14461_v26, 5  ;;  %v1205_v31 = vld [vmem:[%s18695_s22 + $0x368] sm:$0xc] }
  0x2f   : > { %v18858_v32 = vcombine.low %v1427_v15, %v1430_v27  ;;  %v713_v33 = vsel %vm18697_vm2, %v711_v23, %v712_v10  ;;  %v1434_v34 = vsel %vm18714_vm5, %v14555_v20, %v1433_v24  ;;  %v1435_v35 = vrot.slane %v1433_v24, 4  ;;  %v1206_v36 = vld [vmem:[%s18695_s22 + $0x36c] sm:$0xf]  ;;  %v1207_v37 = vld [vmem:[%s18695_s22 + $0x370] sm:$0x3] }
  0x30   : > { %16403 = vmatmul.mubr.msk.bf16.gmra.mrb[8].mxu0 %vm873_vm6, %v14508_v14  ;;  %v14509_v38 = vcombine.low %v710_v22, %v713_v33  ;;  %v717_v39 = vsel %vm18697_vm2, %v14494_v29, %v716_v30  ;;  %v718_v40 = vrot.slane %v716_v30, 4  ;;  %v719_v42 = vrot.slane %v14462_v28, 5  ;;  %v14463_v44 = vld [vmem:[%s18695_s22 + $0x2e0] sm:$0xe]  ;;  %v14464_v45 = vld [vmem:[%s18695_s22 + $0x2e4] sm:$0xf] }
  0x31   : > { %16511 = vmatmul.mubr.msk.bf16.gmra.mrb[8].mxu1 %vm873_vm6, %v18858_v32  ;;  %v1437_v46 = vsel %vm18714_vm5, %v1435_v35, %v1436_v4  ;;  %v14556_v47 = vrot.slane %v1205_v31, 10  ;;  %v1440_v48 = vrot.slane %v1206_v36, 6  ;;  %v1443_v50 = vrot.slane %v1207_v37, 6  ;;  %v14465_v49 = vld [vmem:[%s18695_s22 + $0x2e8] sm:$0x1] }
  0x32   : > { %16406 = vmatprep.mubr.msk.bf16.mxu0 %vm873_vm6, %v14509_v38  ;;  %v18877_v51 = vcombine.low %v1434_v34, %v1437_v46  ;;  %v720_v52 = vsel %vm18697_vm2, %v718_v40, %v719_v42  ;;  %v14495_v53 = vrot.slane %v14463_v44, 9  ;;  %v723_v54 = vrot.slane %v14464_v45, 5  ;;  %v1208_v55 = vld [vmem:[%s18695_s22 + $0x384] sm:$0xc]  ;;  %v1209_v56 = vld [vmem:[%s18695_s22 + $0x388] sm:$0xf] }
  0x33   : > { %v14510_v57 = vcombine.low %v717_v39, %v720_v52  ;;  %v1441_v58 = vsel %vm18714_vm5, %v14556_v47, %v1440_v48  ;;  %v1442_v59 = vrot.slane %v1440_v48, 4  ;;  %v726_v60 = vrot.slane %v14465_v49, 5  ;;  %v1210_v61 = vld [vmem:[%s18695_s22 + $0x38c] sm:$0x3]  ;;  %v14466_v63 = vld [vmem:[%s18695_s22 + $0x2fc] sm:$0xe] }
  0x34   : > { %16514 = vmatprep.mubr.msk.bf16.mxu1 %vm873_vm6, %v18877_v51  ;;  %v724_v0 = vsel %vm18697_vm2, %v14495_v53, %v723_v54  ;;  %v725_v2 = vrot.slane %v723_v54, 4  ;;  %v14557_v3 = vrot.slane %v1208_v55, 10  ;;  %v1447_v6 = vrot.slane %v1209_v56, 6  ;;  %v14467_v7 = vld [vmem:[%s18695_s22 + $0x300] sm:$0xf] }
  0x35   : > { %v1444_v8 = vsel %vm18714_vm5, %v1442_v59, %v1443_v50  ;;  %v1450_v9 = vrot.slane %v1210_v61, 6  ;;  %v14468_v10 = vld [vmem:[%s18695_s22 + $0x304] sm:$0x1]  ;;  %v14496_v11 = vrot.slane %v14466_v63, 9  ;;  %v730_v12 = vrot.slane %v14467_v7, 5 }
  0x36   : > { %v18895_v14 = vcombine.low %v1441_v58, %v1444_v8  ;;  %v727_v15 = vsel %vm18697_vm2, %v725_v2, %v726_v60  ;;  %v1448_v17 = vsel %vm18714_vm5, %v14557_v3, %v1447_v6  ;;  %v1449_v19 = vrot.slane %v1447_v6, 4  ;;  %v1211_v20 = vld [vmem:[%s18695_s22 + $0x3a0] sm:$0xc]  ;;  %v1212_v21 = vld [vmem:[%s18695_s22 + $0x3a4] sm:$0xf] }
  0x37   : > { %v14511_v22 = vcombine.low %v724_v0, %v727_v15  ;;  %v731_v23 = vsel %vm18697_vm2, %v14496_v11, %v730_v12  ;;  %v732_v24 = vrot.slane %v730_v12, 4  ;;  %v733_v4 = vrot.slane %v14468_v10, 5  ;;  %v1213_v26 = vld [vmem:[%s18695_s22 + $0x3a8] sm:$0x3]  ;;  %v14469_v27 = vld [vmem:[%s18695_s22 + $0x318] sm:$0xe] }
  0x38   : > { %16407 = vmatmul.mubr.msk.bf16.gmra.mrb[12].mxu0 %vm873_vm6, %v14510_v57  ;;  %v1451_v28 = vsel %vm18714_vm5, %v1449_v19, %v1450_v9  ;;  %v14558_v29 = vrot.slane %v1211_v20, 10  ;;  %v1454_v30 = vrot.slane %v1212_v21, 6  ;;  %v1457_v31 = vrot.slane %v1213_v26, 6  ;;  %v14470_v33 = vld [vmem:[%s18695_s22 + $0x31c] sm:$0xf] }
  0x39   : > { %16515 = vmatmul.mubr.msk.bf16.gmra.mrb[12].mxu1 %vm873_vm6, %v18895_v14  ;;  %16410 = vmatprep.mubr.msk.bf16.mxu0 %vm873_vm6, %v14511_v22  ;;  %v18914_v34 = vcombine.low %v1448_v17, %v1451_v28  ;;  %v734_v35 = vsel %vm18697_vm2, %v732_v24, %v733_v4  ;;  %v14471_v36 = vld [vmem:[%s18695_s22 + $0x320] sm:$0x1]  ;;  %v14497_v37 = vrot.slane %v14469_v27, 9  ;;  %v737_v38 = vrot.slane %v14470_v33, 5  ;;  %v1214_v39 = vld [vmem:[%s18695_s22 + $0x3bc] sm:$0xc] }
  0x3a   : > { %v1455_v40 = vsel %vm18714_vm5, %v14558_v29, %v1454_v30  ;;  %v1456_v42 = vrot.slane %v1454_v30, 4  ;;  %v740_v44 = vrot.slane %v14471_v36, 5  ;;  %v1215_v45 = vld [vmem:[%s18695_s22 + $0x3c0] sm:$0xf]  ;;  %v1216_v46 = vld [vmem:[%s18695_s22 + $0x3c4] sm:$0x3]  ;;  %v14512_v53 = vcombine.low %v731_v23, %v734_v35 }
  0x3b   : > { %16518 = vmatprep.mubr.msk.bf16.mxu1 %vm873_vm6, %v18914_v34  ;;  %v738_v47 = vsel %vm18697_vm2, %v14497_v37, %v737_v38  ;;  %v739_v48 = vrot.slane %v737_v38, 4  ;;  %v14621_v50 = vrot.slane %v1214_v39, 10  ;;  %v1962_v49 = vrot.slane %v1215_v45, 6  ;;  %v14472_v52 = vld [vmem:[%s18695_s22 + $0x334] sm:$0xe] }
  0x3c   : > { %v1458_v54 = vsel %vm18714_vm5, %v1456_v42, %v1457_v31  ;;  %v1965_v55 = vrot.slane %v1216_v46, 6  ;;  %v14473_v56 = vld [vmem:[%s18695_s22 + $0x338] sm:$0xf]  ;;  %v14474_v57 = vld [vmem:[%s18695_s22 + $0x33c] sm:$0x1]  ;;  %v14498_v58 = vrot.slane %v14472_v52, 9 }
  0x3d   : > { %v18933_v59 = vcombine.low %v1455_v40, %v1458_v54  ;;  %v741_v60 = vsel %vm18697_vm2, %v739_v48, %v740_v44  ;;  %v1963_v61 = vsel %vm18714_vm5, %v14621_v50, %v1962_v49  ;;  %v1964_v63 = vrot.slane %v1962_v49, 4  ;;  %v1217_v0 = vld [vmem:[%s18695_s22 + $0x3d8] sm:$0xc]  ;;  %v1218_v2 = vld [vmem:[%s18695_s22 + $0x3dc] sm:$0xf] }
  0x3e   : > { %v14513_v3 = vcombine.low %v738_v47, %v741_v60  ;;  %v744_v6 = vrot.slane %v14473_v56, 5  ;;  %v747_v7 = vrot.slane %v14474_v57, 5  ;;  %v1219_v8 = vld [vmem:[%s18695_s22 + $0x3e0] sm:$0x3]  ;;  %v14622_v9 = vrot.slane %v1217_v0, 10 }
  0x3f   : > { %v1966_v10 = vsel %vm18714_vm5, %v1964_v63, %v1965_v55  ;;  %v1969_v11 = vrot.slane %v1218_v2, 6  ;;  %v1972_v12 = vrot.slane %v1219_v8, 6  ;;  %v14475_v15 = vld [vmem:[%s18695_s22 + $0x350] sm:$0xe]  ;;  %v14476_v17 = vld [vmem:[%s18695_s22 + $0x354] sm:$0xf] }
  0x40   : > { %16411 = vmatmul.mubr.msk.bf16.gmra.mrb[16].mxu0 %vm873_vm6, %v14512_v53  ;;  %v14631_v19 = vcombine.low %v1963_v61, %v1966_v10  ;;  %v745_v20 = vsel %vm18697_vm2, %v14498_v58, %v744_v6  ;;  %v746_v21 = vrot.slane %v744_v6, 4  ;;  %v14477_v22 = vld [vmem:[%s18695_s22 + $0x358] sm:$0x1]  ;;  %v14499_v23 = vrot.slane %v14475_v15, 9  ;;  %v1220_v24 = vld [vmem:[%s18695_s22 + $0x3f4] sm:$0xc] }
  0x41   : > { %16519 = vmatmul.mubr.msk.bf16.gmra.mrb[16].mxu1 %vm873_vm6, %v18933_v59  ;;  %16414 = vmatprep.mubr.msk.bf16.mxu0 %vm873_vm6, %v14513_v3  ;;  %v1970_v4 = vsel %vm18714_vm5, %v14622_v9, %v1969_v11  ;;  %v1971_v26 = vrot.slane %v1969_v11, 4  ;;  %v751_v27 = vrot.slane %v14476_v17, 5  ;;  %v754_v28 = vrot.slane %v14477_v22, 5  ;;  %v1221_v29 = vld [vmem:[%s18695_s22 + $0x3f8] sm:$0xf] }
  0x42   : > { %16522 = vmatprep.mubr.msk.bf16.mxu1 %vm873_vm6, %v14631_v19  ;;  %v748_v30 = vsel %vm18697_vm2, %v746_v21, %v747_v7  ;;  %v1222_v31 = vld [vmem:[%s18695_s22 + $0x3fc] sm:$0x3]  ;;  %v14623_v33 = vrot.slane %v1220_v24, 10  ;;  %v1976_v35 = vrot.slane %v1221_v29, 6  ;;  %v14478_v36 = vld [vmem:[%s18695_s22 + $0x36c] sm:$0xe] }
  0x43   : > { %v14514_v37 = vcombine.low %v745_v20, %v748_v30  ;;  %v1973_v38 = vsel %vm18714_vm5, %v1971_v26, %v1972_v12  ;;  %v752_v39 = vsel %vm18697_vm2, %v14499_v23, %v751_v27  ;;  %v753_v40 = vrot.slane %v751_v27, 4  ;;  %v14479_v42 = vld [vmem:[%s18695_s22 + $0x370] sm:$0xf]  ;;  %v14480_v44 = vld [vmem:[%s18695_s22 + $0x374] sm:$0x1] }
  0x44   : > { %v14632_v45 = vcombine.low %v1970_v4, %v1973_v38  ;;  %v1977_v46 = vsel %vm18714_vm5, %v14623_v33, %v1976_v35  ;;  %v1978_v47 = vrot.slane %v1976_v35, 4  ;;  %v1979_v48 = vrot.slane %v1222_v31, 6  ;;  %v1223_v50 = vld [vmem:[%s18695_s22 + $0x410] sm:$0xc]  ;;  %v1224_v49 = vld [vmem:[%s18695_s22 + $0x414] sm:$0xf] }
  0x45   : > { %v755_v52 = vsel %vm18697_vm2, %v753_v40, %v754_v28  ;;  %v14500_v53 = vrot.slane %v14478_v36, 9  ;;  %v758_v54 = vrot.slane %v14479_v42, 5  ;;  %v761_v55 = vrot.slane %v14480_v44, 5  ;;  %v1225_v56 = vld [vmem:[%s18695_s22 + $0x418] sm:$0x3] }
  0x46   : > { %v14515_v57 = vcombine.low %v752_v39, %v755_v52  ;;  %v1980_v58 = vsel %vm18714_vm5, %v1978_v47, %v1979_v48  ;;  %v14624_v60 = vrot.slane %v1223_v50, 10  ;;  %v1983_v61 = vrot.slane %v1224_v49, 6  ;;  %v14481_v63 = vld [vmem:[%s18695_s22 + $0x388] sm:$0xe]  ;;  %v14482_v0 = vld [vmem:[%s18695_s22 + $0x38c] sm:$0xf] }
  0x47   : > { %v14633_v2 = vcombine.low %v1977_v46, %v1980_v58  ;;  %v760_v3 = vrot.slane %v758_v54, 4  ;;  %v1986_v6 = vrot.slane %v1225_v56, 6  ;;  %v14483_v7 = vld [vmem:[%s18695_s22 + $0x390] sm:$0x1]  ;;  %v1226_v8 = vld [vmem:[%s18695_s22 + $0x42c] sm:$0xc]  ;;  %v759_v9 = vsel %vm18697_vm2, %v14500_v53, %v758_v54 }
  0x48   : > { %16415 = vmatmul.mubr.msk.bf16.gmra.mrb[20].mxu0 %vm873_vm6, %v14514_v37  ;;  %v1985_v10 = vrot.slane %v1983_v61, 4  ;;  %v14501_v11 = vrot.slane %v14481_v63, 9  ;;  %v765_v12 = vrot.slane %v14482_v0, 5  ;;  %v1227_v15 = vld [vmem:[%s18695_s22 + $0x430] sm:$0xf]  ;;  %v768_v19 = vrot.slane %v14483_v7, 5 }
  0x49   : > { %16523 = vmatmul.mubr.msk.bf16.gmra.mrb[20].mxu1 %vm873_vm6, %v14632_v45  ;;  %16418 = vmatprep.mubr.msk.bf16.mxu0 %vm873_vm6, %v14515_v57  ;;  %v762_v17 = vsel %vm18697_vm2, %v760_v3, %v761_v55  ;;  %v1228_v20 = vld [vmem:[%s18695_s22 + $0x434] sm:$0x3]  ;;  %v14625_v21 = vrot.slane %v1226_v8, 10  ;;  %v1990_v22 = vrot.slane %v1227_v15, 6  ;;  %v1984_v23 = vsel %vm18714_vm5, %v14624_v60, %v1983_v61  ;;  %v14484_v27 = vld [vmem:[%s18695_s22 + $0x3a4] sm:$0xe] }
  0x4a   : > { %16526 = vmatprep.mubr.msk.bf16.mxu1 %vm873_vm6, %v14633_v2  ;;  %v1987_v24 = vsel %vm18714_vm5, %v1985_v10, %v1986_v6  ;;  %v766_v4 = vsel %vm18697_vm2, %v14501_v11, %v765_v12  ;;  %v767_v26 = vrot.slane %v765_v12, 4  ;;  %v14485_v28 = vld [vmem:[%s18695_s22 + $0x3a8] sm:$0xf]  ;;  %v14516_v29 = vcombine.low %v759_v9, %v762_v17  ;;  %v14486_v35 = vld [vmem:[%s18695_s22 + $0x3ac] sm:$0x1] }
  0x4b   : > { %v1991_v30 = vsel %vm18714_vm5, %v14625_v21, %v1990_v22  ;;  %v1992_v31 = vrot.slane %v1990_v22, 4  ;;  %v1993_v33 = vrot.slane %v1228_v20, 6  ;;  %v14502_v37 = vrot.slane %v14484_v27, 9  ;;  %v1229_v45 = vld [vmem:[%s18695_s22 + $0x448] sm:$0xc] }
  0x4c   : > { %v769_v36 = vsel %vm18697_vm2, %v767_v26, %v768_v19  ;;  %v772_v38 = vrot.slane %v14485_v28, 5  ;;  %v775_v39 = vrot.slane %v14486_v35, 5  ;;  %v14634_v40 = vcombine.low %v1984_v23, %v1987_v24  ;;  %v1230_v46 = vld [vmem:[%s18695_s22 + $0x44c] sm:$0xf]  ;;  %v1231_v47 = vld [vmem:[%s18695_s22 + $0x450] sm:$0x3] }
  0x4d   : > { %v14517_v42 = vcombine.low %v766_v4, %v769_v36  ;;  %v1994_v44 = vsel %vm18714_vm5, %v1992_v31, %v1993_v33  ;;  %v14626_v49 = vrot.slane %v1229_v45, 10  ;;  %v1997_v52 = vrot.slane %v1230_v46, 6  ;;  %v1166_v54 = vld [vmem:[%s18695_s22 + $0x1fc] sm:$0xc]  ;;  %v1167_v55 = vld [vmem:[%s18695_s22 + $0x200] sm:$0xf] }
  0x4e   : > { %v14635_v48 = vcombine.low %v1991_v30, %v1994_v44  ;;  %v774_v50 = vrot.slane %v772_v38, 4  ;;  %v2000_v53 = vrot.slane %v1231_v47, 6  ;;  %v773_v56 = vsel %vm18697_vm2, %v14502_v37, %v772_v38  ;;  %v1168_v58 = vld [vmem:[%s18695_s22 + $0x204] sm:$0x3]  ;;  %v2248_v63 = vld [vmem:[%s18695_s22 + $0x158] sm:$0xe] }
  0x4f   : > { %v14543_v60 = vrot.slane %v1166_v54, 10  ;;  %v1327_v61 = vrot.slane %v1167_v55, 6  ;;  %v1998_v0 = vsel %vm18714_vm5, %v14626_v49, %v1997_v52  ;;  %v1999_v2 = vrot.slane %v1997_v52, 4  ;;  %v2249_v6 = vld [vmem:[%s18695_s22 + $0x15c] sm:$0xf] }
  0x50   : > { %16419 = vmatmul.mubr.msk.bf16.gmra.mrb[24].mxu0 %vm873_vm6, %v14516_v29  ;;  %v776_v57 = vsel %vm18697_vm2, %v774_v50, %v775_v39  ;;  %v1330_v3 = vrot.slane %v1168_v58, 6  ;;  %v2250_v7 = vld [vmem:[%s18695_s22 + $0x160] sm:$0x1]  ;;  %v14655_v10 = vrot.slane %v2248_v63, 9  ;;  %v2382_v11 = vrot.slane %v2249_v6, 5 }
  0x51   : > { %16527 = vmatmul.mubr.msk.bf16.gmra.mrb[24].mxu1 %vm873_vm6, %v14634_v40  ;;  %16422 = vmatprep.mubr.msk.bf16.mxu0 %vm873_vm6, %v14517_v42  ;;  %v1328_v8 = vsel %vm18714_vm5, %v14543_v60, %v1327_v61  ;;  %v1329_v9 = vrot.slane %v1327_v61, 4  ;;  %v14518_v12 = vcombine.low %v773_v56, %v776_v57  ;;  %v2001_v15 = vsel %vm18714_vm5, %v1999_v2, %v2000_v53  ;;  %v1169_v19 = vld [vmem:[%s18695_s22 + $0x218] sm:$0xc]  ;;  %v1170_v24 = vld [vmem:[%s18695_s22 + $0x21c] sm:$0xf] }
  0x52   : > { %16530 = vmatprep.mubr.msk.bf16.mxu1 %vm873_vm6, %v14635_v48  ;;  %v2385_v17 = vrot.slane %v2250_v7, 5  ;;  %v14636_v20 = vcombine.low %v1998_v0, %v2001_v15  ;;  %v2383_v22 = vsel %vm18697_vm2, %v14655_v10, %v2382_v11  ;;  %v2384_v23 = vrot.slane %v2382_v11, 4  ;;  %v1171_v4 = vld [vmem:[%s18695_s22 + $0x220] sm:$0x3]  ;;  %v2251_v30 = vld [vmem:[%s18695_s22 + $0x174] sm:$0xe] }
  0x53   : > { %v1331_v21 = vsel %vm18714_vm5, %v1329_v9, %v1330_v3  ;;  %v14544_v27 = vrot.slane %v1169_v19, 10  ;;  %v1334_v28 = vrot.slane %v1170_v24, 6  ;;  %v1337_v29 = vrot.slane %v1171_v4, 6  ;;  %v2252_v33 = vld [vmem:[%s18695_s22 + $0x178] sm:$0xf] }
  0x54   : > { %v19036_v26 = vcombine.low %v1328_v8, %v1331_v21  ;;  %v2386_v31 = vsel %vm18697_vm2, %v2384_v23, %v2385_v17  ;;  %v2253_v35 = vld [vmem:[%s18695_s22 + $0x17c] sm:$0x1]  ;;  %v14656_v36 = vrot.slane %v2251_v30, 9  ;;  %v2389_v39 = vrot.slane %v2252_v33, 5  ;;  %v1172_v40 = vld [vmem:[%s18695_s22 + $0x234] sm:$0xc] }
  0x55   : > { %v14675_v37 = vcombine.low %v2383_v22, %v2386_v31  ;;  %v1336_v38 = vrot.slane %v1334_v28, 4  ;;  %v1173_v42 = vld [vmem:[%s18695_s22 + $0x238] sm:$0xf]  ;;  %v1335_v44 = vsel %vm18714_vm5, %v14544_v27, %v1334_v28  ;;  %v2392_v45 = vrot.slane %v2253_v35, 5  ;;  %v1174_v46 = vld [vmem:[%s18695_s22 + $0x23c] sm:$0x3] }
  0x56   : > { %v14545_v47 = vrot.slane %v1172_v40, 10  ;;  %v1341_v48 = vrot.slane %v1173_v42, 6  ;;  %v2390_v49 = vsel %vm18697_vm2, %v14656_v36, %v2389_v39  ;;  %v2391_v52 = vrot.slane %v2389_v39, 4  ;;  %v2254_v54 = vld [vmem:[%s18695_s22 + $0x190] sm:$0xe]  ;;  %v18433_v36 = vld [vmem:[%s22984_s2 + $0x48] sm:$0xff]  }
  0x57   : > { %v1338_v50 = vsel %vm18714_vm5, %v1336_v38, %v1337_v29  ;;  %v1344_v53 = vrot.slane %v1174_v46, 6  ;;  %v2255_v55 = vld [vmem:[%s18695_s22 + $0x194] sm:$0xf]  ;;  %v2256_v58 = vld [vmem:[%s18695_s22 + $0x198] sm:$0x1]  ;;  %v14657_v60 = vrot.slane %v2254_v54, 9 }
  0x58   : > { %16423 = vmatmul.mubr.msk.bf16.gmra.mrb[28].mxu0 %vm873_vm6, %v14518_v12  ;;  %v1342_v56 = vsel %vm18714_vm5, %v14545_v47, %v1341_v48  ;;  %v1343_v57 = vrot.slane %v1341_v48, 4  ;;  %v1175_v61 = vld [vmem:[%s18695_s22 + $0x250] sm:$0xc]  ;;  %v19063_v63 = vcombine.low %v1335_v44, %v1338_v50  ;;  %v2393_v0 = vsel %vm18697_vm2, %v2391_v52, %v2392_v45  ;;  %v1176_v6 = vld [vmem:[%s18695_s22 + $0x254] sm:$0xf]  ;;  %v18435_v45 = vld [vmem:[%s22984_s2 + $0x8] sm:$0xff]  }
  0x59   : > { %16531 = vmatmul.mubr.msk.bf16.gmra.mrb[28].mxu1 %vm873_vm6, %v14636_v20  ;;  %16430 = vmatprep.mubr.msk.bf16.mxu0 %vm873_vm6, %v19036_v26  ;;  %v2396_v2 = vrot.slane %v2255_v55, 5  ;;  %v2399_v3 = vrot.slane %v2256_v58, 5  ;;  %v1177_v7 = vld [vmem:[%s18695_s22 + $0x258] sm:$0x3]  ;;  %v14676_v8 = vcombine.low %v2390_v49, %v2393_v0  ;;  %v14546_v10 = vrot.slane %v1175_v61, 10  ;;  %v19114_v58 = vld [vmem:[%s22984_s2 + $0x70] sm:$0xff]  }
  0x5a   : > { %16538 = vmatprep.mubr.msk.bf16.mxu1 %vm873_vm6, %v14675_v37  ;;  %v1345_v9 = vsel %vm18714_vm5, %v1343_v57, %v1344_v53  ;;  %v1348_v11 = vrot.slane %v1176_v6, 6  ;;  %v2257_v12 = vld [vmem:[%s18695_s22 + $0x1ac] sm:$0xe]  ;;  %v2258_v15 = vld [vmem:[%s18695_s22 + $0x1b0] sm:$0xf]  ;;  %v1351_v21 = vrot.slane %v1177_v7, 6 }
  0x5b   : > { %v19073_v17 = vcombine.low %v1342_v56, %v1345_v9  ;;  %v2397_v19 = vsel %vm18697_vm2, %v14657_v60, %v2396_v2  ;;  %v2398_v20 = vrot.slane %v2396_v2, 4  ;;  %v2259_v22 = vld [vmem:[%s18695_s22 + $0x1b4] sm:$0x1]  ;;  %v1178_v23 = vld [vmem:[%s18695_s22 + $0x26c] sm:$0xc]  ;;  %v14658_v4 = vrot.slane %v2257_v12, 9 }
  0x5c   : > { %v1350_v24 = vrot.slane %v1348_v11, 4  ;;  %v2403_v27 = vrot.slane %v2258_v15, 5  ;;  %v1179_v28 = vld [vmem:[%s18695_s22 + $0x270] sm:$0xf]  ;;  %v2406_v30 = vrot.slane %v2259_v22, 5  ;;  %v14547_v33 = vrot.slane %v1178_v23, 10 }
  0x5d   : > { %v2400_v29 = vsel %vm18697_vm2, %v2398_v20, %v2399_v3  ;;  %v1180_v31 = vld [vmem:[%s18695_s22 + $0x274] sm:$0x3]  ;;  %v1355_v35 = vrot.slane %v1179_v28, 6  ;;  %v1349_v38 = vsel %vm18714_vm5, %v14546_v10, %v1348_v11  ;;  %v2260_v42 = vld [vmem:[%s18695_s22 + $0x1c8] sm:$0xe] }
  0x5e   : > { %v14677_v37 = vcombine.low %v2397_v19, %v2400_v29  ;;  %v1352_v39 = vsel %vm18714_vm5, %v1350_v24, %v1351_v21  ;;  %v2405_v40 = vrot.slane %v2403_v27, 4  ;;  %v2261_v44 = vld [vmem:[%s18695_s22 + $0x1cc] sm:$0xf]  ;;  %v2404_v46 = vsel %vm18697_vm2, %v14658_v4, %v2403_v27  ;;  %v2262_v49 = vld [vmem:[%s18695_s22 + $0x1d0] sm:$0x1] }
  0x5f   : > { %v1356_v47 = vsel %vm18714_vm5, %v14547_v33, %v1355_v35  ;;  %v1357_v48 = vrot.slane %v1355_v35, 4  ;;  %v1358_v50 = vrot.slane %v1180_v31, 6  ;;  %v1181_v52 = vld [vmem:[%s18695_s22 + $0x288] sm:$0xc]  ;;  %v14659_v54 = vrot.slane %v2260_v42, 9  ;;  %v19126_v3 = vld [vmem:[%s22985_s3 + $0x30] sm:$0xff]  }
  0x60   : > { %16431 = vmatmul.mubr.msk.bf16.vlgmr.msra.gmra.mrb[32].mxu0 %vm873_vm6, %v19063_v63  ;;  %v2407_v53 = vsel %vm18697_vm2, %v2405_v40, %v2406_v30  ;;  %v2410_v55 = vrot.slane %v2261_v44, 5  ;;  %v2413_v56 = vrot.slane %v2262_v49, 5  ;;  %v1182_v57 = vld [vmem:[%s18695_s22 + $0x28c] sm:$0xf]  ;;  %v19116_v60 = vcombine.low %v1349_v38, %v1352_v39  ;;  %v1183_v61 = vld [vmem:[%s18695_s22 + $0x290] sm:$0x3] }
  0x61   : > { %16539 = vmatmul.mubr.msk.bf16.vlgmr.msra.gmra.mrb[0].mxu1 %vm873_vm6, %v14676_v8  ;;  %16434 = vmatprep.mubr.msk.bf16.mxu0 %vm873_vm6, %v19073_v17  ;;  %v1362_v0 = vrot.slane %v1182_v57, 6  ;;  %v2263_v2 = vld [vmem:[%s18695_s22 + $0x1e4] sm:$0xe]  ;;  %v14678_v6 = vcombine.low %v2404_v46, %v2407_v53  ;;  %v14548_v9 = vrot.slane %v1181_v52, 10  ;;  %v2264_v10 = vld [vmem:[%s18695_s22 + $0x1e8] sm:$0xf] }
  0x62   : > { %16571 = vmatpush3.bf16.msra.mxu1 %v18781_v18  ;;  %16542 = vmatprep.mubr.msk.bf16.mxu1 %vm873_vm6, %v14677_v37  ;;  %v1359_v18 = vsel %vm18714_vm5, %v1357_v48, %v1358_v50  ;;  %v2411_v7 = vsel %vm18697_vm2, %v14659_v54, %v2410_v55  ;;  %v2412_v8 = vrot.slane %v2410_v55, 4  ;;  %v2265_v11 = vld [vmem:[%s18695_s22 + $0x1ec] sm:$0x1]  ;;  %v1365_v15 = vrot.slane %v1183_v61, 6  ;;  %v2266_v20 = vld [vmem:[%s18695_s22 + $0x200] sm:$0xe] }
  0x63   : > { %16572 = vmatprep.subr.bf16.mxu1 %v18433_v36  ;;  %16463 = vmatpush3.bf16.msra.mxu0 %v18793_v13  ;;  %v19132_v12 = vcombine.low %v1356_v47, %v1359_v18  ;;  %v1364_v13 = vrot.slane %v1362_v0, 4  ;;  %v2417_v19 = vrot.slane %v2264_v10, 5  ;;  %v14660_v22 = vrot.slane %v2263_v2, 9  ;;  %v2267_v24 = vld [vmem:[%s18695_s22 + $0x204] sm:$0xf] }
  0x64   : > { %16464 = vmatprep.subr.bf16.mxu0 %v18435_v45  ;;  %v2414_v21 = vsel %vm18697_vm2, %v2412_v8, %v2413_v56  ;;  %v2420_v23 = vrot.slane %v2265_v11, 5  ;;  %v2268_v4 = vld [vmem:[%s18695_s22 + $0x208] sm:$0x1]  ;;  %v14661_v29 = vrot.slane %v2266_v20, 9  ;;  %v2270_v30 = vld [vmem:[%s18695_s22 + $0x220] sm:$0xf]  ;;  %v1363_v35 = vsel %vm18714_vm5, %v14548_v9, %v1362_v0 }
  0x65   : > { %v14679_v27 = vcombine.low %v2411_v7, %v2414_v21  ;;  %v2419_v28 = vrot.slane %v2417_v19, 4  ;;  %v2424_v31 = vrot.slane %v2267_v24, 5  ;;  %v2427_v33 = vrot.slane %v2268_v4, 5  ;;  %v2273_v37 = vld [vmem:[%s18695_s22 + $0x23c] sm:$0xf] }
  0x66   : > { %16573 = vmatpush3.bf16.msra.mxu1 %v18433_v36  ;;  %v1366_v36 = vsel %vm18714_vm5, %v1364_v13, %v1365_v15  ;;  %v2418_v38 = vsel %vm18697_vm2, %v14660_v22, %v2417_v19  ;;  %v2269_v42 = vld [vmem:[%s18695_s22 + $0x21c] sm:$0xe]  ;;  %v2431_v44 = vrot.slane %v2270_v30, 5  ;;  %v2271_v46 = vld [vmem:[%s18695_s22 + $0x224] sm:$0x1]  ;;  %v2438_v47 = vrot.slane %v2273_v37, 5 }
  0x67   : > { %16465 = vmatpush3.bf16.msra.mxu0 %v18435_v45  ;;  %16606 = vmatprep.subr.bf16.mxu1 %v19114_v58  ;;  %v2421_v39 = vsel %vm18697_vm2, %v2419_v28, %v2420_v23  ;;  %v2426_v40 = vrot.slane %v2424_v31, 4  ;;  %v2425_v45 = vsel %vm18697_vm2, %v14661_v29, %v2424_v31  ;;  %v19161_v48 = vcombine.low %v1363_v35, %v1366_v36  ;;  %v2272_v49 = vld [vmem:[%s18695_s22 + $0x238] sm:$0xe]  ;;  %v2274_v52 = vld [vmem:[%s18695_s22 + $0x240] sm:$0x1] }
  0x68   : > { %16435 = vmatmul.mubr.msk.bf16.gmra.mrb[36].mxu0 %vm873_vm6, %v19116_v60  ;;  %16750 = vmatprep.subr.bf16.mxu0 %v19126_v3  ;;  %v14680_v53 = vcombine.low %v2418_v38, %v2421_v39  ;;  %v14662_v55 = vrot.slane %v2269_v42, 9  ;;  %v2433_v56 = vrot.slane %v2431_v44, 4  ;;  %v2434_v57 = vrot.slane %v2271_v46, 5  ;;  %v2276_v2 = vld [vmem:[%s18695_s22 + $0x258] sm:$0xf] }
  0x69   : > { %16543 = vmatmul.mubr.msk.bf16.gmra.mrb[4].mxu1 %vm873_vm6, %v14678_v6  ;;  %16438 = vmatprep.mubr.msk.bf16.mxu0 %vm873_vm6, %v19132_v12  ;;  %v2428_v50 = vsel %vm18697_vm2, %v2426_v40, %v2427_v33  ;;  %v14663_v18 = vrot.slane %v2272_v49, 9  ;;  %v2440_v61 = vrot.slane %v2438_v47, 4  ;;  %v2441_v0 = vrot.slane %v2274_v52, 5  ;;  %v2279_v6 = vld [vmem:[%s18695_s22 + $0x274] sm:$0xf] }
  0x6a   : > { %16546 = vmatprep.mubr.msk.bf16.mxu1 %vm873_vm6, %v14679_v27  ;;  %v19167_v54 = vcombine.low %v2425_v45, %v2428_v50  ;;  %v2432_v7 = vsel %vm18697_vm2, %v14662_v55, %v2431_v44  ;;  %v2435_v8 = vsel %vm18697_vm2, %v2433_v56, %v2434_v57  ;;  %v2275_v9 = vld [vmem:[%s18695_s22 + $0x254] sm:$0xe]  ;;  %v2445_v10 = vrot.slane %v2276_v2, 5  ;;  %v2277_v15 = vld [vmem:[%s18695_s22 + $0x25c] sm:$0x1] }
  0x6b   : > { %v2439_v11 = vsel %vm18697_vm2, %v14663_v18, %v2438_v47  ;;  %v2442_v13 = vsel %vm18697_vm2, %v2440_v61, %v2441_v0  ;;  %v2278_v19 = vld [vmem:[%s18695_s22 + $0x270] sm:$0xe]  ;;  %v2452_v20 = vrot.slane %v2279_v6, 5  ;;  %v2280_v21 = vld [vmem:[%s18695_s22 + $0x278] sm:$0x1]  ;;  %v19190_v22 = vcombine.low %v2432_v7, %v2435_v8 }
  0x6c   : > { %v14664_v23 = vrot.slane %v2275_v9, 9  ;;  %v19192_v24 = vcombine.low %v2439_v11, %v2442_v13  ;;  %v2447_v4 = vrot.slane %v2445_v10, 4  ;;  %v2448_v27 = vrot.slane %v2277_v15, 5  ;;  %v2282_v31 = vld [vmem:[%s18695_s22 + $0x290] sm:$0xf] }
  0x6d   : > { %v14665_v28 = vrot.slane %v2278_v19, 9  ;;  %v2454_v29 = vrot.slane %v2452_v20, 4  ;;  %v2455_v30 = vrot.slane %v2280_v21, 5  ;;  %v2285_v33 = vld [vmem:[%s18695_s22 + $0x2ac] sm:$0xf]  ;;  %v2459_v38 = vrot.slane %v2282_v31, 5 }
  0x6e   : > { %v2446_v35 = vsel %vm18697_vm2, %v14664_v23, %v2445_v10  ;;  %v2449_v36 = vsel %vm18697_vm2, %v2447_v4, %v2448_v27  ;;  %v2281_v37 = vld [vmem:[%s18695_s22 + $0x28c] sm:$0xe]  ;;  %v2283_v42 = vld [vmem:[%s18695_s22 + $0x294] sm:$0x1]  ;;  %v2284_v44 = vld [vmem:[%s18695_s22 + $0x2a8] sm:$0xe] }
  0x6f   : > { %v2453_v39 = vsel %vm18697_vm2, %v14665_v28, %v2452_v20  ;;  %v2456_v40 = vsel %vm18697_vm2, %v2454_v29, %v2455_v30  ;;  %v2466_v45 = vrot.slane %v2285_v33, 5  ;;  %v2286_v46 = vld [vmem:[%s18695_s22 + $0x2b0] sm:$0x1]  ;;  %v19216_v47 = vcombine.low %v2446_v35, %v2449_v36  ;;  %v2288_v18 = vld [vmem:[%s18695_s22 + $0x2c8] sm:$0xf] }
  0x70   : > { %16439 = vmatmul.mubr.msk.bf16.gmra.mrb[40].mxu0 %vm873_vm6, %v19161_v48  ;;  %v19218_v50 = vcombine.low %v2453_v39, %v2456_v40  ;;  %v14666_v49 = vrot.slane %v2281_v37, 9  ;;  %v2461_v52 = vrot.slane %v2459_v38, 4  ;;  %v14667_v55 = vrot.slane %v2284_v44, 9  ;;  %v2291_v61 = vld [vmem:[%s18695_s22 + $0x2e4] sm:$0xf] }
  0x71   : > { %16547 = vmatmul.mubr.msk.bf16.gmra.mrb[8].mxu1 %vm873_vm6, %v14680_v53  ;;  %16442 = vmatprep.mubr.msk.bf16.mxu0 %vm873_vm6, %v18738_v43  ;;  %v2462_v53 = vrot.slane %v2283_v42, 5  ;;  %v2468_v56 = vrot.slane %v2466_v45, 4  ;;  %v2469_v57 = vrot.slane %v2286_v46, 5  ;;  %v2287_v6 = vld [vmem:[%s18695_s22 + $0x2c4] sm:$0xe]  ;;  %v2473_v8 = vrot.slane %v2288_v18, 5 }
  0x72   : > { %16550 = vmatprep.mubr.msk.bf16.mxu1 %vm873_vm6, %v19167_v54  ;;  %v2460_v0 = vsel %vm18697_vm2, %v14666_v49, %v2459_v38  ;;  %v2289_v7 = vld [vmem:[%s18695_s22 + $0x2cc] sm:$0x1]  ;;  %v2467_v9 = vsel %vm18697_vm2, %v14667_v55, %v2466_v45  ;;  %v2290_v10 = vld [vmem:[%s18695_s22 + $0x2e0] sm:$0xe]  ;;  %v2480_v11 = vrot.slane %v2291_v61, 5  ;;  %v14668_v19 = vrot.slane %v2287_v6, 9 }
  0x73   : > { %v2463_v2 = vsel %vm18697_vm2, %v2461_v52, %v2462_v53  ;;  %v2292_v13 = vld [vmem:[%s18695_s22 + $0x2e8] sm:$0x1]  ;;  %v2476_v20 = vrot.slane %v2289_v7, 5  ;;  %v2475_v23 = vrot.slane %v2473_v8, 4  ;;  %v14669_v4 = vrot.slane %v2290_v10, 9 }
  0x74   : > { %v19242_v15 = vcombine.low %v2460_v0, %v2463_v2  ;;  %v2482_v27 = vrot.slane %v2480_v11, 4  ;;  %v2483_v28 = vrot.slane %v2292_v13, 5  ;;  %v2294_v29 = vld [vmem:[%s18695_s22 + $0x300] sm:$0xf]  ;;  %v1149_v30 = vld [vmem:[%s18695_s22 + $0x158] sm:$0xf]  ;;  %v2474_v33 = vsel %vm18697_vm2, %v14668_v19, %v2473_v8 }
  0x75   : > { %v2293_v31 = vld [vmem:[%s18695_s22 + $0x2fc] sm:$0xe]  ;;  %v2477_v35 = vsel %vm18697_vm2, %v2475_v23, %v2476_v20  ;;  %v2295_v36 = vld [vmem:[%s18695_s22 + $0x304] sm:$0x1]  ;;  %v1148_v37 = vld [vmem:[%s18695_s22 + $0x154] sm:$0xc] }
  0x76   : > { %v1285_v38 = vrot.slane %v1149_v30, 6  ;;  %v2484_v39 = vsel %vm18697_vm2, %v2482_v27, %v2483_v28  ;;  %v1150_v40 = vld [vmem:[%s18695_s22 + $0x15c] sm:$0x3]  ;;  %v19268_v42 = vcombine.low %v2474_v33, %v2477_v35  ;;  %v14670_v44 = vrot.slane %v2293_v31, 9  ;;  %v1151_v18 = vld [vmem:[%s18695_s22 + $0x170] sm:$0xc] }
  0x77   : > { %v2490_v45 = vrot.slane %v2295_v36, 5  ;;  %v14537_v46 = vrot.slane %v1148_v37, 10  ;;  %v1288_v55 = vrot.slane %v1150_v40, 6  ;;  %v1153_v0 = vld [vmem:[%s18695_s22 + $0x178] sm:$0x3] }
  0x78   : > { %16443 = vmatmul.mubr.msk.bf16.gmra.mrb[44].mxu0 %vm873_vm6, %v18762_v62  ;;  %v1287_v53 = vrot.slane %v1285_v38, 4  ;;  %v1154_v6 = vld [vmem:[%s18695_s22 + $0x18c] sm:$0xc]  ;;  %v1295_v19 = vrot.slane %v1153_v0, 6  ;;  %v1161_v28 = vld [vmem:[%s18695_s22 + $0x1c8] sm:$0xf] }
  0x79   : > { %16551 = vmatmul.mubr.msk.bf16.gmra.mrb[12].mxu1 %vm873_vm6, %v19190_v22  ;;  %16446 = vmatprep.mubr.msk.bf16.mxu0 %vm873_vm6, %v18795_v25  ;;  %v1286_v7 = vsel %vm18714_vm5, %v14537_v46, %v1285_v38  ;;  %v14539_v20 = vrot.slane %v1154_v6, 10  ;;  %v1158_v27 = vld [vmem:[%s18695_s22 + $0x1ac] sm:$0xf]  ;;  %v1157_v35 = vld [vmem:[%s18695_s22 + $0x1a8] sm:$0xc] }
  0x7a   : > { %16554 = vmatprep.mubr.msk.bf16.mxu1 %vm873_vm6, %v19192_v24  ;;  %v1306_v31 = vrot.slane %v1158_v27, 6  ;;  %v1159_v36 = vld [vmem:[%s18695_s22 + $0x1b0] sm:$0x3]  ;;  %v1160_v37 = vld [vmem:[%s18695_s22 + $0x1c4] sm:$0xc]  ;;  %v14540_v40 = vrot.slane %v1157_v35, 10 }
  0x7b   : > { %v1162_v38 = vld [vmem:[%s18695_s22 + $0x1cc] sm:$0x3]  ;;  %v14541_v46 = vrot.slane %v1160_v37, 10  ;;  %v1165_v6 = vld [vmem:[%s18695_s22 + $0x1e8] sm:$0x3] }
  0x7c   : > { %v2300_v27 = vld [vmem:[%s18695_s22 + $0x338] sm:$0xf]  ;;  %v11159_v5 = vld [vmem:[%s18695_s22 + $0x48] sm:$0xc] }
  0x80   : > { %16447 = vmatmul.mubr.msk.bf16.gmra.mrb[48].mxu0 %vm873_vm6, %v18812_v41 }
  0x81   : > { %16555 = vmatmul.mubr.msk.bf16.gmra.mrb[16].mxu1 %vm873_vm6, %v19216_v47  ;;  %16450 = vmatprep.mubr.msk.bf16.mxu0 %vm873_vm6, %v18837_v1  ;;  %v2470_v1 = vsel %vm18697_vm2, %v2468_v56, %v2469_v57  ;;  %v1152_v56 = vld [vmem:[%s18695_s22 + $0x174] sm:$0xf]  ;;  %v1155_v57 = vld [vmem:[%s18695_s22 + $0x190] sm:$0xf] }
  0x82   : > { %16558 = vmatprep.mubr.msk.bf16.mxu1 %vm873_vm6, %v19218_v50  ;;  %v19244_v21 = vcombine.low %v2467_v9, %v2470_v1  ;;  %v1292_v2 = vrot.slane %v1152_v56, 6  ;;  %v1299_v8 = vrot.slane %v1155_v57, 6  ;;  %v1156_v9 = vld [vmem:[%s18695_s22 + $0x194] sm:$0x3]  ;;  %v14538_v1 = vrot.slane %v1151_v18, 10  ;;  %v18439_v56 = vld [vmem:[%s22985_s3 + $0x38] sm:$0xff]  }
  0x83   : > { %v1307_v57 = vsel %vm18714_vm5, %v14540_v40, %v1306_v31  ;;  %v2309_v40 = vld [vmem:[%s18695_s22 + $0x38c] sm:$0xf] }
  0x84   : > { %v1294_v13 = vrot.slane %v1292_v2, 4  ;;  %v1301_v23 = vrot.slane %v1299_v8, 4  ;;  %v1300_v33 = vsel %vm18714_vm5, %v14539_v20, %v1299_v8  ;;  %v2298_v20 = vld [vmem:[%s18695_s22 + $0x320] sm:$0x1] }
  0x86   : > { %v1296_v30 = vsel %vm18714_vm5, %v1294_v13, %v1295_v19  ;;  %v2297_v13 = vld [vmem:[%s18695_s22 + $0x31c] sm:$0xf]  ;;  %v2296_v19 = vld [vmem:[%s18695_s22 + $0x318] sm:$0xe] }
  0x88   : > { %16451 = vmatmul.mubr.msk.bf16.gmra.mrb[52].mxu0 %vm873_vm6, %v18858_v32  ;;  %v2487_v32 = vrot.slane %v2294_v29, 5  ;;  %v1293_v29 = vsel %vm18714_vm5, %v14538_v1, %v1292_v2  ;;  %v1163_v2 = vld [vmem:[%s18695_s22 + $0x1e0] sm:$0xc] }
  0x89   : > { %16559 = vmatmul.mubr.msk.bf16.gmra.mrb[20].mxu1 %vm873_vm6, %v19242_v15  ;;  %16454 = vmatprep.mubr.msk.bf16.mxu0 %vm873_vm6, %v18877_v51  ;;  %v2481_v51 = vsel %vm18697_vm2, %v14669_v4, %v2480_v11  ;;  %v1302_v4 = vrot.slane %v1156_v9, 6  ;;  %v1323_v9 = vrot.slane %v1165_v6, 6 }
  0x8a   : > { %16562 = vmatprep.mubr.msk.bf16.mxu1 %vm873_vm6, %v19244_v21  ;;  %v19270_v49 = vcombine.low %v2481_v51, %v2484_v39  ;;  %v2489_v52 = vrot.slane %v2487_v32, 4  ;;  %v2488_v61 = vsel %vm18697_vm2, %v14670_v44, %v2487_v32  ;;  %v1313_v32 = vrot.slane %v1161_v28, 6  ;;  %v2301_v28 = vld [vmem:[%s18695_s22 + $0x33c] sm:$0x1] }
  0x8b   : > { %v14598_v51 = vcombine.low %v1293_v29, %v1296_v30  ;;  %v1308_v44 = vrot.slane %v1306_v31, 4  ;;  %v2825_v29 = vrot.slane %v2300_v27, 5  ;;  %v2302_v31 = vld [vmem:[%s18695_s22 + $0x350] sm:$0xe]  ;;  %v4401_v27 = vld [vmem:[%s18695_s22 + $0x218] sm:$0xf] }
  0x8c   : > { %v1314_v0 = vsel %vm18714_vm5, %v14541_v46, %v1313_v32  ;;  %v14711_v37 = vrot.slane %v2302_v31, 9  ;;  %v4400_v31 = vld [vmem:[%s18695_s22 + $0x214] sm:$0x8] }
  0x90   : > { %16455 = vmatmul.mubr.msk.bf16.gmra.mrb[56].mxu0 %vm873_vm6, %v18895_v14  ;;  %v2491_v14 = vsel %vm18697_vm2, %v2489_v52, %v2490_v45  ;;  %v1309_v45 = vrot.slane %v1159_v36, 6  ;;  %v1316_v52 = vrot.slane %v1162_v38, 6  ;;  %v2828_v36 = vrot.slane %v2301_v28, 5 }
  0x91   : > { %16563 = vmatmul.mubr.msk.bf16.gmra.mrb[24].mxu1 %vm873_vm6, %v19268_v42  ;;  %16458 = vmatprep.mubr.msk.bf16.mxu0 %vm873_vm6, %v18914_v34  ;;  %v1289_v34 = vsel %vm18714_vm5, %v1287_v53, %v1288_v55  ;;  %v19294_v10 = vcombine.low %v2488_v61, %v2491_v14  ;;  %v1164_v53 = vld [vmem:[%s18695_s22 + $0x1e4] sm:$0xf]  ;;  %v18437_v55 = vld [vmem:[%s22984_s2 + $0x78] sm:$0xff]  }
  0x92   : > { %16566 = vmatprep.mubr.msk.bf16.mxu1 %vm873_vm6, %v19270_v49  ;;  %v14597_v11 = vcombine.low %v1286_v7, %v1289_v34  ;;  %v1310_v18 = vsel %vm18714_vm5, %v1308_v44, %v1309_v45  ;;  %v1320_v61 = vrot.slane %v1164_v53, 6  ;;  %v19345_v14 = vld [vmem:[%s22984_s2 + $0x20] sm:$0xff]   ;;  %v14542_v34 = vrot.slane %v1163_v2, 10  ;;  %v2312_v2 = vld [vmem:[%s18695_s22 + $0x3a8] sm:$0xf] }
  0x93   : > { %v2846_v53 = vrot.slane %v2309_v40, 5 }
  0x94   : > { %v1322_v8 = vrot.slane %v1320_v61, 4 }
  0x96   : > { %v1324_v1 = vsel %vm18714_vm5, %v1322_v8, %v1323_v9  ;;  %v2853_v8 = vrot.slane %v2312_v2, 5  ;;  %v4411_v2 = vld [vmem:[%s18695_s22 + $0x270] sm:$0x7] }
  0x98   : > { %16459 = vmatmul.mubr.msk.bf16.gmra.mrb[60].mxu0 %vm873_vm6, %v18933_v59  ;;  %v1303_v59 = vsel %vm18714_vm5, %v1301_v23, %v1302_v4  ;;  %v2821_v4 = vrot.slane %v2298_v20, 5 }
  0x99   : > { %16567 = vmatmul.mubr.msk.bf16.gmra.mrb[28].mxu1 %vm873_vm6, %v19294_v10  ;;  %16466 = vmatprep.mubr.msk.bf16.mxu0 %vm873_vm6, %v14597_v11  ;;  %v14599_v39 = vcombine.low %v1300_v33, %v1303_v59  ;;  %v2304_v59 = vld [vmem:[%s18695_s22 + $0x358] sm:$0x1] }
  0x9a   : > { %16574 = vmatprep.mubr.msk.bf16.mxu1 %vm873_vm6, %v19167_v54  ;;  %v1315_v54 = vrot.slane %v1313_v32, 4  ;;  %v2827_v32 = vrot.slane %v2825_v29, 4 }
  0x9c   : > { %v2829_v45 = vsel %vm18697_vm2, %v2827_v32, %v2828_v36 }
  0xa0   : > { %16467 = vmatmul.mubr.msk.bf16.vlgmr.msra.gmra.mrb[32].mxu0 %vm873_vm6, %v14598_v51  ;;  %v2835_v51 = vrot.slane %v2304_v59, 5  ;;  %v4625_v59 = vrot.slane %v4401_v27, 7 }
  0xa1   : > { %16575 = vmatmul.mubr.msk.bf16.vlgmr.msra.gmra.mrb[0].mxu1 %vm873_vm6, %v19190_v22  ;;  %16470 = vmatprep.mubr.msk.bf16.mxu0 %vm873_vm6, %v14599_v39  ;;  %v1317_v22 = vsel %vm18714_vm5, %v1315_v54, %v1316_v52  ;;  %v2306_v39 = vld [vmem:[%s18695_s22 + $0x370] sm:$0xf]  ;;  %v2305_v52 = vld [vmem:[%s18695_s22 + $0x36c] sm:$0xe] }
  0xa2   : > { %16607 = vmatpush3.bf16.msra.mxu1 %v19114_v58  ;;  %16578 = vmatprep.mubr.msk.bf16.mxu1 %vm873_vm6, %v19192_v24  ;;  %v14600_v58 = vcombine.low %v1307_v57, %v1310_v18  ;;  %v19350_v24 = vld [vmem:[%s22985_s3] sm:$0xff]   ;;  %v14601_v7 = vcombine.low %v1314_v0, %v1317_v22  ;;  %v2839_v46 = vrot.slane %v2306_v39, 5  ;;  %v14884_v39 = vrot.slane %v4400_v31, 11 }
  0xa3   : > { %16608 = vmatprep.subr.bf16.mxu1 %v18437_v55  ;;  %16751 = vmatpush3.bf16.msra.mxu0 %v19126_v3  ;;  %v1321_v3 = vsel %vm18714_vm5, %v14542_v34, %v1320_v61  ;;  %v14712_v61 = vrot.slane %v2305_v52, 9  ;;  %v4398_v34 = vld [vmem:[%s18695_s22 + $0x1fc] sm:$0xf]  ;;  %v4408_v52 = vld [vmem:[%s18695_s22 + $0x254] sm:$0x7] }
  0xa4   : > { %16752 = vmatprep.subr.bf16.mxu0 %v18439_v56  ;;  %v14602_v11 = vcombine.low %v1321_v3, %v1324_v1  ;;  %v2841_v0 = vrot.slane %v2839_v46, 4  ;;  %v2311_v1 = vld [vmem:[%s18695_s22 + $0x3a4] sm:$0xe] }
  0xa5   : > { %v2840_v9 = vsel %vm18697_vm2, %v14712_v61, %v2839_v46 }
  0xa6   : > { %16609 = vmatpush3.bf16.msra.mxu1 %v18437_v55  ;;  %v2308_v55 = vld [vmem:[%s18695_s22 + $0x388] sm:$0xe] }
  0xa7   : > { %16753 = vmatpush3.bf16.msra.mxu0 %v18439_v56  ;;  %16642 = vmatprep.subr.bf16.mxu1 %v19345_v14  ;;  %v2310_v56 = vld [vmem:[%s18695_s22 + $0x390] sm:$0x1]  ;;  %v14713_v6 = vrot.slane %v2308_v55, 9 }
  0xa8   : > { %16471 = vmatmul.mubr.msk.bf16.gmra.mrb[36].mxu0 %vm873_vm6, %v14600_v58  ;;  %16786 = vmatprep.subr.bf16.mxu0 %v19350_v24  ;;  %v2848_v58 = vrot.slane %v2846_v53, 4 }
  0xa9   : > { %16579 = vmatmul.mubr.msk.bf16.gmra.mrb[4].mxu1 %vm873_vm6, %v19216_v47  ;;  %16474 = vmatprep.mubr.msk.bf16.mxu0 %vm873_vm6, %v14601_v7  ;;  %v2818_v47 = vrot.slane %v2297_v13, 5  ;;  %v2849_v7 = vrot.slane %v2310_v56, 5  ;;  %v2847_v13 = vsel %vm18697_vm2, %v14713_v6, %v2846_v53 }
  0xaa   : > { %16582 = vmatprep.mubr.msk.bf16.mxu1 %vm873_vm6, %v19218_v50  ;;  %v14709_v50 = vrot.slane %v2296_v19, 9  ;;  %v4399_v19 = vld [vmem:[%s18695_s22 + $0x200] sm:$0x7] }
  0xab   : > { %v2820_v23 = vrot.slane %v2818_v47, 4 }
  0xac   : > { %v2819_v30 = vsel %vm18697_vm2, %v14709_v50, %v2818_v47  ;;  %v4397_v47 = vld [vmem:[%s18695_s22 + $0x1f8] sm:$0x8]  ;;  %v14714_v50 = vrot.slane %v2311_v1, 9  ;;  %v4414_v1 = vld [vmem:[%s18695_s22 + $0x28c] sm:$0x7] }
  0xb0   : > { %16475 = vmatmul.mubr.msk.bf16.gmra.mrb[40].mxu0 %vm873_vm6, %v14602_v11  ;;  %v2313_v11 = vld [vmem:[%s18695_s22 + $0x3ac] sm:$0x1] }
  0xb1   : > { %16583 = vmatmul.mubr.msk.bf16.gmra.mrb[8].mxu1 %vm873_vm6, %v19242_v15  ;;  %16478 = vmatprep.mubr.msk.bf16.mxu0 %vm873_vm6, %v19036_v26  ;;  %v2303_v15 = vld [vmem:[%s18695_s22 + $0x354] sm:$0xf] }
  0xb2   : > { %16586 = vmatprep.mubr.msk.bf16.mxu1 %vm873_vm6, %v19244_v21  ;;  %v2299_v26 = vld [vmem:[%s18695_s22 + $0x334] sm:$0xe]  ;;  %v2832_v33 = vrot.slane %v2303_v15, 5 }
  0xb3   : > { %v14710_v35 = vrot.slane %v2299_v26, 9  ;;  %v14883_v26 = vrot.slane %v4397_v47, 11 }
  0xb4   : > { %v2834_v38 = vrot.slane %v2832_v33, 4 }
  0xb5   : > { %v2826_v44 = vsel %vm18697_vm2, %v14710_v35, %v2825_v29  ;;  %v4621_v29 = vrot.slane %v4399_v19, 7  ;;  %v2854_v35 = vsel %vm18697_vm2, %v14714_v50, %v2853_v8  ;;  %v19512_v19 = vld [vmem:[%s18695_s22 + $0x2bc] sm:$0x8]  ;;  %v19515_v50 = vld [vmem:[%s18695_s22 + $0x2c0] sm:$0xf] }
  0xb6   : > { %v2836_v54 = vsel %vm18697_vm2, %v2834_v38, %v2835_v51  ;;  %v19416_v57 = vcombine.low %v2826_v44, %v2829_v45  ;;  %v4407_v51 = vld [vmem:[%s18695_s22 + $0x250] sm:$0xf]  ;;  %v4406_v44 = vld [vmem:[%s18695_s22 + $0x24c] sm:$0x8] }
  0xb7   : > { %v4410_v45 = vld [vmem:[%s18695_s22 + $0x26c] sm:$0xf]  ;;  %v4639_v61 = vrot.slane %v4407_v51, 7 }
  0xb8   : > { %16479 = vmatmul.mubr.msk.bf16.gmra.mrb[44].mxu0 %vm873_vm6, %v19063_v63  ;;  %v2822_v63 = vsel %vm18697_vm2, %v2820_v23, %v2821_v4  ;;  %v2855_v23 = vrot.slane %v2853_v8, 4  ;;  %v2856_v4 = vrot.slane %v2313_v11, 5  ;;  %v4686_v6 = vrot.slane %v4410_v45, 7  ;;  %v19488_v8 = vld [vmem:[%s18695_s22 + $0x2a4] sm:$0xf] }
  0xb9   : > { %16587 = vmatmul.mubr.msk.bf16.gmra.mrb[12].mxu1 %vm873_vm6, %v19268_v42  ;;  %16482 = vmatprep.mubr.msk.bf16.mxu0 %vm873_vm6, %v19073_v17  ;;  %v19392_v17 = vcombine.low %v2819_v30, %v2822_v63  ;;  %v4404_v30 = vld [vmem:[%s18695_s22 + $0x234] sm:$0xf]  ;;  %v19498_v11 = vld [vmem:[%s18695_s22 + $0x2a0] sm:$0x8]  ;;  %v4420_v45 = vld [vmem:[%s18695_s22 + $0x2c4] sm:$0x7] }
  0xba   : > { %16590 = vmatprep.mubr.msk.bf16.mxu1 %vm873_vm6, %v19270_v49  ;;  %v2857_v36 = vsel %vm18697_vm2, %v2855_v23, %v2856_v4  ;;  %v4632_v32 = vrot.slane %v4404_v30, 7  ;;  %v4688_v23 = vrot.slane %v4686_v6, 4  ;;  %v4689_v4 = vrot.slane %v4411_v2, 7 }
  0xbb   : > { %v19475_v46 = vcombine.low %v2854_v35, %v2857_v36  ;;  %v14889_v30 = vrot.slane %v19498_v11, 11  ;;  %v14890_v35 = vrot.slane %v19512_v19, 11  ;;  %v4707_v36 = vrot.slane %v19515_v50, 7  ;;  %v2316_v11 = vld [vmem:[%s18695_s22 + $0x3c8] sm:$0x1] }
  0xbc   : > { %v4634_v55 = vrot.slane %v4632_v32, 4  ;;  %v4430_v50 = vld [vmem:[%s18695_s22 + $0x32c] sm:$0x8] }
  0xc0   : > { %16483 = vmatmul.mubr.msk.bf16.gmra.mrb[48].mxu0 %vm873_vm6, %v19116_v60  ;;  %v2833_v60 = vsel %vm18697_vm2, %v14711_v37, %v2832_v33  ;;  %v4402_v33 = vld [vmem:[%s18695_s22 + $0x21c] sm:$0x7] }
  0xc1   : > { %16591 = vmatmul.mubr.msk.bf16.gmra.mrb[16].mxu1 %vm873_vm6, %v19294_v10  ;;  %16486 = vmatprep.mubr.msk.bf16.mxu0 %vm873_vm6, %v19132_v12  ;;  %v2307_v12 = vld [vmem:[%s18695_s22 + $0x374] sm:$0x1]  ;;  %v19418_v18 = vcombine.low %v2833_v60, %v2836_v54  ;;  %v4628_v40 = vrot.slane %v4402_v33, 7  ;;  %v4627_v60 = vrot.slane %v4625_v59, 4  ;;  %v19523_v33 = vld [vmem:[%s18695_s22 + $0x2dc] sm:$0xf] }
  0xc2   : > { %16594 = vmatprep.mubr.msk.bf16.mxu1 %vm873_vm6, %v19392_v17  ;;  %v2842_v22 = vrot.slane %v2307_v12, 5  ;;  %v19479_v12 = vld [vmem:[%s18695_s22 + $0x288] sm:$0xf] }
  0xc4   : > { %v2843_v3 = vsel %vm18697_vm2, %v2841_v0, %v2842_v22  ;;  %v14886_v0 = vrot.slane %v4406_v44, 11  ;;  %v4409_v22 = vld [vmem:[%s18695_s22 + $0x268] sm:$0x8]  ;;  %v19563_v44 = vld [vmem:[%s22985_s3 + $0x60] sm:$0xff]  }
  0xc5   : > { %v19442_v20 = vcombine.low %v2840_v9, %v2843_v3  ;;  %v4626_v9 = vsel %vm19448_vm9, %v14884_v39, %v4625_v59  ;;  %v4629_v3 = vsel %vm19448_vm9, %v4627_v60, %v4628_v40  ;;  %v14887_v47 = vrot.slane %v4409_v22, 11  ;;  %v19551_v39 = vld [vmem:[%s22984_s2 + $0x50] sm:$0xff]  }
  0xc6   : > { %v19525_v59 = vcombine.low %v4626_v9, %v4629_v3  ;;  %v4690_v40 = vsel %vm19448_vm9, %v4688_v23, %v4689_v4  ;;  %v4427_v23 = vld [vmem:[%s18695_s22 + $0x310] sm:$0x8] }
  0xc7   : > { %v19616_v4 = vld [vmem:[%s18695_s22 + $0x330] sm:$0xf] }
  0xc8   : > { %16487 = vmatmul.mubr.msk.bf16.gmra.mrb[52].mxu0 %vm873_vm6, %v19161_v48  ;;  %v4618_v48 = vrot.slane %v4398_v34, 7  ;;  %v4693_v34 = vrot.slane %v19479_v12, 7 }
  0xc9   : > { %16595 = vmatmul.mubr.msk.bf16.gmra.mrb[20].mxu1 %vm873_vm6, %v19416_v57  ;;  %16490 = vmatprep.mubr.msk.bf16.mxu0 %vm873_vm6, %v18738_v43  ;;  %v2850_v43 = vsel %vm18697_vm2, %v2848_v58, %v2849_v7  ;;  %v4642_v58 = vrot.slane %v4408_v52, 7  ;;  %v4412_v7 = vld [vmem:[%s18695_s22 + $0x284] sm:$0x8] }
  0xca   : > { %16598 = vmatprep.mubr.msk.bf16.mxu1 %vm873_vm6, %v19418_v18  ;;  %v19445_v15 = vcombine.low %v2847_v13, %v2850_v43  ;;  %v4620_v28 = vrot.slane %v4618_v48, 4  ;;  %v4619_v37 = vsel %vm19448_vm9, %v14883_v26, %v4618_v48  ;;  %v19501_v48 = vld [vmem:[%s18695_s22 + $0x2a8] sm:$0x7]  ;;  %v4641_v43 = vrot.slane %v4639_v61, 4 }
  0xcb   : > { %v14888_v27 = vrot.slane %v4412_v7, 11  ;;  %v4700_v26 = vrot.slane %v19488_v8, 7  ;;  %v4703_v31 = vrot.slane %v19501_v48, 7 }
  0xcc   : > { %v4622_v38 = vsel %vm19448_vm9, %v4620_v28, %v4621_v29  ;;  %v4695_v28 = vrot.slane %v4693_v34, 4  ;;  %v4696_v29 = vrot.slane %v4414_v1, 7  ;;  %v4643_v51 = vsel %vm19448_vm9, %v4641_v43, %v4642_v58  ;;  %v19597_v58 = vld [vmem:[%s18695_s22 + $0x314] sm:$0xf] }
  0xcd   : > { %v19481_v53 = vcombine.low %v4619_v37, %v4622_v38  ;;  %v4714_v37 = vrot.slane %v19523_v33, 7  ;;  %v18443_v38 = vld [vmem:[%s22985_s3 + $0x8] sm:$0xff]   ;;  %v4694_v52 = vsel %vm19448_vm9, %v14888_v27, %v4693_v34  ;;  %v4701_v7 = vsel %vm19448_vm9, %v14889_v30, %v4700_v26  ;;  %v4429_v27 = vld [vmem:[%s18695_s22 + $0x318] sm:$0x7] }
  0xce   : > { %v4697_v12 = vsel %vm19448_vm9, %v4695_v28, %v4696_v29  ;;  %v4728_v43 = vrot.slane %v19597_v58, 7  ;;  %v19623_v28 = vld [vmem:[%s18695_s22 + $0x3e0] sm:$0xf]  ;;  %v4708_v29 = vsel %vm19448_vm9, %v14890_v35, %v4707_v36  ;;  %v4432_v35 = vld [vmem:[%s18695_s22 + $0x334] sm:$0x7] }
  0xcf   : > { %v14908_v2 = vcombine.low %v4694_v52, %v4697_v12  ;;  %v4716_v9 = vrot.slane %v4714_v37, 4  ;;  %v2320_v12 = vld [vmem:[%s18695_s22 + $0x3f8] sm:$0xe] }
  0xd0   : > { %16491 = vmatmul.mubr.msk.bf16.gmra.mrb[56].mxu0 %vm873_vm6, %v18762_v62  ;;  %v4403_v62 = vld [vmem:[%s18695_s22 + $0x230] sm:$0x8]  ;;  %v4730_v33 = vrot.slane %v4728_v43, 4 }
  0xd1   : > { %16599 = vmatmul.mubr.msk.bf16.gmra.mrb[24].mxu1 %vm873_vm6, %v19442_v20  ;;  %16494 = vmatprep.mubr.msk.bf16.mxu0 %vm873_vm6, %v18795_v25  ;;  %v4405_v25 = vld [vmem:[%s18695_s22 + $0x238] sm:$0x7]  ;;  %v14885_v54 = vrot.slane %v4403_v62, 11  ;;  %v18441_v62 = vld [vmem:[%s22984_s2 + $0x28] sm:$0xff]  }
  0xd2   : > { %16602 = vmatprep.mubr.msk.bf16.mxu1 %vm873_vm6, %v19445_v15  ;;  %v4635_v56 = vrot.slane %v4405_v25, 7  ;;  %v4640_v25 = vsel %vm19448_vm9, %v14886_v0, %v4639_v61  ;;  %v19582_v61 = vld [vmem:[%s18695_s22 + $0x2fc] sm:$0x7]  ;;  %v4710_v0 = vrot.slane %v4420_v45, 7  ;;  %v3131_v45 = vrot.slane %v19623_v28, 5 }
  0xd3   : > { %v4724_v1 = vrot.slane %v19582_v61, 7  ;;  %v4436_v28 = vld [vmem:[%s18695_s22 + $0x364] sm:$0x8] }
  0xd4   : > { %v4636_v13 = vsel %vm19448_vm9, %v4634_v55, %v4635_v56  ;;  %v4423_v55 = vld [vmem:[%s18695_s22 + $0x2e0] sm:$0x7]  ;;  %v19579_v56 = vld [vmem:[%s18695_s22 + $0x2f4] sm:$0x8] }
  0xd5   : > { %v4717_v3 = vrot.slane %v4423_v55, 7  ;;  %v2322_v55 = vld [vmem:[%s18695_s22 + $0x400] sm:$0x1] }
  0xd8   : > { %16495 = vmatmul.mubr.msk.bf16.gmra.mrb[60].mxu0 %vm873_vm6, %v18812_v41  ;;  %v4633_v41 = vsel %vm19448_vm9, %v14885_v54, %v4632_v32  ;;  %v4702_v32 = vrot.slane %v4700_v26, 4  ;;  %v4421_v54 = vld [vmem:[%s18695_s22 + $0x2d8] sm:$0x8]  ;;  %v19620_v26 = vld [vmem:[%s18695_s22 + $0x3dc] sm:$0xe] }
  0xd9   : > { %16603 = vmatmul.mubr.msk.bf16.gmra.mrb[28].mxu1 %vm873_vm6, %v19475_v46  ;;  %16754 = vmatprep.mubr.msk.bf16.mxu0 %vm873_vm6, %v19481_v53  ;;  %v14891_v8 = vrot.slane %v4421_v54, 11  ;;  %v4738_v54 = vrot.slane %v4432_v35, 7 }
  0xda   : > { %16610 = vmatprep.mubr.msk.bf16.mxu1 %vm873_vm6, %v19244_v21  ;;  %v19529_v21 = vcombine.low %v4633_v41, %v4636_v13  ;;  %v4704_v34 = vsel %vm19448_vm9, %v4702_v32, %v4703_v31  ;;  %v19634_v31 = vld [vmem:[%s18695_s22 + $0x3e4] sm:$0x1]  ;;  %v4735_v32 = vrot.slane %v19616_v4, 7 }
  0xdb   : > { %v4715_v19 = vsel %vm19448_vm9, %v14891_v8, %v4714_v37  ;;  %v14744_v37 = vrot.slane %v19620_v26, 9  ;;  %v3133_v8 = vrot.slane %v3131_v45, 4 }
  0xdd   : > { %v3132_v35 = vsel %vm18697_vm2, %v14744_v37, %v3131_v45  ;;  %v4441_v37 = vld [vmem:[%s18695_s22 + $0x388] sm:$0x7]  ;;  %v19718_v45 = vld [vmem:[%s18695_s22 + $0x450] sm:$0xf] }
  0xe0   : > { %16755 = vmatmul.mubr.msk.bf16.vlgmr.msra.gmra.mrb[64].mxu0 %vm873_vm6, %v19525_v59 }
  0xe1   : > { %16611 = vmatmul.mubr.msk.bf16.vlgmr.msra.gmra.mrb[0].mxu1 %vm873_vm6, %v19268_v42  ;;  %16758 = vmatprep.mubr.msk.bf16.mxu0 %vm873_vm6, %v19529_v21  ;;  %v4687_v42 = vsel %vm19448_vm9, %v14887_v47, %v4686_v6  ;;  %v2315_v6 = vld [vmem:[%s18695_s22 + $0x3c4] sm:$0xf]  ;;  %v14909_v47 = vcombine.low %v4701_v7, %v4704_v34  ;;  %v19678_v34 = vld [vmem:[%s18695_s22 + $0x418] sm:$0xf] }
  0xe2   : > { %16643 = vmatpush3.bf16.msra.mxu1 %v19345_v14  ;;  %16614 = vmatprep.mubr.msk.bf16.mxu1 %vm873_vm6, %v19270_v49  ;;  %v19567_v14 = vld [vmem:[%s18695_s22 + $0x2f8] sm:$0xf]  ;;  %v19570_v49 = vcombine.low %v4640_v25, %v4643_v51  ;;  %v14907_v60 = vcombine.low %v4687_v42, %v4690_v40  ;;  %v3124_v13 = vrot.slane %v2315_v6, 5  ;;  %v2321_v51 = vld [vmem:[%s18695_s22 + $0x3fc] sm:$0xf]  ;;  %v4731_v40 = vrot.slane %v4429_v27, 7 }
  0xe3   : > { %16644 = vmatprep.subr.bf16.mxu1 %v18441_v62  ;;  %16787 = vmatpush3.bf16.msra.mxu0 %v19350_v24  ;;  %v19585_v24 = vld [vmem:[%s18695_s22 + $0x3c0] sm:$0xe]  ;;  %v4721_v22 = vrot.slane %v19567_v14, 7  ;;  %v19653_v42 = vld [vmem:[%s18695_s22 + $0x34c] sm:$0xf]  ;;  %v14894_v14 = vrot.slane %v4430_v50, 11 }
  0xe4   : > { %16788 = vmatprep.subr.bf16.mxu0 %v18443_v38  ;;  %v14743_v41 = vrot.slane %v19585_v24, 9  ;;  %v3126_v25 = vrot.slane %v3124_v13, 4  ;;  %v4742_v61 = vrot.slane %v19653_v42, 7  ;;  %v4433_v24 = vld [vmem:[%s18695_s22 + $0x348] sm:$0x8] }
  0xe5   : > { %v4723_v48 = vrot.slane %v4721_v22, 4  ;;  %v4435_v6 = vld [vmem:[%s18695_s22 + $0x350] sm:$0x7]  ;;  %v4736_v27 = vsel %vm19448_vm9, %v14894_v14, %v4735_v32  ;;  %v4439_v50 = vld [vmem:[%s18695_s22 + $0x380] sm:$0x8]  ;;  %v14896_v14 = vrot.slane %v4436_v28, 11 }
  0xe6   : > { %16645 = vmatpush3.bf16.msra.mxu1 %v18441_v62  ;;  %v3127_v62 = vrot.slane %v2316_v11, 5  ;;  %v4744_v11 = vrot.slane %v4742_v61, 4 }
  0xe7   : > { %16789 = vmatpush3.bf16.msra.mxu0 %v18443_v38  ;;  %16678 = vmatprep.subr.bf16.mxu1 %v19551_v39  ;;  %v4718_v38 = vsel %vm19448_vm9, %v4716_v9, %v4717_v3  ;;  %v4725_v58 = vsel %vm19448_vm9, %v4723_v48, %v4724_v1  ;;  %v14745_v9 = vrot.slane %v2320_v12, 9  ;;  %v3141_v3 = vrot.slane %v2322_v55, 5 }
  0xe8   : > { %16759 = vmatmul.mubr.msk.bf16.gmra.mrb[68].mxu0 %vm873_vm6, %v19570_v49  ;;  %16822 = vmatprep.subr.bf16.mxu0 %v19563_v44  ;;  %v14911_v52 = vcombine.low %v4715_v19, %v4718_v38  ;;  %v3128_v7 = vsel %vm18697_vm2, %v3126_v25, %v3127_v62  ;;  %v14895_v1 = vrot.slane %v4433_v24, 11  ;;  %v4745_v48 = vrot.slane %v4435_v6, 7  ;;  %v2326_v62 = vld [vmem:[%s18695_s22 + $0x430] sm:$0xe]  ;;  %v2328_v19 = vld [vmem:[%s18695_s22 + $0x438] sm:$0x1] }
  0xe9   : > { %16615 = vmatmul.mubr.msk.bf16.gmra.mrb[4].mxu1 %vm873_vm6, %v19294_v10  ;;  %16762 = vmatprep.mubr.msk.bf16.mxu0 %vm873_vm6, %v14907_v60  ;;  %v4709_v10 = vrot.slane %v4707_v36, 4  ;;  %v4737_v60 = vrot.slane %v4735_v32, 4  ;;  %v3155_v12 = vrot.slane %v2328_v19, 5  ;;  %v14897_v55 = vrot.slane %v4439_v50, 11  ;;  %v4365_v19 = vld [vmem:[%s18695_s22 + $0xc8] sm:$0xf] }
  0xea   : > { %16618 = vmatprep.mubr.msk.bf16.mxu1 %vm873_vm6, %v19392_v17  ;;  %v14892_v17 = vrot.slane %v19579_v56, 11  ;;  %v3138_v56 = vrot.slane %v2321_v51, 5  ;;  %v4743_v42 = vsel %vm19448_vm9, %v14895_v1, %v4742_v61  ;;  %v4759_v24 = vrot.slane %v4441_v37, 7  ;;  %v4366_v37 = vld [vmem:[%s18695_s22 + $0xcc] sm:$0x7] }
  0xeb   : > { %v4711_v30 = vsel %vm19448_vm9, %v4709_v10, %v4710_v0  ;;  %v19681_v10 = vld [vmem:[%s18695_s22 + $0x368] sm:$0xf]  ;;  %v4739_v26 = vsel %vm19448_vm9, %v4737_v60, %v4738_v54 }
  0xec   : > { %v14910_v36 = vcombine.low %v4708_v29, %v4711_v30  ;;  %v4722_v0 = vsel %vm19448_vm9, %v14892_v17, %v4721_v22  ;;  %v3140_v17 = vrot.slane %v3138_v56, 4  ;;  %v4438_v29 = vld [vmem:[%s18695_s22 + $0x36c] sm:$0x7]  ;;  %v4440_v30 = vld [vmem:[%s18695_s22 + $0x384] sm:$0xf]  ;;  %v14914_v32 = vcombine.low %v4736_v27, %v4739_v26 }
  0xed   : > { %v3139_v38 = vsel %vm18697_vm2, %v14745_v9, %v3138_v56  ;;  %v4752_v60 = vrot.slane %v4438_v29, 7 }
  0xee   : > { %v3142_v51 = vsel %vm18697_vm2, %v3140_v17, %v3141_v3 }
  0xf0   : > { %16763 = vmatmul.mubr.msk.bf16.gmra.mrb[72].mxu0 %vm873_vm6, %v14908_v2  ;;  %v3125_v2 = vsel %vm18697_vm2, %v14743_v41, %v3124_v13  ;;  %v14912_v41 = vcombine.low %v4722_v0, %v4725_v58  ;;  %v2323_v13 = vld [vmem:[%s18695_s22 + $0x414] sm:$0xe]  ;;  %v3159_v0 = vrot.slane %v19718_v45, 5  ;;  %v2329_v58 = vld [vmem:[%s18695_s22 + $0x44c] sm:$0xe] }
  0xf1   : > { %16619 = vmatmul.mubr.msk.bf16.gmra.mrb[8].mxu1 %vm873_vm6, %v19416_v57  ;;  %16766 = vmatprep.mubr.msk.bf16.mxu0 %vm873_vm6, %v14909_v47  ;;  %v14893_v57 = vrot.slane %v4427_v23, 11  ;;  %v4749_v47 = vrot.slane %v19681_v10, 7  ;;  %v2327_v23 = vld [vmem:[%s18695_s22 + $0x434] sm:$0xf]  ;;  %v4442_v10 = vld [vmem:[%s18695_s22 + $0x39c] sm:$0x8] }
  0xf2   : > { %16622 = vmatprep.mubr.msk.bf16.mxu1 %vm873_vm6, %v19418_v18  ;;  %v3134_v18 = vrot.slane %v19634_v31, 5  ;;  %v14753_v31 = vcombine.low %v3125_v2, %v3128_v7  ;;  %v3152_v25 = vrot.slane %v2327_v23, 5  ;;  %v4443_v7 = vld [vmem:[%s18695_s22 + $0x3a0] sm:$0xf]  ;;  %v14748_v23 = vrot.slane %v2329_v58, 9 }
  0xf3   : > { %v4729_v22 = vsel %vm19448_vm9, %v14893_v57, %v4728_v43  ;;  %v2325_v43 = vld [vmem:[%s18695_s22 + $0x41c] sm:$0x1]  ;;  %v4756_v57 = vrot.slane %v4440_v30, 7  ;;  %v4751_v54 = vrot.slane %v4749_v47, 4  ;;  %v4750_v3 = vsel %vm19448_vm9, %v14896_v14, %v4749_v47  ;;  %v4367_v45 = vld [vmem:[%s18695_s22 + $0xe0] sm:$0x8] }
  0xf4   : > { %v3154_v56 = vrot.slane %v3152_v25, 4  ;;  %v4763_v17 = vrot.slane %v4443_v7, 7  ;;  %v3161_v27 = vrot.slane %v3159_v0, 4  ;;  %v14898_v28 = vrot.slane %v4442_v10, 11 }
  0xf5   : > { %v4758_v61 = vrot.slane %v4756_v57, 4 }
  0xf7   : > { %v4760_v47 = vsel %vm19448_vm9, %v4758_v61, %v4759_v24  ;;  %v4544_v24 = vrot.slane %v4366_v37, 7  ;;  %v4381_v37 = vld [vmem:[%s18695_s22 + $0x158] sm:$0x7] }
  0xf8   : > { %16767 = vmatmul.mubr.msk.bf16.gmra.mrb[76].mxu0 %vm873_vm6, %v14910_v36  ;;  %v3135_v36 = vsel %vm18697_vm2, %v3133_v8, %v3134_v18  ;;  %v4362_v8 = vld [vmem:[%s18695_s22 + $0xac] sm:$0xf] }
  0xf9   : > { %16623 = vmatmul.mubr.msk.bf16.gmra.mrb[12].mxu1 %vm873_vm6, %v19442_v20  ;;  %16770 = vmatprep.mubr.msk.bf16.mxu0 %vm873_vm6, %v14911_v52  ;;  %v4732_v20 = vsel %vm19448_vm9, %v4730_v33, %v4731_v40  ;;  %v14746_v33 = vrot.slane %v2323_v13, 9  ;;  %v3148_v40 = vrot.slane %v2325_v43, 5  ;;  %v14747_v52 = vrot.slane %v2326_v62, 9 }
  0xfa   : > { %16626 = vmatprep.mubr.msk.bf16.mxu1 %vm873_vm6, %v19445_v15  ;;  %v3145_v15 = vrot.slane %v19678_v34, 5  ;;  %v14913_v4 = vcombine.low %v4729_v22, %v4732_v20  ;;  %v14754_v2 = vcombine.low %v3132_v35, %v3135_v36  ;;  %v14755_v22 = vcombine.low %v3139_v38, %v3142_v51  ;;  %v2331_v34 = vld [vmem:[%s18695_s22 + $0x454] sm:$0x1]  ;;  %v4444_v20 = vld [vmem:[%s18695_s22 + $0x3a4] sm:$0x7] }
  0xfb   : > { %v4534_v13 = vrot.slane %v4362_v8, 7  ;;  %v3156_v43 = vsel %vm18697_vm2, %v3154_v56, %v3155_v12  ;;  %v3162_v26 = vrot.slane %v2331_v34, 5  ;;  %v4766_v29 = vrot.slane %v4444_v20, 7  ;;  %v3410_v12 = vld [vmem:[%s18695_s22 + $0x160] sm:$0xf] }
  0xfc   : > { %v3147_v18 = vrot.slane %v3145_v15, 4  ;;  %v3146_v9 = vsel %vm18697_vm2, %v14746_v33, %v3145_v15  ;;  %v4757_v15 = vsel %vm19448_vm9, %v14897_v55, %v4756_v57  ;;  %v4368_v57 = vld [vmem:[%s18695_s22 + $0xe4] sm:$0xf]  ;;  %v4764_v51 = vsel %vm19448_vm9, %v14898_v28, %v4763_v17  ;;  %v4371_v56 = vld [vmem:[%s18695_s22 + $0x100] sm:$0xf] }
  0xfd   : > { %v19758_v35 = vcombine.low %v4757_v15, %v4760_v47  ;;  %v4536_v36 = vrot.slane %v4534_v13, 4  ;;  %v4541_v33 = vrot.slane %v4365_v19, 7  ;;  %v18554_v34 = vld [vmem:[%s18695_s22 + $0x15c] sm:$0xf] }
  0xfe   : > { %v3149_v1 = vsel %vm18697_vm2, %v3147_v18, %v3148_v40  ;;  %v3160_v40 = vsel %vm18697_vm2, %v14748_v23, %v3159_v0  ;;  %v3163_v18 = vsel %vm18697_vm2, %v3161_v27, %v3162_v26  ;;  %v14873_v0 = vrot.slane %v4367_v45, 11  ;;  %v4370_v8 = vld [vmem:[%s18695_s22 + $0xfc] sm:$0x8] }
  0xff   : > { %v14756_v50 = vcombine.low %v3146_v9, %v3149_v1  ;;  %v4543_v61 = vrot.slane %v4541_v33, 4  ;;  %v14758_v58 = vcombine.low %v3160_v40, %v3163_v18  ;;  %v14781_v10 = vcombine.low %v18554_v34, %v3410_v12  ;;  %v4372_v9 = vld [vmem:[%s18695_s22 + $0x104] sm:$0x7]  ;;  %v4379_v40 = vld [vmem:[%s18695_s22 + $0x150] sm:$0x8] }
 0x100   : > { %16771 = vmatmul.mubr.msk.bf16.gmra.mrb[80].mxu0 %vm873_vm6, %v14912_v41  ;;  %v4361_v41 = vld [vmem:[%s18695_s22 + $0xa8] sm:$0x8]  ;;  %v14874_v27 = vrot.slane %v4370_v8, 11  ;;  %v4558_v28 = vrot.slane %v4372_v9, 7  ;;  %v19852_v34 = vld [vmem:[%s22985_s3 + $0x10] sm:$0xff]  }
 0x101   : > { %16627 = vmatmul.mubr.msk.bf16.gmra.mrb[16].mxu1 %vm873_vm6, %v19475_v46  ;;  %16774 = vmatprep.mubr.msk.bf16.mxu0 %vm873_vm6, %v14913_v4  ;;  %v4746_v46 = vsel %vm19448_vm9, %v4744_v11, %v4745_v48  ;;  %v4753_v11 = vsel %vm19448_vm9, %v4751_v54, %v4752_v60  ;;  %v3153_v48 = vsel %vm18697_vm2, %v14747_v52, %v3152_v25  ;;  %v4363_v4 = vld [vmem:[%s18695_s22 + $0xb0] sm:$0x7]  ;;  %v14871_v62 = vrot.slane %v4361_v41, 11  ;;  %v4364_v25 = vld [vmem:[%s18695_s22 + $0xc4] sm:$0x8] }
 0x102   : > { %16630 = vmatprep.mubr.msk.bf16.mxu1 %vm873_vm6, %v14753_v31  ;;  %v19724_v6 = vcombine.low %v4743_v42, %v4746_v46  ;;  %v19755_v30 = vcombine.low %v4750_v3, %v4753_v11  ;;  %v4765_v31 = vrot.slane %v4763_v17, 4  ;;  %v14757_v38 = vcombine.low %v3153_v48, %v3156_v43  ;;  %v4369_v46 = vld [vmem:[%s18695_s22 + $0xe8] sm:$0x7]  ;;  %v4373_v17 = vld [vmem:[%s18695_s22 + $0x118] sm:$0x8] }
 0x103   : > { %v4535_v14 = vsel %vm19448_vm9, %v14871_v62, %v4534_v13  ;;  %v4548_v54 = vrot.slane %v4368_v57, 7  ;;  %v14872_v55 = vrot.slane %v4364_v25, 11  ;;  %v4555_v3 = vrot.slane %v4371_v56, 7  ;;  %v4375_v41 = vld [vmem:[%s18695_s22 + $0x120] sm:$0x7]  ;;  %v18454_v57 = vld [vmem:[%s22984_s2 + $0x58] sm:$0xff]  }
 0x104   : > { %v4767_v42 = vsel %vm19448_vm9, %v4765_v31, %v4766_v29  ;;  %v4545_v11 = vsel %vm19448_vm9, %v4543_v61, %v4544_v24  ;;  %v19802_v13 = vld [vmem:[%s18695_s22 + $0x138] sm:$0xf]  ;;  %v3411_v43 = vld [vmem:[%s18695_s22 + $0x17c] sm:$0xf]  ;;  %v14875_v29 = vrot.slane %v4373_v17, 11  ;;  %v4565_v62 = vrot.slane %v4375_v41, 7 }
 0x105   : > { %v19783_v52 = vcombine.low %v4764_v51, %v4767_v42  ;;  %v4550_v20 = vrot.slane %v4548_v54, 4  ;;  %v4542_v1 = vsel %vm19448_vm9, %v14872_v55, %v4541_v33  ;;  %v4549_v15 = vsel %vm19448_vm9, %v14873_v0, %v4548_v54  ;;  %v4380_v25 = vld [vmem:[%s18695_s22 + $0x154] sm:$0xf]  ;;  %v4378_v33 = vld [vmem:[%s18695_s22 + $0x13c] sm:$0x7] }
 0x106   : > { %v14938_v23 = vcombine.low %v4542_v1, %v4545_v11  ;;  %v4557_v26 = vrot.slane %v4555_v3, 4  ;;  %v4569_v19 = vrot.slane %v19802_v13, 7  ;;  %v18556_v51 = vld [vmem:[%s18695_s22 + $0x194] sm:$0xf]  ;;  %v4576_v45 = vrot.slane %v4380_v25, 7 }
 0x107   : > { %v4556_v18 = vsel %vm19448_vm9, %v14874_v27, %v4555_v3  ;;  %v3414_v54 = vld [vmem:[%s18695_s22 + $0x1d0] sm:$0xf]  ;;  %v4572_v24 = vrot.slane %v4378_v33, 7  ;;  %v14877_v0 = vrot.slane %v4379_v40, 11  ;;  %v18558_v9 = vld [vmem:[%s18695_s22 + $0x1cc] sm:$0xf] }
 0x108   : > { %16775 = vmatmul.mubr.msk.bf16.gmra.mrb[84].mxu0 %vm873_vm6, %v14914_v32  ;;  %v4537_v32 = vrot.slane %v4363_v4, 7  ;;  %v3412_v4 = vld [vmem:[%s18695_s22 + $0x198] sm:$0xf]  ;;  %v4571_v61 = vrot.slane %v4569_v19, 4  ;;  %v14785_v3 = vcombine.low %v18558_v9, %v3414_v54  ;;  %v19860_v17 = vld [vmem:[%s18695_s22 + $0x16c] sm:$0x8] }
 0x109   : > { %16631 = vmatmul.mubr.msk.bf16.gmra.mrb[20].mxu1 %vm873_vm6, %v14754_v2  ;;  %16778 = vmatprep.mubr.msk.bf16.mxu0 %vm873_vm6, %v19724_v6  ;;  %v4551_v2 = vrot.slane %v4369_v46, 7  ;;  %v14783_v42 = vcombine.low %v18556_v51, %v3412_v4  ;;  %v18463_v46 = vld [vmem:[%s22985_s3 + $0x68] sm:$0xff]   ;;  %v19863_v1 = vld [vmem:[%s18695_s22 + $0x174] sm:$0x7]  ;;  %v19896_v4 = vld [vmem:[%s18695_s22 + $0x190] sm:$0x7] }
 0x10a   : > { %16634 = vmatprep.mubr.msk.bf16.mxu1 %vm873_vm6, %v14755_v22  ;;  %v4538_v60 = vsel %vm19448_vm9, %v4536_v36, %v4537_v32  ;;  %v4374_v22 = vld [vmem:[%s18695_s22 + $0x11c] sm:$0xf]  ;;  %v19877_v41 = vsel %vm19448_vm9, %v4571_v61, %v4572_v24  ;;  %v19880_v13 = vld [vmem:[%s18695_s22 + $0x188] sm:$0x8]  ;;  %v4593_v51 = vrot.slane %v19896_v4, 7 }
 0x10b   : > { %v14937_v7 = vcombine.low %v4535_v14, %v4538_v60  ;;  %v4562_v48 = vrot.slane %v4374_v22, 7  ;;  %v4552_v47 = vsel %vm19448_vm9, %v4550_v20, %v4551_v2  ;;  %v4559_v14 = vsel %vm19448_vm9, %v4557_v26, %v4558_v28  ;;  %v3413_v60 = vld [vmem:[%s18695_s22 + $0x1b4] sm:$0xf]  ;;  %v19844_v2 = vld [vmem:[%s22984_s2 + $0x80] sm:$0xff]   ;;  %v19847_v22 = vld [vmem:[%s18695_s22 + $0x170] sm:$0xf] }
 0x10c   : > { %v14939_v32 = vcombine.low %v4549_v15, %v4552_v47  ;;  %v4583_v11 = vrot.slane %v19847_v22, 7  ;;  %v19885_v15 = vld [vmem:[%s18695_s22 + $0x1ec] sm:$0xf]  ;;  %v19889_v47 = vsel %vm19448_vm9, %v14877_v0, %v4576_v45  ;;  %v19899_v27 = vld [vmem:[%s18695_s22 + $0x208] sm:$0xf]  ;;  %v14878_v26 = vrot.slane %v19860_v17, 11 }
 0x10d   : > { %v4564_v31 = vrot.slane %v4562_v48, 4  ;;  %v4563_v12 = vsel %vm19448_vm9, %v14875_v29, %v4562_v48  ;;  %v4586_v28 = vrot.slane %v19863_v1, 7  ;;  %v18608_v29 = vmov 0.0   ;;  %v3417_v40 = vld [vmem:[%s18695_s22 + $0x224] sm:$0xf] }
 0x10e   : > { %439 = vst.msk [vmem:[#allocation2 + $0x10] sm:$0xff] %vm436_vm10, %v18608_v29  ;;  %437 = vst.msk [vmem:[#allocation2] sm:$0xff] %vm436_vm10, %v18608_v29  ;;  %v4391_v54 = vld [vmem:[%s18695_s22 + $0x1c0] sm:$0x8] }
 0x10f   : > { %v4566_v55 = vsel %vm19448_vm9, %v4564_v31, %v4565_v62  ;;  %v19905_v31 = vpop.f32.mrb[0].mxu0  ;;  %438 = vst.msk [vmem:[#allocation2 + $0x8] sm:$0xff] %vm436_vm10, %v18608_v29  ;;  %440 = vst.msk [vmem:[#allocation2 + $0x18] sm:$0xff] %vm436_vm10, %v18608_v29  ;;  %v4395_v4 = vld [vmem:[%s18695_s22 + $0x1e0] sm:$0xf] }
 0x110   : > { %16779 = vmatmul.mubr.msk.bf16.gmra.mrb[88].mxu0 %vm873_vm6, %v19755_v30  ;;  %v14941_v8 = vcombine.low %v4563_v12, %v4566_v55  ;;  %441 = vst.msk [vmem:[#allocation2 + $0x20] sm:$0xff] %vm436_vm10, %v18608_v29  ;;  %442 = vst.msk [vmem:[#allocation2 + $0x28] sm:$0xff] %vm436_vm10, %v18608_v29  ;;  %v956_v12 = vpop.f32.mrb[1].mxu0 }
 0x111   : > { %16635 = vmatmul.mubr.msk.bf16.gmra.mrb[24].mxu1 %vm873_vm6, %v14756_v50  ;;  %16782 = vmatprep.mubr.msk.bf16.mxu0 %vm873_vm6, %v19758_v35  ;;  %v18555_v50 = vld [vmem:[%s18695_s22 + $0x178] sm:$0xf]  ;;  %443 = vst.msk [vmem:[#allocation2 + $0x30] sm:$0xff] %vm436_vm10, %v18608_v29  ;;  %444 = vst.msk [vmem:[#allocation2 + $0x38] sm:$0xff] %vm436_vm10, %v18608_v29 }
 0x112   : > { %16638 = vmatprep.mubr.msk.bf16.mxu1 %vm873_vm6, %v14757_v38  ;;  %v14782_v36 = vcombine.low %v18555_v50, %v3411_v43  ;;  %v4376_v38 = vld [vmem:[%s18695_s22 + $0x134] sm:$0x8]  ;;  %445 = vst.msk [vmem:[#allocation2 + $0x40] sm:$0xff] %vm436_vm10, %v18608_v29  ;;  %446 = vst.msk [vmem:[#allocation2 + $0x48] sm:$0xff] %vm436_vm10, %v18608_v29  ;;  %v14879_v50 = vrot.slane %v19880_v13, 11 }
 0x113   : > { %v14876_v56 = vrot.slane %v4376_v38, 11  ;;  %447 = vst.msk [vmem:[#allocation2 + $0x50] sm:$0xff] %vm436_vm10, %v18608_v29  ;;  %448 = vst.msk [vmem:[#allocation2 + $0x58] sm:$0xff] %vm436_vm10, %v18608_v29 }
 0x114   : > { %449 = vst.msk [vmem:[#allocation2 + $0x60] sm:$0xff] %vm436_vm10, %v18608_v29  ;;  %450 = vst.msk [vmem:[#allocation2 + $0x68] sm:$0xff] %vm436_vm10, %v18608_v29 }
 0x115   : > { %v19873_v48 = vsel %vm19448_vm9, %v14876_v56, %v4569_v19  ;;  %451 = vst.msk [vmem:[#allocation2 + $0x70] sm:$0xff] %vm436_vm10, %v18608_v29  ;;  %452 = vst.msk [vmem:[#allocation2 + $0x78] sm:$0xff] %vm436_vm10, %v18608_v29  ;;  %v4585_v19 = vrot.slane %v4583_v11, 4  ;;  %v779_v24 = vld [vmem:[#allocation2 + $0x10] sm:$0xff]  ;;  %v777_v0 = vld [vmem:[#allocation2] sm:$0xff] }
 0x116   : > { %453 = vst.msk [vmem:[#allocation2 + $0x80] sm:$0xff] %vm436_vm10, %v18608_v29  ;;  %454 = vst.msk [vmem:[#allocation2 + $0x88] sm:$0xff] %vm436_vm10, %v18608_v29  ;;  %v14942_v62 = vcombine.low %v19873_v48, %v19877_v41 }
 0x117   : > { %455 = vst.msk [vmem:[#allocation2 + $0x90] sm:$0xff] %vm436_vm10, %v18608_v29  ;;  %456 = vst.msk [vmem:[#allocation2 + $0x98] sm:$0xff] %vm436_vm10, %v18608_v29 }
 0x118   : > { %16783 = vmatmul.mubr.msk.bf16.gmra.mrb[92].mxu0 %vm873_vm6, %v19783_v52  ;;  %457 = vst.msk [vmem:[#allocation2 + $0xa0] sm:$0xff] %vm436_vm10, %v18608_v29  ;;  %458 = vst.msk [vmem:[#allocation2 + $0xa8] sm:$0xff] %vm436_vm10, %v18608_v29  ;;  %v783_v13 = vld [vmem:[#allocation2 + $0x30] sm:$0xff] }
 0x119   : > { %16639 = vmatmul.mubr.msk.bf16.gmra.mrb[28].mxu1 %vm873_vm6, %v14758_v58  ;;  %16790 = vmatprep.mubr.msk.bf16.mxu0 %vm873_vm6, %v14937_v7  ;;  %v14940_v58 = vcombine.low %v4556_v18, %v4559_v14  ;;  %v4578_v7 = vrot.slane %v4576_v45, 4  ;;  %459 = vst.msk [vmem:[#allocation2 + $0xb0] sm:$0xff] %vm436_vm10, %v18608_v29  ;;  %460 = vst.msk [vmem:[#allocation2 + $0xb8] sm:$0xff] %vm436_vm10, %v18608_v29  ;;  %v4388_v45 = vld [vmem:[%s18695_s22 + $0x1a4] sm:$0x8]  ;;  %v4584_v18 = vsel %vm19448_vm9, %v14878_v26, %v4583_v11 }
 0x11a   : > { %16646 = vmatprep.mubr.msk.bf16.mxu1 %vm873_vm6, %v14781_v10  ;;  %v18557_v10 = vld [vmem:[%s18695_s22 + $0x1b0] sm:$0xf]  ;;  %461 = vst.msk [vmem:[#allocation2 + $0xc0] sm:$0xff] %vm436_vm10, %v18608_v29  ;;  %462 = vst.msk [vmem:[#allocation2 + $0xc8] sm:$0xff] %vm436_vm10, %v18608_v29  ;;  %v4587_v14 = vsel %vm19448_vm9, %v4585_v19, %v4586_v28  ;;  %v14880_v11 = vrot.slane %v4388_v45, 11 }
 0x11b   : > { %v14784_v20 = vcombine.low %v18557_v10, %v3413_v60  ;;  %463 = vst.msk [vmem:[#allocation2 + $0xd0] sm:$0xff] %vm436_vm10, %v18608_v29  ;;  %464 = vst.msk [vmem:[#allocation2 + $0xd8] sm:$0xff] %vm436_vm10, %v18608_v29  ;;  %v3418_v10 = vld [vmem:[%s18695_s22 + $0x240] sm:$0xf]  ;;  %v14944_v1 = vcombine.low %v4584_v18, %v4587_v14  ;;  %v18562_v26 = vld [vmem:[%s18695_s22 + $0x23c] sm:$0xf] }
 0x11c   : > { %465 = vst.msk [vmem:[#allocation2 + $0xe0] sm:$0xff] %vm436_vm10, %v18608_v29  ;;  %466 = vst.msk [vmem:[#allocation2 + $0xe8] sm:$0xff] %vm436_vm10, %v18608_v29  ;;  %v20221_v28 = vcombine.low %v18562_v26, %v3418_v10  ;;  %v4394_v19 = vld [vmem:[%s18695_s22 + $0x1dc] sm:$0x8]  ;;  %v3420_v18 = vld [vmem:[%s18695_s22 + $0x278] sm:$0xf] }
 0x11d   : > { %467 = vst.msk [vmem:[#allocation2 + $0xf0] sm:$0xff] %vm436_vm10, %v18608_v29  ;;  %468 = vst.msk [vmem:[#allocation2 + $0xf8] sm:$0xff] %vm436_vm10, %v18608_v29 }
 0x11e   : > { %469 = vst.msk [vmem:[#allocation2 + $0x100] sm:$0xff] %vm436_vm10, %v18608_v29  ;;  %470 = vst.msk [vmem:[#allocation2 + $0x108] sm:$0xff] %vm436_vm10, %v18608_v29 }
 0x11f   : > { %471 = vst.msk [vmem:[#allocation2 + $0x110] sm:$0xff] %vm436_vm10, %v18608_v29  ;;  %472 = vst.msk [vmem:[#allocation2 + $0x118] sm:$0xff] %vm436_vm10, %v18608_v29 }
 0x120   : > { %16791 = vmatmul.mubr.msk.bf16.vlgmr.msra.gmra.mrb[64].mxu0 %vm873_vm6, %v14938_v23  ;;  %473 = vst.msk [vmem:[#allocation2 + $0x120] sm:$0xff] %vm436_vm10, %v18608_v29  ;;  %474 = vst.msk [vmem:[#allocation2 + $0x128] sm:$0xff] %vm436_vm10, %v18608_v29 }
 0x121   : > { %16647 = vmatmul.mubr.msk.bf16.vlgmr.msra.gmra.mrb[0].mxu1 %vm873_vm6, %v14782_v36  ;;  %16794 = vmatprep.mubr.msk.bf16.mxu0 %vm873_vm6, %v14939_v32  ;;  %475 = vst.msk [vmem:[#allocation2 + $0x130] sm:$0xff] %vm436_vm10, %v18608_v29  ;;  %476 = vst.msk [vmem:[#allocation2 + $0x138] sm:$0xff] %vm436_vm10, %v18608_v29  ;;  %v20167_v36 = vld [vmem:[%s18695_s22 + $0x1a8] sm:$0xf] }
 0x122   : > { %16679 = vmatpush3.bf16.msra.mxu1 %v19551_v39  ;;  %16650 = vmatprep.mubr.msk.bf16.mxu1 %vm873_vm6, %v14783_v42  ;;  %v4579_v39 = vrot.slane %v4381_v37, 7  ;;  %477 = vst.msk [vmem:[#allocation2 + $0x140] sm:$0xff] %vm436_vm10, %v18608_v29  ;;  %478 = vst.msk [vmem:[#allocation2 + $0x148] sm:$0xff] %vm436_vm10, %v18608_v29  ;;  %v18559_v32 = vld [vmem:[%s18695_s22 + $0x1e8] sm:$0xf]  ;;  %v4597_v60 = vrot.slane %v20167_v36, 7 }
 0x123   : > { %16680 = vmatprep.subr.bf16.mxu1 %v18454_v57  ;;  %16823 = vmatpush3.bf16.msra.mxu0 %v19563_v44  ;;  %v19856_v44 = vld [vmem:[%s18695_s22 + $0x18c] sm:$0xf]  ;;  %479 = vst.msk [vmem:[#allocation2 + $0x150] sm:$0xff] %vm436_vm10, %v18608_v29  ;;  %480 = vst.msk [vmem:[#allocation2 + $0x158] sm:$0xff] %vm436_vm10, %v18608_v29  ;;  %v14786_v38 = vcombine.low %v18559_v32, %v19885_v15  ;;  %v18560_v42 = vld [vmem:[%s18695_s22 + $0x204] sm:$0xf] }
 0x124   : > { %16824 = vmatprep.subr.bf16.mxu0 %v18463_v46  ;;  %v4590_v43 = vrot.slane %v19856_v44, 7  ;;  %v19893_v23 = vsel %vm19448_vm9, %v4578_v7, %v4579_v39  ;;  %481 = vst.msk [vmem:[#allocation2 + $0x160] sm:$0xff] %vm436_vm10, %v18608_v29  ;;  %482 = vst.msk [vmem:[#allocation2 + $0x168] sm:$0xff] %vm436_vm10, %v18608_v29  ;;  %v20178_v33 = vcombine.low %v18560_v42, %v19899_v27  ;;  %v20182_v37 = vld [vmem:[%s18695_s22 + $0x1c4] sm:$0xf]  ;;  %v780_v39 = vld [vmem:[#allocation2 + $0x18] sm:$0xff] }
 0x125   : > { %483 = vst.msk [vmem:[#allocation2 + $0x170] sm:$0xff] %vm436_vm10, %v18608_v29  ;;  %484 = vst.msk [vmem:[#allocation2 + $0x178] sm:$0xff] %vm436_vm10, %v18608_v29  ;;  %v14943_v25 = vcombine.low %v19889_v47, %v19893_v23  ;;  %v4604_v61 = vrot.slane %v20182_v37, 7  ;;  %v18561_v7 = vld [vmem:[%s18695_s22 + $0x220] sm:$0xf]  ;;  %v1083_v44 = vadd.f32 %v956_v12, %v777_v0  ;;  %v4599_v47 = vrot.slane %v4597_v60, 4 }
 0x126   : > { %16681 = vmatpush3.bf16.msra.mxu1 %v18454_v57  ;;  %485 = vst.msk [vmem:[#allocation2 + $0x180] sm:$0xff] %vm436_vm10, %v18608_v29  ;;  %486 = vst.msk [vmem:[#allocation2 + $0x188] sm:$0xff] %vm436_vm10, %v18608_v29  ;;  %v4592_v57 = vrot.slane %v4590_v43, 4  ;;  %v4591_v55 = vsel %vm19448_vm9, %v14879_v50, %v4590_v43  ;;  %v20211_v22 = vcombine.low %v18561_v7, %v3417_v40  ;;  %v14881_v23 = vrot.slane %v4391_v54, 11  ;;  %v4396_v37 = vld [vmem:[%s18695_s22 + $0x1e4] sm:$0x7] }
 0x127   : > { %16825 = vmatpush3.bf16.msra.mxu0 %v18463_v46  ;;  %16714 = vmatprep.subr.bf16.mxu1 %v19844_v2  ;;  %487 = vst.msk [vmem:[#allocation2 + $0x190] sm:$0xff] %vm436_vm10, %v18608_v29  ;;  %488 = vst.msk [vmem:[#allocation2 + $0x198] sm:$0xff] %vm436_vm10, %v18608_v29  ;;  %v4390_v46 = vld [vmem:[%s18695_s22 + $0x1ac] sm:$0x7]  ;;  %v4598_v50 = vsel %vm19448_vm9, %v14880_v11, %v4597_v60  ;;  %v4611_v32 = vrot.slane %v4395_v4, 7  ;;  %v787_v54 = vld [vmem:[#allocation2 + $0x50] sm:$0xff] }
 0x128   : > { %16795 = vmatmul.mubr.msk.bf16.gmra.mrb[68].mxu0 %vm873_vm6, %v14940_v58  ;;  %16858 = vmatprep.subr.bf16.mxu0 %v19852_v34  ;;  %489 = vst.msk [vmem:[#allocation2 + $0x1a0] sm:$0xff] %vm436_vm10, %v18608_v29  ;;  %490 = vst.msk [vmem:[#allocation2 + $0x1a8] sm:$0xff] %vm436_vm10, %v18608_v29  ;;  %v4594_v56 = vsel %vm19448_vm9, %v4592_v57, %v4593_v51  ;;  %v16397_v58 = vpop.f32.mrb[2].mxu0  ;;  %v4600_v48 = vrot.slane %v4390_v46, 7  ;;  %v784_v57 = vld [vmem:[#allocation2 + $0x38] sm:$0xff]  ;;  %v782_v51 = vld [vmem:[#allocation2 + $0x28] sm:$0xff]  ;;  %v4605_v42 = vsel %vm19448_vm9, %v14881_v23, %v4604_v61 }
 0x129   : > { %16651 = vmatmul.mubr.msk.bf16.gmra.mrb[4].mxu1 %vm873_vm6, %v14784_v20  ;;  %16798 = vmatprep.mubr.msk.bf16.mxu0 %vm873_vm6, %v14941_v8  ;;  %491 = vst.msk [vmem:[#allocation2 + $0x1b0] sm:$0xff] %vm436_vm10, %v18608_v29  ;;  %492 = vst.msk [vmem:[#allocation2 + $0x1b8] sm:$0xff] %vm436_vm10, %v18608_v29  ;;  %v4393_v20 = vld [vmem:[%s18695_s22 + $0x1c8] sm:$0x7]  ;;  %v1085_v8 = vadd.f32 %v19905_v31, %v779_v24  ;;  %v1086_v9 = vadd.f32 %v16397_v58, %v780_v39  ;;  %v959_v17 = vpop.f32.mrb[3].mxu0  ;;  %v14882_v24 = vrot.slane %v4394_v19, 11 }
 0x12a   : > { %16654 = vmatprep.mubr.msk.bf16.mxu1 %vm873_vm6, %v14785_v3  ;;  %493 = vst.msk [vmem:[#allocation2 + $0x1c0] sm:$0xff] %vm436_vm10, %v18608_v29  ;;  %494 = vst.msk [vmem:[#allocation2 + $0x1c8] sm:$0xff] %vm436_vm10, %v18608_v29  ;;  %v778_v3 = vld [vmem:[#allocation2 + $0x8] sm:$0xff]  ;;  %v16400_v43 = vpop.f32.mrb[4].mxu0  ;;  %v14945_v15 = vcombine.low %v4591_v55, %v4594_v56  ;;  %v4607_v31 = vrot.slane %v4393_v20, 7  ;;  %v4601_v36 = vsel %vm19448_vm9, %v4599_v47, %v4600_v48  ;;  %v4613_v58 = vrot.slane %v4611_v32, 4 }
 0x12b   : > { %495 = vst.msk [vmem:[#allocation2 + $0x1d0] sm:$0xff] %vm436_vm10, %v18608_v29  ;;  %496 = vst.msk [vmem:[#allocation2 + $0x1d8] sm:$0xff] %vm436_vm10, %v18608_v29  ;;  %v1084_v41 = vadd.f32 %v959_v17, %v778_v3  ;;  %v1089_v27 = vadd.f32 %v16400_v43, %v783_v13  ;;  %v18563_v12 = vld [vmem:[%s18695_s22 + $0x258] sm:$0xf]  ;;  %v14946_v56 = vcombine.low %v4598_v50, %v4601_v36  ;;  %v4614_v7 = vrot.slane %v4396_v37, 7  ;;  %v785_v3 = vld [vmem:[#allocation2 + $0x40] sm:$0xff] }
 0x12c   : > { %497 = vst.msk [vmem:[#allocation2 + $0x1e0] sm:$0xff] %vm436_vm10, %v18608_v29  ;;  %498 = vst.msk [vmem:[#allocation2 + $0x1e8] sm:$0xff] %vm436_vm10, %v18608_v29  ;;  %v18564_v20 = vld [vmem:[%s18695_s22 + $0x274] sm:$0xf]  ;;  %v786_v11 = vld [vmem:[#allocation2 + $0x48] sm:$0xff] }
 0x12d   : > { %499 = vst.msk [vmem:[#allocation2 + $0x1f0] sm:$0xff] %vm436_vm10, %v18608_v29  ;;  %500 = vst.msk [vmem:[#allocation2 + $0x1f8] sm:$0xff] %vm436_vm10, %v18608_v29  ;;  %v3421_v48 = vld [vmem:[%s18695_s22 + $0x294] sm:$0xf]  ;;  %v18566_v19 = vld [vmem:[%s18695_s22 + $0x2ac] sm:$0xf] }
 0x12e   : > { %501 = vst.msk [vmem:[#allocation2 + $0x200] sm:$0xff] %vm436_vm10, %v18608_v29  ;;  %502 = vst.msk [vmem:[#allocation2 + $0x208] sm:$0xff] %vm436_vm10, %v18608_v29  ;;  %v791_v43 = vld [vmem:[#allocation2 + $0x70] sm:$0xff]  ;;  %v789_v36 = vld [vmem:[#allocation2 + $0x60] sm:$0xff] }
 0x12f   : > { %503 = vst.msk [vmem:[#allocation2 + $0x210] sm:$0xff] %vm436_vm10, %v18608_v29  ;;  %504 = vst.msk [vmem:[#allocation2 + $0x218] sm:$0xff] %vm436_vm10, %v18608_v29  ;;  %v3424_v37 = vld [vmem:[%s18695_s22 + $0x2e8] sm:$0xf] }
 0x130   : > { %505 = vst.msk [vmem:[#allocation2 + $0x220] sm:$0xff] %vm436_vm10, %v18608_v29  ;;  %506 = vst.msk [vmem:[#allocation2 + $0x228] sm:$0xff] %vm436_vm10, %v18608_v29  ;;  %16799 = vmatmul.mubr.msk.bf16.gmra.mrb[72].mxu0 %vm873_vm6, %v14942_v62  ;;  %v3419_v62 = vld [vmem:[%s18695_s22 + $0x25c] sm:$0xf] }
 0x131   : > { %507 = vst.msk [vmem:[#allocation2 + $0x230] sm:$0xff] %vm436_vm10, %v18608_v29  ;;  %508 = vst.msk [vmem:[#allocation2 + $0x238] sm:$0xff] %vm436_vm10, %v18608_v29  ;;  %16655 = vmatmul.mubr.msk.bf16.gmra.mrb[8].mxu1 %vm873_vm6, %v14786_v38  ;;  %16802 = vmatprep.mubr.msk.bf16.mxu0 %vm873_vm6, %v14943_v25  ;;  %v781_v38 = vld [vmem:[#allocation2 + $0x20] sm:$0xff]  ;;  %v972_v25 = vpop.f32.mrb[5].mxu0  ;;  %v20244_v55 = vcombine.low %v18563_v12, %v3419_v62 }
 0x132   : > { %509 = vst.msk [vmem:[#allocation2 + $0x240] sm:$0xff] %vm436_vm10, %v18608_v29  ;;  %510 = vst.msk [vmem:[#allocation2 + $0x248] sm:$0xff] %vm436_vm10, %v18608_v29  ;;  %16658 = vmatprep.mubr.msk.bf16.mxu1 %vm873_vm6, %v20178_v33  ;;  %v1087_v45 = vadd.f32 %v972_v25, %v781_v38  ;;  %v16401_v46 = vpop.f32.mrb[6].mxu0  ;;  %v792_v38 = vld [vmem:[#allocation2 + $0x78] sm:$0xff]  ;;  %v790_v25 = vld [vmem:[#allocation2 + $0x68] sm:$0xff] }
 0x133   : > { %511 = vst.msk [vmem:[#allocation2 + $0x250] sm:$0xff] %vm436_vm10, %v18608_v29  ;;  %512 = vst.msk [vmem:[#allocation2 + $0x258] sm:$0xff] %vm436_vm10, %v18608_v29  ;;  %v1090_v14 = vadd.f32 %v16401_v46, %v784_v57  ;;  %v975_v60 = vpop.f32.mrb[7].mxu0  ;;  %v3423_v57 = vld [vmem:[%s18695_s22 + $0x2cc] sm:$0xf] }
 0x134   : > { %513 = vst.msk [vmem:[#allocation2 + $0x260] sm:$0xff] %vm436_vm10, %v18608_v29  ;;  %514 = vst.msk [vmem:[#allocation2 + $0x268] sm:$0xff] %vm436_vm10, %v18608_v29  ;;  %v1088_v0 = vadd.f32 %v975_v60, %v782_v51  ;;  %v18568_v12 = vld [vmem:[%s18695_s22 + $0x2e4] sm:$0xf] }
 0x135   : > { %515 = vst.msk [vmem:[#allocation2 + $0x270] sm:$0xff] %vm436_vm10, %v18608_v29  ;;  %516 = vst.msk [vmem:[#allocation2 + $0x278] sm:$0xff] %vm436_vm10, %v18608_v29 }
 0x136   : > { %517 = vst.msk [vmem:[#allocation2 + $0x280] sm:$0xff] %vm436_vm10, %v18608_v29  ;;  %518 = vst.msk [vmem:[#allocation2 + $0x288] sm:$0xff] %vm436_vm10, %v18608_v29 }
 0x137   : > { %519 = vst.msk [vmem:[#allocation2 + $0x290] sm:$0xff] %vm436_vm10, %v18608_v29  ;;  %520 = vst.msk [vmem:[#allocation2 + $0x298] sm:$0xff] %vm436_vm10, %v18608_v29 }
 0x138   : > { %521 = vst.msk [vmem:[#allocation2 + $0x2a0] sm:$0xff] %vm436_vm10, %v18608_v29  ;;  %522 = vst.msk [vmem:[#allocation2 + $0x2a8] sm:$0xff] %vm436_vm10, %v18608_v29  ;;  %16803 = vmatmul.mubr.msk.bf16.gmra.mrb[76].mxu0 %vm873_vm6, %v14944_v1  ;;  %v788_v1 = vld [vmem:[#allocation2 + $0x58] sm:$0xff] }
 0x139   : > { %523 = vst.msk [vmem:[#allocation2 + $0x2b0] sm:$0xff] %vm436_vm10, %v18608_v29  ;;  %524 = vst.msk [vmem:[#allocation2 + $0x2b8] sm:$0xff] %vm436_vm10, %v18608_v29  ;;  %16659 = vmatmul.mubr.msk.bf16.gmra.mrb[12].mxu1 %vm873_vm6, %v20211_v22  ;;  %16806 = vmatprep.mubr.msk.bf16.mxu0 %vm873_vm6, %v14945_v15  ;;  %v3422_v15 = vld [vmem:[%s18695_s22 + $0x2b0] sm:$0xf] }
 0x13a   : > { %525 = vst.msk [vmem:[#allocation2 + $0x2c0] sm:$0xff] %vm436_vm10, %v18608_v29  ;;  %526 = vst.msk [vmem:[#allocation2 + $0x2c8] sm:$0xff] %vm436_vm10, %v18608_v29  ;;  %16662 = vmatprep.mubr.msk.bf16.mxu1 %vm873_vm6, %v20221_v28  ;;  %v20271_v50 = vcombine.low %v18566_v19, %v3422_v15  ;;  %v4445_v15 = vld [vmem:[%s18695_s22 + $0x3b8] sm:$0x8] }
 0x13b   : > { %527 = vst.msk [vmem:[#allocation2 + $0x2d0] sm:$0xff] %vm436_vm10, %v18608_v29  ;;  %528 = vst.msk [vmem:[#allocation2 + $0x2d8] sm:$0xff] %vm436_vm10, %v18608_v29  ;;  %v20323_v19 = vld [vmem:[%s18695_s22 + $0x3d8] sm:$0xf] }
 0x13c   : > { %529 = vst.msk [vmem:[#allocation2 + $0x2e0] sm:$0xff] %vm436_vm10, %v18608_v29  ;;  %530 = vst.msk [vmem:[#allocation2 + $0x2e8] sm:$0xff] %vm436_vm10, %v18608_v29 }
 0x13d   : > { %531 = vst.msk [vmem:[#allocation2 + $0x2f0] sm:$0xff] %vm436_vm10, %v18608_v29  ;;  %532 = vst.msk [vmem:[#allocation2 + $0x2f8] sm:$0xff] %vm436_vm10, %v18608_v29 }
 0x13e   : > { %533 = vst.msk [vmem:[#allocation2 + $0x300] sm:$0xff] %vm436_vm10, %v18608_v29  ;;  %534 = vst.msk [vmem:[#allocation2 + $0x308] sm:$0xff] %vm436_vm10, %v18608_v29 }
 0x13f   : > { %535 = vst.msk [vmem:[#allocation2 + $0x310] sm:$0xff] %vm436_vm10, %v18608_v29  ;;  %536 = vst.msk [vmem:[#allocation2 + $0x318] sm:$0xff] %vm436_vm10, %v18608_v29 }
 0x140   : > { %537 = vst.msk [vmem:[#allocation2 + $0x320] sm:$0xff] %vm436_vm10, %v18608_v29  ;;  %538 = vst.msk [vmem:[#allocation2 + $0x328] sm:$0xff] %vm436_vm10, %v18608_v29  ;;  %16807 = vmatmul.mubr.msk.bf16.gmra.mrb[80].mxu0 %vm873_vm6, %v14946_v56  ;;  %v20290_v56 = vcombine.low %v18568_v12, %v3424_v37  ;;  %v4450_v37 = vld [vmem:[%s18695_s22 + $0x3dc] sm:$0x7] }
 0x141   : > { %539 = vst.msk [vmem:[#allocation2 + $0x330] sm:$0xff] %vm436_vm10, %v18608_v29  ;;  %540 = vst.msk [vmem:[#allocation2 + $0x338] sm:$0xff] %vm436_vm10, %v18608_v29  ;;  %16663 = vmatmul.mubr.msk.bf16.gmra.mrb[16].mxu1 %vm873_vm6, %v20244_v55 }
 0x142   : > { %541 = vst.msk [vmem:[#allocation2 + $0x340] sm:$0xff] %vm436_vm10, %v18608_v29  ;;  %542 = vst.msk [vmem:[#allocation2 + $0x348] sm:$0xff] %vm436_vm10, %v18608_v29 }
 0x143   : > { %543 = vst.msk [vmem:[#allocation2 + $0x350] sm:$0xff] %vm436_vm10, %v18608_v29  ;;  %544 = vst.msk [vmem:[#allocation2 + $0x358] sm:$0xff] %vm436_vm10, %v18608_v29 }
 0x144   : > { %545 = vst.msk [vmem:[#allocation2 + $0x360] sm:$0xff] %vm436_vm10, %v18608_v29  ;;  %546 = vst.msk [vmem:[#allocation2 + $0x368] sm:$0xff] %vm436_vm10, %v18608_v29 }
 0x145   : > { %547 = vst.msk [vmem:[#allocation2 + $0x370] sm:$0xff] %vm436_vm10, %v18608_v29  ;;  %548 = vst.msk [vmem:[#allocation2 + $0x378] sm:$0xff] %vm436_vm10, %v18608_v29 }
 0x146   : > { %549 = vst.msk [vmem:[#allocation2 + $0x380] sm:$0xff] %vm436_vm10, %v18608_v29  ;;  %550 = vst.msk [vmem:[#allocation2 + $0x388] sm:$0xff] %vm436_vm10, %v18608_v29 }
 0x147   : > { %551 = vst.msk [vmem:[#allocation2 + $0x390] sm:$0xff] %vm436_vm10, %v18608_v29  ;;  %552 = vst.msk [vmem:[#allocation2 + $0x398] sm:$0xff] %vm436_vm10, %v18608_v29 }
 0x148   : > { %553 = vst.msk [vmem:[#allocation2 + $0x3a0] sm:$0xff] %vm436_vm10, %v18608_v29  ;;  %554 = vst.msk [vmem:[#allocation2 + $0x3a8] sm:$0xff] %vm436_vm10, %v18608_v29 }
 0x149   : > { %555 = vst.msk [vmem:[#allocation2 + $0x3b0] sm:$0xff] %vm436_vm10, %v18608_v29  ;;  %556 = vst.msk [vmem:[#allocation2 + $0x3b8] sm:$0xff] %vm436_vm10, %v18608_v29 }
 0x14a   : > { %557 = vst.msk [vmem:[#allocation2 + $0x3c0] sm:$0xff] %vm436_vm10, %v18608_v29  ;;  %558 = vst.msk [vmem:[#allocation2 + $0x3c8] sm:$0xff] %vm436_vm10, %v18608_v29 }
 0x14b   : > { %559 = vst.msk [vmem:[#allocation2 + $0x3d0] sm:$0xff] %vm436_vm10, %v18608_v29  ;;  %560 = vst.msk [vmem:[#allocation2 + $0x3d8] sm:$0xff] %vm436_vm10, %v18608_v29 }
 0x14c   : > { %561 = vst.msk [vmem:[#allocation2 + $0x3e0] sm:$0xff] %vm436_vm10, %v18608_v29  ;;  %562 = vst.msk [vmem:[#allocation2 + $0x3e8] sm:$0xff] %vm436_vm10, %v18608_v29 }
 0x14d   : > { %563 = vst.msk [vmem:[#allocation2 + $0x3f0] sm:$0xff] %vm436_vm10, %v18608_v29  ;;  %564 = vst.msk [vmem:[#allocation2 + $0x3f8] sm:$0xff] %vm436_vm10, %v18608_v29  ;;  %v4606_v29 = vrot.slane %v4604_v61, 4  ;;  %v16404_v61 = vpop.f32.mrb[8].mxu0 }
 0x14e   : > { %1118 = vst.msk [vmem:[#allocation2 + $0x10] sm:$0xff] %vm436_vm10, %v1085_v8  ;;  %1116 = vst.msk [vmem:[#allocation2] sm:$0xff] %vm436_vm10, %v1083_v44  ;;  %v1093_v10 = vadd.f32 %v16404_v61, %v787_v54  ;;  %v20249_v8 = vcombine.low %v18564_v20, %v3420_v18  ;;  %v4612_v44 = vsel %vm19448_vm9, %v14882_v24, %v4611_v32  ;;  %v988_v17 = vpop.f32.mrb[9].mxu0  ;;  %v793_v24 = vld [vmem:[#allocation2 + $0x80] sm:$0xff]  ;;  %v796_v61 = vld [vmem:[#allocation2 + $0x98] sm:$0xff] }
 0x14f   : > { %1119 = vst.msk [vmem:[#allocation2 + $0x18] sm:$0xff] %vm436_vm10, %v1086_v9  ;;  %1117 = vst.msk [vmem:[#allocation2 + $0x8] sm:$0xff] %vm436_vm10, %v1084_v41  ;;  %v4608_v40 = vsel %vm19448_vm9, %v4606_v29, %v4607_v31  ;;  %v4615_v9 = vsel %vm19448_vm9, %v4613_v58, %v4614_v7  ;;  %v1091_v41 = vadd.f32 %v988_v17, %v785_v3  ;;  %v16405_v13 = vpop.f32.mrb[10].mxu0  ;;  %v18565_v29 = vld [vmem:[%s18695_s22 + $0x290] sm:$0xf] }
 0x150   : > { %1122 = vst.msk [vmem:[#allocation2 + $0x30] sm:$0xff] %vm436_vm10, %v1089_v27  ;;  %1120 = vst.msk [vmem:[#allocation2 + $0x20] sm:$0xff] %vm436_vm10, %v1087_v45  ;;  %v14947_v39 = vcombine.low %v4605_v42, %v4608_v40  ;;  %16666 = vmatprep.mubr.msk.bf16.mxu1 %vm873_vm6, %v20249_v8  ;;  %v1094_v47 = vadd.f32 %v16405_v13, %v788_v1  ;;  %v991_v23 = vpop.f32.mrb[11].mxu0  ;;  %v14948_v4 = vcombine.low %v4612_v44, %v4615_v9  ;;  %v795_v40 = vld [vmem:[#allocation2 + $0x90] sm:$0xff]  ;;  %v3425_v58 = vld [vmem:[%s18695_s22 + $0x304] sm:$0xf] }
 0x151   : > { %1123 = vst.msk [vmem:[#allocation2 + $0x38] sm:$0xff] %vm436_vm10, %v1090_v14  ;;  %1121 = vst.msk [vmem:[#allocation2 + $0x28] sm:$0xff] %vm436_vm10, %v1088_v0  ;;  %v1092_v27 = vadd.f32 %v991_v23, %v786_v11  ;;  %v16408_v26 = vpop.f32.mrb[12].mxu0  ;;  %v20267_v31 = vcombine.low %v18565_v29, %v3421_v48  ;;  %v18567_v14 = vld [vmem:[%s18695_s22 + $0x2c8] sm:$0xf]  ;;  %v799_v20 = vld [vmem:[#allocation2 + $0xb0] sm:$0xff] }
 0x152   : > { %1126 = vst.msk [vmem:[#allocation2 + $0x50] sm:$0xff] %vm436_vm10, %v1093_v10  ;;  %16810 = vmatprep.mubr.msk.bf16.mxu0 %vm873_vm6, %v14947_v39  ;;  %1124 = vst.msk [vmem:[#allocation2 + $0x40] sm:$0xff] %vm436_vm10, %v1091_v41  ;;  %v1097_v62 = vadd.f32 %v16408_v26, %v791_v43  ;;  %v1004_v32 = vpop.f32.mrb[13].mxu0  ;;  %v20286_v60 = vcombine.low %v18567_v14, %v3423_v57  ;;  %v794_v39 = vld [vmem:[#allocation2 + $0x88] sm:$0xff]  ;;  %v4446_v11 = vld [vmem:[%s18695_s22 + $0x3bc] sm:$0xf] }
 0x153   : > { %1127 = vst.msk [vmem:[#allocation2 + $0x58] sm:$0xff] %vm436_vm10, %v1094_v47  ;;  %1125 = vst.msk [vmem:[#allocation2 + $0x48] sm:$0xff] %vm436_vm10, %v1092_v27  ;;  %16811 = vmatmul.mubr.msk.bf16.gmra.mrb[84].mxu0 %vm873_vm6, %v14948_v4  ;;  %16667 = vmatmul.mubr.msk.bf16.gmra.mrb[20].mxu1 %vm873_vm6, %v20267_v31  ;;  %v1095_v51 = vadd.f32 %v1004_v32, %v789_v36  ;;  %v16409_v42 = vpop.f32.mrb[14].mxu0  ;;  %v797_v48 = vld [vmem:[#allocation2 + $0xa0] sm:$0xff]  ;;  %v800_v13 = vld [vmem:[#allocation2 + $0xb8] sm:$0xff]  ;;  %v5325_v23 = vrot.slane %v4446_v11, 7 }
 0x154   : > { %1130 = vst.msk [vmem:[#allocation2 + $0x70] sm:$0xff] %vm436_vm10, %v1097_v62  ;;  %16814 = vmatprep.mubr.msk.bf16.mxu0 %vm873_vm6, %v19481_v53  ;;  %16670 = vmatprep.mubr.msk.bf16.mxu1 %vm873_vm6, %v20271_v50  ;;  %v1098_v45 = vadd.f32 %v16409_v42, %v792_v38  ;;  %v1007_v46 = vpop.f32.mrb[15].mxu0  ;;  %v798_v43 = vld [vmem:[#allocation2 + $0xa8] sm:$0xff]  ;;  %v4447_v47 = vld [vmem:[%s18695_s22 + $0x3c0] sm:$0x7]  ;;  %v803_v29 = vld [vmem:[#allocation2 + $0xd0] sm:$0xff] }
 0x155   : > { %1128 = vst.msk [vmem:[#allocation2 + $0x60] sm:$0xff] %vm436_vm10, %v1095_v51  ;;  %v1096_v18 = vadd.f32 %v1007_v46, %v790_v25  ;;  %v16412_v53 = vpop.f32.mrb[16].mxu0  ;;  %v14967_v36 = vrot.slane %v4445_v15, 11  ;;  %v5327_v32 = vrot.slane %v5325_v23, 4  ;;  %v5328_v38 = vrot.slane %v4447_v47, 7  ;;  %v18465_v57 = vld [vmem:[%s22984_s2 + $0x88] sm:$0xff]  }
 0x156   : > { %1131 = vst.msk [vmem:[#allocation2 + $0x78] sm:$0xff] %vm436_vm10, %v1098_v45  ;;  %v1101_v54 = vadd.f32 %v16412_v53, %v795_v40  ;;  %v1020_v0 = vpop.f32.mrb[17].mxu0  ;;  %v20328_v25 = vld [vmem:[%s18695_s22 + $0x3f4] sm:$0xf]  ;;  %v5332_v51 = vrot.slane %v20323_v19, 7  ;;  %v18473_v42 = vld [vmem:[%s22985_s3 + $0x18] sm:$0xff]  }
 0x157   : > { %1129 = vst.msk [vmem:[#allocation2 + $0x68] sm:$0xff] %vm436_vm10, %v1096_v18  ;;  %v1099_v7 = vadd.f32 %v1020_v0, %v793_v24  ;;  %v16413_v10 = vpop.f32.mrb[18].mxu0  ;;  %v4448_v40 = vld [vmem:[%s18695_s22 + $0x3d4] sm:$0x8]  ;;  %v4451_v45 = vld [vmem:[%s18695_s22 + $0x3f0] sm:$0x8]  ;;  %v5329_v46 = vsel %vm19448_vm9, %v5327_v32, %v5328_v38 }
 0x158   : > { %1134 = vst.msk [vmem:[#allocation2 + $0x90] sm:$0xff] %vm436_vm10, %v1101_v54  ;;  %v1023_v44 = vpop.f32.mrb[19].mxu0  ;;  %v5339_v18 = vrot.slane %v20328_v25, 7  ;;  %v804_v14 = vld [vmem:[#allocation2 + $0xd8] sm:$0xff]  ;;  %v807_v24 = vld [vmem:[#allocation2 + $0xf0] sm:$0xff]  ;;  %v14968_v0 = vrot.slane %v4448_v40, 11 }
 0x159   : > { %1132 = vst.msk [vmem:[#allocation2 + $0x80] sm:$0xff] %vm436_vm10, %v1099_v7  ;;  %v1100_v9 = vadd.f32 %v1023_v44, %v794_v39  ;;  %v16416_v3 = vpop.f32.mrb[20].mxu0  ;;  %v4453_v54 = vld [vmem:[%s18695_s22 + $0x3f8] sm:$0x7]  ;;  %v5334_v7 = vrot.slane %v5332_v51, 4  ;;  %v14969_v44 = vrot.slane %v4451_v45, 11 }
 0x15a   : > { %v1105_v1 = vadd.f32 %v16416_v3, %v799_v20  ;;  %v1036_v41 = vpop.f32.mrb[21].mxu0  ;;  %v5342_v3 = vrot.slane %v4453_v54, 7  ;;  %v4458_v11 = vld [vmem:[%s18695_s22 + $0x42c] sm:$0xf]  ;;  %v808_v15 = vld [vmem:[#allocation2 + $0xf8] sm:$0xff] }
 0x15b   : > { %16815 = vmatmul.mubr.msk.bf16.gmra.mrb[88].mxu0 %vm873_vm6, %v19525_v59  ;;  %16671 = vmatmul.mubr.msk.bf16.gmra.mrb[24].mxu1 %vm873_vm6, %v20286_v60  ;;  %v1102_v59 = vadd.f32 %v16413_v10, %v796_v61  ;;  %1133 = vst.msk [vmem:[#allocation2 + $0x88] sm:$0xff] %vm436_vm10, %v1100_v9  ;;  %v1103_v4 = vadd.f32 %v1036_v41, %v797_v48  ;;  %v20365_v61 = vld [vmem:[%s22985_s3 + $0x40] sm:$0xff]   ;;  %v5335_v10 = vrot.slane %v4450_v37, 7  ;;  %v5341_v9 = vrot.slane %v5339_v18, 4  ;;  %v806_v47 = vld [vmem:[#allocation2 + $0xe8] sm:$0xff] }
 0x15c   : > { %16818 = vmatprep.mubr.msk.bf16.mxu0 %vm873_vm6, %v19529_v21  ;;  %16674 = vmatprep.mubr.msk.bf16.mxu1 %vm873_vm6, %v20290_v56  ;;  %v18569_v21 = vld [vmem:[%s18695_s22 + $0x300] sm:$0xf]  ;;  %1138 = vst.msk [vmem:[#allocation2 + $0xb0] sm:$0xff] %vm436_vm10, %v1105_v1  ;;  %v5333_v48 = vsel %vm19448_vm9, %v14968_v0, %v5332_v51  ;;  %v4461_v37 = vld [vmem:[%s18695_s22 + $0x448] sm:$0xf] }
 0x15d   : > { %v20305_v17 = vcombine.low %v18569_v21, %v3425_v58  ;;  %1135 = vst.msk [vmem:[#allocation2 + $0x98] sm:$0xff] %vm436_vm10, %v1102_v59  ;;  %1136 = vst.msk [vmem:[#allocation2 + $0xa0] sm:$0xff] %vm436_vm10, %v1103_v4  ;;  %v4455_v21 = vld [vmem:[%s18695_s22 + $0x410] sm:$0xf]  ;;  %v5336_v41 = vsel %vm19448_vm9, %v5334_v7, %v5335_v10  ;;  %v4454_v4 = vld [vmem:[%s18695_s22 + $0x40c] sm:$0x8] }
 0x15e   : > { %v14970_v38 = vrot.slane %v4454_v4, 11  ;;  %v4464_v45 = vld [vmem:[%s18695_s22 + $0x464] sm:$0xf]  ;;  %v4463_v54 = vld [vmem:[%s18695_s22 + $0x460] sm:$0x8] }
 0x163   : > { %16819 = vmatmul.mubr.msk.bf16.gmra.mrb[92].mxu0 %vm873_vm6, %v19570_v49  ;;  %16675 = vmatmul.mubr.msk.bf16.gmra.mrb[28].mxu1 %vm873_vm6, %v20305_v17  ;;  %v16417_v49 = vpop.f32.mrb[22].mxu0 }
 0x164   : > { %16826 = vmatprep.mubr.msk.bf16.mxu0 %vm873_vm6, %v19724_v6  ;;  %16682 = vmatprep.mubr.msk.bf16.mxu1 %vm873_vm6, %v20178_v33  ;;  %v1106_v27 = vadd.f32 %v16417_v49, %v800_v13  ;;  %v1039_v26 = vpop.f32.mrb[23].mxu0  ;;  %v5346_v13 = vrot.slane %v4455_v21, 7  ;;  %v4456_v49 = vld [vmem:[%s18695_s22 + $0x414] sm:$0x7]  ;;  %v4470_v21 = vld [vmem:[%s18695_s22 + $0x49c] sm:$0xf] }
 0x165   : > { %v1104_v6 = vadd.f32 %v1039_v26, %v798_v43  ;;  %v16420_v62 = vpop.f32.mrb[24].mxu0 }
 0x166   : > { %1139 = vst.msk [vmem:[#allocation2 + $0xb8] sm:$0xff] %vm436_vm10, %v1106_v27  ;;  %v1109_v33 = vadd.f32 %v16420_v62, %v803_v29  ;;  %v1052_v53 = vpop.f32.mrb[25].mxu0  ;;  %v5353_v27 = vrot.slane %v4458_v11, 7  ;;  %v4459_v62 = vld [vmem:[%s18695_s22 + $0x430] sm:$0x7]  ;;  %v5348_v25 = vrot.slane %v5346_v13, 4 }
 0x167   : > { %1137 = vst.msk [vmem:[#allocation2 + $0xa8] sm:$0xff] %vm436_vm10, %v1104_v6  ;;  %v16421_v12 = vpop.f32.mrb[26].mxu0  ;;  %v4457_v6 = vld [vmem:[%s18695_s22 + $0x428] sm:$0x8]  ;;  %v5356_v40 = vrot.slane %v4459_v62, 7 }
 0x168   : > { %1142 = vst.msk [vmem:[#allocation2 + $0xd0] sm:$0xff] %vm436_vm10, %v1109_v33  ;;  %v1110_v39 = vadd.f32 %v16421_v12, %v804_v14  ;;  %v1055_v58 = vpop.f32.mrb[27].mxu0  ;;  %v14971_v51 = vrot.slane %v4457_v6, 11  ;;  %v4460_v14 = vld [vmem:[%s18695_s22 + $0x444] sm:$0x8] }
 0x169   : > { %v16424_v59 = vpop.f32.mrb[28].mxu0 }
 0x16a   : > { %1143 = vst.msk [vmem:[#allocation2 + $0xd8] sm:$0xff] %vm436_vm10, %v1110_v39  ;;  %v1113_v1 = vadd.f32 %v16424_v59, %v807_v24  ;;  %v1068_v43 = vpop.f32.mrb[29].mxu0 }
 0x16b   : > { %16827 = vmatmul.mubr.msk.bf16.vlgmr.msra.gmra.mrb[64].mxu0 %vm873_vm6, %v19755_v30  ;;  %16683 = vmatmul.mubr.msk.bf16.vlgmr.msra.gmra.mrb[0].mxu1 %vm873_vm6, %v20211_v22  ;;  %v5326_v30 = vsel %vm19448_vm9, %v14967_v36, %v5325_v23  ;;  %v801_v22 = vld [vmem:[#allocation2 + $0xc0] sm:$0xff]  ;;  %v5343_v23 = vsel %vm19448_vm9, %v5341_v9, %v5342_v3  ;;  %v16425_v29 = vpop.f32.mrb[30].mxu0  ;;  %v14984_v36 = vcombine.low %v5333_v48, %v5336_v41 }
 0x16c   : > { %16830 = vmatprep.mubr.msk.bf16.mxu0 %vm873_vm6, %v19758_v35  ;;  %16715 = vmatpush3.bf16.msra.mxu1 %v19844_v2  ;;  %v802_v35 = vld [vmem:[#allocation2 + $0xc8] sm:$0xff]  ;;  %v20360_v2 = vld [vmem:[%s22986_s4 + $0x30] sm:$0xff]   ;;  %1146 = vst.msk [vmem:[#allocation2 + $0xf0] sm:$0xff] %vm436_vm10, %v1113_v1  ;;  %v1114_v19 = vadd.f32 %v16425_v29, %v808_v15  ;;  %v1071_v33 = vpop.f32.mrb[31].mxu0  ;;  %v4467_v9 = vld [vmem:[%s18695_s22 + $0x480] sm:$0xf] }
 0x16d   : > { %16686 = vmatprep.mubr.msk.bf16.mxu1 %vm873_vm6, %v20221_v28  ;;  %16716 = vmatprep.subr.bf16.mxu1 %v18465_v57  ;;  %v1107_v28 = vadd.f32 %v1052_v53, %v801_v22  ;;  %v1108_v20 = vadd.f32 %v1055_v58, %v802_v35  ;;  %v5354_v22 = vsel %vm19448_vm9, %v14971_v51, %v5353_v27  ;;  %v5367_v35 = vrot.slane %v4464_v45, 7  ;;  %v3426_v48 = vld [vmem:[%s18695_s22 + $0x320] sm:$0xf]  ;;  %v4468_v15 = vld [vmem:[%s18695_s22 + $0x484] sm:$0x7] }
 0x16e   : > { %16859 = vmatpush3.bf16.msra.mxu0 %v19852_v34  ;;  %v14983_v34 = vcombine.low %v5326_v30, %v5329_v46  ;;  %1147 = vst.msk [vmem:[#allocation2 + $0xf8] sm:$0xff] %vm436_vm10, %v1114_v19  ;;  %v5347_v30 = vsel %vm19448_vm9, %v14970_v38, %v5346_v13  ;;  %v14972_v58 = vrot.slane %v4460_v14, 11  ;;  %v5374_v41 = vrot.slane %v4467_v9, 7  ;;  %v4476_v51 = vld [vmem:[%s18695_s22 + $0x4d4] sm:$0xf] }
 0x16f   : > { %16860 = vmatprep.subr.bf16.mxu0 %v18473_v42  ;;  %1140 = vst.msk [vmem:[#allocation2 + $0xc0] sm:$0xff] %vm436_vm10, %v1107_v28  ;;  %1141 = vst.msk [vmem:[#allocation2 + $0xc8] sm:$0xff] %vm436_vm10, %v1108_v20  ;;  %v4465_v28 = vld [vmem:[%s18695_s22 + $0x468] sm:$0x7]  ;;  %v14973_v20 = vrot.slane %v4463_v54, 11  ;;  %v5369_v59 = vrot.slane %v5367_v35, 4 }
 0x170   : > { %16717 = vmatpush3.bf16.msra.mxu1 %v18465_v57  ;;  %v5349_v57 = vrot.slane %v4456_v49, 7  ;;  %v5376_v6 = vrot.slane %v5374_v41, 4  ;;  %v5377_v62 = vrot.slane %v4468_v15, 7  ;;  %v3428_v45 = vld [vmem:[%s18695_s22 + $0x358] sm:$0xf]  ;;  %v5395_v14 = vrot.slane %v4476_v51, 7 }
 0x171   : > { %17074 = vmatprep.subr.bf16.mxu1 %v20360_v2  ;;  %v5368_v13 = vsel %vm19448_vm9, %v14973_v20, %v5367_v35  ;;  %v4477_v35 = vld [vmem:[%s18695_s22 + $0x4d8] sm:$0x7]  ;;  %v18572_v9 = vld [vmem:[%s18695_s22 + $0x354] sm:$0xf] }
 0x172   : > { %16861 = vmatpush3.bf16.msra.mxu0 %v18473_v42  ;;  %v5355_v42 = vrot.slane %v5353_v27, 4  ;;  %v5350_v46 = vsel %vm19448_vm9, %v5348_v25, %v5349_v57  ;;  %v4473_v25 = vld [vmem:[%s18695_s22 + $0x4b8] sm:$0xf] }
 0x173   : > { %16831 = vmatmul.mubr.msk.bf16.gmra.mrb[68].mxu0 %vm873_vm6, %v19783_v52  ;;  %16894 = vmatprep.subr.bf16.mxu0 %v20365_v61  ;;  %v805_v52 = vld [vmem:[#allocation2 + $0xe0] sm:$0xff]  ;;  %v20417_v12 = vpop.f32.mrb[32].mxu0  ;;  %v14986_v24 = vcombine.low %v5347_v30, %v5350_v46  ;;  %v5388_v30 = vrot.slane %v4473_v25, 7 }
 0x174   : > { %16687 = vmatmul.mubr.msk.bf16.gmra.mrb[4].mxu1 %vm873_vm6, %v20244_v55  ;;  %16834 = vmatprep.mubr.msk.bf16.mxu0 %vm873_vm6, %v14983_v34  ;;  %v5340_v55 = vsel %vm19448_vm9, %v14969_v44, %v5339_v18  ;;  %v1111_v26 = vadd.f32 %v1068_v43, %v805_v52  ;;  %v5360_v18 = vrot.slane %v4461_v37, 7  ;;  %v5357_v53 = vsel %vm19448_vm9, %v5355_v42, %v5356_v40  ;;  %v20419_v0 = vpop.f32.mrb[33].mxu0  ;;  %v4466_v43 = vld [vmem:[%s18695_s22 + $0x47c] sm:$0x8] }
 0x175   : > { %16690 = vmatprep.mubr.msk.bf16.mxu1 %vm873_vm6, %v20249_v8  ;;  %v1112_v8 = vadd.f32 %v1071_v33, %v806_v47  ;;  %v14985_v32 = vcombine.low %v5340_v55, %v5343_v23  ;;  %v14987_v39 = vcombine.low %v5354_v22, %v5357_v53  ;;  %v20421_v10 = vpop.f32.mrb[34].mxu0  ;;  %v5370_v44 = vrot.slane %v4465_v28, 7  ;;  %v4469_v55 = vld [vmem:[%s18695_s22 + $0x498] sm:$0x8]  ;;  %v4471_v23 = vld [vmem:[%s18695_s22 + $0x4a0] sm:$0x7] }
 0x176   : > { %1144 = vst.msk [vmem:[#allocation2 + $0xe0] sm:$0xff] %vm436_vm10, %v1111_v26  ;;  %v5362_v34 = vrot.slane %v5360_v18, 4  ;;  %v20424_v3 = vpop.f32.mrb[35].mxu0  ;;  %v5361_v1 = vsel %vm19448_vm9, %v14972_v58, %v5360_v18  ;;  %v5381_v47 = vrot.slane %v4470_v21, 7  ;;  %v14974_v29 = vrot.slane %v4466_v43, 11 }
 0x177   : > { %1145 = vst.msk [vmem:[#allocation2 + $0xe8] sm:$0xff] %vm436_vm10, %v1112_v8  ;;  %v5371_v52 = vsel %vm19448_vm9, %v5369_v59, %v5370_v44  ;;  %v18570_v33 = vld [vmem:[%s18695_s22 + $0x31c] sm:$0xf]  ;;  %v14975_v8 = vrot.slane %v4469_v55, 11  ;;  %v5384_v38 = vrot.slane %v4471_v23, 7  ;;  %v5378_v37 = vsel %vm19448_vm9, %v5376_v6, %v5377_v62 }
 0x178   : > { %v14989_v26 = vcombine.low %v5368_v13, %v5371_v52  ;;  %v3427_v42 = vld [vmem:[%s18695_s22 + $0x33c] sm:$0xf]  ;;  %v5375_v40 = vsel %vm19448_vm9, %v14974_v29, %v5374_v41  ;;  %v4472_v22 = vld [vmem:[%s18695_s22 + $0x4b4] sm:$0x8]  ;;  %v18571_v28 = vld [vmem:[%s18695_s22 + $0x338] sm:$0xf]  ;;  %v20489_v21 = vcombine.low %v18572_v9, %v3428_v45 }
 0x179   : > { %v5382_v46 = vsel %vm19448_vm9, %v14975_v8, %v5381_v47  ;;  %v4474_v53 = vld [vmem:[%s18695_s22 + $0x4bc] sm:$0x7]  ;;  %v5390_v20 = vrot.slane %v5388_v30, 4  ;;  %v4479_v41 = vld [vmem:[%s18695_s22 + $0x4f0] sm:$0xf] }
 0x17a   : > { %v5391_v59 = vrot.slane %v4474_v53, 7  ;;  %v5690_v52 = vld [vmem:[%s18695_s22 + $0xb4] sm:$0xf]  ;;  %v3430_v55 = vld [vmem:[%s18695_s22 + $0x390] sm:$0xf]  ;;  %v5402_v23 = vrot.slane %v4479_v41, 7 }
 0x17b   : > { %16835 = vmatmul.mubr.msk.bf16.gmra.mrb[72].mxu0 %vm873_vm6, %v14984_v36  ;;  %v20446_v4 = vpop.f32.mrb[36].mxu0  ;;  %v20453_v36 = vcombine.low %v18570_v33, %v3426_v48  ;;  %v5398_v48 = vrot.slane %v4477_v35, 7  ;;  %v3429_v43 = vld [vmem:[%s18695_s22 + $0x374] sm:$0xf]  ;;  %v4478_v29 = vld [vmem:[%s18695_s22 + $0x4ec] sm:$0x8] }
 0x17c   : > { %16691 = vmatmul.mubr.msk.bf16.gmra.mrb[8].mxu1 %vm873_vm6, %v20267_v31  ;;  %16838 = vmatprep.mubr.msk.bf16.mxu0 %vm873_vm6, %v14985_v32  ;;  %v4462_v31 = vld [vmem:[%s18695_s22 + $0x44c] sm:$0x7]  ;;  %v20448_v27 = vpop.f32.mrb[37].mxu0  ;;  %v5383_v32 = vrot.slane %v5381_v47, 4  ;;  %v5392_v47 = vsel %vm19448_vm9, %v5390_v20, %v5391_v59  ;;  %v4480_v6 = vld [vmem:[%s18695_s22 + $0x4f4] sm:$0x7] }
 0x17d   : > { %16694 = vmatprep.mubr.msk.bf16.mxu1 %vm873_vm6, %v20271_v50  ;;  %v5363_v7 = vrot.slane %v4462_v31, 7  ;;  %v20450_v19 = vpop.f32.mrb[38].mxu0  ;;  %v4475_v31 = vld [vmem:[%s18695_s22 + $0x4d0] sm:$0x8]  ;;  %v5859_v62 = vrot.slane %v5690_v52, 5  ;;  %v5404_v45 = vrot.slane %v5402_v23, 4 }
 0x17e   : > { %v20456_v57 = vpop.f32.mrb[39].mxu0  ;;  %v5385_v18 = vsel %vm19448_vm9, %v5383_v32, %v5384_v38  ;;  %v5689_v33 = vld [vmem:[%s18695_s22 + $0xb0] sm:$0xe]  ;;  %v5691_v8 = vld [vmem:[%s18695_s22 + $0xb8] sm:$0x1] }
 0x17f   : > { %v5364_v11 = vsel %vm19448_vm9, %v5362_v34, %v5363_v7  ;;  %v14991_v34 = vcombine.low %v5382_v46, %v5385_v18  ;;  %v14976_v7 = vrot.slane %v4472_v22, 11  ;;  %v18573_v38 = vld [vmem:[%s18695_s22 + $0x370] sm:$0xf]  ;;  %v18574_v18 = vld [vmem:[%s18695_s22 + $0x38c] sm:$0xf]  ;;  %v15013_v53 = vrot.slane %v5689_v33, 9 }
 0x180   : > { %v14988_v49 = vcombine.low %v5361_v1, %v5364_v11  ;;  %v14977_v1 = vrot.slane %v4475_v31, 11  ;;  %v5397_v11 = vrot.slane %v5395_v14, 4  ;;  %v20518_v25 = vcombine.low %v18573_v38, %v3429_v43  ;;  %v5693_v35 = vld [vmem:[%s18695_s22 + $0xd0] sm:$0xf]  ;;  %v5695_v52 = vld [vmem:[%s18695_s22 + $0xe8] sm:$0xe] }
 0x181   : > { %v5389_v15 = vsel %vm19448_vm9, %v14976_v7, %v5388_v30  ;;  %v5405_v30 = vrot.slane %v4480_v6, 7  ;;  %v20525_v22 = vcombine.low %v18574_v18, %v3430_v55  ;;  %v5862_v31 = vrot.slane %v5691_v8, 5  ;;  %v5697_v43 = vld [vmem:[%s18695_s22 + $0xf0] sm:$0x1] }
 0x182   : > { %v14992_v51 = vcombine.low %v5389_v15, %v5392_v47  ;;  %v5866_v59 = vrot.slane %v5693_v35, 5  ;;  %v5860_v9 = vsel %vm18697_vm2, %v15013_v53, %v5859_v62  ;;  %v18575_v47 = vld [vmem:[%s18695_s22 + $0x3a8] sm:$0xf]  ;;  %v15015_v8 = vrot.slane %v5695_v52, 9  ;;  %v5698_v35 = vld [vmem:[%s18695_s22 + $0x104] sm:$0xe] }
 0x183   : > { %16839 = vmatmul.mubr.msk.bf16.gmra.mrb[76].mxu0 %vm873_vm6, %v14986_v24  ;;  %v20479_v54 = vpop.f32.mrb[40].mxu0  ;;  %v20482_v24 = vcombine.low %v18571_v28, %v3427_v42  ;;  %v5406_v20 = vsel %vm19448_vm9, %v5404_v45, %v5405_v30  ;;  %v5702_v45 = vld [vmem:[%s18695_s22 + $0x124] sm:$0xf] }
 0x184   : > { %16695 = vmatmul.mubr.msk.bf16.gmra.mrb[12].mxu1 %vm873_vm6, %v20286_v60  ;;  %16842 = vmatprep.mubr.msk.bf16.mxu0 %vm873_vm6, %v14987_v39  ;;  %v14990_v39 = vcombine.low %v5375_v40, %v5378_v37  ;;  %v20484_v58 = vpop.f32.mrb[41].mxu0  ;;  %v14978_v37 = vrot.slane %v4478_v29, 11  ;;  %v5868_v6 = vrot.slane %v5866_v59, 4 }
 0x185   : > { %16698 = vmatprep.mubr.msk.bf16.mxu1 %vm873_vm6, %v20290_v56  ;;  %v20486_v44 = vpop.f32.mrb[42].mxu0 }
 0x186   : > { %v20492_v13 = vpop.f32.mrb[43].mxu0  ;;  %v5403_v7 = vsel %vm19448_vm9, %v14978_v37, %v5402_v23 }
 0x187   : > { %v14994_v23 = vcombine.low %v5403_v7, %v5406_v20  ;;  %v5701_v7 = vld [vmem:[%s18695_s22 + $0x120] sm:$0xe]  ;;  %v5703_v20 = vld [vmem:[%s18695_s22 + $0x128] sm:$0x1] }
 0x18b   : > { %16843 = vmatmul.mubr.msk.bf16.gmra.mrb[80].mxu0 %vm873_vm6, %v14988_v49  ;;  %v5396_v49 = vsel %vm19448_vm9, %v14977_v1, %v5395_v14  ;;  %v20515_v32 = vpop.f32.mrb[44].mxu0  ;;  %v5861_v14 = vrot.slane %v5859_v62, 4 }
 0x18c   : > { %16699 = vmatmul.mubr.msk.bf16.gmra.mrb[16].mxu1 %vm873_vm6, %v20305_v17  ;;  %16846 = vmatprep.mubr.msk.bf16.mxu0 %vm873_vm6, %v14989_v26  ;;  %v5399_v26 = vsel %vm19448_vm9, %v5397_v11, %v5398_v48  ;;  %v20520_v42 = vpop.f32.mrb[45].mxu0  ;;  %v5692_v11 = vld [vmem:[%s18695_s22 + $0xcc] sm:$0xe]  ;;  %v5694_v48 = vld [vmem:[%s18695_s22 + $0xd4] sm:$0x1] }
 0x18d   : > { %16702 = vmatprep.mubr.msk.bf16.mxu1 %vm873_vm6, %v20453_v36  ;;  %v14993_v40 = vcombine.low %v5396_v49, %v5399_v26  ;;  %v20522_v46 = vpop.f32.mrb[46].mxu0  ;;  %v5863_v1 = vsel %vm18697_vm2, %v5861_v14, %v5862_v31  ;;  %v15014_v29 = vrot.slane %v5692_v11, 9  ;;  %v5869_v62 = vrot.slane %v5694_v48, 5 }
 0x18e   : > { %v20528_v28 = vpop.f32.mrb[47].mxu0  ;;  %v15033_v26 = vcombine.low %v5860_v9, %v5863_v1 }
 0x18f   : > { %v5867_v30 = vsel %vm18697_vm2, %v15014_v29, %v5866_v59  ;;  %v5870_v18 = vsel %vm18697_vm2, %v5868_v6, %v5869_v62  ;;  %v5708_v6 = vld [vmem:[%s18695_s22 + $0x15c] sm:$0xf] }
 0x190   : > { %v15034_v9 = vcombine.low %v5867_v30, %v5870_v18  ;;  %v18475_v62 = vld [vmem:[%s22986_s4 + $0x38] sm:$0xff]   ;;  %v5706_v18 = vld [vmem:[%s18695_s22 + $0x144] sm:$0x1] }
 0x191   : > { %v5704_v30 = vld [vmem:[%s18695_s22 + $0x13c] sm:$0xe] }
 0x193   : > { %16847 = vmatmul.mubr.msk.bf16.gmra.mrb[84].mxu0 %vm873_vm6, %v14990_v39  ;;  %v5696_v39 = vld [vmem:[%s18695_s22 + $0xec] sm:$0xf]  ;;  %v20550_v15 = vpop.f32.mrb[48].mxu0 }
 0x194   : > { %16703 = vmatmul.mubr.msk.bf16.gmra.mrb[20].mxu1 %vm873_vm6, %v20482_v24  ;;  %16850 = vmatprep.mubr.msk.bf16.mxu0 %vm873_vm6, %v14991_v34  ;;  %v3431_v34 = vld [vmem:[%s18695_s22 + $0x3ac] sm:$0xf]  ;;  %v5873_v41 = vrot.slane %v5696_v39, 5  ;;  %v20555_v49 = vpop.f32.mrb[49].mxu0 }
 0x195   : > { %16706 = vmatprep.mubr.msk.bf16.mxu1 %vm873_vm6, %v20489_v21  ;;  %v20553_v55 = vcombine.low %v18575_v47, %v3431_v34  ;;  %v20557_v33 = vpop.f32.mrb[50].mxu0  ;;  %v5700_v39 = vld [vmem:[%s18695_s22 + $0x10c] sm:$0x1]  ;;  %v5887_v34 = vrot.slane %v5702_v45, 5 }
 0x196   : > { %v5875_v38 = vrot.slane %v5873_v41, 4  ;;  %v20560_v37 = vpop.f32.mrb[51].mxu0  ;;  %v5874_v14 = vsel %vm18697_vm2, %v15015_v8, %v5873_v41  ;;  %v5883_v52 = vrot.slane %v5700_v39, 5  ;;  %v18477_v8 = vld [vmem:[%s22985_s3 + $0x48] sm:$0xff]   ;;  %v20627_v39 = vld [vmem:[%s22985_s3 + $0x70] sm:$0xff]  }
 0x197   : > { %v5889_v47 = vrot.slane %v5887_v34, 4 }
 0x19b   : > { %16851 = vmatmul.mubr.msk.bf16.gmra.mrb[88].mxu0 %vm873_vm6, %v14992_v51  ;;  %v5876_v51 = vrot.slane %v5697_v43, 5  ;;  %v20581_v59 = vpop.f32.mrb[52].mxu0  ;;  %v15017_v43 = vrot.slane %v5701_v7, 9 }
 0x19c   : > { %16707 = vmatmul.mubr.msk.bf16.gmra.mrb[24].mxu1 %vm873_vm6, %v20518_v25  ;;  %16854 = vmatprep.mubr.msk.bf16.mxu0 %vm873_vm6, %v14993_v40  ;;  %v5699_v40 = vld [vmem:[%s18695_s22 + $0x108] sm:$0xf]  ;;  %v20583_v1 = vpop.f32.mrb[53].mxu0 }
 0x19d   : > { %16710 = vmatprep.mubr.msk.bf16.mxu1 %vm873_vm6, %v20525_v22  ;;  %v5880_v53 = vrot.slane %v5699_v40, 5  ;;  %v5877_v31 = vsel %vm18697_vm2, %v5875_v38, %v5876_v51  ;;  %v20585_v41 = vpop.f32.mrb[54].mxu0  ;;  %v5888_v45 = vsel %vm18697_vm2, %v15017_v43, %v5887_v34  ;;  %v5711_v43 = vld [vmem:[%s18695_s22 + $0x178] sm:$0xf] }
 0x19e   : > { %v15035_v11 = vcombine.low %v5874_v14, %v5877_v31  ;;  %v20588_v29 = vpop.f32.mrb[55].mxu0  ;;  %v5901_v14 = vrot.slane %v5708_v6, 5  ;;  %v5707_v31 = vld [vmem:[%s18695_s22 + $0x158] sm:$0xe] }
 0x19f   : > { %v5882_v48 = vrot.slane %v5880_v53, 4 }
 0x1a1   : > { %v5884_v51 = vsel %vm18697_vm2, %v5882_v48, %v5883_v52  ;;  %v5903_v48 = vrot.slane %v5901_v14, 4 }
 0x1a3   : > { %16855 = vmatmul.mubr.msk.bf16.gmra.mrb[92].mxu0 %vm873_vm6, %v14994_v23  ;;  %v5890_v23 = vrot.slane %v5703_v20, 5  ;;  %v15018_v20 = vrot.slane %v5704_v30, 9 }
 0x1a4   : > { %16711 = vmatmul.mubr.msk.bf16.gmra.mrb[28].mxu1 %vm873_vm6, %v20553_v55  ;;  %16862 = vmatprep.mubr.msk.bf16.mxu0 %vm873_vm6, %v15033_v26  ;;  %v5705_v26 = vld [vmem:[%s18695_s22 + $0x140] sm:$0xf] }
 0x1a5   : > { %16718 = vmatprep.mubr.msk.bf16.mxu1 %vm873_vm6, %v20271_v50  ;;  %v15016_v50 = vrot.slane %v5698_v35, 9  ;;  %v5894_v40 = vrot.slane %v5705_v26, 5 }
 0x1a7   : > { %v5881_v38 = vsel %vm18697_vm2, %v15016_v50, %v5880_v53  ;;  %v5709_v53 = vld [vmem:[%s18695_s22 + $0x160] sm:$0x1]  ;;  %v15019_v50 = vrot.slane %v5707_v31, 9  ;;  %v5895_v26 = vsel %vm18697_vm2, %v15018_v20, %v5894_v40 }
 0x1a8   : > { %v15036_v35 = vcombine.low %v5881_v38, %v5884_v51  ;;  %v5904_v52 = vrot.slane %v5709_v53, 5  ;;  %v5710_v51 = vld [vmem:[%s18695_s22 + $0x174] sm:$0xe] }
 0x1aa   : > { %v5905_v38 = vsel %vm18697_vm2, %v5903_v48, %v5904_v52  ;;  %v5720_v52 = vld [vmem:[%s18695_s22 + $0x1cc] sm:$0xf] }
 0x1ab   : > { %16863 = vmatmul.mubr.msk.bf16.vlgmr.msra.gmra.mrb[64].mxu0 %vm873_vm6, %v15034_v9  ;;  %v5897_v9 = vrot.slane %v5706_v18, 5 }
 0x1ac   : > { %16719 = vmatmul.mubr.msk.bf16.vlgmr.msra.gmra.mrb[0].mxu1 %vm873_vm6, %v20286_v60  ;;  %16866 = vmatprep.mubr.msk.bf16.mxu0 %vm873_vm6, %v15035_v11  ;;  %v5891_v60 = vsel %vm18697_vm2, %v5889_v47, %v5890_v23  ;;  %v5714_v23 = vld [vmem:[%s18695_s22 + $0x194] sm:$0xf] }
 0x1ad   : > { %17075 = vmatpush3.bf16.msra.mxu1 %v20360_v2  ;;  %16722 = vmatprep.mubr.msk.bf16.mxu1 %vm873_vm6, %v20290_v56  ;;  %v20620_v2 = vld [vmem:[%s22986_s4] sm:$0xff]   ;;  %v20622_v56 = vpop.f32.mrb[56].mxu0  ;;  %v15037_v7 = vcombine.low %v5888_v45, %v5891_v60  ;;  %v5915_v45 = vrot.slane %v5714_v23, 5  ;;  %v5713_v60 = vld [vmem:[%s18695_s22 + $0x190] sm:$0xe] }
 0x1ae   : > { %17076 = vmatprep.subr.bf16.mxu1 %v18475_v62  ;;  %16895 = vmatpush3.bf16.msra.mxu0 %v20365_v61  ;;  %v20629_v34 = vpop.f32.mrb[57].mxu0  ;;  %v5896_v61 = vrot.slane %v5894_v40, 4  ;;  %v5715_v40 = vld [vmem:[%s18695_s22 + $0x198] sm:$0x1]  ;;  %v15021_v20 = vrot.slane %v5713_v60, 9 }
 0x1af   : > { %16896 = vmatprep.subr.bf16.mxu0 %v18477_v8  ;;  %v20631_v11 = vpop.f32.mrb[58].mxu0 }
 0x1b0   : > { %v20634_v47 = vpop.f32.mrb[59].mxu0  ;;  %v5898_v6 = vsel %vm18697_vm2, %v5896_v61, %v5897_v9  ;;  %v5917_v61 = vrot.slane %v5915_v45, 4  ;;  %v5918_v9 = vrot.slane %v5715_v40, 5 }
 0x1b1   : > { %17077 = vmatpush3.bf16.msra.mxu1 %v18475_v62  ;;  %v5908_v62 = vrot.slane %v5711_v43, 5  ;;  %v20657_v30 = vpop.f32.mrb[60].mxu0  ;;  %v15038_v18 = vcombine.low %v5895_v26, %v5898_v6  ;;  %v5916_v6 = vsel %vm18697_vm2, %v15021_v20, %v5915_v45  ;;  %v5726_v20 = vld [vmem:[%s18695_s22 + $0x204] sm:$0xf] }
 0x1b2   : > { %16897 = vmatpush3.bf16.msra.mxu0 %v18477_v8  ;;  %17110 = vmatprep.subr.bf16.mxu1 %v20620_v2  ;;  %v5902_v8 = vsel %vm18697_vm2, %v15019_v50, %v5901_v14  ;;  %v20659_v31 = vpop.f32.mrb[61].mxu0  ;;  %v5717_v50 = vld [vmem:[%s18695_s22 + $0x1b0] sm:$0xf] }
 0x1b3   : > { %16867 = vmatmul.mubr.msk.bf16.gmra.mrb[68].mxu0 %vm873_vm6, %v15036_v35  ;;  %16930 = vmatprep.subr.bf16.mxu0 %v20627_v39  ;;  %v15039_v53 = vcombine.low %v5902_v8, %v5905_v38  ;;  %v5910_v35 = vrot.slane %v5908_v62, 4  ;;  %v20661_v14 = vpop.f32.mrb[62].mxu0  ;;  %v5922_v26 = vrot.slane %v5717_v50, 5  ;;  %v5716_v8 = vld [vmem:[%s18695_s22 + $0x1ac] sm:$0xe] }
 0x1b4   : > { %16723 = vmatmul.mubr.msk.bf16.gmra.mrb[4].mxu1 %vm873_vm6, %v20305_v17  ;;  %16870 = vmatprep.mubr.msk.bf16.mxu0 %vm873_vm6, %v15037_v7  ;;  %v5712_v17 = vld [vmem:[%s18695_s22 + $0x17c] sm:$0x1]  ;;  %v20664_v48 = vpop.f32.mrb[63].mxu0  ;;  %v5718_v38 = vld [vmem:[%s18695_s22 + $0x1b4] sm:$0x1] }
 0x1b5   : > { %16726 = vmatprep.mubr.msk.bf16.mxu1 %vm873_vm6, %v20453_v36  ;;  %v15020_v36 = vrot.slane %v5710_v51, 9  ;;  %v5911_v7 = vrot.slane %v5712_v17, 5  ;;  %23000 = vst [vmem:[#allocation4_spill] sm:$0xff] %v20664_v48  ;;  %v5929_v51 = vrot.slane %v5720_v52, 5  ;;  %v5719_v17 = vld [vmem:[%s18695_s22 + $0x1c8] sm:$0xe] }
 0x1b6   : > { %v21181_v48 = vld [vmem:[%s18695_s22 + $0x208] sm:$0xf] }
 0x1b7   : > { %v5909_v43 = vsel %vm18697_vm2, %v15020_v36, %v5908_v62  ;;  %v5912_v23 = vsel %vm18697_vm2, %v5910_v35, %v5911_v7  ;;  %v5721_v62 = vld [vmem:[%s18695_s22 + $0x1d0] sm:$0x1]  ;;  %v5925_v36 = vrot.slane %v5718_v38, 5  ;;  %v5931_v35 = vrot.slane %v5929_v51, 4  ;;  %v5723_v7 = vld [vmem:[%s18695_s22 + $0x1e8] sm:$0xf] }
 0x1b8   : > { %v15040_v60 = vcombine.low %v5909_v43, %v5912_v23  ;;  %v5932_v45 = vrot.slane %v5721_v62, 5  ;;  %v5936_v50 = vrot.slane %v5723_v7, 5  ;;  %v5724_v23 = vld [vmem:[%s18695_s22 + $0x1ec] sm:$0x1] }
 0x1ba   : > { %v5933_v43 = vsel %vm18697_vm2, %v5931_v35, %v5932_v45  ;;  %v5732_v35 = vld [vmem:[%s18695_s22 + $0x23c] sm:$0xf]  ;;  %v3433_v45 = vld [vmem:[%s18695_s22 + $0x3e4] sm:$0xf] }
 0x1bb   : > { %16871 = vmatmul.mubr.msk.bf16.gmra.mrb[72].mxu0 %vm873_vm6, %v15038_v18  ;;  %v15022_v18 = vrot.slane %v5716_v8, 9  ;;  %v5727_v8 = vld [vmem:[%s18695_s22 + $0x208] sm:$0x1] }
 0x1bc   : > { %16727 = vmatmul.mubr.msk.bf16.gmra.mrb[8].mxu1 %vm873_vm6, %v20482_v24  ;;  %16874 = vmatprep.mubr.msk.bf16.mxu0 %vm873_vm6, %v15039_v53  ;;  %v5919_v24 = vsel %vm18697_vm2, %v5917_v61, %v5918_v9  ;;  %v5924_v53 = vrot.slane %v5922_v26, 4 }
 0x1bd   : > { %16730 = vmatprep.mubr.msk.bf16.mxu1 %vm873_vm6, %v20489_v21  ;;  %v15041_v40 = vcombine.low %v5916_v6, %v5919_v24  ;;  %v15023_v21 = vrot.slane %v5719_v17, 9  ;;  %v5923_v61 = vsel %vm18697_vm2, %v15022_v18, %v5922_v26  ;;  %v5943_v6 = vrot.slane %v5726_v20, 5  ;;  %v3432_v26 = vld [vmem:[%s18695_s22 + $0x3c8] sm:$0xf]  ;;  %v5725_v24 = vld [vmem:[%s18695_s22 + $0x200] sm:$0xe] }
 0x1be   : > { %v5926_v9 = vsel %vm18697_vm2, %v5924_v53, %v5925_v36  ;;  %v5946_v36 = vrot.slane %v5727_v8, 5 }
 0x1bf   : > { %v5930_v52 = vsel %vm18697_vm2, %v15023_v21, %v5929_v51  ;;  %v15042_v38 = vcombine.low %v5923_v61, %v5926_v9  ;;  %v15025_v51 = vrot.slane %v5725_v24, 9  ;;  %v5945_v53 = vrot.slane %v5943_v6, 4  ;;  %v5729_v21 = vld [vmem:[%s18695_s22 + $0x220] sm:$0xf] }
 0x1c0   : > { %v15043_v17 = vcombine.low %v5930_v52, %v5933_v43  ;;  %v5950_v61 = vrot.slane %v5729_v21, 5  ;;  %v5730_v43 = vld [vmem:[%s18695_s22 + $0x224] sm:$0x1]  ;;  %v18577_v24 = vld [vmem:[%s18695_s22 + $0x3e0] sm:$0xf] }
 0x1c1   : > { %v5944_v9 = vsel %vm18697_vm2, %v15025_v51, %v5943_v6  ;;  %v5947_v52 = vsel %vm18697_vm2, %v5945_v53, %v5946_v36  ;;  %v14848_v8 = vcombine.low %v18577_v24, %v3433_v45  ;;  %v5735_v36 = vld [vmem:[%s18695_s22 + $0x258] sm:$0xf]  ;;  %v3435_v21 = vld [vmem:[%s18695_s22 + $0x41c] sm:$0xf] }
 0x1c3   : > { %16875 = vmatmul.mubr.msk.bf16.gmra.mrb[76].mxu0 %vm873_vm6, %v15040_v60  ;;  %v5938_v60 = vrot.slane %v5936_v50, 4 }
 0x1c4   : > { %16731 = vmatmul.mubr.msk.bf16.gmra.mrb[12].mxu1 %vm873_vm6, %v20518_v25  ;;  %16878 = vmatprep.mubr.msk.bf16.mxu0 %vm873_vm6, %v15041_v40  ;;  %v5722_v25 = vld [vmem:[%s18695_s22 + $0x1e4] sm:$0xe] }
 0x1c5   : > { %16734 = vmatprep.mubr.msk.bf16.mxu1 %vm873_vm6, %v20525_v22  ;;  %v15024_v62 = vrot.slane %v5722_v25, 9  ;;  %v5939_v22 = vrot.slane %v5724_v23, 5  ;;  %v18576_v40 = vld [vmem:[%s18695_s22 + $0x3c4] sm:$0xf]  ;;  %v5957_v25 = vrot.slane %v5732_v35, 5 }
 0x1c6   : > { %v14847_v18 = vcombine.low %v18576_v40, %v3432_v26  ;;  %v3434_v23 = vld [vmem:[%s18695_s22 + $0x400] sm:$0xf]  ;;  %v5731_v26 = vld [vmem:[%s18695_s22 + $0x238] sm:$0xe]  ;;  %v18578_v40 = vld [vmem:[%s18695_s22 + $0x3fc] sm:$0xf] }
 0x1c7   : > { %v5937_v7 = vsel %vm18697_vm2, %v15024_v62, %v5936_v50  ;;  %v5940_v20 = vsel %vm18697_vm2, %v5938_v60, %v5939_v22  ;;  %v5733_v50 = vld [vmem:[%s18695_s22 + $0x240] sm:$0x1]  ;;  %v5952_v60 = vrot.slane %v5950_v61, 4  ;;  %v5953_v22 = vrot.slane %v5730_v43, 5  ;;  %v3436_v43 = vld [vmem:[%s18695_s22 + $0x438] sm:$0xf] }
 0x1c8   : > { %v14849_v6 = vcombine.low %v18578_v40, %v3434_v23  ;;  %v5959_v51 = vrot.slane %v5957_v25, 4  ;;  %v5960_v53 = vrot.slane %v5733_v50, 5  ;;  %v18579_v23 = vld [vmem:[%s18695_s22 + $0x418] sm:$0xf]  ;;  %v3437_v40 = vld [vmem:[%s18695_s22 + $0x454] sm:$0xf] }
 0x1c9   : > { %v5954_v45 = vsel %vm18697_vm2, %v5952_v60, %v5953_v22 }
 0x1cb   : > { %16879 = vmatmul.mubr.msk.bf16.gmra.mrb[80].mxu0 %vm873_vm6, %v15042_v38  ;;  %v15044_v38 = vcombine.low %v5937_v7, %v5940_v20  ;;  %v5964_v7 = vrot.slane %v5735_v36, 5  ;;  %v5738_v36 = vld [vmem:[%s18695_s22 + $0x274] sm:$0xf] }
 0x1cc   : > { %16735 = vmatmul.mubr.msk.bf16.gmra.mrb[16].mxu1 %vm873_vm6, %v20553_v55  ;;  %16882 = vmatprep.mubr.msk.bf16.mxu0 %vm873_vm6, %v15043_v17  ;;  %v5728_v55 = vld [vmem:[%s18695_s22 + $0x21c] sm:$0xe]  ;;  %v15045_v17 = vcombine.low %v5944_v9, %v5947_v52  ;;  %v5961_v9 = vsel %vm18697_vm2, %v5959_v51, %v5960_v53  ;;  %v5734_v52 = vld [vmem:[%s18695_s22 + $0x254] sm:$0xe] }
 0x1cd   : > { %16738 = vmatprep.mubr.msk.bf16.mxu1 %vm873_vm6, %v14847_v18  ;;  %v15026_v62 = vrot.slane %v5728_v55, 9  ;;  %v15027_v18 = vrot.slane %v5731_v26, 9  ;;  %v5736_v55 = vld [vmem:[%s18695_s22 + $0x25c] sm:$0x1]  ;;  %v14850_v26 = vcombine.low %v18579_v23, %v3435_v21  ;;  %v15028_v24 = vrot.slane %v5734_v52, 9 }
 0x1ce   : > { %v18478_v53 = vld [vmem:[%s18695_s22 + $0x1f8] sm:$0xff]   ;;  %v6313_v21 = vrot.slane %v5738_v36, 5  ;;  %v5744_v23 = vld [vmem:[%s18695_s22 + $0x2ac] sm:$0xf] }
 0x1cf   : > { %v5951_v35 = vsel %vm18697_vm2, %v15026_v62, %v5950_v61  ;;  %v5958_v20 = vsel %vm18697_vm2, %v15027_v18, %v5957_v25  ;;  %v18580_v62 = vld [vmem:[%s18695_s22 + $0x434] sm:$0xf]  ;;  %v5965_v25 = vsel %vm18697_vm2, %v15028_v24, %v5964_v7  ;;  %v18581_v18 = vld [vmem:[%s18695_s22 + $0x450] sm:$0xf] }
 0x1d0   : > { %v15046_v61 = vcombine.low %v5951_v35, %v5954_v45  ;;  %v15047_v50 = vcombine.low %v5958_v20, %v5961_v9  ;;  %v14851_v60 = vcombine.low %v18580_v62, %v3436_v43  ;;  %v14852_v51 = vcombine.low %v18581_v18, %v3437_v40  ;;  %v5737_v35 = vld [vmem:[%s18695_s22 + $0x270] sm:$0xe]  ;;  %v5739_v45 = vld [vmem:[%s18695_s22 + $0x278] sm:$0x1]  ;;  %v5742_v62 = vld [vmem:[%s18695_s22 + $0x294] sm:$0x1] }
 0x1d1   : > { %v18481_v20 = vld [vmem:[%s18695_s22 + $0x230] sm:$0xff]   ;;  %v15067_v9 = vrot.slane %v5737_v35, 9  ;;  %v6315_v52 = vrot.slane %v6313_v21, 4  ;;  %v6323_v36 = vrot.slane %v5742_v62, 5 }
 0x1d2   : > { %v5741_v43 = vld [vmem:[%s18695_s22 + $0x290] sm:$0xf] }
 0x1d3   : > { %16883 = vmatmul.mubr.msk.bf16.gmra.mrb[84].mxu0 %vm873_vm6, %v15044_v38  ;;  %v5967_v38 = vrot.slane %v5736_v55, 5  ;;  %v6316_v55 = vrot.slane %v5739_v45, 5  ;;  %v6320_v24 = vrot.slane %v5741_v43, 5  ;;  %v18482_v40 = vld [vmem:[%s18695_s22 + $0x24c] sm:$0xff]  }
 0x1d4   : > { %16739 = vmatmul.mubr.msk.bf16.gmra.mrb[20].mxu1 %vm873_vm6, %v14848_v8  ;;  %16886 = vmatprep.mubr.msk.bf16.mxu0 %vm873_vm6, %v15045_v17  ;;  %v5966_v8 = vrot.slane %v5964_v7, 4  ;;  %v18480_v7 = vld [vmem:[%s18695_s22 + $0x214] sm:$0xff]  }
 0x1d5   : > { %16742 = vmatprep.mubr.msk.bf16.mxu1 %vm873_vm6, %v14849_v6 }
 0x1d6   : > { %v5968_v22 = vsel %vm18697_vm2, %v5966_v8, %v5967_v38  ;;  %v6314_v8 = vsel %vm18697_vm2, %v15067_v9, %v6313_v21  ;;  %v5740_v38 = vld [vmem:[%s18695_s22 + $0x28c] sm:$0xe] }
 0x1d7   : > { %v15048_v6 = vcombine.low %v5965_v25, %v5968_v22  ;;  %v5743_v25 = vld [vmem:[%s18695_s22 + $0x2a8] sm:$0xe]  ;;  %v5745_v22 = vld [vmem:[%s18695_s22 + $0x2b0] sm:$0x1] }
 0x1d8   : > { %v18483_v21 = vld [vmem:[%s18695_s22 + $0x268] sm:$0xff]   ;;  %v15069_v35 = vrot.slane %v5743_v25, 9 }
 0x1db   : > { %16887 = vmatmul.mubr.msk.bf16.gmra.mrb[88].mxu0 %vm873_vm6, %v15046_v61 }
 0x1dc   : > { %16743 = vmatmul.mubr.msk.bf16.gmra.mrb[24].mxu1 %vm873_vm6, %v14850_v26  ;;  %16890 = vmatprep.mubr.msk.bf16.mxu0 %vm873_vm6, %v15047_v50  ;;  %v18497_v26 = vld [vmem:[%s22985_s3 + $0x78] sm:$0xff]  }
 0x1dd   : > { %16746 = vmatprep.mubr.msk.bf16.mxu1 %vm873_vm6, %v14851_v60  ;;  %v6327_v60 = vrot.slane %v5744_v23, 5  ;;  %v5746_v23 = vld [vmem:[%s18695_s22 + $0x2c4] sm:$0xe] }
 0x1de   : > { %v15070_v25 = vrot.slane %v5746_v23, 9 }
 0x1df   : > { %v6329_v45 = vrot.slane %v6327_v60, 4 }
 0x1e3   : > { %16891 = vmatmul.mubr.msk.bf16.gmra.mrb[92].mxu0 %vm873_vm6, %v15048_v6 }
 0x1e4   : > { %16747 = vmatmul.mubr.msk.bf16.gmra.mrb[28].mxu1 %vm873_vm6, %v14852_v51  ;;  %16898 = vmatprep.mubr.msk.bf16.mxu0 %vm873_vm6, %v15045_v17  ;;  %v18488_v17 = vld [vmem:[%s22986_s4 + $0x8] sm:$0xff]   ;;  %v15068_v51 = vrot.slane %v5740_v38, 9 }
 0x1e5   : > { %17078 = vmatprep.mubr.msk.bf16.mxu1 %vm873_vm6, %v18478_v53  ;;  %v6322_v53 = vrot.slane %v6320_v24, 4  ;;  %v18484_v38 = vld [vmem:[%s18695_s22 + $0x284] sm:$0xff]  }
 0x1e6   : > { %v6321_v9 = vsel %vm18697_vm2, %v15068_v51, %v6320_v24  ;;  %v5751_v24 = vld [vmem:[%s18695_s22 + $0x2e8] sm:$0x1] }
 0x1eb   : > { %16899 = vmatmul.mubr.msk.bf16.vlgmr.msra.gmra.mrb[64].mxu0 %vm873_vm6, %v15046_v61  ;;  %v6317_v61 = vsel %vm18697_vm2, %v6315_v52, %v6316_v55  ;;  %v6324_v52 = vsel %vm18697_vm2, %v6322_v53, %v6323_v36  ;;  %v6344_v53 = vrot.slane %v5751_v24, 5  ;;  %v5753_v36 = vld [vmem:[%s18695_s22 + $0x300] sm:$0xf] }
 0x1ec   : > { %17079 = vmatmul.mubr.msk.bf16.vlgmr.msra.gmra.mrb[32].mxu1 %vm873_vm6, %v18480_v7  ;;  %16902 = vmatprep.mubr.msk.bf16.mxu0 %vm873_vm6, %v15047_v50  ;;  %v20799_v50 = vld [vmem:[%s22985_s3 + $0x20] sm:$0xff]   ;;  %v15083_v18 = vcombine.low %v6314_v8, %v6317_v61  ;;  %v5747_v7 = vld [vmem:[%s18695_s22 + $0x2c8] sm:$0xf]  ;;  %v15084_v61 = vcombine.low %v6321_v9, %v6324_v52  ;;  %v5752_v9 = vld [vmem:[%s18695_s22 + $0x2fc] sm:$0xe] }
 0x1ed   : > { %17111 = vmatpush3.bf16.msra.mxu1 %v20620_v2  ;;  %17082 = vmatprep.mubr.msk.bf16.mxu1 %vm873_vm6, %v18481_v20  ;;  %v20794_v2 = vld [vmem:[%s22986_s4 + $0x60] sm:$0xff]   ;;  %v6334_v55 = vrot.slane %v5747_v7, 5  ;;  %v15072_v24 = vrot.slane %v5752_v9, 9 }
 0x1ee   : > { %17112 = vmatprep.subr.bf16.mxu1 %v18488_v17  ;;  %16931 = vmatpush3.bf16.msra.mxu0 %v20627_v39  ;;  %v6330_v39 = vrot.slane %v5745_v22, 5  ;;  %v5750_v20 = vld [vmem:[%s18695_s22 + $0x2e4] sm:$0xf]  ;;  %v5749_v8 = vld [vmem:[%s18695_s22 + $0x2e0] sm:$0xe] }
 0x1ef   : > { %16932 = vmatprep.subr.bf16.mxu0 %v18497_v26  ;;  %v6336_v22 = vrot.slane %v6334_v55, 4  ;;  %v5754_v52 = vld [vmem:[%s18695_s22 + $0x304] sm:$0x1] }
 0x1f0   : > { %v6331_v43 = vsel %vm18697_vm2, %v6329_v45, %v6330_v39  ;;  %v6348_v39 = vrot.slane %v5753_v36, 5 }
 0x1f1   : > { %17113 = vmatpush3.bf16.msra.mxu1 %v18488_v17  ;;  %v5748_v17 = vld [vmem:[%s18695_s22 + $0x2cc] sm:$0x1] }
 0x1f2   : > { %16933 = vmatpush3.bf16.msra.mxu0 %v18497_v26  ;;  %17146 = vmatprep.subr.bf16.mxu1 %v20794_v2  ;;  %v6341_v26 = vrot.slane %v5750_v20, 5 }
 0x1f3   : > { %16903 = vmatmul.mubr.msk.bf16.gmra.mrb[68].mxu0 %vm873_vm6, %v15048_v6  ;;  %16966 = vmatprep.subr.bf16.mxu0 %v20799_v50  ;;  %v6328_v6 = vsel %vm18697_vm2, %v15069_v35, %v6327_v60  ;;  %v15071_v60 = vrot.slane %v5749_v8, 9  ;;  %v6335_v35 = vsel %vm18697_vm2, %v15070_v25, %v6334_v55  ;;  %v5757_v55 = vld [vmem:[%s18695_s22 + $0x320] sm:$0x1] }
 0x1f4   : > { %17083 = vmatmul.mubr.msk.bf16.gmra.mrb[36].mxu1 %vm873_vm6, %v18482_v40  ;;  %16906 = vmatprep.mubr.msk.bf16.mxu0 %vm873_vm6, %v15083_v18  ;;  %v15085_v62 = vcombine.low %v6328_v6, %v6331_v43  ;;  %v6337_v40 = vrot.slane %v5748_v17, 5  ;;  %v18485_v18 = vld [vmem:[%s18695_s22 + $0x2a0] sm:$0xff]   ;;  %v6343_v51 = vrot.slane %v6341_v26, 4  ;;  %v5755_v43 = vld [vmem:[%s18695_s22 + $0x318] sm:$0xe] }
 0x1f5   : > { %17086 = vmatprep.mubr.msk.bf16.mxu1 %vm873_vm6, %v18483_v21  ;;  %v5756_v21 = vld [vmem:[%s18695_s22 + $0x31c] sm:$0xf]  ;;  %v6342_v7 = vsel %vm18697_vm2, %v15071_v60, %v6341_v26  ;;  %v15073_v26 = vrot.slane %v5755_v43, 9  ;;  %v6349_v60 = vsel %vm18697_vm2, %v15072_v24, %v6348_v39 }
 0x1f6   : > { %v6338_v45 = vsel %vm18697_vm2, %v6336_v22, %v6337_v40  ;;  %v6345_v20 = vsel %vm18697_vm2, %v6343_v51, %v6344_v53  ;;  %v6355_v6 = vrot.slane %v5756_v21, 5  ;;  %v18486_v17 = vld [vmem:[%s18695_s22 + $0x2bc] sm:$0xff]   ;;  %v6358_v22 = vrot.slane %v5757_v55, 5  ;;  %v5759_v40 = vld [vmem:[%s18695_s22 + $0x338] sm:$0xf] }
 0x1f7   : > { %v15086_v23 = vcombine.low %v6335_v35, %v6338_v45  ;;  %v15087_v8 = vcombine.low %v6342_v7, %v6345_v20  ;;  %v6362_v53 = vrot.slane %v5759_v40, 5  ;;  %v5758_v35 = vld [vmem:[%s18695_s22 + $0x334] sm:$0xe]  ;;  %v5760_v45 = vld [vmem:[%s18695_s22 + $0x33c] sm:$0x1] }
 0x1f8   : > { %v6357_v25 = vrot.slane %v6355_v6, 4  ;;  %v6356_v36 = vsel %vm18697_vm2, %v15073_v26, %v6355_v6  ;;  %v5761_v20 = vld [vmem:[%s18695_s22 + $0x350] sm:$0xe]  ;;  %v15074_v55 = vrot.slane %v5758_v35, 9  ;;  %v5769_v35 = vld [vmem:[%s18695_s22 + $0x390] sm:$0x1] }
 0x1f9   : > { %v15075_v6 = vrot.slane %v5761_v20, 9 }
 0x1fa   : > { %v6359_v21 = vsel %vm18697_vm2, %v6357_v25, %v6358_v22  ;;  %v6363_v26 = vsel %vm18697_vm2, %v15074_v55, %v6362_v53 }
 0x1fb   : > { %16907 = vmatmul.mubr.msk.bf16.gmra.mrb[72].mxu0 %vm873_vm6, %v15084_v61  ;;  %v6350_v61 = vrot.slane %v6348_v39, 4  ;;  %v5763_v39 = vld [vmem:[%s18695_s22 + $0x358] sm:$0x1]  ;;  %v15089_v43 = vcombine.low %v6356_v36, %v6359_v21  ;;  %v5767_v21 = vld [vmem:[%s18695_s22 + $0x388] sm:$0xe] }
 0x1fc   : > { %17087 = vmatmul.mubr.msk.bf16.gmra.mrb[40].mxu1 %vm873_vm6, %v18484_v38  ;;  %16910 = vmatprep.mubr.msk.bf16.mxu0 %vm873_vm6, %v15085_v62  ;;  %v6351_v38 = vrot.slane %v5754_v52, 5  ;;  %v18487_v62 = vld [vmem:[%s18695_s22 + $0x2d8] sm:$0xff]   ;;  %v15077_v55 = vrot.slane %v5767_v21, 9  ;;  %v18494_v21 = vld [vmem:[%s18695_s22 + $0x380] sm:$0xff]  }
 0x1fd   : > { %17090 = vmatprep.mubr.msk.bf16.mxu1 %vm873_vm6, %v18485_v18  ;;  %v5762_v18 = vld [vmem:[%s18695_s22 + $0x354] sm:$0xf] }
 0x1fe   : > { %v6352_v51 = vsel %vm18697_vm2, %v6350_v61, %v6351_v38  ;;  %v6369_v7 = vrot.slane %v5762_v18, 5  ;;  %v18489_v52 = vld [vmem:[%s18695_s22 + $0x2f4] sm:$0xff]   ;;  %v6372_v61 = vrot.slane %v5763_v39, 5  ;;  %v5765_v38 = vld [vmem:[%s18695_s22 + $0x370] sm:$0xf] }
 0x1ff   : > { %v15088_v9 = vcombine.low %v6349_v60, %v6352_v51  ;;  %v6376_v22 = vrot.slane %v5765_v38, 5  ;;  %v5764_v60 = vld [vmem:[%s18695_s22 + $0x36c] sm:$0xe]  ;;  %v5766_v51 = vld [vmem:[%s18695_s22 + $0x374] sm:$0x1] }
 0x200   : > { %v6371_v24 = vrot.slane %v6369_v7, 4  ;;  %v6370_v40 = vsel %vm18697_vm2, %v15075_v6, %v6369_v7  ;;  %v15076_v39 = vrot.slane %v5764_v60, 9 }
 0x202   : > { %v6373_v18 = vsel %vm18697_vm2, %v6371_v24, %v6372_v61 }
 0x203   : > { %16911 = vmatmul.mubr.msk.bf16.gmra.mrb[76].mxu0 %vm873_vm6, %v15086_v23  ;;  %v6364_v23 = vrot.slane %v6362_v53, 4  ;;  %v15091_v20 = vcombine.low %v6370_v40, %v6373_v18  ;;  %v18493_v40 = vld [vmem:[%s18695_s22 + $0x364] sm:$0xff]  }
 0x204   : > { %17091 = vmatmul.mubr.msk.bf16.gmra.mrb[44].mxu1 %vm873_vm6, %v18486_v17  ;;  %16914 = vmatprep.mubr.msk.bf16.mxu0 %vm873_vm6, %v15087_v8  ;;  %v6365_v17 = vrot.slane %v5760_v45, 5  ;;  %v18490_v8 = vld [vmem:[%s18695_s22 + $0x310] sm:$0xff]  }
 0x205   : > { %17094 = vmatprep.mubr.msk.bf16.mxu1 %vm873_vm6, %v18487_v62  ;;  %v5768_v62 = vld [vmem:[%s18695_s22 + $0x38c] sm:$0xf] }
 0x206   : > { %v6366_v25 = vsel %vm18697_vm2, %v6364_v23, %v6365_v17  ;;  %v6383_v36 = vrot.slane %v5768_v62, 5  ;;  %v18491_v45 = vld [vmem:[%s18695_s22 + $0x32c] sm:$0xff]   ;;  %v6386_v23 = vrot.slane %v5769_v35, 5  ;;  %v5771_v17 = vld [vmem:[%s18695_s22 + $0x3a8] sm:$0xf] }
 0x207   : > { %v15090_v53 = vcombine.low %v6363_v26, %v6366_v25  ;;  %v6390_v24 = vrot.slane %v5771_v17, 5  ;;  %v5770_v62 = vld [vmem:[%s18695_s22 + $0x3a4] sm:$0xe]  ;;  %v5772_v26 = vld [vmem:[%s18695_s22 + $0x3ac] sm:$0x1] }
 0x208   : > { %v6385_v7 = vrot.slane %v6383_v36, 4  ;;  %v6384_v61 = vsel %vm18697_vm2, %v15077_v55, %v6383_v36  ;;  %v15078_v18 = vrot.slane %v5770_v62, 9  ;;  %v5775_v55 = vld [vmem:[%s18695_s22 + $0x3c8] sm:$0x1] }
 0x209   : > { %v6392_v60 = vrot.slane %v6390_v24, 4 }
 0x20a   : > { %v6387_v38 = vsel %vm18697_vm2, %v6385_v7, %v6386_v23  ;;  %v6391_v36 = vsel %vm18697_vm2, %v15078_v18, %v6390_v24  ;;  %v18500_v7 = vld [vmem:[%s18695_s22 + $0x1c] sm:$0xff]   ;;  %v5778_v18 = vld [vmem:[%s18695_s22 + $0x3e4] sm:$0x1] }
 0x20b   : > { %16915 = vmatmul.mubr.msk.bf16.gmra.mrb[80].mxu0 %vm873_vm6, %v15088_v9  ;;  %v6378_v9 = vrot.slane %v6376_v22, 4  ;;  %v18501_v23 = vld [vmem:[%s18695_s22 + $0x38] sm:$0xff]   ;;  %v5777_v24 = vld [vmem:[%s18695_s22 + $0x3e0] sm:$0xf] }
 0x20c   : > { %17095 = vmatmul.mubr.msk.bf16.gmra.mrb[48].mxu1 %vm873_vm6, %v18489_v52  ;;  %16918 = vmatprep.mubr.msk.bf16.mxu0 %vm873_vm6, %v15089_v43  ;;  %v6379_v52 = vrot.slane %v5766_v51, 5  ;;  %v18492_v43 = vld [vmem:[%s18695_s22 + $0x348] sm:$0xff]   ;;  %v6393_v51 = vrot.slane %v5772_v26, 5  ;;  %v6722_v62 = vrot.slane %v5777_v24, 5 }
 0x20d   : > { %17098 = vmatprep.mubr.msk.bf16.mxu1 %vm873_vm6, %v18490_v8  ;;  %v6377_v8 = vsel %vm18697_vm2, %v15076_v39, %v6376_v22  ;;  %v15093_v22 = vcombine.low %v6384_v61, %v6387_v38  ;;  %v18498_v39 = vld [vmem:[%s18695_s22] sm:$0xff]   ;;  %v5780_v61 = vld [vmem:[%s18695_s22 + $0x3fc] sm:$0xf]  ;;  %v18517_v38 = vld [vmem:[%s22985_s3 + $0x28] sm:$0xff]  }
 0x20e   : > { %v6380_v6 = vsel %vm18697_vm2, %v6378_v9, %v6379_v52  ;;  %v6394_v35 = vsel %vm18697_vm2, %v6392_v60, %v6393_v51  ;;  %v5774_v9 = vld [vmem:[%s18695_s22 + $0x3c4] sm:$0xf]  ;;  %v6729_v60 = vrot.slane %v5780_v61, 5  ;;  %v5779_v51 = vld [vmem:[%s18695_s22 + $0x3f8] sm:$0xe] }
 0x20f   : > { %v15092_v25 = vcombine.low %v6377_v8, %v6380_v6  ;;  %v6715_v52 = vrot.slane %v5774_v9, 5  ;;  %v6718_v6 = vrot.slane %v5775_v55, 5  ;;  %v6725_v9 = vrot.slane %v5778_v18, 5  ;;  %v5782_v61 = vld [vmem:[%s18695_s22 + $0x414] sm:$0xe] }
 0x210   : > { %v6731_v55 = vrot.slane %v6729_v60, 4 }
 0x211   : > { %v6717_v8 = vrot.slane %v6715_v52, 4 }
 0x213   : > { %16919 = vmatmul.mubr.msk.bf16.gmra.mrb[84].mxu0 %vm873_vm6, %v15090_v53  ;;  %v15094_v53 = vcombine.low %v6391_v36, %v6394_v35  ;;  %v18502_v36 = vld [vmem:[%s18695_s22 + $0x54] sm:$0xff]  }
 0x214   : > { %17099 = vmatmul.mubr.msk.bf16.gmra.mrb[52].mxu1 %vm873_vm6, %v18491_v45  ;;  %16922 = vmatprep.mubr.msk.bf16.mxu0 %vm873_vm6, %v15091_v20  ;;  %v18496_v45 = vld [vmem:[%s18695_s22 + $0x39c] sm:$0xff]  }
 0x215   : > { %17102 = vmatprep.mubr.msk.bf16.mxu1 %vm873_vm6, %v18492_v43  ;;  %v5773_v43 = vld [vmem:[%s18695_s22 + $0x3c0] sm:$0xe] }
 0x216   : > { %v15113_v17 = vrot.slane %v5773_v43, 9  ;;  %v15115_v43 = vrot.slane %v5779_v51, 9  ;;  %v15116_v51 = vrot.slane %v5782_v61, 9 }
 0x218   : > { %v6716_v26 = vsel %vm18697_vm2, %v15113_v17, %v6715_v52  ;;  %v18503_v52 = vld [vmem:[%s18695_s22 + $0x70] sm:$0xff]  }
 0x21b   : > { %16923 = vmatmul.mubr.msk.bf16.gmra.mrb[88].mxu0 %vm873_vm6, %v15092_v25 }
 0x21c   : > { %17103 = vmatmul.mubr.msk.bf16.gmra.mrb[56].mxu1 %vm873_vm6, %v18493_v40  ;;  %16926 = vmatprep.mubr.msk.bf16.mxu0 %vm873_vm6, %v15093_v22  ;;  %v5776_v40 = vld [vmem:[%s18695_s22 + $0x3dc] sm:$0xe] }
 0x21d   : > { %17106 = vmatprep.mubr.msk.bf16.mxu1 %vm873_vm6, %v18494_v21  ;;  %v5781_v21 = vld [vmem:[%s18695_s22 + $0x400] sm:$0x1] }
 0x223   : > { %16927 = vmatmul.mubr.msk.bf16.gmra.mrb[92].mxu0 %vm873_vm6, %v15094_v53 }
 0x224   : > { %17107 = vmatmul.mubr.msk.bf16.gmra.mrb[60].mxu1 %vm873_vm6, %v18496_v45  ;;  %16934 = vmatprep.mubr.msk.bf16.mxu0 %vm873_vm6, %v15091_v20  ;;  %v18508_v20 = vld [vmem:[%s22986_s4 + $0x68] sm:$0xff]   ;;  %v15114_v45 = vrot.slane %v5776_v40, 9 }
 0x225   : > { %17114 = vmatprep.mubr.msk.bf16.mxu1 %vm873_vm6, %v18498_v39  ;;  %v6724_v39 = vrot.slane %v6722_v62, 4  ;;  %v18504_v40 = vld [vmem:[%s18695_s22 + $0x8c] sm:$0xff]  }
 0x226   : > { %v6723_v17 = vsel %vm18697_vm2, %v15114_v45, %v6722_v62  ;;  %v5787_v62 = vld [vmem:[%s18695_s22 + $0x438] sm:$0x1] }
 0x22b   : > { %16935 = vmatmul.mubr.msk.bf16.vlgmr.msra.gmra.mrb[64].mxu0 %vm873_vm6, %v15092_v25  ;;  %v6719_v25 = vsel %vm18697_vm2, %v6717_v8, %v6718_v6  ;;  %v6726_v8 = vsel %vm18697_vm2, %v6724_v39, %v6725_v9  ;;  %v6746_v39 = vrot.slane %v5787_v62, 5  ;;  %v5789_v9 = vld [vmem:[%s18695_s22 + $0x450] sm:$0xf] }
 0x22c   : > { %17115 = vmatmul.mubr.msk.bf16.vlgmr.msra.gmra.mrb[32].mxu1 %vm873_vm6, %v18500_v7  ;;  %16938 = vmatprep.mubr.msk.bf16.mxu0 %vm873_vm6, %v15093_v22  ;;  %v20951_v22 = vld [vmem:[%s22985_s3 + $0x50] sm:$0xff]   ;;  %v15129_v35 = vcombine.low %v6716_v26, %v6719_v25  ;;  %v5783_v7 = vld [vmem:[%s18695_s22 + $0x418] sm:$0xf]  ;;  %v15130_v25 = vcombine.low %v6723_v17, %v6726_v8  ;;  %v5788_v17 = vld [vmem:[%s18695_s22 + $0x44c] sm:$0xe] }
 0x22d   : > { %17147 = vmatpush3.bf16.msra.mxu1 %v20794_v2  ;;  %17118 = vmatprep.mubr.msk.bf16.mxu1 %vm873_vm6, %v18501_v23  ;;  %v20946_v2 = vld [vmem:[%s22986_s4 + $0x10] sm:$0xff]   ;;  %v6736_v6 = vrot.slane %v5783_v7, 5  ;;  %v15118_v62 = vrot.slane %v5788_v17, 9 }
 0x22e   : > { %17148 = vmatprep.subr.bf16.mxu1 %v18508_v20  ;;  %16967 = vmatpush3.bf16.msra.mxu0 %v20799_v50  ;;  %v6732_v50 = vrot.slane %v5781_v21, 5  ;;  %v5786_v23 = vld [vmem:[%s18695_s22 + $0x434] sm:$0xf]  ;;  %v5785_v26 = vld [vmem:[%s18695_s22 + $0x430] sm:$0xe] }
 0x22f   : > { %16968 = vmatprep.subr.bf16.mxu0 %v18517_v38  ;;  %v6738_v21 = vrot.slane %v6736_v6, 4  ;;  %v5790_v8 = vld [vmem:[%s18695_s22 + $0x454] sm:$0x1] }
 0x230   : > { %v6733_v24 = vsel %vm18697_vm2, %v6731_v55, %v6732_v50  ;;  %v6750_v50 = vrot.slane %v5789_v9, 5 }
 0x231   : > { %17149 = vmatpush3.bf16.msra.mxu1 %v18508_v20  ;;  %v5784_v20 = vld [vmem:[%s18695_s22 + $0x41c] sm:$0x1] }
 0x232   : > { %16969 = vmatpush3.bf16.msra.mxu0 %v18517_v38  ;;  %17182 = vmatprep.subr.bf16.mxu1 %v20946_v2  ;;  %v6743_v38 = vrot.slane %v5786_v23, 5 }
 0x233   : > { %16939 = vmatmul.mubr.msk.bf16.gmra.mrb[68].mxu0 %vm873_vm6, %v15094_v53  ;;  %17002 = vmatprep.subr.bf16.mxu0 %v20951_v22  ;;  %v6730_v53 = vsel %vm18697_vm2, %v15115_v43, %v6729_v60  ;;  %v15117_v60 = vrot.slane %v5785_v26, 9  ;;  %v6737_v43 = vsel %vm18697_vm2, %v15116_v51, %v6736_v6  ;;  %v5793_v6 = vld [vmem:[%s18695_s22 + $0x470] sm:$0x1] }
 0x234   : > { %17119 = vmatmul.mubr.msk.bf16.gmra.mrb[36].mxu1 %vm873_vm6, %v18502_v36  ;;  %16942 = vmatprep.mubr.msk.bf16.mxu0 %vm873_vm6, %v15129_v35  ;;  %v15131_v18 = vcombine.low %v6730_v53, %v6733_v24  ;;  %v6739_v36 = vrot.slane %v5784_v20, 5  ;;  %v18505_v35 = vld [vmem:[%s18695_s22 + $0xa8] sm:$0xff]   ;;  %v6745_v45 = vrot.slane %v6743_v38, 4 }
 0x235   : > { %17122 = vmatprep.mubr.msk.bf16.mxu1 %vm873_vm6, %v18503_v52  ;;  %v5792_v52 = vld [vmem:[%s18695_s22 + $0x46c] sm:$0xf]  ;;  %v6744_v7 = vsel %vm18697_vm2, %v15117_v60, %v6743_v38  ;;  %v5791_v24 = vld [vmem:[%s18695_s22 + $0x468] sm:$0xe]  ;;  %v6751_v60 = vsel %vm18697_vm2, %v15118_v62, %v6750_v50 }
 0x236   : > { %v6740_v55 = vsel %vm18697_vm2, %v6738_v21, %v6739_v36  ;;  %v6747_v23 = vsel %vm18697_vm2, %v6745_v45, %v6746_v39  ;;  %v6757_v53 = vrot.slane %v5792_v52, 5  ;;  %v18506_v20 = vld [vmem:[%s18695_s22 + $0xc4] sm:$0xff]   ;;  %v15119_v38 = vrot.slane %v5791_v24, 9 }
 0x237   : > { %v15132_v61 = vcombine.low %v6737_v43, %v6740_v55  ;;  %v15133_v26 = vcombine.low %v6744_v7, %v6747_v23  ;;  %v6760_v21 = vrot.slane %v5793_v6, 5  ;;  %v5795_v36 = vld [vmem:[%s18695_s22 + $0x488] sm:$0xf]  ;;  %v5794_v43 = vld [vmem:[%s18695_s22 + $0x484] sm:$0xe] }
 0x238   : > { %v6759_v51 = vrot.slane %v6757_v53, 4  ;;  %v6764_v39 = vrot.slane %v5795_v36, 5  ;;  %v6758_v9 = vsel %vm18697_vm2, %v15119_v38, %v6757_v53  ;;  %v5796_v55 = vld [vmem:[%s18695_s22 + $0x48c] sm:$0x1]  ;;  %v5797_v23 = vld [vmem:[%s18695_s22 + $0x4a0] sm:$0xe] }
 0x239   : > { %v15120_v6 = vrot.slane %v5794_v43, 9  ;;  %v15121_v53 = vrot.slane %v5797_v23, 9 }
 0x23a   : > { %v6761_v52 = vsel %vm18697_vm2, %v6759_v51, %v6760_v21 }
 0x23b   : > { %16943 = vmatmul.mubr.msk.bf16.gmra.mrb[72].mxu0 %vm873_vm6, %v15130_v25  ;;  %v6752_v25 = vrot.slane %v6750_v50, 4  ;;  %v5799_v50 = vld [vmem:[%s18695_s22 + $0x4a8] sm:$0x1]  ;;  %v15135_v24 = vcombine.low %v6758_v9, %v6761_v52  ;;  %v6765_v38 = vsel %vm18697_vm2, %v15120_v6, %v6764_v39  ;;  %v5803_v52 = vld [vmem:[%s18695_s22 + $0x4d8] sm:$0xe] }
 0x23c   : > { %17123 = vmatmul.mubr.msk.bf16.gmra.mrb[40].mxu1 %vm873_vm6, %v18504_v40  ;;  %16946 = vmatprep.mubr.msk.bf16.mxu0 %vm873_vm6, %v15131_v18  ;;  %v6753_v40 = vrot.slane %v5790_v8, 5  ;;  %v18507_v18 = vld [vmem:[%s18695_s22 + $0xe0] sm:$0xff]  }
 0x23d   : > { %17126 = vmatprep.mubr.msk.bf16.mxu1 %vm873_vm6, %v18505_v35  ;;  %v5798_v35 = vld [vmem:[%s18695_s22 + $0x4a4] sm:$0xf]  ;;  %v18509_v8 = vld [vmem:[%s18695_s22 + $0xfc] sm:$0xff]  }
 0x23e   : > { %v6754_v45 = vsel %vm18697_vm2, %v6752_v25, %v6753_v40  ;;  %v6771_v7 = vrot.slane %v5798_v35, 5  ;;  %v6774_v25 = vrot.slane %v5799_v50, 5  ;;  %v5801_v40 = vld [vmem:[%s18695_s22 + $0x4c0] sm:$0xf] }
 0x23f   : > { %v15134_v17 = vcombine.low %v6751_v60, %v6754_v45  ;;  %v6778_v21 = vrot.slane %v5801_v40, 5  ;;  %v5800_v60 = vld [vmem:[%s18695_s22 + $0x4bc] sm:$0xe]  ;;  %v5802_v45 = vld [vmem:[%s18695_s22 + $0x4c4] sm:$0x1] }
 0x240   : > { %v6773_v62 = vrot.slane %v6771_v7, 4  ;;  %v6772_v36 = vsel %vm18697_vm2, %v15121_v53, %v6771_v7  ;;  %v15122_v50 = vrot.slane %v5800_v60, 9  ;;  %v15123_v7 = vrot.slane %v5803_v52, 9 }
 0x242   : > { %v6775_v35 = vsel %vm18697_vm2, %v6773_v62, %v6774_v25  ;;  %v6779_v53 = vsel %vm18697_vm2, %v15122_v50, %v6778_v21 }
 0x243   : > { %16947 = vmatmul.mubr.msk.bf16.gmra.mrb[76].mxu0 %vm873_vm6, %v15132_v61  ;;  %v6766_v61 = vrot.slane %v6764_v39, 4  ;;  %v5805_v39 = vld [vmem:[%s18695_s22 + $0x4e0] sm:$0x1]  ;;  %v15137_v23 = vcombine.low %v6772_v36, %v6775_v35  ;;  %v7079_v35 = vld [vmem:[%s18695_s22 + $0xb4] sm:$0x8] }
 0x244   : > { %17127 = vmatmul.mubr.msk.bf16.gmra.mrb[44].mxu1 %vm873_vm6, %v18506_v20  ;;  %16950 = vmatprep.mubr.msk.bf16.mxu0 %vm873_vm6, %v15133_v26  ;;  %v6767_v20 = vrot.slane %v5796_v55, 5  ;;  %v18510_v26 = vld [vmem:[%s18695_s22 + $0x118] sm:$0xff]  }
 0x245   : > { %17130 = vmatprep.mubr.msk.bf16.mxu1 %vm873_vm6, %v18507_v18  ;;  %v5804_v18 = vld [vmem:[%s18695_s22 + $0x4dc] sm:$0xf]  ;;  %v18511_v55 = vld [vmem:[%s18695_s22 + $0x134] sm:$0xff]  }
 0x246   : > { %v6768_v51 = vsel %vm18697_vm2, %v6766_v61, %v6767_v20  ;;  %v6785_v9 = vrot.slane %v5804_v18, 5  ;;  %v6788_v61 = vrot.slane %v5805_v39, 5  ;;  %v5807_v20 = vld [vmem:[%s18695_s22 + $0x4f8] sm:$0xf] }
 0x247   : > { %v15136_v43 = vcombine.low %v6765_v38, %v6768_v51  ;;  %v6792_v25 = vrot.slane %v5807_v20, 5  ;;  %v5806_v38 = vld [vmem:[%s18695_s22 + $0x4f4] sm:$0xe]  ;;  %v5808_v51 = vld [vmem:[%s18695_s22 + $0x4fc] sm:$0x1] }
 0x248   : > { %v6787_v6 = vrot.slane %v6785_v9, 4  ;;  %v6786_v40 = vsel %vm18697_vm2, %v15123_v7, %v6785_v9  ;;  %v15124_v39 = vrot.slane %v5806_v38, 9  ;;  %v15159_v9 = vrot.slane %v7079_v35, 11 }
 0x24a   : > { %v6789_v18 = vsel %vm18697_vm2, %v6787_v6, %v6788_v61  ;;  %v6793_v7 = vsel %vm18697_vm2, %v15124_v39, %v6792_v25 }
 0x24b   : > { %16951 = vmatmul.mubr.msk.bf16.gmra.mrb[80].mxu0 %vm873_vm6, %v15134_v17  ;;  %v6780_v17 = vrot.slane %v6778_v21, 4  ;;  %v7081_v21 = vld [vmem:[%s18695_s22 + $0xbc] sm:$0x7]  ;;  %v15139_v52 = vcombine.low %v6786_v40, %v6789_v18  ;;  %v7085_v18 = vld [vmem:[%s18695_s22 + $0xec] sm:$0x8] }
 0x24c   : > { %17131 = vmatmul.mubr.msk.bf16.gmra.mrb[48].mxu1 %vm873_vm6, %v18509_v8  ;;  %16954 = vmatprep.mubr.msk.bf16.mxu0 %vm873_vm6, %v15135_v24  ;;  %v6781_v8 = vrot.slane %v5802_v45, 5  ;;  %v18512_v24 = vld [vmem:[%s18695_s22 + $0x150] sm:$0xff]  }
 0x24d   : > { %17134 = vmatprep.mubr.msk.bf16.mxu1 %vm873_vm6, %v18510_v26  ;;  %v7080_v26 = vld [vmem:[%s18695_s22 + $0xb8] sm:$0xf]  ;;  %v18513_v45 = vld [vmem:[%s18695_s22 + $0x16c] sm:$0xff]  }
 0x24e   : > { %v6782_v62 = vsel %vm18697_vm2, %v6780_v17, %v6781_v8  ;;  %v7249_v36 = vrot.slane %v7080_v26, 7  ;;  %v7252_v17 = vrot.slane %v7081_v21, 7  ;;  %v7083_v8 = vld [vmem:[%s18695_s22 + $0xd4] sm:$0xf] }
 0x24f   : > { %v15138_v60 = vcombine.low %v6779_v53, %v6782_v62  ;;  %v7256_v61 = vrot.slane %v7083_v8, 7  ;;  %v7082_v53 = vld [vmem:[%s18695_s22 + $0xd0] sm:$0x8]  ;;  %v7084_v62 = vld [vmem:[%s18695_s22 + $0xd8] sm:$0x7] }
 0x250   : > { %v7251_v50 = vrot.slane %v7249_v36, 4  ;;  %v7250_v20 = vsel %vm19448_vm9, %v15159_v9, %v7249_v36  ;;  %v15160_v21 = vrot.slane %v7082_v53, 11  ;;  %v15161_v36 = vrot.slane %v7085_v18, 11 }
 0x252   : > { %v7253_v26 = vsel %vm19448_vm9, %v7251_v50, %v7252_v17  ;;  %v7257_v9 = vsel %vm19448_vm9, %v15160_v21, %v7256_v61 }
 0x253   : > { %16955 = vmatmul.mubr.msk.bf16.gmra.mrb[84].mxu0 %vm873_vm6, %v15136_v43  ;;  %v6794_v43 = vrot.slane %v6792_v25, 4  ;;  %v7087_v25 = vld [vmem:[%s18695_s22 + $0xf4] sm:$0x7]  ;;  %v15179_v35 = vcombine.low %v7250_v20, %v7253_v26  ;;  %v7091_v26 = vld [vmem:[%s18695_s22 + $0x124] sm:$0x8] }
 0x254   : > { %17135 = vmatmul.mubr.msk.bf16.gmra.mrb[52].mxu1 %vm873_vm6, %v18511_v55  ;;  %16958 = vmatprep.mubr.msk.bf16.mxu0 %vm873_vm6, %v15137_v23  ;;  %v6795_v55 = vrot.slane %v5808_v51, 5  ;;  %v18514_v23 = vld [vmem:[%s18695_s22 + $0x188] sm:$0xff]   ;;  %v15163_v21 = vrot.slane %v7091_v26, 11  ;;  %v21131_v26 = vld [vmem:[%s22985_s3 + $0x80] sm:$0xff]  }
 0x255   : > { %17138 = vmatprep.mubr.msk.bf16.mxu1 %vm873_vm6, %v18512_v24  ;;  %v7086_v24 = vld [vmem:[%s18695_s22 + $0xf0] sm:$0xf]  ;;  %v18516_v51 = vld [vmem:[%s18695_s22 + $0x1a4] sm:$0xff]  }
 0x256   : > { %v6796_v6 = vsel %vm18697_vm2, %v6794_v43, %v6795_v55  ;;  %v7263_v40 = vrot.slane %v7086_v24, 7  ;;  %v7266_v43 = vrot.slane %v7087_v25, 7  ;;  %v7089_v55 = vld [vmem:[%s18695_s22 + $0x10c] sm:$0xf] }
 0x257   : > { %v15140_v38 = vcombine.low %v6793_v7, %v6796_v6  ;;  %v7270_v17 = vrot.slane %v7089_v55, 7  ;;  %v7088_v7 = vld [vmem:[%s18695_s22 + $0x108] sm:$0x8]  ;;  %v7090_v6 = vld [vmem:[%s18695_s22 + $0x110] sm:$0x7] }
 0x258   : > { %v7265_v39 = vrot.slane %v7263_v40, 4  ;;  %v7264_v8 = vsel %vm19448_vm9, %v15161_v36, %v7263_v40  ;;  %v15162_v25 = vrot.slane %v7088_v7, 11  ;;  %v18528_v36 = vld [vmem:[%s22986_s4 + $0x18] sm:$0xff]  }
 0x259   : > { %v7097_v7 = vld [vmem:[%s18695_s22 + $0x15c] sm:$0x8] }
 0x25a   : > { %v7267_v24 = vsel %vm19448_vm9, %v7265_v39, %v7266_v43  ;;  %v18537_v39 = vld [vmem:[%s22985_s3 + $0x58] sm:$0xff]   ;;  %v7271_v43 = vsel %vm19448_vm9, %v15162_v25, %v7270_v17 }
 0x25b   : > { %16959 = vmatmul.mubr.msk.bf16.gmra.mrb[88].mxu0 %vm873_vm6, %v15138_v60  ;;  %v7258_v60 = vrot.slane %v7256_v61, 4  ;;  %v7093_v61 = vld [vmem:[%s18695_s22 + $0x12c] sm:$0x7]  ;;  %v15181_v18 = vcombine.low %v7264_v8, %v7267_v24  ;;  %v7094_v8 = vld [vmem:[%s18695_s22 + $0x140] sm:$0x8] }
 0x25c   : > { %17139 = vmatmul.mubr.msk.bf16.gmra.mrb[56].mxu1 %vm873_vm6, %v18513_v45  ;;  %16962 = vmatprep.mubr.msk.bf16.mxu0 %vm873_vm6, %v15139_v52  ;;  %v7259_v45 = vrot.slane %v7084_v62, 7  ;;  %v18518_v52 = vld [vmem:[%s18695_s22 + $0x3f0] sm:$0xff]   ;;  %v7280_v40 = vrot.slane %v7093_v61, 7  ;;  %v7096_v24 = vld [vmem:[%s18695_s22 + $0x148] sm:$0x7] }
 0x25d   : > { %17142 = vmatprep.mubr.msk.bf16.mxu1 %vm873_vm6, %v18514_v23  ;;  %v7092_v23 = vld [vmem:[%s18695_s22 + $0x128] sm:$0xf]  ;;  %v18520_v62 = vld [vmem:[%s18695_s22 + $0x40c] sm:$0xff]   ;;  %v7287_v25 = vrot.slane %v7096_v24, 7 }
 0x25e   : > { %v7260_v50 = vsel %vm19448_vm9, %v7258_v60, %v7259_v45  ;;  %v7277_v20 = vrot.slane %v7092_v23, 7  ;;  %v7095_v45 = vld [vmem:[%s18695_s22 + $0x144] sm:$0xf] }
 0x25f   : > { %v15180_v53 = vcombine.low %v7257_v9, %v7260_v50  ;;  %v7284_v23 = vrot.slane %v7095_v45, 7  ;;  %v18522_v61 = vld [vmem:[%s18695_s22 + $0x444] sm:$0xff]  }
 0x260   : > { %v7279_v60 = vrot.slane %v7277_v20, 4  ;;  %v7278_v9 = vsel %vm19448_vm9, %v15163_v21, %v7277_v20 }
 0x262   : > { %v7281_v50 = vsel %vm19448_vm9, %v7279_v60, %v7280_v40  ;;  %v7104_v60 = vld [vmem:[%s18695_s22 + $0x198] sm:$0xf] }
 0x263   : > { %16963 = vmatmul.mubr.msk.bf16.gmra.mrb[92].mxu0 %vm873_vm6, %v15140_v38  ;;  %v7272_v38 = vrot.slane %v7270_v17, 4 }
 0x264   : > { %17143 = vmatmul.mubr.msk.bf16.gmra.mrb[60].mxu1 %vm873_vm6, %v18516_v51  ;;  %16970 = vmatprep.mubr.msk.bf16.mxu0 %vm873_vm6, %v15179_v35  ;;  %v7273_v51 = vrot.slane %v7090_v6, 7  ;;  %v18521_v35 = vld [vmem:[%s18695_s22 + $0x428] sm:$0xff]   ;;  %v7099_v6 = vld [vmem:[%s18695_s22 + $0x164] sm:$0x7] }
 0x265   : > { %17150 = vmatprep.mubr.msk.bf16.mxu1 %vm873_vm6, %v18518_v52  ;;  %v7098_v52 = vld [vmem:[%s18695_s22 + $0x160] sm:$0xf]  ;;  %v7294_v21 = vrot.slane %v7099_v6, 7 }
 0x266   : > { %v7274_v55 = vsel %vm19448_vm9, %v7272_v38, %v7273_v51  ;;  %v7291_v17 = vrot.slane %v7098_v52, 7  ;;  %v7101_v38 = vld [vmem:[%s18695_s22 + $0x17c] sm:$0xf]  ;;  %v15165_v51 = vrot.slane %v7097_v7, 11 }
 0x267   : > { %v15182_v20 = vcombine.low %v7271_v43, %v7274_v55  ;;  %v7298_v40 = vrot.slane %v7101_v38, 7  ;;  %v7305_v43 = vrot.slane %v7104_v60, 7  ;;  %v7110_v38 = vld [vmem:[%s18695_s22 + $0x1d0] sm:$0xf] }
 0x268   : > { %v7292_v55 = vsel %vm19448_vm9, %v15165_v51, %v7291_v17  ;;  %v7106_v51 = vld [vmem:[%s18695_s22 + $0x1b0] sm:$0x8] }
 0x269   : > { %v7300_v7 = vrot.slane %v7298_v40, 4 }
 0x26b   : > { %16971 = vmatmul.mubr.msk.bf16.vlgmr.msra.gmra.mrb[64].mxu0 %vm873_vm6, %v15180_v53  ;;  %v15183_v53 = vcombine.low %v7278_v9, %v7281_v50  ;;  %v7103_v50 = vld [vmem:[%s18695_s22 + $0x194] sm:$0x8] }
 0x26c   : > { %17151 = vmatmul.mubr.msk.bf16.vlgmr.msra.gmra.mrb[32].mxu1 %vm873_vm6, %v18520_v62  ;;  %16974 = vmatprep.mubr.msk.bf16.mxu0 %vm873_vm6, %v15181_v18  ;;  %v15164_v62 = vrot.slane %v7094_v8, 11  ;;  %v7286_v18 = vrot.slane %v7284_v23, 4 }
 0x26d   : > { %17183 = vmatpush3.bf16.msra.mxu1 %v20946_v2  ;;  %17154 = vmatprep.mubr.msk.bf16.mxu1 %vm873_vm6, %v18521_v35  ;;  %v21126_v2 = vld [vmem:[%s22986_s4 + $0x40] sm:$0xff]   ;;  %v7293_v35 = vrot.slane %v7291_v17, 4  ;;  %v18525_v17 = vld [vmem:[%s18695_s22 + $0x498] sm:$0xff]  }
 0x26e   : > { %17184 = vmatprep.subr.bf16.mxu1 %v18528_v36  ;;  %17003 = vmatpush3.bf16.msra.mxu0 %v20951_v22  ;;  %v18523_v22 = vld [vmem:[%s18695_s22 + $0x460] sm:$0xff]   ;;  %v7285_v45 = vsel %vm19448_vm9, %v15164_v62, %v7284_v23  ;;  %v7288_v52 = vsel %vm19448_vm9, %v7286_v18, %v7287_v25  ;;  %v7105_v23 = vld [vmem:[%s18695_s22 + $0x19c] sm:$0x7]  ;;  %v7307_v62 = vrot.slane %v7305_v43, 4  ;;  %v7107_v25 = vld [vmem:[%s18695_s22 + $0x1b4] sm:$0xf] }
 0x26f   : > { %17004 = vmatprep.subr.bf16.mxu0 %v18537_v39  ;;  %v7295_v9 = vsel %vm19448_vm9, %v7293_v35, %v7294_v21  ;;  %v15184_v8 = vcombine.low %v7285_v45, %v7288_v52  ;;  %v7308_v18 = vrot.slane %v7105_v23, 7  ;;  %v7312_v35 = vrot.slane %v7107_v25, 7  ;;  %v7108_v52 = vld [vmem:[%s18695_s22 + $0x1b8] sm:$0x7]  ;;  %v4265_v23 = vld [vmem:[#allocation2 + $0x100] sm:$0xff] }
 0x270   : > { %v7113_v25 = vld [vmem:[%s18695_s22 + $0x1ec] sm:$0xf] }
 0x271   : > { %17185 = vmatpush3.bf16.msra.mxu1 %v18528_v36  ;;  %v7100_v36 = vld [vmem:[%s18695_s22 + $0x178] sm:$0x8]  ;;  %v7309_v45 = vsel %vm19448_vm9, %v7307_v62, %v7308_v18 }
 0x272   : > { %17005 = vmatpush3.bf16.msra.mxu0 %v18537_v39  ;;  %17218 = vmatprep.subr.bf16.mxu1 %v21126_v2  ;;  %v7102_v39 = vld [vmem:[%s18695_s22 + $0x180] sm:$0x7]  ;;  %v15166_v24 = vrot.slane %v7100_v36, 11  ;;  %v7319_v36 = vrot.slane %v7110_v38, 7 }
 0x273   : > { %16975 = vmatmul.mubr.msk.bf16.gmra.mrb[68].mxu0 %vm873_vm6, %v15182_v20  ;;  %17038 = vmatprep.subr.bf16.mxu0 %v21131_v26  ;;  %v7301_v6 = vrot.slane %v7102_v39, 7  ;;  %v18524_v20 = vld [vmem:[%s18695_s22 + $0x47c] sm:$0xff]   ;;  %v7111_v39 = vld [vmem:[%s18695_s22 + $0x1d4] sm:$0x7] }
 0x274   : > { %17155 = vmatmul.mubr.msk.bf16.gmra.mrb[36].mxu1 %vm873_vm6, %v18522_v61  ;;  %16978 = vmatprep.mubr.msk.bf16.mxu0 %vm873_vm6, %v15183_v53  ;;  %v15185_v61 = vcombine.low %v7292_v55, %v7295_v9  ;;  %v15167_v53 = vrot.slane %v7103_v50, 11  ;;  %v15168_v55 = vrot.slane %v7106_v51, 11  ;;  %v4267_v50 = vld [vmem:[#allocation2 + $0x110] sm:$0xff]  ;;  %v7321_v62 = vrot.slane %v7319_v36, 4  ;;  %v4268_v51 = vld [vmem:[#allocation2 + $0x118] sm:$0xff] }
 0x275   : > { %17158 = vmatprep.mubr.msk.bf16.mxu1 %vm873_vm6, %v18523_v22  ;;  %v7299_v22 = vsel %vm19448_vm9, %v15166_v24, %v7298_v40  ;;  %v7302_v21 = vsel %vm19448_vm9, %v7300_v7, %v7301_v6  ;;  %v7109_v40 = vld [vmem:[%s18695_s22 + $0x1cc] sm:$0x8]  ;;  %v18526_v24 = vld [vmem:[%s18695_s22 + $0x4b4] sm:$0xff]   ;;  %v7315_v6 = vrot.slane %v7108_v52, 7  ;;  %v7322_v18 = vrot.slane %v7111_v39, 7 }
 0x276   : > { %v7306_v60 = vsel %vm19448_vm9, %v15167_v53, %v7305_v43  ;;  %v7314_v43 = vrot.slane %v7312_v35, 4  ;;  %v15169_v53 = vrot.slane %v7109_v40, 11  ;;  %v7112_v39 = vld [vmem:[%s18695_s22 + $0x1e8] sm:$0x8] }
 0x277   : > { %v15187_v7 = vcombine.low %v7306_v60, %v7309_v45  ;;  %v4266_v45 = vld [vmem:[#allocation2 + $0x108] sm:$0xff] }
 0x27b   : > { %16979 = vmatmul.mubr.msk.bf16.gmra.mrb[72].mxu0 %vm873_vm6, %v15184_v8  ;;  %v15186_v8 = vcombine.low %v7299_v22, %v7302_v21 }
 0x27c   : > { %17159 = vmatmul.mubr.msk.bf16.gmra.mrb[40].mxu1 %vm873_vm6, %v18524_v20  ;;  %16982 = vmatprep.mubr.msk.bf16.mxu0 %vm873_vm6, %v15185_v61 }
 0x27d   : > { %17162 = vmatprep.mubr.msk.bf16.mxu1 %vm873_vm6, %v18525_v17 }
 0x27f   : > { %v16720_v9 = vpop.f32.mrb[0].mxu1 }
 0x280   : > { %v17534_v20 = vadd.f32 %v16720_v9, %v20417_v12  ;;  %v4105_v61 = vpop.f32.mrb[1].mxu1  ;;  %v7313_v12 = vsel %vm19448_vm9, %v15168_v55, %v7312_v35  ;;  %v7326_v9 = vrot.slane %v7113_v25, 7  ;;  %v7320_v35 = vsel %vm19448_vm9, %v15169_v53, %v7319_v36  ;;  %v7114_v55 = vld [vmem:[%s18695_s22 + $0x1f0] sm:$0x7] }
 0x281   : > { %v17535_v17 = vadd.f32 %v4105_v61, %v20419_v0  ;;  %v16721_v38 = vpop.f32.mrb[2].mxu1  ;;  %v7316_v0 = vsel %vm19448_vm9, %v7314_v43, %v7315_v6  ;;  %v7117_v43 = vld [vmem:[%s18695_s22 + $0x20c] sm:$0x7]  ;;  %v4269_v6 = vld [vmem:[#allocation2 + $0x120] sm:$0xff] }
 0x282   : > { %v4299_v22 = vadd.f32 %v17534_v20, %v4267_v50  ;;  %v17536_v21 = vadd.f32 %v16721_v38, %v20421_v10  ;;  %v4108_v60 = vpop.f32.mrb[3].mxu1  ;;  %v7333_v50 = vrot.slane %v21181_v48, 7  ;;  %v15188_v20 = vcombine.low %v7313_v12, %v7316_v0  ;;  %v18529_v48 = vld [vmem:[%s18695_s22 + $0x4ec] sm:$0xff]  }
 0x283   : > { %v4297_v52 = vadd.f32 %v17535_v17, %v4265_v23  ;;  %v17537_v40 = vadd.f32 %v4108_v60, %v20424_v3  ;;  %16983 = vmatmul.mubr.msk.bf16.gmra.mrb[76].mxu0 %vm873_vm6, %v15186_v8  ;;  %v7323_v3 = vsel %vm19448_vm9, %v7321_v62, %v7322_v18  ;;  %v7115_v8 = vld [vmem:[%s18695_s22 + $0x204] sm:$0x8]  ;;  %v7328_v53 = vrot.slane %v7326_v9, 4  ;;  %v4272_v60 = vld [vmem:[#allocation2 + $0x138] sm:$0xff] }
 0x284   : > { %4331 = vst.msk [vmem:[#allocation2 + $0x110] sm:$0xff] %vm436_vm10, %v4299_v22  ;;  %v4300_v10 = vadd.f32 %v17536_v21, %v4268_v51  ;;  %17163 = vmatmul.mubr.msk.bf16.gmra.mrb[44].mxu1 %vm873_vm6, %v18526_v24  ;;  %16986 = vmatprep.mubr.msk.bf16.mxu0 %vm873_vm6, %v15187_v7  ;;  %v15170_v24 = vrot.slane %v7112_v39, 11  ;;  %v4271_v7 = vld [vmem:[#allocation2 + $0x130] sm:$0xff]  ;;  %v15189_v61 = vcombine.low %v7320_v35, %v7323_v3  ;;  %v7329_v62 = vrot.slane %v7114_v55, 7  ;;  %v7119_v51 = vld [vmem:[%s18695_s22 + $0x224] sm:$0xf] }
 0x285   : > { %4329 = vst.msk [vmem:[#allocation2 + $0x100] sm:$0xff] %vm436_vm10, %v4297_v52  ;;  %v4298_v23 = vadd.f32 %v17537_v40, %v4266_v45  ;;  %17166 = vmatprep.mubr.msk.bf16.mxu1 %vm873_vm6, %v18527_v16  ;;  %v15171_v25 = vrot.slane %v7115_v8, 11  ;;  %v7335_v17 = vrot.slane %v7333_v50, 4  ;;  %v7336_v38 = vrot.slane %v7117_v43, 7  ;;  %v18530_v45 = vld [vmem:[%s18695_s22 + $0x508] sm:$0xff]  }
 0x286   : > { %4332 = vst.msk [vmem:[#allocation2 + $0x118] sm:$0xff] %vm436_vm10, %v4300_v10  ;;  %v21212_v52 = vld [vmem:[%s18695_s22 + $0x240] sm:$0xf]  ;;  %v4270_v39 = vld [vmem:[#allocation2 + $0x128] sm:$0xff]  ;;  %v7340_v55 = vrot.slane %v7119_v51, 7 }
 0x287   : > { %4330 = vst.msk [vmem:[#allocation2 + $0x108] sm:$0xff] %vm436_vm10, %v4298_v23  ;;  %v16724_v36 = vpop.f32.mrb[4].mxu1  ;;  %v7118_v3 = vld [vmem:[%s18695_s22 + $0x220] sm:$0x8]  ;;  %v7120_v23 = vld [vmem:[%s18695_s22 + $0x228] sm:$0x7] }
 0x288   : > { %v17538_v16 = vadd.f32 %v16724_v36, %v20446_v4  ;;  %v4121_v18 = vpop.f32.mrb[5].mxu1  ;;  %v7327_v4 = vsel %vm19448_vm9, %v15170_v24, %v7326_v9  ;;  %v7334_v9 = vsel %vm19448_vm9, %v15171_v25, %v7333_v50  ;;  %v7347_v8 = vrot.slane %v21212_v52, 7  ;;  %v7121_v24 = vld [vmem:[%s18695_s22 + $0x23c] sm:$0x8]  ;;  %v7123_v36 = vld [vmem:[%s18695_s22 + $0x244] sm:$0x7] }
 0x289   : > { %v17539_v22 = vadd.f32 %v4121_v18, %v20448_v27  ;;  %v16725_v21 = vpop.f32.mrb[6].mxu1  ;;  %v7330_v27 = vsel %vm19448_vm9, %v7328_v53, %v7329_v62  ;;  %v7342_v62 = vrot.slane %v7340_v55, 4  ;;  %v7350_v51 = vrot.slane %v7123_v36, 7  ;;  %v18532_v52 = vld [vmem:[%s18695_s22 + $0x540] sm:$0xff]  }
 0x28a   : > { %v4303_v12 = vadd.f32 %v17538_v16, %v4271_v7  ;;  %v17540_v40 = vadd.f32 %v16725_v21, %v20450_v19  ;;  %v4124_v0 = vpop.f32.mrb[7].mxu1  ;;  %v15172_v7 = vrot.slane %v7118_v3, 11  ;;  %v7343_v16 = vrot.slane %v7120_v23, 7  ;;  %v9611_v23 = vld [vmem:[%s18695_s22 + $0x8] sm:$0xe]  ;;  %v4277_v36 = vld [vmem:[#allocation2 + $0x160] sm:$0xff] }
 0x28b   : > { %v4301_v10 = vadd.f32 %v17539_v22, %v4269_v6  ;;  %v17541_v35 = vadd.f32 %v4124_v0, %v20456_v57  ;;  %16987 = vmatmul.mubr.msk.bf16.gmra.mrb[80].mxu0 %vm873_vm6, %v15188_v20  ;;  %v7337_v57 = vsel %vm19448_vm9, %v7335_v17, %v7336_v38  ;;  %v4275_v6 = vld [vmem:[#allocation2 + $0x150] sm:$0xff]  ;;  %v4273_v20 = vld [vmem:[#allocation2 + $0x140] sm:$0xff]  ;;  %v15173_v17 = vrot.slane %v7121_v24, 11  ;;  %v7125_v22 = vld [vmem:[%s18695_s22 + $0x25c] sm:$0xf] }
 0x28c   : > { %4335 = vst.msk [vmem:[#allocation2 + $0x130] sm:$0xff] %vm436_vm10, %v4303_v12  ;;  %v4304_v19 = vadd.f32 %v17540_v40, %v4272_v60  ;;  %17167 = vmatmul.mubr.msk.bf16.gmra.mrb[48].mxu1 %vm873_vm6, %v18529_v48  ;;  %16990 = vmatprep.mubr.msk.bf16.mxu0 %vm873_vm6, %v15189_v61  ;;  %v15190_v48 = vcombine.low %v7327_v4, %v7330_v27  ;;  %v18531_v61 = vld [vmem:[%s18695_s22 + $0x524] sm:$0xff]   ;;  %v7349_v38 = vrot.slane %v7347_v8, 4  ;;  %v21245_v12 = vld [vmem:[%s18695_s22 + $0xc] sm:$0xf]  ;;  %v7354_v3 = vrot.slane %v7125_v22, 7 }
 0x28d   : > { %4333 = vst.msk [vmem:[#allocation2 + $0x120] sm:$0xff] %vm436_vm10, %v4301_v10  ;;  %v4302_v43 = vadd.f32 %v17541_v35, %v4270_v39  ;;  %17170 = vmatprep.mubr.msk.bf16.mxu1 %vm873_vm6, %v18530_v45  ;;  %v21238_v53 = vcombine.low %v7334_v9, %v7337_v57  ;;  %v4276_v45 = vld [vmem:[#allocation2 + $0x158] sm:$0xff]  ;;  %v4274_v4 = vld [vmem:[#allocation2 + $0x148] sm:$0xff]  ;;  %v9805_v9 = vrot.slane %v21245_v12, 5  ;;  %v4279_v24 = vld [vmem:[#allocation2 + $0x170] sm:$0xff] }
 0x28e   : > { %4336 = vst.msk [vmem:[#allocation2 + $0x138] sm:$0xff] %vm436_vm10, %v4304_v19  ;;  %v7124_v27 = vld [vmem:[%s18695_s22 + $0x258] sm:$0x8]  ;;  %v7126_v19 = vld [vmem:[%s18695_s22 + $0x260] sm:$0x7] }
 0x28f   : > { %4334 = vst.msk [vmem:[#allocation2 + $0x128] sm:$0xff] %vm436_vm10, %v4302_v43  ;;  %v16728_v50 = vpop.f32.mrb[8].mxu1  ;;  %v9613_v43 = vld [vmem:[%s18695_s22 + $0x10] sm:$0x1]  ;;  %v9614_v22 = vld [vmem:[%s18695_s22 + $0x24] sm:$0xe] }
 0x290   : > { %v17542_v18 = vadd.f32 %v16728_v50, %v20479_v54  ;;  %v4137_v25 = vpop.f32.mrb[9].mxu1  ;;  %v7341_v54 = vsel %vm19448_vm9, %v15172_v7, %v7340_v55  ;;  %v7351_v55 = vsel %vm19448_vm9, %v7349_v38, %v7350_v51  ;;  %v21271_v7 = vld [vmem:[%s18695_s22 + $0x28] sm:$0xf]  ;;  %v9807_v38 = vrot.slane %v9805_v9, 4 }
 0x291   : > { %v17543_v21 = vadd.f32 %v4137_v25, %v20484_v58  ;;  %v16729_v60 = vpop.f32.mrb[10].mxu1  ;;  %v7344_v58 = vsel %vm19448_vm9, %v7342_v62, %v7343_v16  ;;  %v7357_v62 = vrot.slane %v7126_v19, 7  ;;  %v21280_v16 = vld [vmem:[%s18695_s22 + $0x44] sm:$0xf]  ;;  %v9808_v51 = vrot.slane %v9613_v43, 5 }
 0x292   : > { %v4307_v40 = vadd.f32 %v17542_v18, %v4275_v6  ;;  %v17544_v0 = vadd.f32 %v16729_v60, %v20486_v44  ;;  %v4140_v39 = vpop.f32.mrb[11].mxu1  ;;  %v21274_v6 = vcombine.low %v7341_v54, %v7344_v58  ;;  %v9812_v12 = vrot.slane %v21271_v7, 5 }
 0x293   : > { %v4305_v10 = vadd.f32 %v17543_v21, %v4273_v20  ;;  %v17545_v35 = vadd.f32 %v4140_v39, %v20492_v13  ;;  %16991 = vmatmul.mubr.msk.bf16.gmra.mrb[84].mxu0 %vm873_vm6, %v15190_v48  ;;  %v7348_v13 = vsel %vm19448_vm9, %v15173_v17, %v7347_v8  ;;  %v15174_v8 = vrot.slane %v7124_v27, 11  ;;  %v18533_v20 = vld [vmem:[%s18695_s22 + $0x55c] sm:$0xff]  }
 0x294   : > { %4339 = vst.msk [vmem:[#allocation2 + $0x150] sm:$0xff] %vm436_vm10, %v4307_v40  ;;  %v4308_v44 = vadd.f32 %v17544_v0, %v4276_v45  ;;  %17171 = vmatmul.mubr.msk.bf16.gmra.mrb[52].mxu1 %vm873_vm6, %v18531_v61  ;;  %16994 = vmatprep.mubr.msk.bf16.mxu0 %vm873_vm6, %v21238_v53  ;;  %v21277_v48 = vcombine.low %v7348_v13, %v7351_v55  ;;  %v7356_v61 = vrot.slane %v7354_v3, 4  ;;  %v15415_v17 = vrot.slane %v9611_v23, 9  ;;  %v4280_v45 = vld [vmem:[#allocation2 + $0x178] sm:$0xff]  ;;  %v21288_v40 = vld [vmem:[%s18695_s22 + $0x60] sm:$0xf] }
 0x295   : > { %4337 = vst.msk [vmem:[#allocation2 + $0x140] sm:$0xff] %vm436_vm10, %v4305_v10  ;;  %v4306_v57 = vadd.f32 %v17545_v35, %v4274_v4  ;;  %17174 = vmatprep.mubr.msk.bf16.mxu1 %vm873_vm6, %v18532_v52  ;;  %v18534_v52 = vld [vmem:[%s18695_s22 + $0x578] sm:$0xff]   ;;  %v4278_v4 = vld [vmem:[#allocation2 + $0x168] sm:$0xff]  ;;  %v7355_v54 = vsel %vm19448_vm9, %v15174_v8, %v7354_v3  ;;  %v9809_v55 = vsel %vm18697_vm2, %v9807_v38, %v9808_v51  ;;  %v9826_v19 = vrot.slane %v21288_v40, 5  ;;  %v4283_v23 = vld [vmem:[#allocation2 + $0x190] sm:$0xff] }
 0x296   : > { %4340 = vst.msk [vmem:[#allocation2 + $0x158] sm:$0xff] %vm436_vm10, %v4308_v44  ;;  %v9616_v10 = vld [vmem:[%s18695_s22 + $0x2c] sm:$0x1]  ;;  %v7358_v27 = vsel %vm19448_vm9, %v7356_v61, %v7357_v62  ;;  %v15416_v44 = vrot.slane %v9614_v22, 9  ;;  %v9619_v13 = vld [vmem:[%s18695_s22 + $0x48] sm:$0x1] }
 0x297   : > { %4338 = vst.msk [vmem:[#allocation2 + $0x148] sm:$0xff] %vm436_vm10, %v4306_v57  ;;  %v16732_v50 = vpop.f32.mrb[12].mxu1  ;;  %v9814_v43 = vrot.slane %v9812_v12, 4  ;;  %v21315_v8 = vld [vmem:[%s18695_s22 + $0x278] sm:$0xf] }
 0x298   : > { %v17546_v18 = vadd.f32 %v16732_v50, %v20515_v32  ;;  %v4153_v25 = vpop.f32.mrb[13].mxu1  ;;  %v21319_v61 = vld [vmem:[%s18695_s22 + $0x7c] sm:$0xf]  ;;  %v9622_v38 = vld [vmem:[%s18695_s22 + $0x64] sm:$0x1] }
 0x299   : > { %v17547_v21 = vadd.f32 %v4153_v25, %v20520_v42  ;;  %v16733_v60 = vpop.f32.mrb[14].mxu1  ;;  %v9819_v42 = vrot.slane %v21280_v16, 5  ;;  %v4284_v16 = vld [vmem:[#allocation2 + $0x198] sm:$0xff] }
 0x29a   : > { %v4311_v0 = vadd.f32 %v17546_v18, %v4279_v24  ;;  %v17548_v32 = vadd.f32 %v16733_v60, %v20522_v46  ;;  %v4156_v39 = vpop.f32.mrb[15].mxu1  ;;  %v9617_v46 = vld [vmem:[%s18695_s22 + $0x40] sm:$0xe]  ;;  %v9815_v24 = vrot.slane %v9616_v10, 5  ;;  %v21322_v18 = vcombine.low %v7355_v54, %v7358_v27  ;;  %v18536_v25 = vld [vmem:[%s18695_s22 + $0x594] sm:$0xff]  }
 0x29b   : > { %v4309_v35 = vadd.f32 %v17547_v21, %v4277_v36  ;;  %v17549_v58 = vadd.f32 %v4156_v39, %v20528_v28  ;;  %16995 = vmatmul.mubr.msk.bf16.gmra.mrb[88].mxu0 %vm873_vm6, %v21274_v6  ;;  %v9806_v28 = vsel %vm18697_vm2, %v15415_v17, %v9805_v9  ;;  %v9620_v36 = vld [vmem:[%s18695_s22 + $0x5c] sm:$0xe]  ;;  %v4281_v9 = vld [vmem:[#allocation2 + $0x180] sm:$0xff]  ;;  %v15417_v7 = vrot.slane %v9617_v46, 9  ;;  %v21342_v54 = vld [vmem:[%s18695_s22 + $0x78] sm:$0xe] }
 0x29c   : > { %4343 = vst.msk [vmem:[#allocation2 + $0x170] sm:$0xff] %vm436_vm10, %v4311_v0  ;;  %v4312_v3 = vadd.f32 %v17548_v32, %v4280_v45  ;;  %17175 = vmatmul.mubr.msk.bf16.gmra.mrb[56].mxu1 %vm873_vm6, %v18533_v20  ;;  %16998 = vmatprep.mubr.msk.bf16.mxu0 %vm873_vm6, %v21277_v48  ;;  %v9821_v50 = vrot.slane %v9819_v42, 4  ;;  %v9822_v20 = vrot.slane %v9619_v13, 5  ;;  %v15435_v17 = vcombine.low %v9806_v28, %v9809_v55  ;;  %v7127_v45 = vld [vmem:[%s18695_s22 + $0x274] sm:$0x8] }
 0x29d   : > { %4341 = vst.msk [vmem:[#allocation2 + $0x160] sm:$0xff] %vm436_vm10, %v4309_v35  ;;  %v4310_v57 = vadd.f32 %v17549_v58, %v4278_v4  ;;  %17178 = vmatprep.mubr.msk.bf16.mxu1 %vm873_vm6, %v18534_v52  ;;  %v15418_v21 = vrot.slane %v9620_v36, 9  ;;  %v9828_v60 = vrot.slane %v9826_v19, 4  ;;  %v7703_v52 = vrot.slane %v21315_v8, 7  ;;  %v21359_v55 = vld [vmem:[%s18695_s22 + $0x294] sm:$0xf] }
 0x29e   : > { %4344 = vst.msk [vmem:[#allocation2 + $0x178] sm:$0xff] %vm436_vm10, %v4312_v3  ;;  %v21334_v39 = vsel %vm18697_vm2, %v15416_v44, %v9812_v12  ;;  %v21338_v4 = vsel %vm18697_vm2, %v9814_v43, %v9815_v24  ;;  %v9833_v10 = vrot.slane %v21319_v61, 5  ;;  %v21348_v46 = vsel %vm18697_vm2, %v15417_v7, %v9819_v42  ;;  %v9625_v44 = vld [vmem:[%s18695_s22 + $0x80] sm:$0x1]  ;;  %v21367_v43 = vld [vmem:[%s18695_s22 + $0x98] sm:$0xf] }
 0x29f   : > { %4342 = vst.msk [vmem:[#allocation2 + $0x168] sm:$0xff] %vm436_vm10, %v4310_v57  ;;  %v16736_v62 = vpop.f32.mrb[16].mxu1  ;;  %v21352_v12 = vsel %vm18697_vm2, %v9821_v50, %v9822_v20  ;;  %v9829_v28 = vrot.slane %v9622_v38, 5  ;;  %v7705_v57 = vrot.slane %v7703_v52, 4  ;;  %v9836_v8 = vrot.slane %v9625_v44, 5 }
 0x2a0   : > { %v17550_v51 = vadd.f32 %v16736_v62, %v20550_v15  ;;  %v4169_v22 = vpop.f32.mrb[17].mxu1  ;;  %v7129_v15 = vld [vmem:[%s18695_s22 + $0x27c] sm:$0x7]  ;;  %v9835_v36 = vrot.slane %v9833_v10, 4  ;;  %v21375_v7 = vld [vmem:[%s18695_s22 + $0x298] sm:$0x7]  ;;  %v15437_v50 = vcombine.low %v21348_v46, %v21352_v12  ;;  %v21386_v20 = vsel %vm18697_vm2, %v15418_v21, %v9826_v19 }
 0x2a1   : > { %v17551_v0 = vadd.f32 %v4169_v22, %v20555_v49  ;;  %v16737_v32 = vpop.f32.mrb[18].mxu1  ;;  %v4282_v49 = vld [vmem:[#allocation2 + $0x188] sm:$0xff]  ;;  %v21389_v61 = vld [vmem:[%s18695_s22 + $0x94] sm:$0xe]  ;;  %v21392_v62 = vld [vmem:[%s18695_s22 + $0x9c] sm:$0x1]  ;;  %v21400_v38 = vsel %vm18697_vm2, %v9828_v60, %v9829_v28 }
 0x2a2   : > { %v4315_v35 = vadd.f32 %v17550_v51, %v4283_v23  ;;  %v17552_v58 = vadd.f32 %v16737_v32, %v20557_v33  ;;  %v4172_v27 = vpop.f32.mrb[19].mxu1  ;;  %v15213_v33 = vrot.slane %v7127_v45, 11  ;;  %v15419_v23 = vrot.slane %v21342_v54, 9  ;;  %v4285_v45 = vld [vmem:[#allocation2 + $0x1a0] sm:$0xff]  ;;  %v4286_v32 = vld [vmem:[#allocation2 + $0x1a8] sm:$0xff] }
 0x2a3   : > { %v4313_v13 = vadd.f32 %v17551_v0, %v4281_v9  ;;  %v17553_v3 = vadd.f32 %v4172_v27, %v20560_v37  ;;  %16999 = vmatmul.mubr.msk.bf16.gmra.mrb[92].mxu0 %vm873_vm6, %v21322_v18  ;;  %v7706_v37 = vrot.slane %v7129_v15, 7  ;;  %v21372_v9 = vld [vmem:[%s18695_s22 + $0x290] sm:$0x8]  ;;  %v7710_v19 = vrot.slane %v21359_v55, 7  ;;  %v4288_v0 = vld [vmem:[#allocation2 + $0x1b8] sm:$0xff] }
 0x2a4   : > { %4347 = vst.msk [vmem:[#allocation2 + $0x190] sm:$0xff] %vm436_vm10, %v4315_v35  ;;  %v4316_v42 = vadd.f32 %v17552_v58, %v4284_v16  ;;  %17179 = vmatmul.mubr.msk.bf16.gmra.mrb[60].mxu1 %vm873_vm6, %v18536_v25  ;;  %17006 = vmatprep.mubr.msk.bf16.mxu0 %vm873_vm6, %v21238_v53  ;;  %v15436_v53 = vcombine.low %v21334_v39, %v21338_v4  ;;  %v21395_v16 = vld [vmem:[%s18695_s22 + $0x2b0] sm:$0xf]  ;;  %v9840_v51 = vrot.slane %v21367_v43, 5  ;;  %v7713_v39 = vrot.slane %v21375_v7, 7 }
 0x2a5   : > { %4345 = vst.msk [vmem:[#allocation2 + $0x180] sm:$0xff] %vm436_vm10, %v4313_v13  ;;  %v4314_v24 = vadd.f32 %v17553_v3, %v4282_v49  ;;  %17186 = vmatprep.mubr.msk.bf16.mxu1 %vm873_vm6, %v15435_v17  ;;  %v4287_v17 = vld [vmem:[#allocation2 + $0x1b0] sm:$0xff]  ;;  %v21404_v40 = vsel %vm19448_vm9, %v15213_v33, %v7703_v52  ;;  %v21411_v60 = vsel %vm19448_vm9, %v7705_v57, %v7706_v37  ;;  %v15214_v52 = vrot.slane %v21372_v9, 11  ;;  %v7133_v44 = vld [vmem:[%s18695_s22 + $0x2ac] sm:$0x8] }
 0x2a6   : > { %4348 = vst.msk [vmem:[#allocation2 + $0x198] sm:$0xff] %vm436_vm10, %v4316_v42  ;;  %v15420_v54 = vrot.slane %v21389_v61, 9  ;;  %v7717_v35 = vrot.slane %v21395_v16, 7  ;;  %v21420_v58 = vld [vmem:[%s18695_s22 + $0xb4] sm:$0xf]  ;;  %v21425_v12 = vsel %vm18697_vm2, %v15419_v23, %v9833_v10  ;;  %v18539_v3 = vld [vmem:[%s22986_s4 + $0x48] sm:$0xff]   ;;  %v15438_v9 = vcombine.low %v21386_v20, %v21400_v38 }
 0x2a7   : > { %4346 = vst.msk [vmem:[#allocation2 + $0x188] sm:$0xff] %vm436_vm10, %v4314_v24  ;;  %v16740_v25 = vpop.f32.mrb[20].mxu1  ;;  %v7135_v13 = vld [vmem:[%s18695_s22 + $0x2b4] sm:$0x7]  ;;  %v9842_v10 = vrot.slane %v9840_v51, 4  ;;  %v18541_v42 = vld [vmem:[%s22985_s3 + $0x88] sm:$0xff]   ;;  %v15229_v7 = vcombine.low %v21404_v40, %v21411_v60 }
 0x2a8   : > { %v17554_v22 = vadd.f32 %v16740_v25, %v20581_v59  ;;  %v4185_v21 = vpop.f32.mrb[21].mxu1  ;;  %v9843_v59 = vrot.slane %v21392_v62, 5  ;;  %v9629_v55 = vld [vmem:[%s18695_s22 + $0xb0] sm:$0xe]  ;;  %v21449_v37 = vld [vmem:[%s18695_s22 + $0x2cc] sm:$0xf]  ;;  %v21474_v62 = vsel %vm19448_vm9, %v15214_v52, %v7710_v19 }
 0x2a9   : > { %v17555_v4 = vadd.f32 %v4185_v21, %v20583_v1  ;;  %v16741_v15 = vpop.f32.mrb[22].mxu1  ;;  %v21429_v1 = vsel %vm18697_vm2, %v9835_v36, %v9836_v8  ;;  %v4291_v23 = vld [vmem:[#allocation2 + $0x1d0] sm:$0xff]  ;;  %v15215_v43 = vrot.slane %v7133_v44, 11  ;;  %v7719_v24 = vrot.slane %v7717_v35, 4  ;;  %v9631_v8 = vld [vmem:[%s18695_s22 + $0xb8] sm:$0x1] }
 0x2aa   : > { %v4319_v27 = vadd.f32 %v17554_v22, %v4287_v17  ;;  %v17556_v49 = vadd.f32 %v16741_v15, %v20585_v41  ;;  %v4188_v46 = vpop.f32.mrb[23].mxu1  ;;  %v7712_v41 = vrot.slane %v7710_v19, 4  ;;  %v7720_v36 = vrot.slane %v7135_v13, 7  ;;  %v21469_v61 = vld [vmem:[%s22986_s4 + $0x70] sm:$0xff]   ;;  %v21497_v40 = vld [vmem:[%s22987_s5 + $0x8] sm:$0xff]   ;;  %v4292_v52 = vld [vmem:[#allocation2 + $0x1d8] sm:$0xff] }
 0x2ab   : > { %v4317_v28 = vadd.f32 %v17555_v4, %v4285_v45  ;;  %v17557_v33 = vadd.f32 %v4188_v46, %v20588_v29  ;;  %17007 = vmatmul.mubr.msk.bf16.vlgmr.msra.gmra.mrb[64].mxu0 %vm873_vm6, %v21274_v6  ;;  %v9847_v29 = vrot.slane %v21420_v58, 5  ;;  %v21486_v25 = vsel %vm18697_vm2, %v9842_v10, %v9843_v59  ;;  %v21489_v17 = vld [vmem:[%s18695_s22 + $0x2d0] sm:$0x7]  ;;  %v21513_v15 = vld [vmem:[%s18695_s22 + $0x2e8] sm:$0xf] }
 0x2ac   : > { %4351 = vst.msk [vmem:[#allocation2 + $0x1b0] sm:$0xff] %vm436_vm10, %v4319_v27  ;;  %v4320_v57 = vadd.f32 %v17556_v49, %v4288_v0  ;;  %17187 = vmatmul.mubr.msk.bf16.vlgmr.msra.gmra.mrb[32].mxu1 %vm873_vm6, %v15436_v53  ;;  %17010 = vmatprep.mubr.msk.bf16.mxu0 %vm873_vm6, %v21277_v48  ;;  %v4289_v48 = vld [vmem:[#allocation2 + $0x1c0] sm:$0xff]  ;;  %v15421_v53 = vrot.slane %v9629_v55, 9  ;;  %v21478_v16 = vsel %vm19448_vm9, %v7712_v41, %v7713_v39  ;;  %v21492_v38 = vld [vmem:[%s18695_s22 + $0xd0] sm:$0xf]  ;;  %v9850_v21 = vrot.slane %v9631_v8, 5 }
 0x2ad   : > { %4349 = vst.msk [vmem:[#allocation2 + $0x1a0] sm:$0xff] %vm436_vm10, %v4317_v28  ;;  %v4318_v6 = vadd.f32 %v17557_v33, %v4286_v32  ;;  %17219 = vmatpush3.bf16.msra.mxu1 %v21126_v2  ;;  %17190 = vmatprep.mubr.msk.bf16.mxu1 %vm873_vm6, %v15437_v50  ;;  %v15439_v2 = vcombine.low %v21425_v12, %v21429_v1  ;;  %v21463_v50 = vld [vmem:[%s18695_s22 + $0x2c8] sm:$0x8]  ;;  %v7724_v45 = vrot.slane %v21449_v37, 7  ;;  %v9632_v0 = vld [vmem:[%s18695_s22 + $0xcc] sm:$0xe] }
 0x2ae   : > { %4352 = vst.msk [vmem:[#allocation2 + $0x1b8] sm:$0xff] %vm436_vm10, %v4320_v57  ;;  %17220 = vmatprep.subr.bf16.mxu1 %v18539_v3  ;;  %17039 = vmatpush3.bf16.msra.mxu0 %v21131_v26  ;;  %v21482_v26 = vsel %vm18697_vm2, %v15420_v54, %v9840_v51  ;;  %v9849_v51 = vrot.slane %v9847_v29, 4  ;;  %v21505_v39 = vsel %vm19448_vm9, %v15215_v43, %v7717_v35  ;;  %v4290_v58 = vld [vmem:[#allocation2 + $0x1c8] sm:$0xff]  ;;  %v9854_v35 = vrot.slane %v21492_v38, 5  ;;  %v9634_v1 = vld [vmem:[%s18695_s22 + $0xd4] sm:$0x1] }
 0x2af   : > { %4350 = vst.msk [vmem:[#allocation2 + $0x1a8] sm:$0xff] %vm436_vm10, %v4318_v6  ;;  %v16744_v20 = vpop.f32.mrb[24].mxu1  ;;  %17040 = vmatprep.subr.bf16.mxu0 %v18541_v42  ;;  %v21509_v4 = vsel %vm19448_vm9, %v7719_v24, %v7720_v36  ;;  %v21518_v27 = vsel %vm18697_vm2, %v15421_v53, %v9847_v29  ;;  %v21522_v49 = vld [vmem:[%s18695_s22 + $0xec] sm:$0xf]  ;;  %v15422_v44 = vrot.slane %v9632_v0, 9  ;;  %v7731_v28 = vrot.slane %v21513_v15, 7 }
 0x2b0   : > { %v17558_v19 = vadd.f32 %v16744_v20, %v20622_v56  ;;  %v4201_v22 = vpop.f32.mrb[25].mxu1  ;;  %v15216_v56 = vrot.slane %v21463_v50, 11  ;;  %v4295_v41 = vld [vmem:[#allocation2 + $0x1f0] sm:$0xff]  ;;  %v9861_v10 = vrot.slane %v21522_v49, 5  ;;  %v15230_v55 = vcombine.low %v21474_v62, %v21478_v16  ;;  %v7141_v37 = vld [vmem:[%s18695_s22 + $0x2ec] sm:$0x7] }
 0x2b1   : > { %v17559_v32 = vadd.f32 %v4201_v22, %v20629_v34  ;;  %v16745_v60 = vpop.f32.mrb[26].mxu1  ;;  %17221 = vmatpush3.bf16.msra.mxu1 %v18539_v3  ;;  %v7139_v3 = vld [vmem:[%s18695_s22 + $0x2e4] sm:$0x8]  ;;  %v9856_v57 = vrot.slane %v9854_v35, 4  ;;  %v9857_v29 = vrot.slane %v9634_v1, 5  ;;  %v4296_v24 = vld [vmem:[#allocation2 + $0x1f8] sm:$0xff]  ;;  %v15231_v36 = vcombine.low %v21505_v39, %v21509_v4 }
 0x2b2   : > { %v4323_v54 = vadd.f32 %v17558_v19, %v4291_v23  ;;  %v17560_v59 = vadd.f32 %v16745_v60, %v20631_v11  ;;  %v4204_v34 = vpop.f32.mrb[27].mxu1  ;;  %17041 = vmatpush3.bf16.msra.mxu0 %v18541_v42  ;;  %17254 = vmatprep.subr.bf16.mxu1 %v21469_v61  ;;  %v7727_v11 = vrot.slane %v21489_v17, 7  ;;  %v15440_v42 = vcombine.low %v21482_v26, %v21486_v25  ;;  %v9635_v6 = vld [vmem:[%s18695_s22 + $0xe8] sm:$0xe]  ;;  %v4293_v43 = vld [vmem:[#allocation2 + $0x1e0] sm:$0xff] }
 0x2b3   : > { %v4321_v46 = vadd.f32 %v17559_v32, %v4289_v48  ;;  %v17561_v12 = vadd.f32 %v4204_v34, %v20634_v47  ;;  %17011 = vmatmul.mubr.msk.bf16.gmra.mrb[68].mxu0 %vm873_vm6, %v21322_v18  ;;  %17398 = vmatprep.subr.bf16.mxu0 %v21497_v40  ;;  %v21536_v47 = vsel %vm18697_vm2, %v9849_v51, %v9850_v21  ;;  %v7726_v18 = vrot.slane %v7724_v45, 4  ;;  %v21570_v16 = vld [vmem:[%s18695_s22 + $0x304] sm:$0xf]  ;;  %v21573_v26 = vld [vmem:[%s18695_s22 + $0x108] sm:$0xf] }
 0x2b4   : > { %4355 = vst.msk [vmem:[#allocation2 + $0x1d0] sm:$0xff] %vm436_vm10, %v4323_v54  ;;  %v4324_v13 = vadd.f32 %v17560_v59, %v4292_v52  ;;  %17191 = vmatmul.mubr.msk.bf16.gmra.mrb[36].mxu1 %vm873_vm6, %v15438_v9  ;;  %17014 = vmatprep.mubr.msk.bf16.mxu0 %vm873_vm6, %v15229_v7  ;;  %v15441_v8 = vcombine.low %v21518_v27, %v21536_v47  ;;  %v15217_v9 = vrot.slane %v7139_v3, 11  ;;  %v9637_v7 = vld [vmem:[%s18695_s22 + $0xf0] sm:$0x1]  ;;  %v7733_v62 = vrot.slane %v7731_v28, 4  ;;  %v4294_v0 = vld [vmem:[#allocation2 + $0x1e8] sm:$0xff] }
 0x2b5   : > { %4353 = vst.msk [vmem:[#allocation2 + $0x1c0] sm:$0xff] %vm436_vm10, %v4321_v46  ;;  %v4322_v33 = vadd.f32 %v17561_v12, %v4290_v58  ;;  %17194 = vmatprep.mubr.msk.bf16.mxu1 %vm873_vm6, %v15439_v2  ;;  %v21557_v48 = vsel %vm19448_vm9, %v15216_v56, %v7724_v45  ;;  %v21563_v50 = vsel %vm19448_vm9, %v7726_v18, %v7727_v11  ;;  %v15423_v38 = vrot.slane %v9635_v6, 9  ;;  %v21579_v22 = vld [vmem:[%s18695_s22 + $0x320] sm:$0xf]  ;;  %v21585_v60 = vld [vmem:[%s18695_s22 + $0x124] sm:$0xf] }
 0x2b6   : > { %4356 = vst.msk [vmem:[#allocation2 + $0x1d8] sm:$0xff] %vm436_vm10, %v4324_v13  ;;  %v21567_v20 = vsel %vm18697_vm2, %v15422_v44, %v9854_v35  ;;  %v9863_v19 = vrot.slane %v9861_v10, 4  ;;  %v9858_v32 = vsel %vm18697_vm2, %v9856_v57, %v9857_v29  ;;  %v23001_v39 = vld [vmem:[#allocation4_spill] sm:$0xff]  ;;  %v7142_v56 = vld [vmem:[%s18695_s22 + $0x300] sm:$0x8]  ;;  %v7738_v54 = vrot.slane %v21570_v16, 7 }
 0x2b7   : > { %4354 = vst.msk [vmem:[#allocation2 + $0x1c8] sm:$0xff] %vm436_vm10, %v4322_v33  ;;  %v16748_v23 = vpop.f32.mrb[28].mxu1  ;;  %v7144_v15 = vld [vmem:[%s18695_s22 + $0x308] sm:$0x7]  ;;  %v15232_v34 = vcombine.low %v21557_v48, %v21563_v50  ;;  %v7732_v58 = vsel %vm19448_vm9, %v15217_v9, %v7731_v28  ;;  %v9638_v27 = vld [vmem:[%s18695_s22 + $0x104] sm:$0xe]  ;;  %v15442_v11 = vcombine.low %v21567_v20, %v9858_v32  ;;  %v9862_v18 = vsel %vm18697_vm2, %v15423_v38, %v9861_v10 }
 0x2b8   : > { %v17562_v2 = vadd.f32 %v16748_v23, %v20657_v30  ;;  %v4217_v53 = vpop.f32.mrb[29].mxu1  ;;  %v7734_v30 = vrot.slane %v7141_v37, 7  ;;  %v9640_v35 = vld [vmem:[%s18695_s22 + $0x10c] sm:$0x1]  ;;  %v7745_v46 = vrot.slane %v21579_v22, 7  ;;  %v9875_v47 = vrot.slane %v21585_v60, 5 }
 0x2b9   : > { %v17563_v25 = vadd.f32 %v4217_v53, %v20659_v31  ;;  %v16749_v17 = vpop.f32.mrb[30].mxu1  ;;  %v9864_v31 = vrot.slane %v9637_v7, 5  ;;  %v7145_v44 = vld [vmem:[%s18695_s22 + $0x31c] sm:$0x8]  ;;  %v7147_v13 = vld [vmem:[%s18695_s22 + $0x324] sm:$0x7] }
 0x2ba   : > { %v4327_v51 = vadd.f32 %v17562_v2, %v4295_v41  ;;  %v17564_v21 = vadd.f32 %v16749_v17, %v20661_v14  ;;  %v4220_v45 = vpop.f32.mrb[31].mxu1  ;;  %v9868_v14 = vrot.slane %v21573_v26, 5  ;;  %v7735_v1 = vsel %vm19448_vm9, %v7733_v62, %v7734_v30  ;;  %v9641_v41 = vld [vmem:[%s18695_s22 + $0x120] sm:$0xe]  ;;  %v7152_v2 = vld [vmem:[%s18695_s22 + $0x358] sm:$0xf] }
 0x2bb   : > { %v4325_v52 = vadd.f32 %v17563_v25, %v4293_v43  ;;  %v17565_v4 = vadd.f32 %v4220_v45, %v23001_v39  ;;  %17015 = vmatmul.mubr.msk.bf16.gmra.mrb[72].mxu0 %vm873_vm6, %v15230_v55  ;;  %v9865_v3 = vsel %vm18697_vm2, %v9863_v19, %v9864_v31  ;;  %v15218_v28 = vrot.slane %v7142_v56, 11  ;;  %v9643_v55 = vld [vmem:[%s18695_s22 + $0x128] sm:$0x1]  ;;  %v7149_v43 = vld [vmem:[%s18695_s22 + $0x33c] sm:$0xf] }
 0x2bc   : > { %4359 = vst.msk [vmem:[#allocation2 + $0x1f0] sm:$0xff] %vm436_vm10, %v4327_v51  ;;  %v4328_v59 = vadd.f32 %v17564_v21, %v4296_v24  ;;  %17195 = vmatmul.mubr.msk.bf16.gmra.mrb[40].mxu1 %vm873_vm6, %v15440_v42  ;;  %17018 = vmatprep.mubr.msk.bf16.mxu0 %vm873_vm6, %v15231_v36  ;;  %v7741_v33 = vrot.slane %v7144_v15, 7  ;;  %v7740_v42 = vrot.slane %v7738_v54, 4  ;;  %v15424_v57 = vrot.slane %v9638_v27, 9  ;;  %v9645_v9 = vld [vmem:[%s18695_s22 + $0x140] sm:$0xf] }
 0x2bd   : > { %4357 = vst.msk [vmem:[#allocation2 + $0x1e0] sm:$0xff] %vm436_vm10, %v4325_v52  ;;  %v4326_v12 = vadd.f32 %v17565_v4, %v4294_v0  ;;  %17198 = vmatprep.mubr.msk.bf16.mxu1 %vm873_vm6, %v15441_v8  ;;  %v9870_v29 = vrot.slane %v9868_v14, 4  ;;  %v9871_v49 = vrot.slane %v9640_v35, 5  ;;  %v15233_v37 = vcombine.low %v7732_v58, %v7735_v1  ;;  %v9648_v53 = vld [vmem:[%s18695_s22 + $0x15c] sm:$0xf] }
 0x2be   : > { %4360 = vst.msk [vmem:[#allocation2 + $0x1f8] sm:$0xff] %vm436_vm10, %v4328_v59  ;;  %v15219_v6 = vrot.slane %v7145_v44, 11  ;;  %v7747_v10 = vrot.slane %v7745_v46, 4  ;;  %v7748_v23 = vrot.slane %v7147_v13, 7  ;;  %v15443_v24 = vcombine.low %v9862_v18, %v9865_v3  ;;  %v7148_v16 = vld [vmem:[%s18695_s22 + $0x338] sm:$0x8] }
 0x2bf   : > { %4358 = vst.msk [vmem:[#allocation2 + $0x1e8] sm:$0xff] %vm436_vm10, %v4326_v12  ;;  %v15425_v36 = vrot.slane %v9641_v41, 9  ;;  %v9877_v8 = vrot.slane %v9875_v47, 4  ;;  %v9878_v48 = vrot.slane %v9643_v55, 5  ;;  %v7739_v7 = vsel %vm19448_vm9, %v15218_v28, %v7738_v54  ;;  %v7150_v26 = vld [vmem:[%s18695_s22 + $0x340] sm:$0x7] }
 0x2c0   : > { %v7742_v50 = vsel %vm19448_vm9, %v7740_v42, %v7741_v33  ;;  %v9869_v20 = vsel %vm18697_vm2, %v15424_v57, %v9868_v14  ;;  %v9872_v62 = vsel %vm18697_vm2, %v9870_v29, %v9871_v49  ;;  %v7752_v25 = vrot.slane %v7149_v43, 7  ;;  %v9644_v38 = vld [vmem:[%s18695_s22 + $0x13c] sm:$0xe]  ;;  %v9646_v19 = vld [vmem:[%s18695_s22 + $0x144] sm:$0x1] }
 0x2c1   : > { %v7746_v17 = vsel %vm19448_vm9, %v15219_v6, %v7745_v46  ;;  %v7749_v30 = vsel %vm19448_vm9, %v7747_v10, %v7748_v23  ;;  %v9882_v22 = vrot.slane %v9645_v9, 5  ;;  %v9876_v51 = vsel %vm18697_vm2, %v15425_v36, %v9875_v47  ;;  %v7151_v45 = vld [vmem:[%s18695_s22 + $0x354] sm:$0x8]  ;;  %v9647_v32 = vld [vmem:[%s18695_s22 + $0x158] sm:$0xe] }
 0x2c2   : > { %v9879_v21 = vsel %vm18697_vm2, %v9877_v8, %v9878_v48  ;;  %v7759_v0 = vrot.slane %v7152_v2, 7  ;;  %v9889_v31 = vrot.slane %v9648_v53, 5  ;;  %v15234_v60 = vcombine.low %v7739_v7, %v7742_v50  ;;  %v7153_v56 = vld [vmem:[%s18695_s22 + $0x35c] sm:$0x7]  ;;  %v9649_v15 = vld [vmem:[%s18695_s22 + $0x160] sm:$0x1] }
 0x2c3   : > { %17019 = vmatmul.mubr.msk.bf16.gmra.mrb[76].mxu0 %vm873_vm6, %v15232_v34  ;;  %v15444_v52 = vcombine.low %v9869_v20, %v9872_v62  ;;  %v15220_v39 = vrot.slane %v7148_v16, 11  ;;  %v7755_v4 = vrot.slane %v7150_v26, 7  ;;  %v15235_v54 = vcombine.low %v7746_v17, %v7749_v30  ;;  %v7155_v13 = vld [vmem:[%s18695_s22 + $0x374] sm:$0xf]  ;;  %v9651_v47 = vld [vmem:[%s18695_s22 + $0x178] sm:$0xf] }
 0x2c4   : > { %17199 = vmatmul.mubr.msk.bf16.gmra.mrb[44].mxu1 %vm873_vm6, %v15442_v11  ;;  %17022 = vmatprep.mubr.msk.bf16.mxu0 %vm873_vm6, %v15233_v37  ;;  %v7754_v14 = vrot.slane %v7752_v25, 4  ;;  %v15426_v59 = vrot.slane %v9644_v38, 9  ;;  %v9885_v34 = vrot.slane %v9646_v19, 5  ;;  %v15445_v58 = vcombine.low %v9876_v51, %v9879_v21  ;;  %v7158_v18 = vld [vmem:[%s18695_s22 + $0x390] sm:$0xf] }
 0x2c5   : > { %17202 = vmatprep.mubr.msk.bf16.mxu1 %vm873_vm6, %v15443_v24  ;;  %v9884_v27 = vrot.slane %v9882_v22, 4  ;;  %v15221_v35 = vrot.slane %v7151_v45, 11  ;;  %v15427_v46 = vrot.slane %v9647_v32, 9  ;;  %v7761_v12 = vrot.slane %v7759_v0, 4  ;;  %v7154_v41 = vld [vmem:[%s18695_s22 + $0x370] sm:$0x8] }
 0x2c6   : > { %v7762_v11 = vrot.slane %v7153_v56, 7  ;;  %v9891_v1 = vrot.slane %v9889_v31, 4  ;;  %v9892_v44 = vrot.slane %v9649_v15, 5  ;;  %v7753_v3 = vsel %vm19448_vm9, %v15220_v39, %v7752_v25  ;;  %v9654_v55 = vld [vmem:[%s18695_s22 + $0x194] sm:$0xf] }
 0x2c7   : > { %v7756_v28 = vsel %vm19448_vm9, %v7754_v14, %v7755_v4  ;;  %v9883_v33 = vsel %vm18697_vm2, %v15426_v59, %v9882_v22  ;;  %v9886_v42 = vsel %vm18697_vm2, %v9884_v27, %v9885_v34  ;;  %v7760_v57 = vsel %vm19448_vm9, %v15221_v35, %v7759_v0  ;;  %v7156_v49 = vld [vmem:[%s18695_s22 + $0x378] sm:$0x7]  ;;  %v9650_v6 = vld [vmem:[%s18695_s22 + $0x174] sm:$0xe]  ;;  %v9652_v43 = vld [vmem:[%s18695_s22 + $0x17c] sm:$0x1] }
 0x2c8   : > { %v9890_v29 = vsel %vm18697_vm2, %v15427_v46, %v9889_v31  ;;  %v7766_v37 = vrot.slane %v7155_v13, 7  ;;  %v7763_v10 = vsel %vm19448_vm9, %v7761_v12, %v7762_v11  ;;  %v9893_v23 = vsel %vm18697_vm2, %v9891_v1, %v9892_v44  ;;  %v7157_v48 = vld [vmem:[%s18695_s22 + $0x38c] sm:$0x8]  ;;  %v7159_v9 = vld [vmem:[%s18695_s22 + $0x394] sm:$0x7] }
 0x2c9   : > { %v9896_v24 = vrot.slane %v9651_v47, 5  ;;  %v7773_v36 = vrot.slane %v7158_v18, 7  ;;  %v15222_v8 = vrot.slane %v7154_v41, 11  ;;  %v9903_v7 = vrot.slane %v9654_v55, 5  ;;  %v9653_v62 = vld [vmem:[%s18695_s22 + $0x190] sm:$0xe] }
 0x2ca   : > { %v15236_v2 = vcombine.low %v7753_v3, %v7756_v28  ;;  %v15446_v53 = vcombine.low %v9883_v33, %v9886_v42  ;;  %v7769_v50 = vrot.slane %v7156_v49, 7  ;;  %v15428_v20 = vrot.slane %v9650_v6, 9  ;;  %v9655_v16 = vld [vmem:[%s18695_s22 + $0x198] sm:$0x1]  ;;  %v7161_v21 = vld [vmem:[%s18695_s22 + $0x3ac] sm:$0xf] }
 0x2cb   : > { %17023 = vmatmul.mubr.msk.bf16.gmra.mrb[80].mxu0 %vm873_vm6, %v15234_v60  ;;  %v21685_v26 = vcombine.low %v7760_v57, %v7763_v10  ;;  %v15447_v25 = vcombine.low %v9890_v29, %v9893_v23  ;;  %v7768_v17 = vrot.slane %v7766_v37, 4  ;;  %v9899_v30 = vrot.slane %v9652_v43, 5  ;;  %v9657_v31 = vld [vmem:[%s18695_s22 + $0x1b0] sm:$0xf]  ;;  %v9660_v60 = vld [vmem:[%s18695_s22 + $0x204] sm:$0xf] }
 0x2cc   : > { %17203 = vmatmul.mubr.msk.bf16.gmra.mrb[48].mxu1 %vm873_vm6, %v15444_v52  ;;  %17026 = vmatprep.mubr.msk.bf16.mxu0 %vm873_vm6, %v15235_v54  ;;  %v9898_v38 = vrot.slane %v9896_v24, 4  ;;  %v15223_v19 = vrot.slane %v7157_v48, 11  ;;  %v7775_v22 = vrot.slane %v7773_v36, 4  ;;  %v7776_v51 = vrot.slane %v7159_v9, 7  ;;  %v7160_v56 = vld [vmem:[%s18695_s22 + $0x3a8] sm:$0x8] }
 0x2cd   : > { %17206 = vmatprep.mubr.msk.bf16.mxu1 %vm873_vm6, %v15445_v58  ;;  %v15429_v45 = vrot.slane %v9653_v62, 9  ;;  %v9905_v0 = vrot.slane %v9903_v7, 4  ;;  %v9906_v32 = vrot.slane %v9655_v16, 5  ;;  %v7767_v52 = vsel %vm19448_vm9, %v15222_v8, %v7766_v37  ;;  %v7162_v34 = vld [vmem:[%s18695_s22 + $0x3b0] sm:$0x7] }
 0x2ce   : > { %v7770_v39 = vsel %vm19448_vm9, %v7768_v17, %v7769_v50  ;;  %v9897_v4 = vsel %vm18697_vm2, %v15428_v20, %v9896_v24  ;;  %v7780_v15 = vrot.slane %v7161_v21, 7  ;;  %v9900_v54 = vsel %vm18697_vm2, %v9898_v38, %v9899_v30  ;;  %v9656_v46 = vld [vmem:[%s18695_s22 + $0x1ac] sm:$0xe]  ;;  %v9658_v12 = vld [vmem:[%s18695_s22 + $0x1b4] sm:$0x1] }
 0x2cf   : > { %v7774_v14 = vsel %vm19448_vm9, %v15223_v19, %v7773_v36  ;;  %v7777_v59 = vsel %vm19448_vm9, %v7775_v22, %v7776_v51  ;;  %v9910_v58 = vrot.slane %v9657_v31, 5  ;;  %v9904_v27 = vsel %vm18697_vm2, %v15429_v45, %v9903_v7  ;;  %v9659_v13 = vld [vmem:[%s18695_s22 + $0x200] sm:$0xe]  ;;  %v9661_v47 = vld [vmem:[%s18695_s22 + $0x208] sm:$0x1] }
 0x2d0   : > { %v9907_v35 = vsel %vm18697_vm2, %v9905_v0, %v9906_v32  ;;  %v10271_v11 = vrot.slane %v9660_v60, 5  ;;  %v21715_v1 = vcombine.low %v7767_v52, %v7770_v39  ;;  %v15224_v44 = vrot.slane %v7160_v56, 11  ;;  %v9663_v29 = vld [vmem:[%s18695_s22 + $0x220] sm:$0xf]  ;;  %v9666_v10 = vld [vmem:[%s18695_s22 + $0x23c] sm:$0xf] }
 0x2d1   : > { %v15448_v18 = vcombine.low %v9897_v4, %v9900_v54  ;;  %v21719_v3 = vcombine.low %v7774_v14, %v7777_v59  ;;  %v7782_v28 = vrot.slane %v7780_v15, 4  ;;  %v7783_v33 = vrot.slane %v7162_v34, 7  ;;  %v9662_v48 = vld [vmem:[%s18695_s22 + $0x21c] sm:$0xe]  ;;  %v9664_v9 = vld [vmem:[%s18695_s22 + $0x224] sm:$0x1] }
 0x2d2   : > { %v15449_v41 = vcombine.low %v9904_v27, %v9907_v35  ;;  %v15430_v55 = vrot.slane %v9656_v46, 9  ;;  %v9912_v42 = vrot.slane %v9910_v58, 4  ;;  %v9913_v57 = vrot.slane %v9658_v12, 5  ;;  %v9669_v20 = vld [vmem:[%s18695_s22 + $0x258] sm:$0xf] }
 0x2d3   : > { %17027 = vmatmul.mubr.msk.bf16.gmra.mrb[84].mxu0 %vm873_vm6, %v15236_v2  ;;  %v15469_v49 = vrot.slane %v9659_v13, 9  ;;  %v10273_v37 = vrot.slane %v10271_v11, 4  ;;  %v10274_v6 = vrot.slane %v9661_v47, 5  ;;  %v7781_v23 = vsel %vm19448_vm9, %v15224_v44, %v7780_v15  ;;  %v9667_v16 = vld [vmem:[%s18695_s22 + $0x240] sm:$0x1] }
 0x2d4   : > { %17207 = vmatmul.mubr.msk.bf16.gmra.mrb[52].mxu1 %vm873_vm6, %v15446_v53  ;;  %17030 = vmatprep.mubr.msk.bf16.mxu0 %vm873_vm6, %v21685_v26  ;;  %v7784_v43 = vsel %vm19448_vm9, %v7782_v28, %v7783_v33  ;;  %v10278_v24 = vrot.slane %v9663_v29, 5  ;;  %v9911_v36 = vsel %vm18697_vm2, %v15430_v55, %v9910_v58  ;;  %v9914_v8 = vsel %vm18697_vm2, %v9912_v42, %v9913_v57  ;;  %v9665_v53 = vld [vmem:[%s18695_s22 + $0x238] sm:$0xe]  ;;  %v7164_v38 = vld [vmem:[%s18695_s22 + $0x3c8] sm:$0xf] }
 0x2d5   : > { %17210 = vmatprep.mubr.msk.bf16.mxu1 %vm873_vm6, %v15447_v25  ;;  %v10272_v7 = vsel %vm18697_vm2, %v15469_v49, %v10271_v11  ;;  %v10275_v2 = vsel %vm18697_vm2, %v10273_v37, %v10274_v6  ;;  %v10285_v50 = vrot.slane %v9666_v10, 5  ;;  %v21745_v62 = vcombine.low %v7781_v23, %v7784_v43  ;;  %v9668_v32 = vld [vmem:[%s18695_s22 + $0x254] sm:$0xe]  ;;  %v9670_v60 = vld [vmem:[%s18695_s22 + $0x25c] sm:$0x1] }
 0x2d6   : > { %v15450_v25 = vcombine.low %v9911_v36, %v9914_v8  ;;  %v15470_v17 = vrot.slane %v9662_v48, 9  ;;  %v10280_v30 = vrot.slane %v10278_v24, 4  ;;  %v15489_v19 = vcombine.low %v10272_v7, %v10275_v2  ;;  %v9672_v31 = vld [vmem:[%s18695_s22 + $0x274] sm:$0xf]  ;;  %v7163_v39 = vld [vmem:[%s18695_s22 + $0x3c4] sm:$0x8] }
 0x2d7   : > { %v10281_v22 = vrot.slane %v9664_v9, 5  ;;  %v15471_v51 = vrot.slane %v9665_v53, 9  ;;  %v10292_v21 = vrot.slane %v9669_v20, 5  ;;  %v10287_v45 = vrot.slane %v10285_v50, 4  ;;  %v7165_v4 = vld [vmem:[%s18695_s22 + $0x3cc] sm:$0x7] }
 0x2d8   : > { %v10288_v0 = vrot.slane %v9667_v16, 5  ;;  %v8105_v52 = vrot.slane %v7164_v38, 7  ;;  %v10279_v56 = vsel %vm18697_vm2, %v15470_v17, %v10278_v24  ;;  %v15472_v54 = vrot.slane %v9668_v32, 9  ;;  %v9671_v14 = vld [vmem:[%s18695_s22 + $0x270] sm:$0xe]  ;;  %v18543_v10 = vld [vmem:[%s22986_s4 + $0x78] sm:$0xff]  }
 0x2d9   : > { %v10282_v15 = vsel %vm18697_vm2, %v10280_v30, %v10281_v22  ;;  %v10299_v59 = vrot.slane %v9672_v31, 5  ;;  %v10286_v34 = vsel %vm18697_vm2, %v15471_v51, %v10285_v50  ;;  %v10294_v58 = vrot.slane %v10292_v21, 4  ;;  %v9673_v35 = vld [vmem:[%s18695_s22 + $0x278] sm:$0x1]  ;;  %v7167_v44 = vld [vmem:[%s18695_s22 + $0x3e4] sm:$0xf] }
 0x2da   : > { %v10295_v27 = vrot.slane %v9670_v60, 5  ;;  %v15259_v46 = vrot.slane %v7163_v39, 11  ;;  %v8107_v12 = vrot.slane %v8105_v52, 4  ;;  %v8108_v11 = vrot.slane %v7165_v4, 7  ;;  %v7170_v55 = vld [vmem:[%s18695_s22 + $0x400] sm:$0xf] }
 0x2db   : > { %17031 = vmatmul.mubr.msk.bf16.gmra.mrb[88].mxu0 %vm873_vm6, %v21715_v1  ;;  %v15490_v13 = vcombine.low %v10279_v56, %v10282_v15  ;;  %v15473_v47 = vrot.slane %v9671_v14, 9  ;;  %v10301_v33 = vrot.slane %v10299_v59, 4  ;;  %v21776_v42 = vld [vmem:[%s18695_s22 + $0x2ac] sm:$0xf]  ;;  %v10293_v57 = vsel %vm18697_vm2, %v15472_v54, %v10292_v21  ;;  %v7166_v49 = vld [vmem:[%s18695_s22 + $0x3e0] sm:$0x8] }
 0x2dc   : > { %17211 = vmatmul.mubr.msk.bf16.gmra.mrb[56].mxu1 %vm873_vm6, %v15448_v18  ;;  %17034 = vmatprep.mubr.msk.bf16.mxu0 %vm873_vm6, %v21719_v3  ;;  %v21772_v18 = vld [vmem:[%s18695_s22 + $0x290] sm:$0xf]  ;;  %v10296_v29 = vsel %vm18697_vm2, %v10294_v58, %v10295_v27  ;;  %v7168_v37 = vld [vmem:[%s18695_s22 + $0x3e8] sm:$0x7]  ;;  %v8112_v6 = vrot.slane %v7167_v44, 7  ;;  %v8106_v23 = vsel %vm19448_vm9, %v15259_v46, %v8105_v52  ;;  %v8109_v43 = vsel %vm19448_vm9, %v8107_v12, %v8108_v11  ;;  %v21799_v48 = vld [vmem:[%s22987_s5] sm:$0xff]  }
 0x2dd   : > { %17214 = vmatprep.mubr.msk.bf16.mxu1 %vm873_vm6, %v15449_v41  ;;  %v10302_v41 = vrot.slane %v9673_v35, 5  ;;  %v9674_v24 = vld [vmem:[%s18695_s22 + $0x28c] sm:$0xe]  ;;  %v9676_v36 = vld [vmem:[%s18695_s22 + $0x294] sm:$0x1]  ;;  %v10306_v8 = vrot.slane %v21772_v18, 5  ;;  %v15492_v53 = vcombine.low %v10293_v57, %v10296_v29  ;;  %v10300_v50 = vsel %vm18697_vm2, %v15473_v47, %v10299_v59 }
 0x2de   : > { %v7171_v9 = vld [vmem:[%s18695_s22 + $0x404] sm:$0x7]  ;;  %v8119_v7 = vrot.slane %v7170_v55, 7  ;;  %v10313_v2 = vrot.slane %v21776_v42, 5  ;;  %v15260_v16 = vrot.slane %v7166_v49, 11  ;;  %v15275_v17 = vcombine.low %v8106_v23, %v8109_v43 }
 0x2df   : > { %v10303_v20 = vsel %vm18697_vm2, %v10301_v33, %v10302_v41  ;;  %v8114_v30 = vrot.slane %v8112_v6, 4  ;;  %v8115_v38 = vrot.slane %v7168_v37, 7  ;;  %v7173_v22 = vld [vmem:[%s18695_s22 + $0x41c] sm:$0xf]  ;;  %v10308_v51 = vrot.slane %v10306_v8, 4 }
 0x2e0   : > { %v10309_v21 = vrot.slane %v9676_v36, 5  ;;  %v8121_v32 = vrot.slane %v8119_v7, 4  ;;  %v10315_v60 = vrot.slane %v10313_v2, 4  ;;  %v7172_v39 = vld [vmem:[%s18695_s22 + $0x418] sm:$0x8]  ;;  %v8126_v4 = vrot.slane %v7173_v22, 7 }
 0x2e1   : > { %v9681_v56 = vld [vmem:[%s18695_s22 + $0x2c8] sm:$0xf]  ;;  %v8113_v15 = vsel %vm19448_vm9, %v15260_v16, %v8112_v6  ;;  %v8116_v54 = vsel %vm19448_vm9, %v8114_v30, %v8115_v38  ;;  %v7174_v14 = vld [vmem:[%s18695_s22 + $0x420] sm:$0x7]  ;;  %v7176_v59 = vld [vmem:[%s18695_s22 + $0x438] sm:$0xf] }
 0x2e2   : > { %v15262_v27 = vrot.slane %v7172_v39, 11  ;;  %v9684_v35 = vld [vmem:[%s18695_s22 + $0x2e4] sm:$0xf]  ;;  %v9682_v44 = vld [vmem:[%s18695_s22 + $0x2cc] sm:$0x1]  ;;  %v8128_v47 = vrot.slane %v8126_v4, 4  ;;  %v15276_v41 = vcombine.low %v8113_v15, %v8116_v54 }
 0x2e3   : > { %17035 = vmatmul.mubr.msk.bf16.gmra.mrb[92].mxu0 %vm873_vm6, %v21745_v62  ;;  %v9680_v11 = vld [vmem:[%s18695_s22 + $0x2c4] sm:$0xe]  ;;  %v8129_v18 = vrot.slane %v7174_v14, 7  ;;  %v8133_v33 = vrot.slane %v7176_v59, 7  ;;  %v7177_v55 = vld [vmem:[%s18695_s22 + $0x43c] sm:$0x7] }
 0x2e4   : > { %17215 = vmatmul.mubr.msk.bf16.gmra.mrb[60].mxu1 %vm873_vm6, %v15450_v25  ;;  %17042 = vmatprep.mubr.msk.bf16.mxu0 %vm873_vm6, %v21685_v26  ;;  %v10289_v26 = vsel %vm18697_vm2, %v10287_v45, %v10288_v0  ;;  %v9677_v25 = vld [vmem:[%s18695_s22 + $0x2a8] sm:$0xe]  ;;  %v8122_v0 = vrot.slane %v7171_v9, 7  ;;  %v9683_v42 = vld [vmem:[%s18695_s22 + $0x2e0] sm:$0xe]  ;;  %v10327_v57 = vrot.slane %v9684_v35, 5  ;;  %v8127_v6 = vsel %vm19448_vm9, %v15262_v27, %v8126_v4 }
 0x2e5   : > { %17222 = vmatprep.mubr.msk.bf16.mxu1 %vm873_vm6, %v15489_v19  ;;  %v15491_v28 = vcombine.low %v10286_v34, %v10289_v26  ;;  %v15474_v19 = vrot.slane %v9674_v24, 9  ;;  %v15475_v31 = vrot.slane %v9677_v25, 9  ;;  %v10310_v26 = vsel %vm18697_vm2, %v10308_v51, %v10309_v21  ;;  %v7179_v23 = vld [vmem:[%s18695_s22 + $0x454] sm:$0xf]  ;;  %v7178_v25 = vld [vmem:[%s18695_s22 + $0x450] sm:$0x8] }
 0x2e6   : > { %v15476_v43 = vrot.slane %v9680_v11, 9  ;;  %v10323_v36 = vrot.slane %v9682_v44, 5  ;;  %v8130_v9 = vsel %vm19448_vm9, %v8128_v47, %v8129_v18  ;;  %v9690_v38 = vld [vmem:[%s18695_s22 + $0x31c] sm:$0xf]  ;;  %v7181_v39 = vld [vmem:[%s18695_s22 + $0x46c] sm:$0x8] }
 0x2e7   : > { %v10307_v34 = vsel %vm18697_vm2, %v15474_v19, %v10306_v8  ;;  %v10314_v46 = vsel %vm18697_vm2, %v15475_v31, %v10313_v2  ;;  %v8136_v2 = vrot.slane %v7177_v55, 7  ;;  %v15278_v19 = vcombine.low %v8127_v6, %v8130_v9  ;;  %v9686_v21 = vld [vmem:[%s18695_s22 + $0x2fc] sm:$0xe]  ;;  %v9689_v54 = vld [vmem:[%s18695_s22 + $0x318] sm:$0xe] }
 0x2e8   : > { %v15494_v29 = vcombine.low %v10307_v34, %v10310_v26  ;;  %v10341_v14 = vrot.slane %v9690_v38, 5  ;;  %v15478_v34 = vrot.slane %v9686_v21, 9  ;;  %v9691_v27 = vld [vmem:[%s18695_s22 + $0x320] sm:$0x1]  ;;  %v7185_v11 = vld [vmem:[%s18695_s22 + $0x48c] sm:$0xf] }
 0x2e9   : > { %v9693_v47 = vld [vmem:[%s18695_s22 + $0x338] sm:$0xf]  ;;  %v7188_v18 = vld [vmem:[%s18695_s22 + $0x4a8] sm:$0xf]  ;;  %v10344_v55 = vrot.slane %v9691_v27, 5 }
 0x2ea   : > { %v9692_v6 = vld [vmem:[%s18695_s22 + $0x334] sm:$0xe]  ;;  %v7192_v27 = vld [vmem:[%s18695_s22 + $0x4c8] sm:$0x7] }
 0x2eb   : > { %17043 = vmatmul.mubr.msk.bf16.vlgmr.msra.gmra.mrb[64].mxu0 %vm873_vm6, %v21715_v1  ;;  %v7169_v1 = vld [vmem:[%s18695_s22 + $0x3fc] sm:$0x8] }
 0x2ec   : > { %17223 = vmatmul.mubr.msk.bf16.vlgmr.msra.gmra.mrb[32].mxu1 %vm873_vm6, %v15490_v13  ;;  %17046 = vmatprep.mubr.msk.bf16.mxu0 %vm873_vm6, %v21719_v3  ;;  %v9679_v3 = vld [vmem:[%s18695_s22 + $0x2b0] sm:$0x1]  ;;  %v15261_v45 = vrot.slane %v7169_v1, 11  ;;  %v10320_v13 = vrot.slane %v9681_v56, 5  ;;  %v9687_v1 = vld [vmem:[%s18695_s22 + $0x300] sm:$0xf] }
 0x2ed   : > { %17255 = vmatpush3.bf16.msra.mxu1 %v21469_v61  ;;  %17226 = vmatprep.mubr.msk.bf16.mxu1 %vm873_vm6, %v15491_v28  ;;  %v21820_v61 = vld [vmem:[%s22986_s4 + $0x20] sm:$0xff]   ;;  %v10316_v52 = vrot.slane %v9679_v3, 5  ;;  %v7175_v28 = vld [vmem:[%s18695_s22 + $0x434] sm:$0x8]  ;;  %v8140_v3 = vrot.slane %v7179_v23, 7  ;;  %v10334_v30 = vrot.slane %v9687_v1, 5 }
 0x2ee   : > { %17256 = vmatprep.subr.bf16.mxu1 %v18543_v10  ;;  %17399 = vmatpush3.bf16.msra.mxu0 %v21497_v40  ;;  %v15493_v40 = vcombine.low %v10300_v50, %v10303_v20  ;;  %v8120_v58 = vsel %vm19448_vm9, %v15261_v45, %v8119_v7  ;;  %v10322_v24 = vrot.slane %v10320_v13, 4  ;;  %v15263_v8 = vrot.slane %v7175_v28, 11  ;;  %v7182_v50 = vld [vmem:[%s18695_s22 + $0x470] sm:$0xf]  ;;  %v9688_v45 = vld [vmem:[%s18695_s22 + $0x304] sm:$0x1] }
 0x2ef   : > { %17432 = vmatprep.subr.bf16.mxu0 %v21799_v48  ;;  %v10317_v12 = vsel %vm18697_vm2, %v10315_v60, %v10316_v52  ;;  %v8135_v7 = vrot.slane %v8133_v33, 4  ;;  %v10329_v20 = vrot.slane %v10327_v57, 4  ;;  %v10321_v22 = vsel %vm18697_vm2, %v15476_v43, %v10320_v13 }
 0x2f0   : > { %v15495_v37 = vcombine.low %v10314_v46, %v10317_v12  ;;  %v10324_v51 = vsel %vm18697_vm2, %v10322_v24, %v10323_v36  ;;  %v15264_v52 = vrot.slane %v7178_v25, 11  ;;  %v8142_v56 = vrot.slane %v8140_v3, 4  ;;  %v7187_v36 = vld [vmem:[%s18695_s22 + $0x4a4] sm:$0x8] }
 0x2f1   : > { %17257 = vmatpush3.bf16.msra.mxu1 %v18543_v10  ;;  %v9685_v10 = vld [vmem:[%s18695_s22 + $0x2e8] sm:$0x1]  ;;  %v8137_v31 = vsel %vm19448_vm9, %v8135_v7, %v8136_v2  ;;  %v15496_v59 = vcombine.low %v10321_v22, %v10324_v51  ;;  %v10336_v26 = vrot.slane %v10334_v30, 4  ;;  %v15479_v13 = vrot.slane %v9689_v54, 9  ;;  %v9694_v2 = vld [vmem:[%s18695_s22 + $0x33c] sm:$0x1] }
 0x2f2   : > { %17290 = vmatprep.subr.bf16.mxu1 %v21820_v61  ;;  %v10330_v16 = vrot.slane %v9685_v10, 5  ;;  %v8141_v28 = vsel %vm19448_vm9, %v15264_v52, %v8140_v3  ;;  %v9696_v10 = vld [vmem:[%s18695_s22 + $0x354] sm:$0xf]  ;;  %v10348_v24 = vrot.slane %v9693_v47, 5  ;;  %v15267_v38 = vrot.slane %v7187_v36, 11 }
 0x2f3   : > { %17047 = vmatmul.mubr.msk.bf16.gmra.mrb[68].mxu0 %vm873_vm6, %v21745_v62  ;;  %v8123_v62 = vsel %vm19448_vm9, %v8121_v32, %v8122_v0  ;;  %v8147_v0 = vrot.slane %v7182_v50, 7  ;;  %v8134_v32 = vsel %vm19448_vm9, %v15263_v8, %v8133_v33  ;;  %v8161_v8 = vrot.slane %v7188_v18, 7  ;;  %v9697_v22 = vld [vmem:[%s18695_s22 + $0x358] sm:$0x1]  ;;  %v7193_v18 = vld [vmem:[%s18695_s22 + $0x4dc] sm:$0x8] }
 0x2f4   : > { %17227 = vmatmul.mubr.msk.bf16.gmra.mrb[36].mxu1 %vm873_vm6, %v15492_v53  ;;  %17050 = vmatprep.mubr.msk.bf16.mxu0 %vm873_vm6, %v15275_v17  ;;  %v15277_v49 = vcombine.low %v8120_v58, %v8123_v62  ;;  %v15477_v53 = vrot.slane %v9683_v42, 9  ;;  %v7180_v17 = vld [vmem:[%s18695_s22 + $0x458] sm:$0x7]  ;;  %v10331_v4 = vsel %vm18697_vm2, %v10329_v20, %v10330_v16  ;;  %v10337_v58 = vrot.slane %v9688_v45, 5  ;;  %v7184_v42 = vld [vmem:[%s18695_s22 + $0x488] sm:$0x8] }
 0x2f5   : > { %17230 = vmatprep.mubr.msk.bf16.mxu1 %vm873_vm6, %v15493_v40  ;;  %v7183_v40 = vld [vmem:[%s18695_s22 + $0x474] sm:$0x7]  ;;  %v8143_v15 = vrot.slane %v7180_v17, 7  ;;  %v15279_v35 = vcombine.low %v8134_v32, %v8137_v31  ;;  %v15265_v62 = vrot.slane %v7181_v39, 11  ;;  %v8149_v46 = vrot.slane %v8147_v0, 4 }
 0x2f6   : > { %v10328_v60 = vsel %vm18697_vm2, %v15477_v53, %v10327_v57  ;;  %v8150_v12 = vrot.slane %v7183_v40, 7  ;;  %v7186_v57 = vld [vmem:[%s18695_s22 + $0x490] sm:$0x7]  ;;  %v10342_v9 = vsel %vm18697_vm2, %v15479_v13, %v10341_v14  ;;  %v15266_v7 = vrot.slane %v7184_v42, 11  ;;  %v7189_v53 = vld [vmem:[%s18695_s22 + $0x4ac] sm:$0x7] }
 0x2f7   : > { %v15497_v44 = vcombine.low %v10328_v60, %v10331_v4  ;;  %v8144_v33 = vsel %vm19448_vm9, %v8142_v56, %v8143_v15  ;;  %v8148_v23 = vsel %vm19448_vm9, %v15265_v62, %v8147_v0  ;;  %v8157_v20 = vrot.slane %v7186_v57, 7  ;;  %v7191_v31 = vld [vmem:[%s18695_s22 + $0x4c4] sm:$0xf]  ;;  %v9699_v60 = vld [vmem:[%s18695_s22 + $0x370] sm:$0xf] }
 0x2f8   : > { %v8151_v43 = vsel %vm19448_vm9, %v8149_v46, %v8150_v12  ;;  %v15280_v1 = vcombine.low %v8141_v28, %v8144_v33  ;;  %v15480_v16 = vrot.slane %v9692_v6, 9  ;;  %v10355_v25 = vrot.slane %v9696_v10, 5  ;;  %v7194_v4 = vld [vmem:[%s18695_s22 + $0x4e0] sm:$0xf]  ;;  %v9698_v46 = vld [vmem:[%s18695_s22 + $0x36c] sm:$0xe] }
 0x2f9   : > { %v15281_v17 = vcombine.low %v8148_v23, %v8151_v43  ;;  %v10350_v51 = vrot.slane %v10348_v24, 4  ;;  %v10351_v21 = vrot.slane %v9694_v2, 5  ;;  %v8163_v45 = vrot.slane %v8161_v8, 4  ;;  %v9700_v12 = vld [vmem:[%s18695_s22 + $0x374] sm:$0x1] }
 0x2fa   : > { %v8164_v0 = vrot.slane %v7189_v53, 7  ;;  %v10357_v39 = vrot.slane %v10355_v25, 4  ;;  %v10358_v40 = vrot.slane %v9697_v22, 5  ;;  %v10349_v54 = vsel %vm18697_vm2, %v15480_v16, %v10348_v24  ;;  %v7195_v28 = vld [vmem:[%s18695_s22 + $0x4e4] sm:$0x7] }
 0x2fb   : > { %17051 = vmatmul.mubr.msk.bf16.gmra.mrb[72].mxu0 %vm873_vm6, %v15276_v41  ;;  %v10343_v41 = vrot.slane %v10341_v14, 4  ;;  %v8162_v14 = vsel %vm19448_vm9, %v15267_v38, %v8161_v8  ;;  %v10362_v62 = vrot.slane %v9699_v60, 5  ;;  %v8171_v57 = vrot.slane %v7192_v27, 7  ;;  %v9705_v53 = vld [vmem:[%s18695_s22 + $0x3a8] sm:$0xf] }
 0x2fc   : > { %17231 = vmatmul.mubr.msk.bf16.gmra.mrb[40].mxu1 %vm873_vm6, %v15494_v29  ;;  %17054 = vmatprep.mubr.msk.bf16.mxu0 %vm873_vm6, %v15277_v49  ;;  %v10335_v29 = vsel %vm18697_vm2, %v15478_v34, %v10334_v30  ;;  %v10338_v49 = vsel %vm18697_vm2, %v10336_v26, %v10337_v58  ;;  %v10352_v34 = vsel %vm18697_vm2, %v10350_v51, %v10351_v21  ;;  %v7190_v58 = vld [vmem:[%s18695_s22 + $0x4c0] sm:$0x8]  ;;  %v15482_v6 = vrot.slane %v9698_v46, 9  ;;  %v7198_v22 = vld [vmem:[%s18695_s22 + $0x500] sm:$0x7] }
 0x2fd   : > { %17234 = vmatprep.mubr.msk.bf16.mxu1 %vm873_vm6, %v15495_v37  ;;  %v8154_v37 = vrot.slane %v7185_v11, 7  ;;  %v10345_v50 = vsel %vm18697_vm2, %v10343_v41, %v10344_v55  ;;  %v15498_v3 = vcombine.low %v10335_v29, %v10338_v49  ;;  %v8165_v26 = vsel %vm19448_vm9, %v8163_v45, %v8164_v0  ;;  %v9701_v29 = vld [vmem:[%s18695_s22 + $0x388] sm:$0xe]  ;;  %v9703_v49 = vld [vmem:[%s18695_s22 + $0x390] sm:$0x1] }
 0x2fe   : > { %v15499_v32 = vcombine.low %v10342_v9, %v10345_v50  ;;  %v8175_v11 = vrot.slane %v7194_v4, 7  ;;  %v10359_v47 = vsel %vm18697_vm2, %v10357_v39, %v10358_v40  ;;  %v15500_v41 = vcombine.low %v10349_v54, %v10352_v34  ;;  %v9704_v51 = vld [vmem:[%s18695_s22 + $0x3a4] sm:$0xe]  ;;  %v9707_v4 = vld [vmem:[%s18695_s22 + $0x3f8] sm:$0xe] }
 0x2ff   : > { %v8156_v30 = vrot.slane %v8154_v37, 4  ;;  %v8155_v56 = vsel %vm19448_vm9, %v15266_v7, %v8154_v37  ;;  %v15283_v55 = vcombine.low %v8162_v14, %v8165_v26  ;;  %v15268_v42 = vrot.slane %v7190_v58, 11  ;;  %v21984_v34 = vld [vmem:[%s22988_s6] ss:$0 sm:$0xff]  ;;  %v9711_v46 = vld [vmem:[%s18695_s22 + $0x418] sm:$0xf] }
 0x300   : > { %v10364_v10 = vrot.slane %v10362_v62, 4  ;;  %v10365_v23 = vrot.slane %v9700_v12, 5  ;;  %v15269_v24 = vrot.slane %v7193_v18, 11  ;;  %v8177_v36 = vrot.slane %v8175_v11, 4  ;;  %v12916_v26 = vld [vmem:[#allocation2 + $0x100] sm:$0xff] }
 0x301   : > { %v8158_v15 = vsel %vm19448_vm9, %v8156_v30, %v8157_v20  ;;  %v8178_v8 = vrot.slane %v7195_v28, 7  ;;  %v15483_v9 = vrot.slane %v9701_v29, 9  ;;  %v10372_v2 = vrot.slane %v9703_v49, 5  ;;  %v9708_v20 = vld [vmem:[%s18695_s22 + $0x3fc] sm:$0xf] }
 0x302   : > { %v8176_v38 = vsel %vm19448_vm9, %v15269_v24, %v8175_v11  ;;  %v10376_v21 = vrot.slane %v9705_v53, 5  ;;  %v10737_v60 = vrot.slane %v9708_v20, 5  ;;  %v8185_v14 = vrot.slane %v7198_v22, 7  ;;  %v9710_v29 = vld [vmem:[%s18695_s22 + $0x414] sm:$0xe] }
 0x303   : > { %17055 = vmatmul.mubr.msk.bf16.gmra.mrb[76].mxu0 %vm873_vm6, %v15278_v19  ;;  %v9695_v19 = vld [vmem:[%s18695_s22 + $0x350] sm:$0xe]  ;;  %v15523_v12 = vrot.slane %v9707_v4, 9  ;;  %v9712_v49 = vld [vmem:[%s18695_s22 + $0x41c] sm:$0x1] }
 0x304   : > { %17235 = vmatmul.mubr.msk.bf16.gmra.mrb[44].mxu1 %vm873_vm6, %v15496_v59  ;;  %17058 = vmatprep.mubr.msk.bf16.mxu0 %vm873_vm6, %v15279_v35  ;;  %v15481_v52 = vrot.slane %v9695_v19, 9  ;;  %v9702_v59 = vld [vmem:[%s18695_s22 + $0x38c] sm:$0xf]  ;;  %v8168_v35 = vrot.slane %v7191_v31, 7  ;;  %v8179_v19 = vsel %vm19448_vm9, %v8177_v36, %v8178_v8  ;;  %v10378_v27 = vrot.slane %v10376_v21, 4 }
 0x305   : > { %17238 = vmatprep.mubr.msk.bf16.mxu1 %vm873_vm6, %v15497_v44  ;;  %v15282_v44 = vcombine.low %v8155_v56, %v8158_v15  ;;  %v10369_v33 = vrot.slane %v9702_v59, 5  ;;  %v12917_v31 = vld [vmem:[#allocation2 + $0x108] sm:$0xff]  ;;  %v9709_v56 = vld [vmem:[%s18695_s22 + $0x400] sm:$0x1]  ;;  %v15285_v15 = vcombine.low %v8176_v38, %v8179_v19  ;;  %v15484_v59 = vrot.slane %v9704_v51, 9 }
 0x306   : > { %v10356_v13 = vsel %vm18697_vm2, %v15481_v52, %v10355_v25  ;;  %v8170_v37 = vrot.slane %v8168_v35, 4  ;;  %v8169_v50 = vsel %vm19448_vm9, %v15268_v42, %v8168_v35  ;;  %v10363_v25 = vsel %vm18697_vm2, %v15482_v6, %v10362_v62  ;;  %v12918_v6 = vld [vmem:[#allocation2 + $0x110] sm:$0xff]  ;;  %v12921_v36 = vld [vmem:[#allocation2 + $0x128] sm:$0xff] }
 0x307   : > { %v15501_v43 = vcombine.low %v10356_v13, %v10359_v47  ;;  %v10371_v7 = vrot.slane %v10369_v33, 4  ;;  %v10370_v45 = vsel %vm18697_vm2, %v15483_v9, %v10369_v33  ;;  %v12949_v62 = vadd.f32 %v21984_v34, %v12917_v31  ;;  %v9714_v47 = vld [vmem:[%s18695_s22 + $0x434] sm:$0xf]  ;;  %v9713_v8 = vld [vmem:[%s18695_s22 + $0x430] sm:$0xe] }
 0x308   : > { %v8172_v16 = vsel %vm19448_vm9, %v8170_v37, %v8171_v57  ;;  %v10739_v11 = vrot.slane %v10737_v60, 4  ;;  %v12948_v13 = vadd.f32 %v21984_v34, %v12916_v26  ;;  %v10744_v33 = vrot.slane %v9711_v46, 5  ;;  %v9717_v19 = vld [vmem:[%s18695_s22 + $0x450] sm:$0xf]  ;;  %v9720_v51 = vld [vmem:[%s18695_s22 + $0x46c] sm:$0xf] }
 0x309   : > { %v10373_v0 = vsel %vm18697_vm2, %v10371_v7, %v10372_v2  ;;  %v15284_v52 = vcombine.low %v8169_v50, %v8172_v16  ;;  %v12981_v57 = vmax.f32 %v12949_v62, 0.0  ;;  %v10738_v37 = vsel %vm18697_vm2, %v15523_v12, %v10737_v60  ;;  %v9716_v60 = vld [vmem:[%s18695_s22 + $0x44c] sm:$0xe] }
 0x30a   : > { %v15503_v58 = vcombine.low %v10370_v45, %v10373_v0  ;;  %v15524_v7 = vrot.slane %v9710_v29, 9  ;;  %v10746_v2 = vrot.slane %v10744_v33, 4  ;;  %v10747_v53 = vrot.slane %v9712_v49, 5  ;;  %v9726_v49 = vld [vmem:[%s18695_s22 + $0x4a4] sm:$0xf] }
 0x30b   : > { %17059 = vmatmul.mubr.msk.bf16.gmra.mrb[80].mxu0 %vm873_vm6, %v15280_v1  ;;  %v7197_v1 = vld [vmem:[%s18695_s22 + $0x4fc] sm:$0xf]  ;;  %v12950_v16 = vadd.f32 %v21984_v34, %v12918_v6  ;;  %v15526_v62 = vrot.slane %v9716_v60, 9 }
 0x30c   : > { %17239 = vmatmul.mubr.msk.bf16.gmra.mrb[48].mxu1 %vm873_vm6, %v15498_v3  ;;  %17062 = vmatprep.mubr.msk.bf16.mxu0 %vm873_vm6, %v15281_v17  ;;  %v10366_v3 = vsel %vm18697_vm2, %v10364_v10, %v10365_v23  ;;  %v7196_v17 = vld [vmem:[%s18695_s22 + $0x4f8] sm:$0x8]  ;;  %v8182_v30 = vrot.slane %v7197_v1, 7  ;;  %v10751_v10 = vrot.slane %v9714_v47, 5  ;;  %v9715_v1 = vld [vmem:[%s18695_s22 + $0x438] sm:$0x1]  ;;  %v10748_v45 = vsel %vm18697_vm2, %v10746_v2, %v10747_v53 }
 0x30d   : > { %17242 = vmatprep.mubr.msk.bf16.mxu1 %vm873_vm6, %v15499_v32  ;;  %v9706_v32 = vld [vmem:[%s18695_s22 + $0x3ac] sm:$0x1]  ;;  %v15502_v39 = vcombine.low %v10363_v25, %v10366_v3  ;;  %v15270_v40 = vrot.slane %v7196_v17, 11  ;;  %v12920_v25 = vld [vmem:[#allocation2 + $0x120] sm:$0xff]  ;;  %v12953_v3 = vadd.f32 %v21984_v34, %v12921_v36  ;;  %v15525_v17 = vrot.slane %v9713_v8, 9 }
 0x30e   : > { %v8184_v54 = vrot.slane %v8182_v30, 4  ;;  %v10379_v35 = vrot.slane %v9706_v32, 5  ;;  %v10754_v38 = vrot.slane %v9715_v1, 5  ;;  %v12952_v0 = vadd.f32 %v21984_v34, %v12920_v25  ;;  %v12923_v32 = vld [vmem:[#allocation2 + $0x138] sm:$0xff]  ;;  %v12929_v53 = vld [vmem:[#allocation2 + $0x168] sm:$0xff] }
 0x30f   : > { %v8183_v18 = vsel %vm19448_vm9, %v15270_v40, %v8182_v30  ;;  %v10753_v30 = vrot.slane %v10751_v10, 4  ;;  %v12982_v31 = vmax.f32 %v12950_v16, 0.0  ;;  %v12985_v40 = vmax.f32 %v12953_v3, 0.0  ;;  %v12927_v1 = vld [vmem:[#allocation2 + $0x158] sm:$0xff] }
 0x310   : > { %v8186_v28 = vsel %vm19448_vm9, %v8184_v54, %v8185_v14  ;;  %v10380_v42 = vsel %vm18697_vm2, %v10378_v27, %v10379_v35  ;;  %v10752_v4 = vsel %vm18697_vm2, %v15525_v17, %v10751_v10  ;;  %v12925_v54 = vld [vmem:[#allocation2 + $0x148] sm:$0xff]  ;;  %v10765_v14 = vrot.slane %v9720_v51, 5  ;;  %v9721_v27 = vld [vmem:[%s18695_s22 + $0x470] sm:$0x1] }
 0x311   : > { %v15286_v23 = vcombine.low %v8183_v18, %v8186_v28  ;;  %v12984_v35 = vmax.f32 %v12952_v0, 0.0  ;;  %v12955_v12 = vadd.f32 %v21984_v34, %v12923_v32  ;;  %v12957_v18 = vadd.f32 %v21984_v34, %v12925_v54  ;;  %v9728_v54 = vld [vmem:[%s18695_s22 + $0x4bc] sm:$0xe] }
 0x312   : > { %v12959_v51 = vadd.f32 %v21984_v34, %v12927_v1  ;;  %v12935_v1 = vld [vmem:[#allocation2 + $0x198] sm:$0xff] }
 0x313   : > { %17063 = vmatmul.mubr.msk.bf16.gmra.mrb[84].mxu0 %vm873_vm6, %v15282_v44  ;;  %v10740_v44 = vrot.slane %v9709_v56, 5  ;;  %v10755_v56 = vsel %vm18697_vm2, %v10753_v30, %v10754_v38  ;;  %v13014_v28 = vpack.c.bf16 %v12985_v40, %v12984_v35  ;;  %v12989_v10 = vmax.f32 %v12957_v18, 0.0  ;;  %v12926_v30 = vld [vmem:[#allocation2 + $0x150] sm:$0xff]  ;;  %v12928_v38 = vld [vmem:[#allocation2 + $0x160] sm:$0xff]  ;;  %v12933_v35 = vld [vmem:[#allocation2 + $0x188] sm:$0xff] }
 0x314   : > { %17243 = vmatmul.mubr.msk.bf16.gmra.mrb[52].mxu1 %vm873_vm6, %v15500_v41  ;;  %17066 = vmatprep.mubr.msk.bf16.mxu0 %vm873_vm6, %v15283_v55  ;;  %v12919_v41 = vld [vmem:[#allocation2 + $0x118] sm:$0xff]  ;;  %v10377_v55 = vsel %vm18697_vm2, %v15484_v59, %v10376_v21  ;;  %v10745_v21 = vsel %vm18697_vm2, %v15524_v7, %v10744_v33  ;;  %v22060_v7 = vld [vmem:[%s22986_s4 + $0x50] sm:$0xff]   ;;  %v12958_v60 = vadd.f32 %v21984_v34, %v12926_v30 }
 0x315   : > { %17246 = vmatprep.mubr.msk.bf16.mxu1 %vm873_vm6, %v15501_v43  ;;  %v10741_v63 = vsel %vm18697_vm2, %v10739_v11, %v10740_v44  ;;  %v12980_v43 = vmax.f32 %v12948_v13, 0.0  ;;  %v12951_v24 = vadd.f32 %v21984_v34, %v12919_v41  ;;  %v15504_v9 = vcombine.low %v10377_v55, %v10380_v42  ;;  %v12924_v11 = vld [vmem:[#allocation2 + $0x140] sm:$0xff]  ;;  %v9723_v42 = vld [vmem:[%s18695_s22 + $0x488] sm:$0xf] }
 0x316   : > { %v15543_v20 = vcombine.low %v10738_v37, %v10741_v63  ;;  %v15544_v59 = vcombine.low %v10745_v21, %v10748_v45  ;;  %v15545_v44 = vcombine.low %v10752_v4, %v10755_v56  ;;  %v10767_v41 = vrot.slane %v10765_v14, 4  ;;  %v9729_v21 = vld [vmem:[%s18695_s22 + $0x4c0] sm:$0xf] }
 0x317   : > { %v13012_v50 = vpack.c.bf16 %v12981_v57, %v12980_v43  ;;  %v12983_v22 = vmax.f32 %v12951_v24, 0.0  ;;  %v10768_v55 = vrot.slane %v9721_v27, 5  ;;  %v18546_v57 = vld [vmem:[%s22986_s4 + $0x28] sm:$0xff]   ;;  %v12956_v29 = vadd.f32 %v21984_v34, %v12924_v11  ;;  %v12931_v27 = vld [vmem:[#allocation2 + $0x178] sm:$0xff] }
 0x318   : > { %v12987_v37 = vmax.f32 %v12955_v12, 0.0  ;;  %v9724_v43 = vld [vmem:[%s18695_s22 + $0x48c] sm:$0x1]  ;;  %v10772_v24 = vrot.slane %v9723_v42, 5  ;;  %v12961_v45 = vadd.f32 %v21984_v34, %v12929_v53  ;;  %v10786_v40 = vrot.slane %v9729_v21, 5 }
 0x319   : > { %v13013_v26 = vpack.c.bf16 %v12983_v22, %v12982_v31  ;;  %v12988_v2 = vmax.f32 %v12956_v29, 0.0  ;;  %v10775_v17 = vrot.slane %v9724_v43, 5  ;;  %v9731_v11 = vld [vmem:[%s18695_s22 + $0x4d8] sm:$0xe]  ;;  %v12965_v29 = vadd.f32 %v21984_v34, %v12933_v35  ;;  %v9739_v21 = vld [vmem:[%s18695_s22 + $0x518] sm:$0x1] }
 0x31a   : > { %v10788_v18 = vrot.slane %v10786_v40, 4 }
 0x31b   : > { %17067 = vmatmul.mubr.msk.bf16.gmra.mrb[88].mxu0 %vm873_vm6, %v15284_v52  ;;  %v9718_v52 = vld [vmem:[%s18695_s22 + $0x454] sm:$0x1]  ;;  %v12997_v53 = vmax.f32 %v12965_v29, 0.0  ;;  %v9743_v29 = vld [vmem:[%s18695_s22 + $0x548] sm:$0xe] }
 0x31c   : > { %17247 = vmatmul.mubr.msk.bf16.gmra.mrb[56].mxu1 %vm873_vm6, %v15502_v39  ;;  %17070 = vmatprep.mubr.msk.bf16.mxu0 %vm873_vm6, %v15285_v15  ;;  %v10758_v39 = vrot.slane %v9717_v19, 5  ;;  %v12922_v15 = vld [vmem:[#allocation2 + $0x130] sm:$0xff]  ;;  %v10761_v46 = vrot.slane %v9718_v52, 5  ;;  %v13016_v19 = vpack.c.bf16 %v12989_v10, %v12988_v2  ;;  %v12960_v52 = vadd.f32 %v21984_v34, %v12928_v38 }
 0x31d   : > { %17250 = vmatprep.mubr.msk.bf16.mxu1 %vm873_vm6, %v15503_v58  ;;  %v9719_v58 = vld [vmem:[%s18695_s22 + $0x468] sm:$0xe]  ;;  %v12954_v47 = vadd.f32 %v21984_v34, %v12922_v15  ;;  %v12991_v15 = vmax.f32 %v12959_v51, 0.0  ;;  %v9737_v51 = vld [vmem:[%s18695_s22 + $0x510] sm:$0xe] }
 0x31e   : > { %v10760_v13 = vrot.slane %v10758_v39, 4  ;;  %v15527_v33 = vrot.slane %v9719_v58, 9  ;;  %v10759_v63 = vsel %vm18697_vm2, %v15526_v62, %v10758_v39  ;;  %v9732_v39 = vld [vmem:[%s18695_s22 + $0x4dc] sm:$0xf]  ;;  %v12992_v12 = vmax.f32 %v12960_v52, 0.0 }
 0x31f   : > { %v12986_v36 = vmax.f32 %v12954_v47, 0.0  ;;  %v10793_v62 = vrot.slane %v9732_v39, 5  ;;  %v15530_v47 = vrot.slane %v9728_v54, 9  ;;  %v10810_v54 = vrot.slane %v9739_v21, 5  ;;  %v9748_v21 = vld [vmem:[%s18695_s22 + $0x56c] sm:$0x1] }
 0x320   : > { %v10762_v6 = vsel %vm18697_vm2, %v10760_v13, %v10761_v46  ;;  %v10766_v8 = vsel %vm18697_vm2, %v15527_v33, %v10765_v14  ;;  %v9730_v14 = vld [vmem:[%s18695_s22 + $0x4c4] sm:$0x1]  ;;  %v12990_v46 = vmax.f32 %v12958_v60, 0.0  ;;  %v12930_v33 = vld [vmem:[#allocation2 + $0x170] sm:$0xff] }
 0x321   : > { %v15546_v16 = vcombine.low %v10759_v63, %v10762_v6  ;;  %v13015_v25 = vpack.c.bf16 %v12987_v37, %v12986_v36  ;;  %v15531_v63 = vrot.slane %v9731_v11, 9  ;;  %v10795_v6 = vrot.slane %v10793_v62, 4  ;;  %v12939_v11 = vld [vmem:[#allocation2 + $0x1b8] sm:$0xff] }
 0x322   : > { %v10787_v36 = vsel %vm18697_vm2, %v15530_v47, %v10786_v40 }
 0x323   : > { %17071 = vmatmul.mubr.msk.bf16.gmra.mrb[92].mxu0 %vm873_vm6, %v15286_v23  ;;  %v9722_v23 = vld [vmem:[%s18695_s22 + $0x484] sm:$0xe] }
 0x324   : > { %17251 = vmatmul.mubr.msk.bf16.gmra.mrb[60].mxu1 %vm873_vm6, %v15504_v9  ;;  %17400 = vmatprep.mubr.msk.bf16.mxu0 %vm436_vm10, %v13012_v50  ;;  %v10779_v9 = vrot.slane %v9726_v49, 5  ;;  %v9725_v50 = vld [vmem:[%s18695_s22 + $0x4a0] sm:$0xe]  ;;  %v15528_v3 = vrot.slane %v9722_v23, 9  ;;  %v9735_v49 = vld [vmem:[%s18695_s22 + $0x4f8] sm:$0xf]  ;;  %v12962_v23 = vadd.f32 %v21984_v34, %v12930_v33 }
 0x325   : > { %17258 = vmatprep.mubr.msk.bf16.mxu1 %vm873_vm6, %v15543_v20  ;;  %v9727_v20 = vld [vmem:[%s18695_s22 + $0x4a8] sm:$0x1]  ;;  %v15529_v0 = vrot.slane %v9725_v50, 9  ;;  %v9734_v50 = vld [vmem:[%s18695_s22 + $0x4f4] sm:$0xe] }
 0x326   : > { %v10781_v32 = vrot.slane %v10779_v9, 4  ;;  %v10782_v31 = vrot.slane %v9727_v20, 5  ;;  %v10773_v4 = vsel %vm18697_vm2, %v15528_v3, %v10772_v24  ;;  %v9736_v20 = vld [vmem:[%s18695_s22 + $0x4fc] sm:$0x1]  ;;  %v12934_v3 = vld [vmem:[#allocation2 + $0x190] sm:$0xff] }
 0x327   : > { %v12966_v40 = vadd.f32 %v21984_v34, %v12934_v3  ;;  %v12938_v33 = vld [vmem:[#allocation2 + $0x1b0] sm:$0xff] }
 0x328   : > { %v10783_v58 = vsel %vm18697_vm2, %v10781_v32, %v10782_v31  ;;  %v10803_v32 = vrot.slane %v9736_v20, 5 }
 0x32b   : > { %17401 = vmatmul.mubr.msk.bf16.vlgmr.msra.gmra.mrb[96].mxu0 %vm436_vm10, %v13013_v26  ;;  %v10780_v26 = vsel %vm18697_vm2, %v15529_v0, %v10779_v9  ;;  %v12937_v9 = vld [vmem:[#allocation2 + $0x1a8] sm:$0xff] }
 0x32c   : > { %17259 = vmatmul.mubr.msk.bf16.vlgmr.msra.gmra.mrb[32].mxu1 %vm873_vm6, %v15544_v59  ;;  %17404 = vmatprep.mubr.msk.bf16.mxu0 %vm436_vm10, %v13014_v28  ;;  %v12993_v59 = vmax.f32 %v12961_v45, 0.0  ;;  %v10789_v28 = vrot.slane %v9730_v14, 5  ;;  %v15549_v42 = vcombine.low %v10780_v26, %v10783_v58  ;;  %v15532_v45 = vrot.slane %v9734_v50, 9  ;;  %v9741_v14 = vld [vmem:[%s18695_s22 + $0x530] sm:$0xf] }
 0x32d   : > { %17291 = vmatpush3.bf16.msra.mxu1 %v21820_v61  ;;  %17262 = vmatprep.mubr.msk.bf16.mxu1 %vm873_vm6, %v15545_v44  ;;  %v10769_v61 = vsel %vm18697_vm2, %v10767_v41, %v10768_v55  ;;  %v9733_v44 = vld [vmem:[%s18695_s22 + $0x4e0] sm:$0x1]  ;;  %v13017_v55 = vpack.c.bf16 %v12991_v15, %v12990_v46  ;;  %v12969_v31 = vadd.f32 %v21984_v34, %v12937_v9  ;;  %v9744_v26 = vld [vmem:[%s18695_s22 + $0x54c] sm:$0xf] }
 0x32e   : > { %17292 = vmatprep.subr.bf16.mxu1 %v18546_v57  ;;  %17433 = vmatpush3.bf16.msra.mxu0 %v21799_v48  ;;  %v15547_v22 = vcombine.low %v10766_v8, %v10769_v61  ;;  %v10774_v48 = vrot.slane %v10772_v24, 4  ;;  %v12932_v41 = vld [vmem:[#allocation2 + $0x180] sm:$0xff]  ;;  %v13018_v37 = vpack.c.bf16 %v12993_v59, %v12992_v12  ;;  %v10796_v10 = vrot.slane %v9733_v44, 5  ;;  %v9738_v24 = vld [vmem:[%s18695_s22 + $0x514] sm:$0xf]  ;;  %v12941_v44 = vld [vmem:[#allocation2 + $0x1c8] sm:$0xff] }
 0x32f   : > { %v12964_v43 = vadd.f32 %v21984_v34, %v12932_v41  ;;  %v10790_v8 = vsel %vm18697_vm2, %v10788_v18, %v10789_v28  ;;  %v10800_v61 = vrot.slane %v9735_v49, 5  ;;  %v10807_v30 = vrot.slane %v9738_v24, 5  ;;  %v9740_v46 = vld [vmem:[%s18695_s22 + $0x52c] sm:$0xe]  ;;  %v9742_v28 = vld [vmem:[%s18695_s22 + $0x534] sm:$0x1] }
 0x330   : > { %v10776_v56 = vsel %vm18697_vm2, %v10774_v48, %v10775_v17  ;;  %v12936_v17 = vld [vmem:[#allocation2 + $0x1a0] sm:$0xff]  ;;  %v15550_v38 = vcombine.low %v10787_v36, %v10790_v8  ;;  %v12967_v48 = vadd.f32 %v21984_v34, %v12935_v1  ;;  %v13001_v35 = vmax.f32 %v12969_v31, 0.0  ;;  %v9745_v49 = vld [vmem:[%s18695_s22 + $0x550] sm:$0x1] }
 0x331   : > { %17293 = vmatpush3.bf16.msra.mxu1 %v18546_v57  ;;  %v15548_v13 = vcombine.low %v10773_v4, %v10776_v56  ;;  %v12963_v57 = vadd.f32 %v21984_v34, %v12931_v27  ;;  %v10802_v0 = vrot.slane %v10800_v61, 4  ;;  %v12968_v4 = vadd.f32 %v21984_v34, %v12936_v17  ;;  %v9749_v31 = vld [vmem:[%s18695_s22 + $0x580] sm:$0xe] }
 0x332   : > { %17326 = vmatprep.subr.bf16.mxu1 %v22060_v7  ;;  %v15533_v56 = vrot.slane %v9737_v51, 9  ;;  %v10809_v15 = vrot.slane %v10807_v30, 4  ;;  %v12999_v59 = vmax.f32 %v12967_v48, 0.0  ;;  %v10801_v58 = vsel %vm18697_vm2, %v15532_v45, %v10800_v61  ;;  %v9746_v51 = vld [vmem:[%s18695_s22 + $0x564] sm:$0xe] }
 0x333   : > { %17405 = vmatmul.mubr.msk.bf16.gmra.mrb[100].mxu0 %vm436_vm10, %v13015_v25  ;;  %v12995_v2 = vmax.f32 %v12963_v57, 0.0  ;;  %v10797_v25 = vsel %vm18697_vm2, %v10795_v6, %v10796_v10  ;;  %v10804_v27 = vsel %vm18697_vm2, %v10802_v0, %v10803_v32  ;;  %v10814_v12 = vrot.slane %v9741_v14, 5  ;;  %v12940_v57 = vld [vmem:[#allocation2 + $0x1c0] sm:$0xff]  ;;  %v12945_v32 = vld [vmem:[#allocation2 + $0x1e8] sm:$0xff] }
 0x334   : > { %17263 = vmatmul.mubr.msk.bf16.gmra.mrb[36].mxu1 %vm873_vm6, %v15546_v16  ;;  %17408 = vmatprep.mubr.msk.bf16.mxu0 %vm436_vm10, %v13016_v19  ;;  %v10794_v16 = vsel %vm18697_vm2, %v15531_v63, %v10793_v62  ;;  %v12994_v19 = vmax.f32 %v12962_v23, 0.0  ;;  %v12998_v62 = vmax.f32 %v12966_v40, 0.0  ;;  %v10808_v47 = vsel %vm18697_vm2, %v15533_v56, %v10807_v30 }
 0x335   : > { %17266 = vmatprep.mubr.msk.bf16.mxu1 %vm873_vm6, %v15547_v22  ;;  %v12996_v22 = vmax.f32 %v12964_v43, 0.0  ;;  %v15551_v39 = vcombine.low %v10794_v16, %v10797_v25  ;;  %v10811_v18 = vsel %vm18697_vm2, %v10809_v15, %v10810_v54  ;;  %v10821_v41 = vrot.slane %v9744_v26, 5  ;;  %v12942_v16 = vld [vmem:[#allocation2 + $0x1d0] sm:$0xff] }
 0x336   : > { %v13019_v60 = vpack.c.bf16 %v12995_v2, %v12994_v19  ;;  %v15534_v63 = vrot.slane %v9740_v46, 9  ;;  %v12971_v6 = vadd.f32 %v21984_v34, %v12939_v11  ;;  %v12973_v10 = vadd.f32 %v21984_v34, %v12941_v44  ;;  %v9747_v2 = vld [vmem:[%s18695_s22 + $0x568] sm:$0xf]  ;;  %v22160_v46 = vld [vmem:[%s22987_s5 + $0x10] sm:$0xff]  }
 0x337   : > { %v13020_v52 = vpack.c.bf16 %v12997_v53, %v12996_v22  ;;  %v15553_v23 = vcombine.low %v10808_v47, %v10811_v18  ;;  %v10816_v43 = vrot.slane %v10814_v12, 4  ;;  %v10817_v24 = vrot.slane %v9742_v28, 5  ;;  %v9750_v53 = vld [vmem:[%s18695_s22 + $0x584] sm:$0xf]  ;;  %v12797_v18 = vld [vmem:[#allocation2 + $0x8] sm:$0xff]  ;;  %17466 = vmatprep.subr.bf16.mxu0 %v22160_v46 }
 0x338   : > { %v12970_v36 = vadd.f32 %v21984_v34, %v12938_v33  ;;  %v12972_v8 = vadd.f32 %v21984_v34, %v12940_v57  ;;  %v15535_v61 = vrot.slane %v9743_v29, 9  ;;  %v10823_v1 = vrot.slane %v10821_v41, 4  ;;  %v12796_v47 = vld [vmem:[#allocation2] sm:$0xff] }
 0x339   : > { %v10824_v9 = vrot.slane %v9745_v49, 5  ;;  %v13003_v50 = vmax.f32 %v12971_v6, 0.0  ;;  %v13005_v20 = vmax.f32 %v12973_v10, 0.0  ;;  %v10815_v25 = vsel %vm18697_vm2, %v15534_v63, %v10814_v12  ;;  %v11154_v12 = vld [vmem:[%s18695_s22 + $0x14] sm:$0xf] }
 0x33a   : > { %v10818_v3 = vsel %vm18697_vm2, %v10816_v43, %v10817_v24  ;;  %v13002_v17 = vmax.f32 %v12970_v36, 0.0  ;;  %v10828_v30 = vrot.slane %v9747_v2, 5  ;;  %v13004_v19 = vmax.f32 %v12972_v8, 0.0  ;;  %v9754_v63 = vld [vmem:[%s18695_s22 + $0x5a4] sm:$0x1] }
 0x33b   : > { %17409 = vmatmul.mubr.msk.bf16.gmra.mrb[104].mxu0 %vm436_vm10, %v13017_v55  ;;  %v15552_v55 = vcombine.low %v10801_v58, %v10804_v27  ;;  %v10822_v22 = vsel %vm18697_vm2, %v15535_v61, %v10821_v41  ;;  %v10825_v48 = vsel %vm18697_vm2, %v10823_v1, %v10824_v9  ;;  %v10835_v45 = vrot.slane %v9750_v53, 5  ;;  %v11153_v24 = vld [vmem:[%s18695_s22 + $0x10] sm:$0xc]  ;;  %v11155_v36 = vld [vmem:[%s18695_s22 + $0x18] sm:$0x3] }
 0x33c   : > { %17267 = vmatmul.mubr.msk.bf16.gmra.mrb[40].mxu1 %vm873_vm6, %v15548_v13  ;;  %17412 = vmatprep.mubr.msk.bf16.mxu0 %vm436_vm10, %v13018_v37  ;;  %v13000_v13 = vmax.f32 %v12968_v4, 0.0  ;;  %v12974_v0 = vadd.f32 %v21984_v34, %v12942_v16  ;;  %v13024_v40 = vpack.c.bf16 %v13005_v20, %v13004_v19  ;;  %v15555_v56 = vcombine.low %v10822_v22, %v10825_v48 }
 0x33d   : > { %17270 = vmatprep.mubr.msk.bf16.mxu1 %vm873_vm6, %v15549_v42  ;;  %v13021_v42 = vpack.c.bf16 %v12999_v59, %v12998_v62  ;;  %v15536_v15 = vrot.slane %v9746_v51, 9  ;;  %v10830_v54 = vrot.slane %v10828_v30, 4  ;;  %v10831_v14 = vrot.slane %v9748_v21, 5  ;;  %v12944_v59 = vld [vmem:[#allocation2 + $0x1e0] sm:$0xff]  ;;  %v12798_v51 = vld [vmem:[#allocation2 + $0x10] sm:$0xff]  ;;  %v12799_v21 = vld [vmem:[#allocation2 + $0x18] sm:$0xff] }
 0x33e   : > { %v13022_v37 = vpack.c.bf16 %v13001_v35, %v13000_v13  ;;  %v12977_v26 = vadd.f32 %v21984_v34, %v12945_v32  ;;  %v15537_v58 = vrot.slane %v9749_v31, 9  ;;  %v10837_v27 = vrot.slane %v10835_v45, 4  ;;  %v9753_v62 = vld [vmem:[%s18695_s22 + $0x5a0] sm:$0xf]  ;;  %v12946_v13 = vld [vmem:[#allocation2 + $0x1f0] sm:$0xff] }
 0x33f   : > { %v12976_v44 = vadd.f32 %v21984_v34, %v12944_v59  ;;  %v10829_v28 = vsel %vm18697_vm2, %v15536_v15, %v10828_v30  ;;  %v10832_v33 = vsel %vm18697_vm2, %v10830_v54, %v10831_v14  ;;  %v13006_v41 = vmax.f32 %v12974_v0, 0.0  ;;  %v11157_v30 = vld [vmem:[%s18695_s22 + $0x30] sm:$0xf]  ;;  %v12800_v31 = vld [vmem:[#allocation2 + $0x20] sm:$0xff]  ;;  %v12801_v59 = vld [vmem:[#allocation2 + $0x28] sm:$0xff] }
 0x340   : > { %v13009_v57 = vmax.f32 %v12977_v26, 0.0  ;;  %v10836_v29 = vsel %vm18697_vm2, %v15537_v58, %v10835_v45  ;;  %v11347_v6 = vrot.slane %v11154_v12, 6  ;;  %v12978_v10 = vadd.f32 %v21984_v34, %v12946_v13  ;;  %v11161_v26 = vld [vmem:[%s18695_s22 + $0x50] sm:$0x3] }
 0x341   : > { %v12835_v43 = vadd.f32 %v21984_v34, %v12797_v18  ;;  %v15556_v8 = vcombine.low %v10829_v28, %v10832_v33  ;;  %v13008_v1 = vmax.f32 %v12976_v44, 0.0  ;;  %v10845_v20 = vrot.slane %v9754_v63, 5 }
 0x342   : > { %v11354_v32 = vrot.slane %v11157_v30, 6  ;;  %v12836_v54 = vadd.f32 %v21984_v34, %v12798_v51  ;;  %v12837_v14 = vadd.f32 %v21984_v34, %v12799_v21  ;;  %v15579_v18 = vrot.slane %v11159_v5, 10  ;;  %v12808_v5 = vld [vmem:[#allocation2 + $0x60] sm:$0xff] }
 0x343   : > { %17413 = vmatmul.mubr.msk.bf16.gmra.mrb[108].mxu0 %vm436_vm10, %v13019_v60  ;;  %v9751_v60 = vld [vmem:[%s18695_s22 + $0x588] sm:$0x1]  ;;  %v13026_v16 = vpack.c.bf16 %v13009_v57, %v13008_v1  ;;  %v12867_v48 = vmax.f32 %v12835_v43, 0.0  ;;  %v11364_v33 = vrot.slane %v11161_v26, 6  ;;  %v11164_v1 = vld [vmem:[%s18695_s22 + $0x6c] sm:$0x3] }
 0x344   : > { %17271 = vmatmul.mubr.msk.bf16.gmra.mrb[44].mxu1 %vm873_vm6, %v15550_v38  ;;  %17416 = vmatprep.mubr.msk.bf16.mxu0 %vm436_vm10, %v13020_v52  ;;  %v12943_v38 = vld [vmem:[#allocation2 + $0x1d8] sm:$0xff]  ;;  %v15554_v52 = vcombine.low %v10815_v25, %v10818_v3  ;;  %v10838_v35 = vrot.slane %v9751_v60, 5  ;;  %v15577_v25 = vrot.slane %v11153_v24, 10  ;;  %v11349_v3 = vrot.slane %v11347_v6, 4  ;;  %v12805_v43 = vld [vmem:[#allocation2 + $0x48] sm:$0xff] }
 0x345   : > { %17274 = vmatprep.mubr.msk.bf16.mxu1 %vm873_vm6, %v15551_v39  ;;  %v13023_v39 = vpack.c.bf16 %v13003_v50, %v13002_v17  ;;  %v12975_v4 = vadd.f32 %v21984_v34, %v12943_v38  ;;  %v11350_v17 = vrot.slane %v11155_v36, 6  ;;  %v11160_v38 = vld [vmem:[%s18695_s22 + $0x4c] sm:$0xf]  ;;  %v13010_v60 = vmax.f32 %v12978_v10, 0.0 }
 0x346   : > { %v10839_v49 = vsel %vm18697_vm2, %v10837_v27, %v10838_v35  ;;  %v11361_v15 = vrot.slane %v11160_v38, 6  ;;  %v11356_v44 = vrot.slane %v11354_v32, 4  ;;  %v12869_v57 = vmax.f32 %v12837_v14, 0.0 }
 0x347   : > { %v13007_v11 = vmax.f32 %v12975_v4, 0.0  ;;  %v15557_v2 = vcombine.low %v10836_v29, %v10839_v49  ;;  %v11156_v4 = vld [vmem:[%s18695_s22 + $0x2c] sm:$0xc]  ;;  %v12802_v29 = vld [vmem:[#allocation2 + $0x30] sm:$0xff]  ;;  %v12803_v49 = vld [vmem:[#allocation2 + $0x38] sm:$0xff] }
 0x348   : > { %v11363_v28 = vrot.slane %v11361_v15, 4  ;;  %v11362_v36 = vsel %vm18714_vm5, %v15579_v18, %v11361_v15 }
 0x349   : > { %v13025_v61 = vpack.c.bf16 %v13007_v11, %v13006_v41  ;;  %v15578_v11 = vrot.slane %v11156_v4, 10  ;;  %v11163_v41 = vld [vmem:[%s18695_s22 + $0x68] sm:$0xf] }
 0x34a   : > { %v11368_v10 = vrot.slane %v11163_v41, 6  ;;  %v12846_v41 = vadd.f32 %v21984_v34, %v12808_v5 }
 0x34b   : > { %17417 = vmatmul.mubr.msk.bf16.gmra.mrb[112].mxu0 %vm436_vm10, %v13021_v42  ;;  %v12947_v42 = vld [vmem:[#allocation2 + $0x1f8] sm:$0xff] }
 0x34c   : > { %17275 = vmatmul.mubr.msk.bf16.gmra.mrb[48].mxu1 %vm873_vm6, %v15552_v55  ;;  %17420 = vmatprep.mubr.msk.bf16.mxu0 %vm436_vm10, %v13022_v37  ;;  %v10842_v55 = vrot.slane %v9753_v62, 5  ;;  %v9752_v37 = vld [vmem:[%s18695_s22 + $0x59c] sm:$0xe]  ;;  %v12979_v9 = vadd.f32 %v21984_v34, %v12947_v42  ;;  %v12838_v62 = vadd.f32 %v21984_v34, %v12800_v31  ;;  %v12868_v42 = vmax.f32 %v12836_v54, 0.0 }
 0x34d   : > { %17278 = vmatprep.mubr.msk.bf16.mxu1 %vm873_vm6, %v15553_v23  ;;  %v12834_v23 = vadd.f32 %v21984_v34, %v12796_v47  ;;  %v15538_v53 = vrot.slane %v9752_v37, 9  ;;  %v12839_v47 = vadd.f32 %v21984_v34, %v12801_v59  ;;  %v11355_v37 = vsel %vm18714_vm5, %v15578_v11, %v11354_v32  ;;  %v18549_v32 = vld [vmem:[%s22986_s4 + $0x58] sm:$0xff]  }
 0x34e   : > { %v10844_v50 = vrot.slane %v10842_v55, 4  ;;  %v13011_v19 = vmax.f32 %v12979_v9, 0.0  ;;  %v12807_v59 = vld [vmem:[#allocation2 + $0x58] sm:$0xff] }
 0x34f   : > { %v12866_v22 = vmax.f32 %v12834_v23, 0.0  ;;  %v10843_v45 = vsel %vm18697_vm2, %v15538_v53, %v10842_v55  ;;  %v11166_v55 = vld [vmem:[%s18695_s22 + $0x84] sm:$0xf]  ;;  %v12871_v24 = vmax.f32 %v12839_v47, 0.0  ;;  %v12841_v53 = vadd.f32 %v21984_v34, %v12803_v49  ;;  %v11173_v47 = vld [vmem:[%s18695_s22 + $0xc0] sm:$0x3] }
 0x350   : > { %v10846_v0 = vsel %vm18697_vm2, %v10844_v50, %v10845_v20  ;;  %v13027_v27 = vpack.c.bf16 %v13011_v19, %v13010_v60  ;;  %v12804_v23 = vld [vmem:[#allocation2 + $0x40] sm:$0xff]  ;;  %v11375_v9 = vrot.slane %v11166_v55, 6  ;;  %v11167_v20 = vld [vmem:[%s18695_s22 + $0x88] sm:$0x3]  ;;  %v11370_v19 = vrot.slane %v11368_v10, 4 }
 0x351   : > { %v15558_v58 = vcombine.low %v10843_v45, %v10846_v0  ;;  %v12898_v35 = vpack.c.bf16 %v12867_v48, %v12866_v22  ;;  %v11165_v50 = vld [vmem:[%s18695_s22 + $0x80] sm:$0xc]  ;;  %v11371_v22 = vrot.slane %v11164_v1, 6  ;;  %v11378_v45 = vrot.slane %v11167_v20, 6 }
 0x352   : > { %v15581_v51 = vrot.slane %v11165_v50, 10  ;;  %v11377_v21 = vrot.slane %v11375_v9, 4  ;;  %v11169_v0 = vld [vmem:[%s18695_s22 + $0xa0] sm:$0xf]  ;;  %v12873_v60 = vmax.f32 %v12841_v53, 0.0  ;;  %v12878_v1 = vmax.f32 %v12846_v41, 0.0 }
 0x353   : > { %17421 = vmatmul.mubr.msk.bf16.gmra.mrb[116].mxu0 %vm436_vm10, %v13023_v39  ;;  %v11348_v39 = vsel %vm18714_vm5, %v15577_v25, %v11347_v6  ;;  %v12870_v6 = vmax.f32 %v12838_v62, 0.0  ;;  %v12899_v25 = vpack.c.bf16 %v12869_v57, %v12868_v42  ;;  %v11372_v54 = vsel %vm18714_vm5, %v11370_v19, %v11371_v22  ;;  %v22252_v62 = vld [vmem:[%s22986_s4 + $0x80] sm:$0xff]   ;;  %v12813_v53 = vld [vmem:[#allocation2 + $0x88] sm:$0xff]  ;;  %v11177_v19 = vld [vmem:[%s18695_s22 + $0xf0] sm:$0xc] }
 0x354   : > { %17279 = vmatmul.mubr.msk.bf16.gmra.mrb[52].mxu1 %vm873_vm6, %v15554_v52  ;;  %17424 = vmatprep.mubr.msk.bf16.mxu0 %vm436_vm10, %v13024_v40  ;;  %v11351_v40 = vsel %vm18714_vm5, %v11349_v3, %v11350_v17  ;;  %v12842_v3 = vadd.f32 %v21984_v34, %v12804_v23  ;;  %v12843_v17 = vadd.f32 %v21984_v34, %v12805_v43  ;;  %v11382_v14 = vrot.slane %v11169_v0, 6  ;;  %v11179_v22 = vld [vmem:[%s18695_s22 + $0xf8] sm:$0x3] }
 0x355   : > { %17282 = vmatprep.mubr.msk.bf16.mxu1 %vm873_vm6, %v15555_v56  ;;  %v11158_v56 = vld [vmem:[%s18695_s22 + $0x34] sm:$0x3]  ;;  %v15597_v12 = vcombine.low %v11348_v39, %v11351_v40  ;;  %v12900_v48 = vpack.c.bf16 %v12871_v24, %v12870_v6  ;;  %v11172_v39 = vld [vmem:[%s18695_s22 + $0xbc] sm:$0xf]  ;;  %v11376_v26 = vsel %vm18714_vm5, %v15581_v51, %v11375_v9  ;;  %v11175_v6 = vld [vmem:[%s18695_s22 + $0xd8] sm:$0xf] }
 0x356   : > { %v11357_v13 = vrot.slane %v11158_v56, 6  ;;  %v12874_v40 = vmax.f32 %v12842_v3, 0.0  ;;  %v12875_v4 = vmax.f32 %v12843_v17, 0.0  ;;  %v12806_v56 = vld [vmem:[#allocation2 + $0x50] sm:$0xff]  ;;  %v11384_v57 = vrot.slane %v11382_v14, 4 }
 0x357   : > { %v12844_v11 = vadd.f32 %v21984_v34, %v12806_v56  ;;  %v12810_v24 = vld [vmem:[#allocation2 + $0x70] sm:$0xff]  ;;  %v11396_v9 = vrot.slane %v11175_v6, 6  ;;  %v11176_v3 = vld [vmem:[%s18695_s22 + $0xdc] sm:$0x3]  ;;  %v11406_v56 = vrot.slane %v11179_v22, 6 }
 0x358   : > { %v11358_v63 = vsel %vm18714_vm5, %v11356_v44, %v11357_v13  ;;  %v12809_v44 = vld [vmem:[#allocation2 + $0x68] sm:$0xff]  ;;  %v11171_v13 = vld [vmem:[%s18695_s22 + $0xb8] sm:$0xc] }
 0x359   : > { %v15583_v49 = vrot.slane %v11171_v13, 10  ;;  %v12876_v23 = vmax.f32 %v12844_v11, 0.0  ;;  %v12816_v11 = vld [vmem:[#allocation2 + $0xa0] sm:$0xff] }
 0x35b   : > { %17425 = vmatmul.mubr.msk.bf16.gmra.mrb[120].mxu0 %vm436_vm10, %v13025_v61  ;;  %v11162_v61 = vld [vmem:[%s18695_s22 + $0x64] sm:$0xc] }
 0x35c   : > { %17283 = vmatmul.mubr.msk.bf16.gmra.mrb[56].mxu1 %vm873_vm6, %v15556_v8  ;;  %17428 = vmatprep.mubr.msk.bf16.mxu0 %vm436_vm10, %v13026_v16  ;;  %v11365_v8 = vsel %vm18714_vm5, %v11363_v28, %v11364_v33  ;;  %v15598_v16 = vcombine.low %v11355_v37, %v11358_v63  ;;  %v15580_v38 = vrot.slane %v11162_v61, 10  ;;  %v12902_v28 = vpack.c.bf16 %v12875_v4, %v12874_v40 }
 0x35d   : > { %17286 = vmatprep.mubr.msk.bf16.mxu1 %vm873_vm6, %v15557_v2  ;;  %v12840_v2 = vadd.f32 %v21984_v34, %v12802_v29  ;;  %v15599_v30 = vcombine.low %v11362_v36, %v11365_v8  ;;  %v12845_v33 = vadd.f32 %v21984_v34, %v12807_v59  ;;  %v11392_v63 = vrot.slane %v11173_v47, 6  ;;  %v12811_v36 = vld [vmem:[#allocation2 + $0x78] sm:$0xff]  ;;  %v11184_v59 = vld [vmem:[%s18695_s22 + $0x12c] sm:$0xf] }
 0x35e   : > { %v11369_v15 = vsel %vm18714_vm5, %v15580_v38, %v11368_v10  ;;  %v11178_v10 = vld [vmem:[%s18695_s22 + $0xf4] sm:$0xf]  ;;  %v12849_v38 = vadd.f32 %v21984_v34, %v12811_v36  ;;  %v15585_v40 = vrot.slane %v11177_v19, 10  ;;  %v11180_v47 = vld [vmem:[%s18695_s22 + $0x10c] sm:$0xc] }
 0x35f   : > { %v12872_v31 = vmax.f32 %v12840_v2, 0.0  ;;  %v15600_v18 = vcombine.low %v11369_v15, %v11372_v54  ;;  %v12877_v43 = vmax.f32 %v12845_v33, 0.0  ;;  %v12812_v2 = vld [vmem:[#allocation2 + $0x80] sm:$0xff]  ;;  %v11403_v17 = vrot.slane %v11178_v10, 6  ;;  %v11181_v15 = vld [vmem:[%s18695_s22 + $0x110] sm:$0xf] }
 0x360   : > { %v15586_v6 = vrot.slane %v11180_v47, 10 }
 0x361   : > { %v12903_v51 = vpack.c.bf16 %v12877_v43, %v12876_v23  ;;  %v11405_v4 = vrot.slane %v11403_v17, 4  ;;  %v22308_v43 = vld [vmem:[%s22988_s6] ss:$0 sm:$0xff] }
 0x363   : > { %17429 = vmatmul.mubr.msk.bf16.gmra.mrb[124].mxu0 %vm436_vm10, %v13027_v27  ;;  %v11170_v27 = vld [vmem:[%s18695_s22 + $0xa4] sm:$0x3]  ;;  %v11407_v13 = vsel %vm18714_vm5, %v11405_v4, %v11406_v56 }
 0x364   : > { %17287 = vmatmul.mubr.msk.bf16.gmra.mrb[60].mxu1 %vm873_vm6, %v15558_v58  ;;  %17434 = vmatprep.mubr.msk.bf16.mxu0 %vm436_vm10, %v12898_v35  ;;  %v11379_v58 = vsel %vm18714_vm5, %v11377_v21, %v11378_v45  ;;  %v11389_v35 = vrot.slane %v11172_v39, 6  ;;  %v11385_v29 = vrot.slane %v11170_v27, 6  ;;  %v12850_v21 = vadd.f32 %v21984_v34, %v12812_v2 }
 0x365   : > { %17294 = vmatprep.mubr.msk.bf16.mxu1 %vm873_vm6, %v15597_v12  ;;  %v12901_v12 = vpack.c.bf16 %v12873_v60, %v12872_v31  ;;  %v15601_v55 = vcombine.low %v11376_v26, %v11379_v58  ;;  %v12851_v45 = vadd.f32 %v21984_v34, %v12813_v53  ;;  %v11398_v31 = vrot.slane %v11396_v9, 4  ;;  %v12814_v58 = vld [vmem:[#allocation2 + $0x90] sm:$0xff] }
 0x366   : > { %v11391_v37 = vrot.slane %v11389_v35, 4  ;;  %v11386_v61 = vsel %vm18714_vm5, %v11384_v57, %v11385_v29  ;;  %v11390_v20 = vsel %vm18714_vm5, %v15583_v49, %v11389_v35  ;;  %v11399_v60 = vrot.slane %v11176_v3, 6  ;;  %v11185_v57 = vld [vmem:[%s18695_s22 + $0x130] sm:$0x3] }
 0x367   : > { %v12882_v5 = vmax.f32 %v12850_v21, 0.0  ;;  %v12883_v26 = vmax.f32 %v12851_v45, 0.0  ;;  %v11410_v35 = vrot.slane %v11181_v15, 6  ;;  %v12852_v41 = vadd.f32 %v21984_v34, %v12814_v58  ;;  %v12818_v53 = vld [vmem:[#allocation2 + $0xb0] sm:$0xff] }
 0x368   : > { %v11400_v27 = vsel %vm18714_vm5, %v11398_v31, %v11399_v60  ;;  %v12856_v45 = vadd.f32 %v22308_v43, %v12818_v53  ;;  %v11191_v31 = vld [vmem:[%s18695_s22 + $0x168] sm:$0x3] }
 0x369   : > { %v11412_v10 = vrot.slane %v11410_v35, 4  ;;  %v11434_v58 = vrot.slane %v11191_v31, 6  ;;  %v11200_v31 = vld [vmem:[%s18695_s22 + $0x1bc] sm:$0x3] }
 0x36b   : > { %17435 = vmatmul.mubr.msk.bf16.vlgmr.msra.gmra.mrb[96].mxu0 %vm436_vm10, %v12899_v25  ;;  %v11174_v25 = vld [vmem:[%s18695_s22 + $0xd4] sm:$0xc] }
 0x36c   : > { %17295 = vmatmul.mubr.msk.bf16.vlgmr.msra.gmra.mrb[32].mxu1 %vm873_vm6, %v15598_v16  ;;  %17438 = vmatprep.mubr.msk.bf16.mxu0 %vm436_vm10, %v12900_v48  ;;  %v11393_v16 = vsel %vm18714_vm5, %v11391_v37, %v11392_v63  ;;  %v12854_v37 = vadd.f32 %v21984_v34, %v12816_v11 }
 0x36d   : > { %17327 = vmatpush3.bf16.msra.mxu1 %v22060_v7  ;;  %17298 = vmatprep.mubr.msk.bf16.mxu1 %vm873_vm6, %v15599_v30  ;;  %v11168_v7 = vld [vmem:[%s18695_s22 + $0x9c] sm:$0xc]  ;;  %v12848_v30 = vadd.f32 %v21984_v34, %v12810_v24  ;;  %v15603_v0 = vcombine.low %v11390_v20, %v11393_v16  ;;  %v11411_v20 = vsel %vm18714_vm5, %v15586_v6, %v11410_v35  ;;  %v11195_v6 = vld [vmem:[%s18695_s22 + $0x198] sm:$0xc] }
 0x36e   : > { %17328 = vmatprep.subr.bf16.mxu1 %v18549_v32  ;;  %17467 = vmatpush3.bf16.msra.mxu0 %v22160_v46  ;;  %v15582_v42 = vrot.slane %v11168_v7, 10  ;;  %v12847_v46 = vadd.f32 %v21984_v34, %v12809_v44  ;;  %v11404_v44 = vsel %vm18714_vm5, %v15585_v40, %v11403_v17  ;;  %v12820_v17 = vld [vmem:[#allocation2 + $0xc0] sm:$0xff]  ;;  %v15591_v53 = vrot.slane %v11195_v6, 10 }
 0x36f   : > { %v12880_v54 = vmax.f32 %v12848_v30, 0.0  ;;  %v15605_v63 = vcombine.low %v11404_v44, %v11407_v13  ;;  %v12821_v30 = vld [vmem:[#allocation2 + $0xc8] sm:$0xff]  ;;  %v12858_v40 = vadd.f32 %v22308_v43, %v12820_v17  ;;  %v12822_v13 = vld [vmem:[#allocation2 + $0xd0] sm:$0xff] }
 0x370   : > { %v11383_v8 = vsel %vm18714_vm5, %v15582_v42, %v11382_v14  ;;  %v12879_v50 = vmax.f32 %v12847_v46, 0.0  ;;  %v12881_v14 = vmax.f32 %v12849_v38, 0.0  ;;  %v11183_v42 = vld [vmem:[%s18695_s22 + $0x128] sm:$0xc]  ;;  %v12906_v46 = vpack.c.bf16 %v12883_v26, %v12882_v5 }
 0x371   : > { %17329 = vmatpush3.bf16.msra.mxu1 %v18549_v32  ;;  %v15602_v48 = vcombine.low %v11383_v8, %v11386_v61  ;;  %v15584_v32 = vrot.slane %v11174_v25, 10  ;;  %v15587_v36 = vrot.slane %v11183_v42, 10  ;;  %v11420_v61 = vrot.slane %v11185_v57, 6  ;;  %v11192_v57 = vld [vmem:[%s18695_s22 + $0x17c] sm:$0xc] }
 0x372   : > { %17362 = vmatprep.subr.bf16.mxu1 %v22252_v62  ;;  %v12904_v39 = vpack.c.bf16 %v12879_v50, %v12878_v1  ;;  %v12905_v33 = vpack.c.bf16 %v12881_v14, %v12880_v54  ;;  %v11187_v1 = vld [vmem:[%s18695_s22 + $0x148] sm:$0xf]  ;;  %v12819_v50 = vld [vmem:[#allocation2 + $0xb8] sm:$0xff]  ;;  %v12886_v25 = vmax.f32 %v12854_v37, 0.0  ;;  %v12859_v4 = vadd.f32 %v22308_v43, %v12821_v30 }
 0x373   : > { %17439 = vmatmul.mubr.msk.bf16.gmra.mrb[100].mxu0 %vm436_vm10, %v12901_v12  ;;  %v11397_v7 = vsel %vm18714_vm5, %v15584_v32, %v11396_v9  ;;  %v12815_v12 = vld [vmem:[#allocation2 + $0x98] sm:$0xff]  ;;  %v11190_v9 = vld [vmem:[%s18695_s22 + $0x164] sm:$0xf]  ;;  %v11424_v3 = vrot.slane %v11187_v1, 6  ;;  %v11189_v32 = vld [vmem:[%s18695_s22 + $0x160] sm:$0xc]  ;;  %v12860_v37 = vadd.f32 %v22308_v43, %v12822_v13 }
 0x374   : > { %17299 = vmatmul.mubr.msk.bf16.gmra.mrb[36].mxu1 %vm873_vm6, %v15600_v18  ;;  %17442 = vmatprep.mubr.msk.bf16.mxu0 %vm436_vm10, %v12902_v28  ;;  %v11182_v18 = vld [vmem:[%s18695_s22 + $0x114] sm:$0x3]  ;;  %v11417_v28 = vrot.slane %v11184_v59, 6  ;;  %v15604_v29 = vcombine.low %v11397_v7, %v11400_v27  ;;  %v12853_v49 = vadd.f32 %v21984_v34, %v12815_v12  ;;  %v12884_v34 = vmax.f32 %v12852_v41, 0.0  ;;  %v11193_v7 = vld [vmem:[%s18695_s22 + $0x180] sm:$0xf] }
 0x375   : > { %17302 = vmatprep.mubr.msk.bf16.mxu1 %vm873_vm6, %v15601_v55  ;;  %v12817_v55 = vld [vmem:[#allocation2 + $0xa8] sm:$0xff]  ;;  %v11413_v23 = vrot.slane %v11182_v18, 6  ;;  %v11431_v21 = vrot.slane %v11190_v9, 6  ;;  %v11426_v54 = vrot.slane %v11424_v3, 4  ;;  %v15589_v5 = vrot.slane %v11189_v32, 10  ;;  %v12824_v41 = vld [vmem:[#allocation2 + $0xe0] sm:$0xff] }
 0x376   : > { %v12855_v24 = vadd.f32 %v22308_v43, %v12817_v55  ;;  %v11419_v8 = vrot.slane %v11417_v28, 4  ;;  %v12885_v2 = vmax.f32 %v12853_v49, 0.0  ;;  %v11418_v19 = vsel %vm18714_vm5, %v15587_v36, %v11417_v28  ;;  %v11196_v12 = vld [vmem:[%s18695_s22 + $0x19c] sm:$0xf]  ;;  %v11198_v32 = vld [vmem:[%s18695_s22 + $0x1b4] sm:$0xc] }
 0x377   : > { %v11414_v16 = vsel %vm18714_vm5, %v11412_v10, %v11413_v23  ;;  %v11433_v26 = vrot.slane %v11431_v21, 4  ;;  %v12888_v27 = vmax.f32 %v12856_v45, 0.0  ;;  %v12890_v11 = vmax.f32 %v12858_v40, 0.0  ;;  %v11197_v10 = vld [vmem:[%s18695_s22 + $0x1a0] sm:$0x3] }
 0x378   : > { %v12887_v38 = vmax.f32 %v12855_v24, 0.0  ;;  %v11421_v22 = vsel %vm18714_vm5, %v11419_v8, %v11420_v61  ;;  %v15606_v60 = vcombine.low %v11411_v20, %v11414_v16  ;;  %v12891_v44 = vmax.f32 %v12859_v4, 0.0  ;;  %v11199_v16 = vld [vmem:[%s18695_s22 + $0x1b8] sm:$0xf]  ;;  %v11203_v40 = vld [vmem:[%s18695_s22 + $0x210] sm:$0x3] }
 0x379   : > { %v15607_v56 = vcombine.low %v11418_v19, %v11421_v22  ;;  %v11438_v28 = vrot.slane %v11193_v7, 6  ;;  %v11432_v55 = vsel %vm18714_vm5, %v15589_v5, %v11431_v21  ;;  %v11435_v42 = vsel %vm18714_vm5, %v11433_v26, %v11434_v58 }
 0x37a   : > { %v12908_v59 = vpack.c.bf16 %v12887_v38, %v12886_v25  ;;  %v12910_v24 = vpack.c.bf16 %v12891_v44, %v12890_v11  ;;  %v12862_v8 = vadd.f32 %v22308_v43, %v12824_v41  ;;  %v15609_v61 = vcombine.low %v11432_v55, %v11435_v42  ;;  %v11202_v25 = vld [vmem:[%s18695_s22 + $0x20c] sm:$0xf]  ;;  %v11208_v11 = vld [vmem:[%s18695_s22 + $0x244] sm:$0xf] }
 0x37b   : > { %17443 = vmatmul.mubr.msk.bf16.gmra.mrb[104].mxu0 %vm436_vm10, %v12903_v51  ;;  %v11188_v51 = vld [vmem:[%s18695_s22 + $0x14c] sm:$0x3]  ;;  %v15590_v1 = vrot.slane %v11192_v57, 10  ;;  %v11440_v9 = vrot.slane %v11438_v28, 4  ;;  %v11448_v20 = vrot.slane %v11197_v10, 6  ;;  %v11452_v22 = vrot.slane %v11199_v16, 6 }
 0x37c   : > { %17303 = vmatmul.mubr.msk.bf16.gmra.mrb[40].mxu1 %vm873_vm6, %v15602_v48  ;;  %17446 = vmatprep.mubr.msk.bf16.mxu0 %vm436_vm10, %v12904_v39  ;;  %v11186_v48 = vld [vmem:[%s18695_s22 + $0x144] sm:$0xc]  ;;  %v12907_v39 = vpack.c.bf16 %v12885_v2, %v12884_v34  ;;  %v11427_v14 = vrot.slane %v11188_v51, 6  ;;  %v12894_v19 = vmax.f32 %v12862_v8, 0.0  ;;  %v12827_v51 = vld [vmem:[#allocation2 + $0xf8] sm:$0xff]  ;;  %v11455_v26 = vrot.slane %v11200_v31, 6 }
 0x37d   : > { %17306 = vmatprep.mubr.msk.bf16.mxu1 %vm873_vm6, %v15603_v0  ;;  %v12857_v0 = vadd.f32 %v22308_v43, %v12819_v50  ;;  %v15588_v15 = vrot.slane %v11186_v48, 10  ;;  %v11439_v30 = vsel %vm18714_vm5, %v15590_v1, %v11438_v28  ;;  %v12826_v48 = vld [vmem:[#allocation2 + $0xf0] sm:$0xff]  ;;  %v11454_v5 = vrot.slane %v11452_v22, 4  ;;  %v11204_v55 = vld [vmem:[%s18695_s22 + $0x224] sm:$0xc]  ;;  %v18551_v31 = vld [vmem:[%s22986_s4 + $0x88] sm:$0xff]  }
 0x37e   : > { %v11428_v18 = vsel %vm18714_vm5, %v11426_v54, %v11427_v14  ;;  %v12865_v54 = vadd.f32 %v22308_v43, %v12827_v51  ;;  %v11206_v42 = vld [vmem:[%s18695_s22 + $0x22c] sm:$0x3]  ;;  %v11827_v57 = vrot.slane %v11208_v11, 6  ;;  %v15632_v6 = vrot.slane %v11204_v55, 10  ;;  %v11214_v1 = vld [vmem:[%s18695_s22 + $0x27c] sm:$0xf] }
 0x37f   : > { %v12889_v35 = vmax.f32 %v12857_v0, 0.0  ;;  %v11425_v47 = vsel %vm18714_vm5, %v15588_v15, %v11424_v3  ;;  %v12892_v3 = vmax.f32 %v12860_v37, 0.0  ;;  %v12864_v15 = vadd.f32 %v22308_v43, %v12826_v48  ;;  %v11210_v16 = vld [vmem:[%s18695_s22 + $0x25c] sm:$0xc]  ;;  %v11224_v55 = vld [vmem:[%s18695_s22 + $0x2d4] sm:$0x3] }
 0x380   : > { %v15608_v23 = vcombine.low %v11425_v47, %v11428_v18  ;;  %v12897_v13 = vmax.f32 %v12865_v54, 0.0  ;;  %v11456_v18 = vsel %vm18714_vm5, %v11454_v5, %v11455_v26  ;;  %v11216_v54 = vld [vmem:[%s18695_s22 + $0x294] sm:$0xc]  ;;  %v11221_v5 = vld [vmem:[%s18695_s22 + $0x2b8] sm:$0x3] }
 0x381   : > { %v12909_v49 = vpack.c.bf16 %v12889_v35, %v12888_v27  ;;  %v11816_v35 = vrot.slane %v11203_v40, 6  ;;  %v12896_v44 = vmax.f32 %v12864_v15, 0.0 }
 0x383   : > { %17447 = vmatmul.mubr.msk.bf16.gmra.mrb[108].mxu0 %vm436_vm10, %v12905_v33  ;;  %v12823_v33 = vld [vmem:[#allocation2 + $0xd8] sm:$0xff]  ;;  %v12913_v37 = vpack.c.bf16 %v12897_v13, %v12896_v44  ;;  %v11858_v13 = vrot.slane %v11221_v5, 6 }
 0x384   : > { %17307 = vmatmul.mubr.msk.bf16.gmra.mrb[44].mxu1 %vm873_vm6, %v15604_v29  ;;  %17450 = vmatprep.mubr.msk.bf16.mxu0 %vm436_vm10, %v12906_v46  ;;  %v11194_v29 = vld [vmem:[%s18695_s22 + $0x184] sm:$0x3]  ;;  %v11445_v46 = vrot.slane %v11196_v12, 6  ;;  %v12861_v36 = vadd.f32 %v22308_v43, %v12823_v33  ;;  %v11205_v12 = vld [vmem:[%s18695_s22 + $0x228] sm:$0xf] }
 0x385   : > { %17310 = vmatprep.mubr.msk.bf16.mxu1 %vm873_vm6, %v15605_v63  ;;  %v12825_v63 = vld [vmem:[#allocation2 + $0xe8] sm:$0xff]  ;;  %v11441_v34 = vrot.slane %v11194_v29, 6  ;;  %v11820_v28 = vrot.slane %v11205_v12, 6  ;;  %v11207_v29 = vld [vmem:[%s18695_s22 + $0x240] sm:$0xc] }
 0x386   : > { %v12863_v2 = vadd.f32 %v22308_v43, %v12825_v63  ;;  %v11447_v50 = vrot.slane %v11445_v46, 4  ;;  %v12893_v17 = vmax.f32 %v12861_v36, 0.0  ;;  %v11446_v45 = vsel %vm18714_vm5, %v15591_v53, %v11445_v46  ;;  %v11209_v46 = vld [vmem:[%s18695_s22 + $0x248] sm:$0x3]  ;;  %v11223_v12 = vld [vmem:[%s18695_s22 + $0x2d0] sm:$0xf] }
 0x387   : > { %v11442_v38 = vsel %vm18714_vm5, %v11440_v9, %v11441_v34  ;;  %v11822_v10 = vrot.slane %v11820_v28, 4  ;;  %v11829_v36 = vrot.slane %v11827_v57, 4  ;;  %v11830_v8 = vrot.slane %v11209_v46, 6  ;;  %v22400_v9 = vld [vmem:[%s22987_s5 + $0x18] sm:$0xff]   ;;  %v11225_v46 = vld [vmem:[%s18695_s22 + $0x2e8] sm:$0xc] }
 0x388   : > { %v12895_v21 = vmax.f32 %v12863_v2, 0.0  ;;  %v11449_v0 = vsel %vm18714_vm5, %v11447_v50, %v11448_v20  ;;  %v15610_v4 = vcombine.low %v11439_v30, %v11442_v38  ;;  %v11821_v34 = vsel %vm18714_vm5, %v15632_v6, %v11820_v28  ;;  %17500 = vmatprep.subr.bf16.mxu0 %v22400_v9  ;;  %v11215_v30 = vld [vmem:[%s18695_s22 + $0x280] sm:$0x3] }
 0x389   : > { %v15611_v14 = vcombine.low %v11446_v45, %v11449_v0  ;;  %v11831_v20 = vsel %vm18714_vm5, %v11829_v36, %v11830_v8  ;;  %v11844_v0 = vrot.slane %v11215_v30, 6 }
 0x38a   : > { %v12912_v58 = vpack.c.bf16 %v12895_v21, %v12894_v19 }
 0x38b   : > { %17451 = vmatmul.mubr.msk.bf16.gmra.mrb[112].mxu0 %vm436_vm10, %v12907_v39  ;;  %v11201_v39 = vld [vmem:[%s18695_s22 + $0x208] sm:$0xc] }
 0x38c   : > { %17311 = vmatmul.mubr.msk.bf16.gmra.mrb[48].mxu1 %vm873_vm6, %v15606_v60  ;;  %17454 = vmatprep.mubr.msk.bf16.mxu0 %vm436_vm10, %v12908_v59  ;;  %v11813_v60 = vrot.slane %v11202_v25, 6  ;;  %v15592_v59 = vrot.slane %v11198_v32, 10  ;;  %v15631_v7 = vrot.slane %v11201_v39, 10  ;;  %v11212_v25 = vld [vmem:[%s18695_s22 + $0x264] sm:$0x3] }
 0x38d   : > { %17314 = vmatprep.mubr.msk.bf16.mxu1 %vm873_vm6, %v15607_v56  ;;  %v12911_v56 = vpack.c.bf16 %v12893_v17, %v12892_v3  ;;  %v11841_v3 = vrot.slane %v11214_v1, 6  ;;  %v11213_v17 = vld [vmem:[%s18695_s22 + $0x278] sm:$0xc]  ;;  %v11837_v51 = vrot.slane %v11212_v25, 6  ;;  %v11232_v1 = vld [vmem:[%s18695_s22 + $0x324] sm:$0xf] }
 0x38e   : > { %v11815_v27 = vrot.slane %v11813_v60, 4  ;;  %v11453_v47 = vsel %vm18714_vm5, %v15592_v59, %v11452_v22  ;;  %v11814_v33 = vsel %vm18714_vm5, %v15631_v7, %v11813_v60  ;;  %v15634_v22 = vrot.slane %v11210_v16, 10  ;;  %v11217_v32 = vld [vmem:[%s18695_s22 + $0x298] sm:$0xf]  ;;  %v11220_v60 = vld [vmem:[%s18695_s22 + $0x2b4] sm:$0xf] }
 0x38f   : > { %v15635_v21 = vrot.slane %v11213_v17, 10  ;;  %v11843_v45 = vrot.slane %v11841_v3, 4  ;;  %v11219_v59 = vld [vmem:[%s18695_s22 + $0x2b0] sm:$0xc]  ;;  %v15636_v7 = vrot.slane %v11216_v54, 10  ;;  %v8470_v16 = vld [vmem:[#allocation2 + $0x200] sm:$0xff] }
 0x390   : > { %v11817_v41 = vsel %vm18714_vm5, %v11815_v27, %v11816_v35  ;;  %v15637_v11 = vrot.slane %v11219_v59, 10  ;;  %v11230_v17 = vld [vmem:[%s18695_s22 + $0x30c] sm:$0x3]  ;;  %v11883_v30 = vrot.slane %v11232_v1, 6 }
 0x391   : > { %v15651_v63 = vcombine.low %v11814_v33, %v11817_v41  ;;  %v11845_v15 = vsel %vm18714_vm5, %v11843_v45, %v11844_v0  ;;  %v11222_v41 = vld [vmem:[%s18695_s22 + $0x2cc] sm:$0xc] }
 0x392   : > { %v8471_v45 = vld [vmem:[#allocation2 + $0x208] sm:$0xff] }
 0x393   : > { %17455 = vmatmul.mubr.msk.bf16.gmra.mrb[116].mxu0 %vm436_vm10, %v12909_v49  ;;  %v15612_v49 = vcombine.low %v11453_v47, %v11456_v18  ;;  %v11226_v47 = vld [vmem:[%s18695_s22 + $0x2ec] sm:$0xf]  ;;  %v11862_v18 = vrot.slane %v11223_v12, 6  ;;  %v11236_v12 = vld [vmem:[%s18695_s22 + $0x344] sm:$0x3] }
 0x394   : > { %17315 = vmatmul.mubr.msk.bf16.gmra.mrb[52].mxu1 %vm873_vm6, %v15608_v23  ;;  %17458 = vmatprep.mubr.msk.bf16.mxu0 %vm436_vm10, %v12910_v24  ;;  %v11823_v23 = vrot.slane %v11206_v42, 6  ;;  %v15633_v24 = vrot.slane %v11207_v29, 10  ;;  %v11869_v42 = vrot.slane %v11226_v47, 6 }
 0x395   : > { %17318 = vmatprep.mubr.msk.bf16.mxu1 %vm873_vm6, %v15609_v61  ;;  %v11211_v61 = vld [vmem:[%s18695_s22 + $0x260] sm:$0xf]  ;;  %v11864_v6 = vrot.slane %v11862_v18, 4 }
 0x396   : > { %v11824_v2 = vsel %vm18714_vm5, %v11822_v10, %v11823_v23  ;;  %v11834_v53 = vrot.slane %v11211_v61, 6  ;;  %v11828_v50 = vsel %vm18714_vm5, %v15633_v24, %v11827_v57  ;;  %v11865_v10 = vrot.slane %v11224_v55, 6  ;;  %v11229_v61 = vld [vmem:[%s18695_s22 + $0x308] sm:$0xf]  ;;  %v11237_v55 = vld [vmem:[%s18695_s22 + $0x358] sm:$0xc] }
 0x397   : > { %v15652_v38 = vcombine.low %v11821_v34, %v11824_v2  ;;  %v15653_v19 = vcombine.low %v11828_v50, %v11831_v20  ;;  %v15639_v24 = vrot.slane %v11225_v46, 10  ;;  %v11871_v36 = vrot.slane %v11869_v42, 4  ;;  %v8472_v34 = vld [vmem:[#allocation2 + $0x210] sm:$0xff]  ;;  %v11228_v50 = vld [vmem:[%s18695_s22 + $0x304] sm:$0xc]  ;;  %v8475_v46 = vld [vmem:[#allocation2 + $0x228] sm:$0xff] }
 0x398   : > { %v11836_v48 = vrot.slane %v11834_v53, 4  ;;  %v11835_v39 = vsel %vm18714_vm5, %v15634_v22, %v11834_v53  ;;  %v11866_v53 = vsel %vm18714_vm5, %v11864_v6, %v11865_v10  ;;  %v11876_v20 = vrot.slane %v11229_v61, 6  ;;  %v11231_v22 = vld [vmem:[%s18695_s22 + $0x320] sm:$0xc] }
 0x399   : > { %v11870_v25 = vsel %vm18714_vm5, %v15639_v24, %v11869_v42  ;;  %v11239_v42 = vld [vmem:[%s18695_s22 + $0x360] sm:$0x3] }
 0x39a   : > { %v11838_v40 = vsel %vm18714_vm5, %v11836_v48, %v11837_v51  ;;  %v11233_v48 = vld [vmem:[%s18695_s22 + $0x328] sm:$0x3] }
 0x39b   : > { %17459 = vmatmul.mubr.msk.bf16.gmra.mrb[120].mxu0 %vm436_vm10, %v12911_v56  ;;  %v11842_v56 = vsel %vm18714_vm5, %v15635_v21, %v11841_v3  ;;  %v15654_v26 = vcombine.low %v11835_v39, %v11838_v40  ;;  %v11878_v40 = vrot.slane %v11876_v20, 4  ;;  %v11886_v59 = vrot.slane %v11233_v48, 6 }
 0x39c   : > { %17319 = vmatmul.mubr.msk.bf16.gmra.mrb[56].mxu1 %vm873_vm6, %v15610_v4  ;;  %17462 = vmatprep.mubr.msk.bf16.mxu0 %vm436_vm10, %v12912_v58  ;;  %v11848_v4 = vrot.slane %v11217_v32, 6  ;;  %v15655_v58 = vcombine.low %v11842_v56, %v11845_v15  ;;  %v15640_v32 = vrot.slane %v11228_v50, 10  ;;  %v11235_v56 = vld [vmem:[%s18695_s22 + $0x340] sm:$0xf] }
 0x39d   : > { %17322 = vmatprep.mubr.msk.bf16.mxu1 %vm873_vm6, %v15611_v14  ;;  %v11218_v14 = vld [vmem:[%s18695_s22 + $0x29c] sm:$0x3] }
 0x39e   : > { %v11850_v27 = vrot.slane %v11848_v4, 4  ;;  %v11851_v35 = vrot.slane %v11218_v14, 6  ;;  %v11849_v28 = vsel %vm18714_vm5, %v15636_v7, %v11848_v4  ;;  %v11879_v4 = vrot.slane %v11230_v17, 6 }
 0x39f   : > { %v15641_v14 = vrot.slane %v11231_v22, 10  ;;  %v11890_v7 = vrot.slane %v11235_v56, 6  ;;  %v11240_v22 = vld [vmem:[%s18695_s22 + $0x374] sm:$0xc] }
 0x3a0   : > { %v11852_v33 = vsel %vm18714_vm5, %v11850_v27, %v11851_v35  ;;  %v8476_v27 = vld [vmem:[#allocation2 + $0x230] sm:$0xff]  ;;  %v11877_v35 = vsel %vm18714_vm5, %v15640_v32, %v11876_v20  ;;  %v8481_v32 = vld [vmem:[#allocation2 + $0x258] sm:$0xff] }
 0x3a1   : > { %v11884_v47 = vsel %vm18714_vm5, %v15641_v14, %v11883_v30 }
 0x3a3   : > { %17463 = vmatmul.mubr.msk.bf16.gmra.mrb[124].mxu0 %vm436_vm10, %v12913_v37  ;;  %v15656_v37 = vcombine.low %v11849_v28, %v11852_v33 }
 0x3a4   : > { %17323 = vmatmul.mubr.msk.bf16.gmra.mrb[60].mxu1 %vm873_vm6, %v15612_v49  ;;  %v11227_v49 = vld [vmem:[%s18695_s22 + $0x2f0] sm:$0x3] }
 0x3a5   : > { %17330 = vmatprep.mubr.msk.bf16.mxu1 %vm873_vm6, %v15651_v63  ;;  %v15638_v63 = vrot.slane %v11222_v41, 10  ;;  %v11872_v8 = vrot.slane %v11227_v49, 6  ;;  %v11892_v49 = vrot.slane %v11890_v7, 4 }
 0x3a7   : > { %v11863_v2 = vsel %vm18714_vm5, %v15638_v63, %v11862_v18  ;;  %v11873_v3 = vsel %vm18714_vm5, %v11871_v36, %v11872_v8  ;;  %v22489_v36 = vld [vmem:[%s18695_s22 + $0x378] sm:$0xf] }
 0x3a8   : > { %v15658_v0 = vcombine.low %v11863_v2, %v11866_v53  ;;  %v15659_v39 = vcombine.low %v11870_v25, %v11873_v3  ;;  %v11900_v53 = vrot.slane %v11239_v42, 6  ;;  %v22499_v3 = vld [vmem:[%s18695_s22 + $0x394] sm:$0xf]  ;;  %v11904_v48 = vrot.slane %v22489_v36, 6 }
 0x3ac   : > { %17331 = vmatmul.mubr.msk.bf16.vlgmr.msra.gmra.mrb[32].mxu1 %vm873_vm6, %v15652_v38 }
 0x3ad   : > { %17363 = vmatpush3.bf16.msra.mxu1 %v22252_v62  ;;  %17334 = vmatprep.mubr.msk.bf16.mxu1 %vm873_vm6, %v15653_v19  ;;  %v11855_v62 = vrot.slane %v11220_v60, 6  ;;  %v8473_v19 = vld [vmem:[#allocation2 + $0x218] sm:$0xff] }
 0x3ae   : > { %17364 = vmatprep.subr.bf16.mxu1 %v18551_v31 }
 0x3af   : > { %v11857_v44 = vrot.slane %v11855_v62, 4  ;;  %v11856_v57 = vsel %vm18714_vm5, %v15637_v11, %v11855_v62  ;;  %v11885_v62 = vrot.slane %v11883_v30, 4  ;;  %v8474_v11 = vld [vmem:[#allocation2 + $0x220] sm:$0xff] }
 0x3b1   : > { %17365 = vmatpush3.bf16.msra.mxu1 %v18551_v31  ;;  %v11859_v29 = vsel %vm18714_vm5, %v11857_v44, %v11858_v13  ;;  %v8477_v44 = vld [vmem:[#allocation2 + $0x238] sm:$0xff]  ;;  %v11880_v13 = vsel %vm18714_vm5, %v11878_v40, %v11879_v4  ;;  %v11887_v18 = vsel %vm18714_vm5, %v11885_v62, %v11886_v59  ;;  %v11243_v40 = vld [vmem:[%s18695_s22 + $0x390] sm:$0xc]  ;;  %v11911_v4 = vrot.slane %v22499_v3, 6  ;;  %v11249_v3 = vld [vmem:[%s18695_s22 + $0x400] sm:$0xc] }
 0x3b2   : > { %v15657_v23 = vcombine.low %v11856_v57, %v11859_v29  ;;  %v15660_v10 = vcombine.low %v11877_v35, %v11880_v13  ;;  %v15644_v62 = vrot.slane %v11240_v22, 10  ;;  %v11245_v59 = vld [vmem:[%s18695_s22 + $0x398] sm:$0x3] }
 0x3b4   : > { %17335 = vmatmul.mubr.msk.bf16.gmra.mrb[36].mxu1 %vm873_vm6, %v15654_v26  ;;  %v11238_v26 = vld [vmem:[%s18695_s22 + $0x35c] sm:$0xf] }
 0x3b5   : > { %17338 = vmatprep.mubr.msk.bf16.mxu1 %vm873_vm6, %v15655_v58  ;;  %v11234_v58 = vld [vmem:[%s18695_s22 + $0x33c] sm:$0xc]  ;;  %v11897_v28 = vrot.slane %v11238_v26, 6 }
 0x3b6   : > { %v15642_v41 = vrot.slane %v11234_v58, 10  ;;  %v8479_v58 = vld [vmem:[#allocation2 + $0x248] sm:$0xff] }
 0x3b7   : > { %v11899_v2 = vrot.slane %v11897_v28, 4 }
 0x3bc   : > { %17339 = vmatmul.mubr.msk.bf16.gmra.mrb[40].mxu1 %vm873_vm6, %v15656_v37  ;;  %v11893_v37 = vrot.slane %v11236_v12, 6 }
 0x3bd   : > { %17342 = vmatprep.mubr.msk.bf16.mxu1 %vm873_vm6, %v15657_v23  ;;  %v15661_v23 = vcombine.low %v11884_v47, %v11887_v18  ;;  %v15645_v18 = vrot.slane %v11243_v40, 10 }
 0x3be   : > { %v17044_v38 = vpop.f32.mrb[64].mxu0  ;;  %v11894_v30 = vsel %vm18714_vm5, %v11892_v49, %v11893_v37  ;;  %v22530_v37 = vsel %vm18714_vm5, %v15644_v62, %v11904_v48 }
 0x3bf   : > { %v8504_v51 = vadd.f32 %v17044_v38, %v8472_v34  ;;  %v8310_v21 = vpop.f32.mrb[65].mxu0  ;;  %v15643_v34 = vrot.slane %v11237_v55, 10 }
 0x3c0   : > { %v8502_v31 = vadd.f32 %v8470_v16, %v8310_v21  ;;  %v17045_v60 = vpop.f32.mrb[66].mxu0  ;;  %v22496_v16 = vsel %vm18714_vm5, %v15642_v41, %v11890_v7 }
 0x3c1   : > { %8536 = vst.msk [vmem:[#allocation2 + $0x210] sm:$0xff] %vm436_vm10, %v8504_v51  ;;  %v8505_v15 = vadd.f32 %v17045_v60, %v8473_v19  ;;  %v8313_v54 = vpop.f32.mrb[67].mxu0  ;;  %v8480_v51 = vld [vmem:[#allocation2 + $0x250] sm:$0xff]  ;;  %v11898_v60 = vsel %vm18714_vm5, %v15643_v34, %v11897_v28  ;;  %v15662_v14 = vcombine.low %v22496_v16, %v11894_v30  ;;  %v11912_v16 = vsel %vm18714_vm5, %v15645_v18, %v11911_v4 }
 0x3c2   : > { %8534 = vst.msk [vmem:[#allocation2 + $0x200] sm:$0xff] %vm436_vm10, %v8502_v31  ;;  %v8503_v5 = vadd.f32 %v8471_v45, %v8313_v54  ;;  %v11242_v45 = vld [vmem:[%s18695_s22 + $0x37c] sm:$0x3]  ;;  %v22522_v28 = vld [vmem:[%s18695_s22 + $0x3b0] sm:$0xf] }
 0x3c3   : > { %8537 = vst.msk [vmem:[#allocation2 + $0x218] sm:$0xff] %vm436_vm10, %v8505_v15  ;;  %v11907_v35 = vrot.slane %v11242_v45, 6  ;;  %v8483_v45 = vld [vmem:[#allocation2 + $0x268] sm:$0xff] }
 0x3c4   : > { %8535 = vst.msk [vmem:[#allocation2 + $0x208] sm:$0xff] %vm436_vm10, %v8503_v5  ;;  %17343 = vmatmul.mubr.msk.bf16.gmra.mrb[44].mxu1 %vm873_vm6, %v15658_v0  ;;  %v8478_v0 = vld [vmem:[#allocation2 + $0x240] sm:$0xff] }
 0x3c5   : > { %17346 = vmatprep.mubr.msk.bf16.mxu1 %vm873_vm6, %v15659_v39  ;;  %v11901_v39 = vsel %vm18714_vm5, %v11899_v2, %v11900_v53  ;;  %v11248_v2 = vld [vmem:[%s18695_s22 + $0x3b4] sm:$0x3]  ;;  %v8482_v53 = vld [vmem:[#allocation2 + $0x260] sm:$0xff] }
 0x3c6   : > { %v17048_v33 = vpop.f32.mrb[68].mxu0  ;;  %v15663_v13 = vcombine.low %v11898_v60, %v11901_v39 }
 0x3c7   : > { %v8508_v57 = vadd.f32 %v17048_v33, %v8476_v27  ;;  %v8326_v29 = vpop.f32.mrb[69].mxu0  ;;  %v11906_v27 = vrot.slane %v11904_v48, 4  ;;  %v11251_v48 = vld [vmem:[%s18695_s22 + $0x408] sm:$0x3] }
 0x3c8   : > { %v8506_v63 = vadd.f32 %v8474_v11, %v8326_v29  ;;  %v17049_v6 = vpop.f32.mrb[70].mxu0  ;;  %v13463_v24 = vld [vmem:[#allocation2 + $0x210] sm:$0xff]  ;;  %v11914_v29 = vrot.slane %v11245_v59, 6 }
 0x3c9   : > { %8540 = vst.msk [vmem:[#allocation2 + $0x230] sm:$0xff] %vm436_vm10, %v8508_v57  ;;  %v8509_v8 = vadd.f32 %v17049_v6, %v8477_v44  ;;  %v8329_v61 = vpop.f32.mrb[71].mxu0  ;;  %v13461_v1 = vld [vmem:[#allocation2 + $0x200] sm:$0xff]  ;;  %v13495_v38 = vadd.f32 %v22308_v43, %v13463_v24  ;;  %v11913_v57 = vrot.slane %v11911_v4, 4 }
 0x3ca   : > { %8538 = vst.msk [vmem:[#allocation2 + $0x220] sm:$0xff] %vm436_vm10, %v8506_v63  ;;  %v8507_v50 = vadd.f32 %v8475_v46, %v8329_v61  ;;  %v13493_v20 = vadd.f32 %v22308_v43, %v13461_v1  ;;  %v13464_v25 = vld [vmem:[#allocation2 + $0x218] sm:$0xff]  ;;  %v22533_v6 = vld [vmem:[%s18695_s22 + $0x404] sm:$0xf]  ;;  %v11918_v61 = vrot.slane %v22522_v28, 6  ;;  %v8484_v1 = vld [vmem:[#allocation2 + $0x270] sm:$0xff] }
 0x3cb   : > { %8541 = vst.msk [vmem:[#allocation2 + $0x238] sm:$0xff] %vm436_vm10, %v8509_v8  ;;  %v13462_v17 = vld [vmem:[#allocation2 + $0x208] sm:$0xff]  ;;  %v13496_v19 = vadd.f32 %v22308_v43, %v13464_v25  ;;  %v13527_v7 = vmax.f32 %v13495_v38, 0.0  ;;  %v11915_v25 = vsel %vm18714_vm5, %v11913_v57, %v11914_v29  ;;  %v11252_v28 = vld [vmem:[%s18695_s22 + $0x41c] sm:$0xc]  ;;  %v8486_v57 = vld [vmem:[#allocation2 + $0x280] sm:$0xff] }
 0x3cc   : > { %8539 = vst.msk [vmem:[#allocation2 + $0x228] sm:$0xff] %vm436_vm10, %v8507_v50  ;;  %17347 = vmatmul.mubr.msk.bf16.gmra.mrb[48].mxu1 %vm873_vm6, %v15660_v10  ;;  %v13494_v21 = vadd.f32 %v22308_v43, %v13462_v17  ;;  %v13525_v15 = vmax.f32 %v13493_v20, 0.0  ;;  %v11246_v8 = vld [vmem:[%s18695_s22 + $0x3ac] sm:$0xc]  ;;  %v8485_v50 = vld [vmem:[#allocation2 + $0x278] sm:$0xff]  ;;  %v12279_v17 = vrot.slane %v22533_v6, 6  ;;  %v15665_v4 = vcombine.low %v11912_v16, %v11915_v25 }
 0x3cd   : > { %17350 = vmatprep.mubr.msk.bf16.mxu1 %vm873_vm6, %v15661_v23  ;;  %v13528_v31 = vmax.f32 %v13496_v19, 0.0  ;;  %v11908_v23 = vsel %vm18714_vm5, %v11906_v27, %v11907_v35  ;;  %v15646_v22 = vrot.slane %v11246_v8, 10  ;;  %v8489_v29 = vld [vmem:[#allocation2 + $0x298] sm:$0xff]  ;;  %v15686_v8 = vrot.slane %v11252_v28, 10 }
 0x3ce   : > { %v17052_v56 = vpop.f32.mrb[72].mxu0  ;;  %v13526_v54 = vmax.f32 %v13494_v21, 0.0 }
 0x3cf   : > { %v8512_v5 = vadd.f32 %v17052_v56, %v8480_v51  ;;  %v8342_v26 = vpop.f32.mrb[73].mxu0  ;;  %v13558_v55 = vpack.c.bf16 %v13528_v31, %v13527_v7  ;;  %v11921_v31 = vrot.slane %v11248_v2, 6  ;;  %v22566_v35 = vsel %vm18714_vm5, %v15646_v22, %v11918_v61  ;;  %v8487_v2 = vld [vmem:[#allocation2 + $0x288] sm:$0xff] }
 0x3d0   : > { %v8510_v12 = vadd.f32 %v8478_v0, %v8342_v26  ;;  %v17053_v11 = vpop.f32.mrb[74].mxu0  ;;  %v13557_v44 = vpack.c.bf16 %v13526_v54, %v13525_v15  ;;  %v13467_v47 = vld [vmem:[#allocation2 + $0x230] sm:$0xff]  ;;  %v15685_v15 = vrot.slane %v11249_v3, 10  ;;  %v22558_v54 = vld [vmem:[%s18695_s22 + $0x420] sm:$0xf]  ;;  %v12281_v26 = vrot.slane %v12279_v17, 4 }
 0x3d1   : > { %8544 = vst.msk [vmem:[#allocation2 + $0x250] sm:$0xff] %vm436_vm10, %v8512_v5  ;;  %v8513_v33 = vadd.f32 %v17053_v11, %v8481_v32  ;;  %v8345_v41 = vpop.f32.mrb[75].mxu0  ;;  %v13465_v42 = vld [vmem:[#allocation2 + $0x220] sm:$0xff]  ;;  %v13499_v24 = vadd.f32 %v22308_v43, %v13467_v47  ;;  %v11920_v32 = vrot.slane %v11918_v61, 4  ;;  %v22569_v11 = vld [vmem:[%s18695_s22 + $0x43c] sm:$0xf] }
 0x3d2   : > { %8542 = vst.msk [vmem:[#allocation2 + $0x240] sm:$0xff] %vm436_vm10, %v8510_v12  ;;  %v8511_v46 = vadd.f32 %v8479_v58, %v8345_v41  ;;  %17468 = vmatprep.mubr.msk.bf16.mxu0 %vm436_vm10, %v13557_v44  ;;  %v13497_v49 = vadd.f32 %v22308_v43, %v13465_v42  ;;  %v13468_v63 = vld [vmem:[#allocation2 + $0x238] sm:$0xff]  ;;  %v12282_v58 = vrot.slane %v11251_v48, 6  ;;  %v8488_v41 = vld [vmem:[#allocation2 + $0x290] sm:$0xff]  ;;  %v11254_v42 = vld [vmem:[%s18695_s22 + $0x424] sm:$0x3] }
 0x3d3   : > { %8545 = vst.msk [vmem:[#allocation2 + $0x258] sm:$0xff] %vm436_vm10, %v8513_v33  ;;  %17469 = vmatmul.mubr.msk.bf16.vlgmr.msra.gmra.mrb[96].mxu0 %vm436_vm10, %v13558_v55  ;;  %v13466_v10 = vld [vmem:[#allocation2 + $0x228] sm:$0xff]  ;;  %v13500_v36 = vadd.f32 %v22308_v43, %v13468_v63  ;;  %v13531_v0 = vmax.f32 %v13499_v24, 0.0  ;;  %v12286_v33 = vrot.slane %v22558_v54, 6  ;;  %v11255_v63 = vld [vmem:[%s18695_s22 + $0x438] sm:$0xc] }
 0x3d4   : > { %8543 = vst.msk [vmem:[#allocation2 + $0x248] sm:$0xff] %vm436_vm10, %v8511_v46  ;;  %17351 = vmatmul.mubr.msk.bf16.gmra.mrb[52].mxu1 %vm873_vm6, %v15662_v14  ;;  %v13498_v34 = vadd.f32 %v22308_v43, %v13466_v10  ;;  %17501 = vmatpush3.bf16.msra.mxu0 %v22400_v9  ;;  %v13529_v38 = vmax.f32 %v13497_v49, 0.0  ;;  %v15664_v9 = vcombine.low %v22530_v37, %v11908_v23  ;;  %v12293_v6 = vrot.slane %v22569_v11, 6  ;;  %v11257_v61 = vld [vmem:[%s18695_s22 + $0x440] sm:$0x3] }
 0x3d5   : > { %17354 = vmatprep.mubr.msk.bf16.mxu1 %vm873_vm6, %v15663_v13  ;;  %v13532_v20 = vmax.f32 %v13500_v36, 0.0  ;;  %v11922_v13 = vsel %vm18714_vm5, %v11920_v32, %v11921_v31  ;;  %v12280_v49 = vsel %vm18714_vm5, %v15685_v15, %v12279_v17  ;;  %v12283_v37 = vsel %vm18714_vm5, %v12281_v26, %v12282_v58  ;;  %v11258_v54 = vld [vmem:[%s18695_s22 + $0x454] sm:$0xc]  ;;  %v8490_v26 = vld [vmem:[#allocation2 + $0x2a0] sm:$0xff]  ;;  %v8493_v58 = vld [vmem:[#allocation2 + $0x2b8] sm:$0xff] }
 0x3d6   : > { %v17056_v30 = vpop.f32.mrb[76].mxu0  ;;  %v13530_v19 = vmax.f32 %v13498_v34, 0.0  ;;  %v15666_v36 = vcombine.low %v22566_v35, %v11922_v13  ;;  %v15705_v17 = vcombine.low %v12280_v49, %v12283_v37  ;;  %v22601_v31 = vsel %vm18714_vm5, %v15686_v8, %v12286_v33 }
 0x3d7   : > { %v8516_v51 = vadd.f32 %v17056_v30, %v8484_v1  ;;  %v8358_v21 = vpop.f32.mrb[77].mxu0  ;;  %v13560_v59 = vpack.c.bf16 %v13532_v20, %v13531_v0  ;;  %v12289_v20 = vrot.slane %v11254_v42, 6  ;;  %v15688_v28 = vrot.slane %v11258_v54, 10  ;;  %v8491_v42 = vld [vmem:[#allocation2 + $0x2a8] sm:$0xff] }
 0x3d8   : > { %v8514_v60 = vadd.f32 %v8482_v53, %v8358_v21  ;;  %v17057_v39 = vpop.f32.mrb[78].mxu0  ;;  %v13559_v40 = vpack.c.bf16 %v13530_v19, %v13529_v38  ;;  %v13471_v56 = vld [vmem:[#allocation2 + $0x250] sm:$0xff]  ;;  %v15687_v38 = vrot.slane %v11255_v63, 10  ;;  %v22593_v19 = vld [vmem:[%s18695_s22 + $0x458] sm:$0xf]  ;;  %v12295_v21 = vrot.slane %v12293_v6, 4 }
 0x3d9   : > { %8548 = vst.msk [vmem:[#allocation2 + $0x270] sm:$0xff] %vm436_vm10, %v8516_v51  ;;  %v8517_v14 = vadd.f32 %v17057_v39, %v8485_v50  ;;  %v8361_v62 = vpop.f32.mrb[79].mxu0  ;;  %v13469_v5 = vld [vmem:[#allocation2 + $0x240] sm:$0xff]  ;;  %v13503_v47 = vadd.f32 %v22308_v43, %v13471_v56  ;;  %v12288_v50 = vrot.slane %v12286_v33, 4  ;;  %v22604_v39 = vld [vmem:[%s18695_s22 + $0x474] sm:$0xf] }
 0x3da   : > { %8546 = vst.msk [vmem:[#allocation2 + $0x260] sm:$0xff] %vm436_vm10, %v8514_v60  ;;  %v8515_v7 = vadd.f32 %v8483_v45, %v8361_v62  ;;  %17472 = vmatprep.mubr.msk.bf16.mxu0 %vm436_vm10, %v13559_v40  ;;  %v13501_v27 = vadd.f32 %v22308_v43, %v13469_v5  ;;  %v13472_v12 = vld [vmem:[#allocation2 + $0x258] sm:$0xff]  ;;  %v12296_v45 = vrot.slane %v11257_v61, 6  ;;  %v8492_v62 = vld [vmem:[#allocation2 + $0x2b0] sm:$0xff]  ;;  %v12307_v11 = vrot.slane %v22604_v39, 6 }
 0x3db   : > { %8549 = vst.msk [vmem:[#allocation2 + $0x278] sm:$0xff] %vm436_vm10, %v8517_v14  ;;  %17473 = vmatmul.mubr.msk.bf16.gmra.mrb[100].mxu0 %vm436_vm10, %v13560_v59  ;;  %v13470_v44 = vld [vmem:[#allocation2 + $0x248] sm:$0xff]  ;;  %v13504_v18 = vadd.f32 %v22308_v43, %v13472_v12  ;;  %v13535_v53 = vmax.f32 %v13503_v47, 0.0  ;;  %v12300_v14 = vrot.slane %v22593_v19, 6  ;;  %v11260_v5 = vld [vmem:[%s18695_s22 + $0x45c] sm:$0x3] }
 0x3dc   : > { %8547 = vst.msk [vmem:[#allocation2 + $0x268] sm:$0xff] %vm436_vm10, %v8515_v7  ;;  %17355 = vmatmul.mubr.msk.bf16.gmra.mrb[56].mxu1 %vm873_vm6, %v15664_v9  ;;  %v13502_v55 = vadd.f32 %v22308_v43, %v13470_v44  ;;  %v13533_v23 = vmax.f32 %v13501_v27, 0.0  ;;  %v12294_v27 = vsel %vm18714_vm5, %v15687_v38, %v12293_v6  ;;  %v12297_v35 = vsel %vm18714_vm5, %v12295_v21, %v12296_v45  ;;  %v11261_v12 = vld [vmem:[%s18695_s22 + $0x470] sm:$0xc]  ;;  %v11263_v33 = vld [vmem:[%s18695_s22 + $0x478] sm:$0x3] }
 0x3dd   : > { %17358 = vmatprep.mubr.msk.bf16.mxu1 %vm873_vm6, %v15665_v4  ;;  %v13536_v46 = vmax.f32 %v13504_v18, 0.0  ;;  %v12290_v4 = vsel %vm18714_vm5, %v12288_v50, %v12289_v20  ;;  %v15707_v6 = vcombine.low %v12294_v27, %v12297_v35  ;;  %v22636_v20 = vsel %vm18714_vm5, %v15688_v28, %v12300_v14  ;;  %v11264_v19 = vld [vmem:[%s18695_s22 + $0x48c] sm:$0xc]  ;;  %v8494_v21 = vld [vmem:[#allocation2 + $0x2c0] sm:$0xff]  ;;  %v8497_v45 = vld [vmem:[#allocation2 + $0x2d8] sm:$0xff] }
 0x3de   : > { %v17060_v10 = vpop.f32.mrb[80].mxu0  ;;  %v13534_v24 = vmax.f32 %v13502_v55, 0.0  ;;  %v15706_v18 = vcombine.low %v22601_v31, %v12290_v4  ;;  %v15690_v54 = vrot.slane %v11264_v19, 10 }
 0x3df   : > { %v8520_v1 = vadd.f32 %v17060_v10, %v8488_v41  ;;  %v8374_v34 = vpop.f32.mrb[81].mxu0  ;;  %v13562_v48 = vpack.c.bf16 %v13536_v46, %v13535_v53  ;;  %v12303_v46 = vrot.slane %v11260_v5, 6  ;;  %v8495_v5 = vld [vmem:[#allocation2 + $0x2c8] sm:$0xff] }
 0x3e0   : > { %v8518_v16 = vadd.f32 %v8486_v57, %v8374_v34  ;;  %v17061_v25 = vpop.f32.mrb[82].mxu0  ;;  %v13561_v3 = vpack.c.bf16 %v13534_v24, %v13533_v23  ;;  %v13475_v30 = vld [vmem:[#allocation2 + $0x270] sm:$0xff]  ;;  %v15689_v23 = vrot.slane %v11261_v12, 10  ;;  %v12309_v34 = vrot.slane %v12307_v11, 4 }
 0x3e1   : > { %8552 = vst.msk [vmem:[#allocation2 + $0x290] sm:$0xff] %vm436_vm10, %v8520_v1  ;;  %v8521_v9 = vadd.f32 %v17061_v25, %v8489_v29  ;;  %v8377_v22 = vpop.f32.mrb[83].mxu0  ;;  %v13473_v51 = vld [vmem:[#allocation2 + $0x260] sm:$0xff]  ;;  %v13507_v56 = vadd.f32 %v22308_v43, %v13475_v30  ;;  %v12302_v29 = vrot.slane %v12300_v14, 4  ;;  %v22628_v24 = vld [vmem:[%s18695_s22 + $0x490] sm:$0xf] }
 0x3e2   : > { %8550 = vst.msk [vmem:[#allocation2 + $0x280] sm:$0xff] %vm436_vm10, %v8518_v16  ;;  %v8519_v0 = vadd.f32 %v8487_v2, %v8377_v22  ;;  %17476 = vmatprep.mubr.msk.bf16.mxu0 %vm436_vm10, %v13561_v3  ;;  %v13505_v32 = vadd.f32 %v22308_v43, %v13473_v51  ;;  %v13476_v60 = vld [vmem:[#allocation2 + $0x278] sm:$0xff]  ;;  %v12310_v2 = vrot.slane %v11263_v33, 6  ;;  %v22639_v25 = vld [vmem:[%s18695_s22 + $0x4ac] sm:$0xf]  ;;  %v8496_v22 = vld [vmem:[#allocation2 + $0x2d0] sm:$0xff] }
 0x3e3   : > { %8553 = vst.msk [vmem:[#allocation2 + $0x298] sm:$0xff] %vm436_vm10, %v8521_v9  ;;  %17477 = vmatmul.mubr.msk.bf16.gmra.mrb[104].mxu0 %vm436_vm10, %v13562_v48  ;;  %v13474_v40 = vld [vmem:[#allocation2 + $0x268] sm:$0xff]  ;;  %v13508_v15 = vadd.f32 %v22308_v43, %v13476_v60  ;;  %v13539_v57 = vmax.f32 %v13507_v56, 0.0  ;;  %v12314_v9 = vrot.slane %v22628_v24, 6  ;;  %v11266_v51 = vld [vmem:[%s18695_s22 + $0x494] sm:$0x3] }
 0x3e4   : > { %8551 = vst.msk [vmem:[#allocation2 + $0x288] sm:$0xff] %vm436_vm10, %v8519_v0  ;;  %17359 = vmatmul.mubr.msk.bf16.gmra.mrb[60].mxu1 %vm873_vm6, %v15666_v36  ;;  %v13506_v59 = vadd.f32 %v22308_v43, %v13474_v40  ;;  %v13537_v13 = vmax.f32 %v13505_v32, 0.0  ;;  %v12308_v32 = vsel %vm18714_vm5, %v15689_v23, %v12307_v11  ;;  %v12311_v31 = vsel %vm18714_vm5, %v12309_v34, %v12310_v2  ;;  %v11267_v60 = vld [vmem:[%s18695_s22 + $0x4a8] sm:$0xc]  ;;  %v11269_v14 = vld [vmem:[%s18695_s22 + $0x4b0] sm:$0x3] }
 0x3e5   : > { %17366 = vmatprep.mubr.msk.bf16.mxu1 %vm873_vm6, %v15705_v17  ;;  %v13540_v7 = vmax.f32 %v13508_v15, 0.0  ;;  %v12304_v17 = vsel %vm18714_vm5, %v12302_v29, %v12303_v46  ;;  %v12321_v39 = vrot.slane %v22639_v25, 6  ;;  %v15709_v11 = vcombine.low %v12308_v32, %v12311_v31  ;;  %v11270_v24 = vld [vmem:[%s18695_s22 + $0x4c4] sm:$0xc]  ;;  %v11273_v34 = vld [vmem:[%s18695_s22 + $0x4e0] sm:$0xc] }
 0x3e6   : > { %v17064_v44 = vpop.f32.mrb[84].mxu0  ;;  %v13538_v47 = vmax.f32 %v13506_v59, 0.0  ;;  %v15708_v15 = vcombine.low %v22636_v20, %v12304_v17  ;;  %v8498_v2 = vld [vmem:[#allocation2 + $0x2e0] sm:$0xff]  ;;  %v15692_v19 = vrot.slane %v11270_v24, 10 }
 0x3e7   : > { %v8524_v41 = vadd.f32 %v17064_v44, %v8492_v62  ;;  %v8390_v55 = vpop.f32.mrb[85].mxu0  ;;  %v13564_v61 = vpack.c.bf16 %v13540_v7, %v13539_v57  ;;  %v12317_v7 = vrot.slane %v11266_v51, 6  ;;  %v8499_v51 = vld [vmem:[#allocation2 + $0x2e8] sm:$0xff] }
 0x3e8   : > { %v8522_v49 = vadd.f32 %v8490_v26, %v8390_v55  ;;  %v17065_v37 = vpop.f32.mrb[86].mxu0  ;;  %v13563_v63 = vpack.c.bf16 %v13538_v47, %v13537_v13  ;;  %v13479_v10 = vld [vmem:[#allocation2 + $0x290] sm:$0xff]  ;;  %v15691_v13 = vrot.slane %v11267_v60, 10  ;;  %v12324_v55 = vrot.slane %v11269_v14, 6 }
 0x3e9   : > { %8556 = vst.msk [vmem:[#allocation2 + $0x2b0] sm:$0xff] %vm436_vm10, %v8524_v41  ;;  %v8525_v36 = vadd.f32 %v17065_v37, %v8493_v58  ;;  %v8393_v8 = vpop.f32.mrb[87].mxu0  ;;  %v13477_v1 = vld [vmem:[#allocation2 + $0x280] sm:$0xff]  ;;  %v12316_v58 = vrot.slane %v12314_v9, 4  ;;  %v12323_v41 = vrot.slane %v12321_v39, 4 }
 0x3ea   : > { %8554 = vst.msk [vmem:[#allocation2 + $0x2a0] sm:$0xff] %vm436_vm10, %v8522_v49  ;;  %v8523_v53 = vadd.f32 %v8491_v42, %v8393_v8  ;;  %17480 = vmatprep.mubr.msk.bf16.mxu0 %vm436_vm10, %v13563_v63  ;;  %v13509_v50 = vadd.f32 %v22308_v43, %v13477_v1  ;;  %v13480_v16 = vld [vmem:[#allocation2 + $0x298] sm:$0xff]  ;;  %v22648_v43 = vld [vmem:[%s22988_s6] ss:$0 sm:$0xff]  ;;  %v22669_v42 = vld [vmem:[%s18695_s22 + $0x4c8] sm:$0xf]  ;;  %v12315_v63 = vsel %vm18714_vm5, %v15690_v54, %v12314_v9 }
 0x3eb   : > { %8557 = vst.msk [vmem:[#allocation2 + $0x2b8] sm:$0xff] %vm436_vm10, %v8525_v36  ;;  %17481 = vmatmul.mubr.msk.bf16.gmra.mrb[108].mxu0 %vm436_vm10, %v13564_v61  ;;  %v13478_v3 = vld [vmem:[#allocation2 + $0x288] sm:$0xff]  ;;  %v13511_v30 = vadd.f32 %v22648_v43, %v13479_v10  ;;  %v13512_v38 = vadd.f32 %v22648_v43, %v13480_v16  ;;  %v22675_v49 = vld [vmem:[%s18695_s22 + $0x4e4] sm:$0xf]  ;;  %v8500_v36 = vld [vmem:[#allocation2 + $0x2f0] sm:$0xff]  ;;  %v12328_v1 = vrot.slane %v22669_v42, 6  ;;  %v12322_v20 = vsel %vm18714_vm5, %v15691_v13, %v12321_v39 }
 0x3ec   : > { %8555 = vst.msk [vmem:[#allocation2 + $0x2a8] sm:$0xff] %vm436_vm10, %v8523_v53  ;;  %17367 = vmatmul.mubr.msk.bf16.vlgmr.msra.gmra.mrb[32].mxu1 %vm873_vm6, %v15706_v18  ;;  %v13510_v48 = vadd.f32 %v22648_v43, %v13478_v3  ;;  %v13541_v4 = vmax.f32 %v13509_v50, 0.0  ;;  %v11272_v61 = vld [vmem:[%s18695_s22 + $0x4cc] sm:$0x3]  ;;  %v8501_v53 = vld [vmem:[#allocation2 + $0x2f8] sm:$0xff]  ;;  %v12325_v16 = vsel %vm18714_vm5, %v12323_v41, %v12324_v55  ;;  %v12335_v25 = vrot.slane %v22675_v49, 6 }
 0x3ed   : > { %17370 = vmatprep.mubr.msk.bf16.mxu1 %vm873_vm6, %v15707_v6  ;;  %v13544_v0 = vmax.f32 %v13512_v38, 0.0  ;;  %v13543_v26 = vmax.f32 %v13511_v30, 0.0  ;;  %v12318_v6 = vsel %vm18714_vm5, %v12316_v58, %v12317_v7  ;;  %v11275_v9 = vld [vmem:[%s18695_s22 + $0x4e8] sm:$0x3]  ;;  %v15711_v39 = vcombine.low %v12322_v20, %v12325_v16  ;;  %v11277_v7 = vld [vmem:[%s18695_s22 + $0x500] sm:$0xf] }
 0x3ee   : > { %v17068_v40 = vpop.f32.mrb[88].mxu0  ;;  %v13542_v56 = vmax.f32 %v13510_v48, 0.0  ;;  %v15710_v38 = vcombine.low %v12315_v63, %v12318_v6  ;;  %v12329_v13 = vsel %vm18714_vm5, %v15692_v19, %v12328_v1  ;;  %v11276_v41 = vld [vmem:[%s18695_s22 + $0x4fc] sm:$0xc]  ;;  %v11278_v55 = vld [vmem:[%s18695_s22 + $0x504] sm:$0x3] }
 0x3ef   : > { %v8528_v62 = vadd.f32 %v17068_v40, %v8496_v22  ;;  %v8406_v59 = vpop.f32.mrb[89].mxu0  ;;  %v13566_v28 = vpack.c.bf16 %v13544_v0, %v13543_v26  ;;  %v15693_v0 = vrot.slane %v11273_v34, 10  ;;  %v12330_v40 = vrot.slane %v12328_v1, 4  ;;  %v11281_v63 = vld [vmem:[%s18695_s22 + $0x520] sm:$0x3] }
 0x3f0   : > { %v8526_v27 = vadd.f32 %v8494_v21, %v8406_v59  ;;  %v17069_v35 = vpop.f32.mrb[90].mxu0  ;;  %v13565_v12 = vpack.c.bf16 %v13542_v56, %v13541_v4  ;;  %v13483_v44 = vld [vmem:[#allocation2 + $0x2b0] sm:$0xff]  ;;  %v12338_v59 = vrot.slane %v11275_v9, 6  ;;  %v12342_v42 = vrot.slane %v11277_v7, 6 }
 0x3f1   : > { %8560 = vst.msk [vmem:[#allocation2 + $0x2d0] sm:$0xff] %vm436_vm10, %v8528_v62  ;;  %v8529_v47 = vadd.f32 %v17069_v35, %v8497_v45  ;;  %v8409_v18 = vpop.f32.mrb[91].mxu0  ;;  %v13481_v33 = vld [vmem:[#allocation2 + $0x2a0] sm:$0xff]  ;;  %v13515_v10 = vadd.f32 %v22648_v43, %v13483_v44  ;;  %v12331_v45 = vrot.slane %v11272_v61, 6  ;;  %v12337_v62 = vrot.slane %v12335_v25, 4 }
 0x3f2   : > { %8558 = vst.msk [vmem:[#allocation2 + $0x2c0] sm:$0xff] %vm436_vm10, %v8526_v27  ;;  %v8527_v57 = vadd.f32 %v8495_v5, %v8409_v18  ;;  %17484 = vmatprep.mubr.msk.bf16.mxu0 %vm436_vm10, %v13565_v12  ;;  %v13513_v29 = vadd.f32 %v22648_v43, %v13481_v33  ;;  %v13484_v46 = vld [vmem:[#allocation2 + $0x2b8] sm:$0xff]  ;;  %v15694_v24 = vrot.slane %v11276_v41, 10  ;;  %v12344_v1 = vrot.slane %v12342_v42, 4 }
 0x3f3   : > { %8561 = vst.msk [vmem:[#allocation2 + $0x2d8] sm:$0xff] %vm436_vm10, %v8529_v47  ;;  %17485 = vmatmul.mubr.msk.bf16.gmra.mrb[112].mxu0 %vm436_vm10, %v13566_v28  ;;  %v13482_v37 = vld [vmem:[#allocation2 + $0x2a8] sm:$0xff]  ;;  %v13516_v23 = vadd.f32 %v22648_v43, %v13484_v46  ;;  %v13547_v21 = vmax.f32 %v13515_v10, 0.0  ;;  %v12336_v47 = vsel %vm18714_vm5, %v15693_v0, %v12335_v25  ;;  %v12332_v18 = vsel %vm18714_vm5, %v12330_v40, %v12331_v45  ;;  %v11279_v46 = vld [vmem:[%s18695_s22 + $0x518] sm:$0xc] }
 0x3f4   : > { %8559 = vst.msk [vmem:[#allocation2 + $0x2c8] sm:$0xff] %vm436_vm10, %v8527_v57  ;;  %17371 = vmatmul.mubr.msk.bf16.gmra.mrb[36].mxu1 %vm873_vm6, %v15708_v15  ;;  %v13514_v8 = vadd.f32 %v22648_v43, %v13482_v37  ;;  %v13545_v17 = vmax.f32 %v13513_v29, 0.0  ;;  %v12339_v33 = vsel %vm18714_vm5, %v12337_v62, %v12338_v59  ;;  %v15712_v10 = vcombine.low %v12329_v13, %v12332_v18  ;;  %v11283_v25 = vld [vmem:[%s18695_s22 + $0x538] sm:$0xf] }
 0x3f5   : > { %17374 = vmatprep.mubr.msk.bf16.mxu1 %vm873_vm6, %v15709_v11  ;;  %v13548_v50 = vmax.f32 %v13516_v23, 0.0  ;;  %v11280_v11 = vld [vmem:[%s18695_s22 + $0x51c] sm:$0xf]  ;;  %v15713_v23 = vcombine.low %v12336_v47, %v12339_v33  ;;  %v12345_v34 = vrot.slane %v11278_v55, 6  ;;  %v12352_v16 = vrot.slane %v11281_v63, 6 }
 0x3f6   : > { %v17072_v3 = vpop.f32.mrb[92].mxu0  ;;  %v13546_v30 = vmax.f32 %v13514_v8, 0.0  ;;  %v12349_v49 = vrot.slane %v11280_v11, 6  ;;  %v12343_v9 = vsel %vm18714_vm5, %v15694_v24, %v12342_v42  ;;  %v12356_v45 = vrot.slane %v11283_v25, 6  ;;  %v11290_v33 = vld [vmem:[%s18695_s22 + $0x574] sm:$0x3] }
 0x3f7   : > { %v8532_v22 = vadd.f32 %v17072_v3, %v8500_v36  ;;  %v8422_v48 = vpop.f32.mrb[93].mxu0  ;;  %v13568_v54 = vpack.c.bf16 %v13548_v50, %v13547_v21  ;;  %v11282_v21 = vld [vmem:[%s18695_s22 + $0x534] sm:$0xc]  ;;  %v11291_v55 = vld [vmem:[%s18695_s22 + $0x588] sm:$0xc] }
 0x3f8   : > { %v8530_v32 = vadd.f32 %v8498_v2, %v8422_v48  ;;  %v17073_v31 = vpop.f32.mrb[94].mxu0  ;;  %v13567_v60 = vpack.c.bf16 %v13546_v30, %v13545_v17  ;;  %v13487_v4 = vld [vmem:[#allocation2 + $0x2d0] sm:$0xff]  ;;  %v15695_v2 = vrot.slane %v11279_v46, 10  ;;  %v12351_v20 = vrot.slane %v12349_v49, 4 }
 0x3f9   : > { %8564 = vst.msk [vmem:[#allocation2 + $0x2f0] sm:$0xff] %vm436_vm10, %v8532_v22  ;;  %v8533_v56 = vadd.f32 %v17073_v31, %v8501_v53  ;;  %v8425_v15 = vpop.f32.mrb[95].mxu0  ;;  %v13485_v14 = vld [vmem:[#allocation2 + $0x2c0] sm:$0xff]  ;;  %v13519_v35 = vadd.f32 %v22648_v43, %v13487_v4  ;;  %v12346_v22 = vsel %vm18714_vm5, %v12344_v1, %v12345_v34  ;;  %v11285_v4 = vld [vmem:[%s18695_s22 + $0x550] sm:$0xc]  ;;  %v15699_v63 = vrot.slane %v11291_v55, 10 }
 0x3fa   : > { %8562 = vst.msk [vmem:[#allocation2 + $0x2e0] sm:$0xff] %vm436_vm10, %v8530_v32  ;;  %v8531_v5 = vadd.f32 %v8499_v51, %v8425_v15  ;;  %17488 = vmatprep.mubr.msk.bf16.mxu0 %vm436_vm10, %v13567_v60  ;;  %v13517_v26 = vadd.f32 %v22648_v43, %v13485_v14  ;;  %v13488_v58 = vld [vmem:[#allocation2 + $0x2d8] sm:$0xff]  ;;  %v12350_v51 = vsel %vm18714_vm5, %v15695_v2, %v12349_v49  ;;  %v15696_v14 = vrot.slane %v11282_v21, 10  ;;  %v11293_v42 = vld [vmem:[%s18695_s22 + $0x590] sm:$0x3]  ;;  %v12697_v21 = vld [vmem:[#allocation2 + $0x308] sm:$0xff] }
 0x3fb   : > { %8565 = vst.msk [vmem:[#allocation2 + $0x2f8] sm:$0xff] %vm436_vm10, %v8533_v56  ;;  %17489 = vmatmul.mubr.msk.bf16.gmra.mrb[116].mxu0 %vm436_vm10, %v13568_v54  ;;  %v13486_v27 = vld [vmem:[#allocation2 + $0x2c8] sm:$0xff]  ;;  %v13520_v12 = vadd.f32 %v22648_v43, %v13488_v58  ;;  %v13551_v37 = vmax.f32 %v13519_v35, 0.0  ;;  %v12353_v31 = vsel %vm18714_vm5, %v12351_v20, %v12352_v16  ;;  %v11284_v60 = vld [vmem:[%s18695_s22 + $0x53c] sm:$0x3]  ;;  %v15714_v54 = vcombine.low %v12343_v9, %v12346_v22 }
 0x3fc   : > { %8563 = vst.msk [vmem:[#allocation2 + $0x2e8] sm:$0xff] %vm436_vm10, %v8531_v5  ;;  %17375 = vmatmul.mubr.msk.bf16.gmra.mrb[40].mxu1 %vm873_vm6, %v15710_v38  ;;  %v13518_v44 = vadd.f32 %v22648_v43, %v13486_v27  ;;  %v13549_v57 = vmax.f32 %v13517_v26, 0.0  ;;  %v11286_v38 = vld [vmem:[%s18695_s22 + $0x554] sm:$0xf]  ;;  %v11287_v56 = vld [vmem:[%s18695_s22 + $0x558] sm:$0x3]  ;;  %v15715_v59 = vcombine.low %v12350_v51, %v12353_v31  ;;  %v12357_v11 = vsel %vm18714_vm5, %v15696_v14, %v12356_v45 }
 0x3fd   : > { %17378 = vmatprep.mubr.msk.bf16.mxu1 %vm873_vm6, %v15711_v39  ;;  %v13552_v28 = vmax.f32 %v13520_v12, 0.0  ;;  %v12363_v39 = vrot.slane %v11286_v38, 6  ;;  %v12358_v5 = vrot.slane %v12356_v45, 4  ;;  %v12359_v26 = vrot.slane %v11284_v60, 6  ;;  %v11289_v35 = vld [vmem:[%s18695_s22 + $0x570] sm:$0xf] }
 0x3fe   : > { %v13550_v29 = vmax.f32 %v13518_v44, 0.0  ;;  %v15697_v58 = vrot.slane %v11285_v4, 10  ;;  %v12366_v27 = vrot.slane %v11287_v56, 6  ;;  %v11292_v12 = vld [vmem:[%s18695_s22 + $0x58c] sm:$0xf]  ;;  %v12370_v13 = vrot.slane %v11289_v35, 6 }
 0x3ff   : > { %v13570_v8 = vpack.c.bf16 %v13552_v28, %v13551_v37  ;;  %v12365_v7 = vrot.slane %v12363_v39, 4  ;;  %v12360_v44 = vsel %vm18714_vm5, %v12358_v5, %v12359_v26  ;;  %v11288_v28 = vld [vmem:[%s18695_s22 + $0x56c] sm:$0xc]  ;;  %v12377_v41 = vrot.slane %v11292_v12, 6  ;;  %v11294_v34 = vld [vmem:[%s18695_s22 + $0x5a4] sm:$0xc] }
 0x400   : > { %v13569_v6 = vpack.c.bf16 %v13550_v29, %v13549_v57  ;;  %v13491_v36 = vld [vmem:[#allocation2 + $0x2f0] sm:$0xff]  ;;  %v12364_v47 = vsel %vm18714_vm5, %v15697_v58, %v12363_v39  ;;  %v15716_v57 = vcombine.low %v12357_v11, %v12360_v44  ;;  %v15698_v46 = vrot.slane %v11288_v28, 10  ;;  %v11296_v2 = vld [vmem:[%s18695_s22 + $0x5ac] sm:$0x3]  ;;  %v12699_v22 = vld [vmem:[#allocation2 + $0x318] sm:$0xff] }
 0x401   : > { %v13489_v61 = vld [vmem:[#allocation2 + $0x2e0] sm:$0xff]  ;;  %v13523_v17 = vadd.f32 %v22648_v43, %v13491_v36  ;;  %v12367_v18 = vsel %vm18714_vm5, %v12365_v7, %v12366_v27  ;;  %v12372_v49 = vrot.slane %v12370_v13, 4  ;;  %v12373_v37 = vrot.slane %v11290_v33, 6  ;;  %v12698_v38 = vld [vmem:[#allocation2 + $0x310] sm:$0xff]  ;;  %v12703_v4 = vld [vmem:[#allocation2 + $0x338] sm:$0xff] }
 0x402   : > { %17492 = vmatprep.mubr.msk.bf16.mxu0 %vm436_vm10, %v13569_v6  ;;  %v13521_v53 = vadd.f32 %v22648_v43, %v13489_v61  ;;  %v13492_v50 = vld [vmem:[#allocation2 + $0x2f8] sm:$0xff]  ;;  %v15717_v29 = vcombine.low %v12364_v47, %v12367_v18  ;;  %v12379_v6 = vrot.slane %v12377_v41, 4  ;;  %v12371_v24 = vsel %vm18714_vm5, %v15698_v46, %v12370_v13  ;;  %v12702_v60 = vld [vmem:[#allocation2 + $0x330] sm:$0xff]  ;;  %v12700_v39 = vld [vmem:[#allocation2 + $0x320] sm:$0xff] }
 0x403   : > { %17493 = vmatmul.mubr.msk.bf16.gmra.mrb[120].mxu0 %vm436_vm10, %v13570_v8  ;;  %v13490_v3 = vld [vmem:[#allocation2 + $0x2e8] sm:$0xff]  ;;  %v13524_v30 = vadd.f32 %v22648_v43, %v13492_v50  ;;  %v13555_v40 = vmax.f32 %v13523_v17, 0.0  ;;  %v12374_v36 = vsel %vm18714_vm5, %v12372_v49, %v12373_v37  ;;  %v12378_v61 = vsel %vm18714_vm5, %v15699_v63, %v12377_v41  ;;  %v12706_v13 = vld [vmem:[#allocation2 + $0x350] sm:$0xff]  ;;  %v12704_v18 = vld [vmem:[#allocation2 + $0x340] sm:$0xff] }
 0x404   : > { %17379 = vmatmul.mubr.msk.bf16.gmra.mrb[44].mxu1 %vm873_vm6, %v15712_v10  ;;  %v13522_v19 = vadd.f32 %v22648_v43, %v13490_v3  ;;  %v13553_v0 = vmax.f32 %v13521_v53, 0.0  ;;  %v12380_v10 = vrot.slane %v11293_v42, 6  ;;  %v15718_v53 = vcombine.low %v12371_v24, %v12374_v36  ;;  %v12707_v41 = vld [vmem:[#allocation2 + $0x358] sm:$0xff]  ;;  %v12705_v46 = vld [vmem:[#allocation2 + $0x348] sm:$0xff] }
 0x405   : > { %17382 = vmatprep.mubr.msk.bf16.mxu1 %vm873_vm6, %v15713_v23  ;;  %v13556_v48 = vmax.f32 %v13524_v30, 0.0  ;;  %v11295_v23 = vld [vmem:[%s18695_s22 + $0x5a8] sm:$0xf]  ;;  %v15700_v20 = vrot.slane %v11294_v34, 10  ;;  %v12387_v25 = vrot.slane %v11296_v2, 6 }
 0x406   : > { %v13554_v32 = vmax.f32 %v13522_v19, 0.0  ;;  %v12384_v8 = vrot.slane %v11295_v23, 6  ;;  %v12381_v1 = vsel %vm18714_vm5, %v12379_v6, %v12380_v10  ;;  %v12696_v19 = vld [vmem:[#allocation2 + $0x300] sm:$0xff] }
 0x407   : > { %v13572_v62 = vpack.c.bf16 %v13556_v48, %v13555_v40  ;;  %v15719_v50 = vcombine.low %v12378_v61, %v12381_v1 }
 0x408   : > { %v13571_v15 = vpack.c.bf16 %v13554_v32, %v13553_v0  ;;  %v12386_v16 = vrot.slane %v12384_v8, 4  ;;  %v12385_v3 = vsel %vm18714_vm5, %v15700_v20, %v12384_v8  ;;  %v12710_v20 = vld [vmem:[#allocation2 + $0x370] sm:$0xff] }
 0x40a   : > { %17496 = vmatprep.mubr.msk.bf16.mxu0 %vm436_vm10, %v13571_v15  ;;  %v12388_v17 = vsel %vm18714_vm5, %v12386_v16, %v12387_v25  ;;  %v12708_v25 = vld [vmem:[#allocation2 + $0x360] sm:$0xff] }
 0x40b   : > { %17497 = vmatmul.mubr.msk.bf16.gmra.mrb[124].mxu0 %vm436_vm10, %v13572_v62  ;;  %v15720_v30 = vcombine.low %v12385_v3, %v12388_v17 }
 0x40c   : > { %17383 = vmatmul.mubr.msk.bf16.gmra.mrb[48].mxu1 %vm873_vm6, %v15714_v54  ;;  %v12701_v54 = vld [vmem:[#allocation2 + $0x328] sm:$0xff] }
 0x40d   : > { %17386 = vmatprep.mubr.msk.bf16.mxu1 %vm873_vm6, %v15715_v59 }
 0x414   : > { %17387 = vmatmul.mubr.msk.bf16.gmra.mrb[52].mxu1 %vm873_vm6, %v15716_v57 }
 0x415   : > { %17390 = vmatprep.mubr.msk.bf16.mxu1 %vm873_vm6, %v15717_v29 }
 0x41c   : > { %17391 = vmatmul.mubr.msk.bf16.gmra.mrb[56].mxu1 %vm873_vm6, %v15718_v53 }
 0x41d   : > { %17394 = vmatprep.mubr.msk.bf16.mxu1 %vm873_vm6, %v15719_v50 }
 0x424   : > { %17395 = vmatmul.mubr.msk.bf16.gmra.mrb[60].mxu1 %vm873_vm6, %v15720_v30  ;;  %v12711_v30 = vld [vmem:[#allocation2 + $0x378] sm:$0xff] }
 0x4bf   : > { %v17368_v9 = vpop.f32.mrb[32].mxu1 }
 0x4c0   : > { %v12730_v48 = vadd.f32 %v17368_v9, %v12698_v38  ;;  %v12536_v51 = vpop.f32.mrb[33].mxu1 }
 0x4c1   : > { %v12728_v45 = vadd.f32 %v12696_v19, %v12536_v51  ;;  %v17369_v0 = vpop.f32.mrb[34].mxu1 }
 0x4c2   : > { %12762 = vst.msk [vmem:[#allocation2 + $0x310] sm:$0xff] %vm436_vm10, %v12730_v48  ;;  %v12731_v32 = vadd.f32 %v17369_v0, %v12699_v22  ;;  %v12539_v31 = vpop.f32.mrb[35].mxu1  ;;  %v12709_v48 = vld [vmem:[#allocation2 + $0x368] sm:$0xff] }
 0x4c3   : > { %12760 = vst.msk [vmem:[#allocation2 + $0x300] sm:$0xff] %vm436_vm10, %v12728_v45  ;;  %v12729_v52 = vadd.f32 %v12697_v21, %v12539_v31 }
 0x4c4   : > { %12763 = vst.msk [vmem:[#allocation2 + $0x318] sm:$0xff] %vm436_vm10, %v12731_v32 }
 0x4c5   : > { %12761 = vst.msk [vmem:[#allocation2 + $0x308] sm:$0xff] %vm436_vm10, %v12729_v52 }
 0x4c7   : > { %v17372_v40 = vpop.f32.mrb[36].mxu1 }
 0x4c8   : > { %v12734_v56 = vadd.f32 %v17372_v40, %v12702_v60  ;;  %v12552_v15 = vpop.f32.mrb[37].mxu1 }
 0x4c9   : > { %v12732_v14 = vadd.f32 %v12700_v39, %v12552_v15  ;;  %v17373_v62 = vpop.f32.mrb[38].mxu1  ;;  %v13825_v59 = vld [vmem:[#allocation2 + $0x310] sm:$0xff] }
 0x4ca   : > { %12766 = vst.msk [vmem:[#allocation2 + $0x330] sm:$0xff] %vm436_vm10, %v12734_v56  ;;  %v12735_v5 = vadd.f32 %v17373_v62, %v12703_v4  ;;  %v12555_v26 = vpop.f32.mrb[39].mxu1  ;;  %v13823_v58 = vld [vmem:[#allocation2 + $0x300] sm:$0xff]  ;;  %v13857_v11 = vadd.f32 %v22648_v43, %v13825_v59  ;;  %v12714_v62 = vld [vmem:[#allocation2 + $0x390] sm:$0xff] }
 0x4cb   : > { %12764 = vst.msk [vmem:[#allocation2 + $0x320] sm:$0xff] %vm436_vm10, %v12732_v14  ;;  %v12733_v7 = vadd.f32 %v12701_v54, %v12555_v26  ;;  %v13855_v27 = vadd.f32 %v22648_v43, %v13823_v58  ;;  %v13826_v35 = vld [vmem:[#allocation2 + $0x318] sm:$0xff] }
 0x4cc   : > { %12767 = vst.msk [vmem:[#allocation2 + $0x338] sm:$0xff] %vm436_vm10, %v12735_v5  ;;  %v13824_v12 = vld [vmem:[#allocation2 + $0x308] sm:$0xff]  ;;  %v13858_v44 = vadd.f32 %v22648_v43, %v13826_v35  ;;  %v13889_v49 = vmax.f32 %v13857_v11, 0.0  ;;  %v12712_v5 = vld [vmem:[#allocation2 + $0x380] sm:$0xff] }
 0x4cd   : > { %12765 = vst.msk [vmem:[#allocation2 + $0x328] sm:$0xff] %vm436_vm10, %v12733_v7  ;;  %v13856_v47 = vadd.f32 %v22648_v43, %v13824_v12  ;;  %v13887_v55 = vmax.f32 %v13855_v27, 0.0  ;;  %v12715_v7 = vld [vmem:[#allocation2 + $0x398] sm:$0xff] }
 0x4ce   : > { %v13890_v28 = vmax.f32 %v13858_v44, 0.0  ;;  %v12713_v44 = vld [vmem:[#allocation2 + $0x388] sm:$0xff] }
 0x4cf   : > { %v17376_v33 = vpop.f32.mrb[40].mxu1  ;;  %v13888_v42 = vmax.f32 %v13856_v47, 0.0 }
 0x4d0   : > { %v12738_v57 = vadd.f32 %v17376_v33, %v12706_v13  ;;  %v12568_v29 = vpop.f32.mrb[41].mxu1  ;;  %v13920_v36 = vpack.c.bf16 %v13890_v28, %v13889_v49 }
 0x4d1   : > { %v12736_v37 = vadd.f32 %v12704_v18, %v12568_v29  ;;  %v17377_v63 = vpop.f32.mrb[42].mxu1  ;;  %v13919_v6 = vpack.c.bf16 %v13888_v42, %v13887_v55  ;;  %v13829_v10 = vld [vmem:[#allocation2 + $0x330] sm:$0xff] }
 0x4d2   : > { %12770 = vst.msk [vmem:[#allocation2 + $0x350] sm:$0xff] %vm436_vm10, %v12738_v57  ;;  %v12739_v23 = vadd.f32 %v17377_v63, %v12707_v41  ;;  %v12571_v24 = vpop.f32.mrb[43].mxu1  ;;  %v13827_v8 = vld [vmem:[#allocation2 + $0x320] sm:$0xff]  ;;  %v13861_v53 = vadd.f32 %v22648_v43, %v13829_v10  ;;  %v12718_v10 = vld [vmem:[#allocation2 + $0x3b0] sm:$0xff] }
 0x4d3   : > { %12768 = vst.msk [vmem:[#allocation2 + $0x340] sm:$0xff] %vm436_vm10, %v12736_v37  ;;  %v12737_v61 = vadd.f32 %v12705_v46, %v12571_v24  ;;  %17502 = vmatprep.mubr.msk.bf16.mxu0 %vm436_vm10, %v13919_v6  ;;  %v13859_v1 = vadd.f32 %v22648_v43, %v13827_v8  ;;  %v13830_v34 = vld [vmem:[#allocation2 + $0x338] sm:$0xff]  ;;  %v12716_v24 = vld [vmem:[#allocation2 + $0x3a0] sm:$0xff] }
 0x4d4   : > { %12771 = vst.msk [vmem:[#allocation2 + $0x358] sm:$0xff] %vm436_vm10, %v12739_v23  ;;  %17503 = vmatmul.mubr.msk.bf16.vlgmr.msra.gmra.mrb[96].mxu0 %vm436_vm10, %v13920_v36  ;;  %v13828_v2 = vld [vmem:[#allocation2 + $0x328] sm:$0xff]  ;;  %v13862_v50 = vadd.f32 %v22648_v43, %v13830_v34  ;;  %v13893_v51 = vmax.f32 %v13861_v53, 0.0 }
 0x4d5   : > { %12769 = vst.msk [vmem:[#allocation2 + $0x348] sm:$0xff] %vm436_vm10, %v12737_v61  ;;  %v13860_v16 = vadd.f32 %v22648_v43, %v13828_v2  ;;  %v13891_v38 = vmax.f32 %v13859_v1, 0.0  ;;  %v12719_v61 = vld [vmem:[#allocation2 + $0x3b8] sm:$0xff] }
 0x4d6   : > { %v13894_v3 = vmax.f32 %v13862_v50, 0.0  ;;  %v12717_v50 = vld [vmem:[#allocation2 + $0x3a8] sm:$0xff] }
 0x4d7   : > { %v17380_v17 = vpop.f32.mrb[44].mxu1  ;;  %v13892_v19 = vmax.f32 %v13860_v16, 0.0 }
 0x4d8   : > { %v12742_v9 = vadd.f32 %v17380_v17, %v12710_v20  ;;  %v12584_v22 = vpop.f32.mrb[45].mxu1  ;;  %v13922_v60 = vpack.c.bf16 %v13894_v3, %v13893_v51 }
 0x4d9   : > { %v12740_v21 = vadd.f32 %v12708_v25, %v12584_v22  ;;  %v17381_v45 = vpop.f32.mrb[46].mxu1  ;;  %v13921_v0 = vpack.c.bf16 %v13892_v19, %v13891_v38  ;;  %v13833_v32 = vld [vmem:[#allocation2 + $0x350] sm:$0xff] }
 0x4da   : > { %12774 = vst.msk [vmem:[#allocation2 + $0x370] sm:$0xff] %vm436_vm10, %v12742_v9  ;;  %v12743_v31 = vadd.f32 %v17381_v45, %v12711_v30  ;;  %v12587_v52 = vpop.f32.mrb[47].mxu1  ;;  %v13831_v39 = vld [vmem:[#allocation2 + $0x340] sm:$0xff]  ;;  %v13865_v54 = vadd.f32 %v22648_v43, %v13833_v32  ;;  %v12722_v32 = vld [vmem:[#allocation2 + $0x3d0] sm:$0xff] }
 0x4db   : > { %12772 = vst.msk [vmem:[#allocation2 + $0x360] sm:$0xff] %vm436_vm10, %v12740_v21  ;;  %v12741_v40 = vadd.f32 %v12709_v48, %v12587_v52  ;;  %17506 = vmatprep.mubr.msk.bf16.mxu0 %vm436_vm10, %v13921_v0  ;;  %v13863_v4 = vadd.f32 %v22648_v43, %v13831_v39  ;;  %v13834_v56 = vld [vmem:[#allocation2 + $0x358] sm:$0xff]  ;;  %v12720_v52 = vld [vmem:[#allocation2 + $0x3c0] sm:$0xff] }
 0x4dc   : > { %12775 = vst.msk [vmem:[#allocation2 + $0x378] sm:$0xff] %vm436_vm10, %v12743_v31  ;;  %17507 = vmatmul.mubr.msk.bf16.gmra.mrb[100].mxu0 %vm436_vm10, %v13922_v60  ;;  %v13832_v15 = vld [vmem:[#allocation2 + $0x348] sm:$0xff]  ;;  %v13866_v14 = vadd.f32 %v22648_v43, %v13834_v56  ;;  %v13897_v13 = vmax.f32 %v13865_v54, 0.0 }
 0x4dd   : > { %12773 = vst.msk [vmem:[#allocation2 + $0x368] sm:$0xff] %vm436_vm10, %v12741_v40  ;;  %v13864_v59 = vadd.f32 %v22648_v43, %v13832_v15  ;;  %v13895_v27 = vmax.f32 %v13863_v4, 0.0  ;;  %v12723_v40 = vld [vmem:[#allocation2 + $0x3d8] sm:$0xff] }
 0x4de   : > { %v13898_v26 = vmax.f32 %v13866_v14, 0.0  ;;  %v12721_v14 = vld [vmem:[#allocation2 + $0x3c8] sm:$0xff] }
 0x4df   : > { %v17384_v58 = vpop.f32.mrb[48].mxu1  ;;  %v13896_v35 = vmax.f32 %v13864_v59, 0.0 }
 0x4e0   : > { %v12746_v12 = vadd.f32 %v17384_v58, %v12714_v62  ;;  %v12600_v11 = vpop.f32.mrb[49].mxu1  ;;  %v13924_v42 = vpack.c.bf16 %v13898_v26, %v13897_v13 }
 0x4e1   : > { %v12744_v47 = vadd.f32 %v12712_v5, %v12600_v11  ;;  %v17385_v18 = vpop.f32.mrb[50].mxu1  ;;  %v13923_v28 = vpack.c.bf16 %v13896_v35, %v13895_v27  ;;  %v13837_v33 = vld [vmem:[#allocation2 + $0x370] sm:$0xff] }
 0x4e2   : > { %12778 = vst.msk [vmem:[#allocation2 + $0x390] sm:$0xff] %vm436_vm10, %v12746_v12  ;;  %v12747_v41 = vadd.f32 %v17385_v18, %v12715_v7  ;;  %v12603_v55 = vpop.f32.mrb[51].mxu1  ;;  %v13835_v57 = vld [vmem:[#allocation2 + $0x360] sm:$0xff]  ;;  %v13869_v63 = vadd.f32 %v22648_v43, %v13837_v33  ;;  %v12726_v33 = vld [vmem:[#allocation2 + $0x3f0] sm:$0xff] }
 0x4e3   : > { %12776 = vst.msk [vmem:[#allocation2 + $0x380] sm:$0xff] %vm436_vm10, %v12744_v47  ;;  %v12745_v29 = vadd.f32 %v12713_v44, %v12603_v55  ;;  %17510 = vmatprep.mubr.msk.bf16.mxu0 %vm436_vm10, %v13923_v28  ;;  %v13867_v46 = vadd.f32 %v22648_v43, %v13835_v57  ;;  %v13838_v49 = vld [vmem:[#allocation2 + $0x378] sm:$0xff]  ;;  %v12724_v55 = vld [vmem:[#allocation2 + $0x3e0] sm:$0xff] }
 0x4e4   : > { %12779 = vst.msk [vmem:[#allocation2 + $0x398] sm:$0xff] %vm436_vm10, %v12747_v41  ;;  %17511 = vmatmul.mubr.msk.bf16.gmra.mrb[104].mxu0 %vm436_vm10, %v13924_v42  ;;  %v13836_v37 = vld [vmem:[#allocation2 + $0x368] sm:$0xff]  ;;  %v13870_v6 = vadd.f32 %v22648_v43, %v13838_v49  ;;  %v13901_v20 = vmax.f32 %v13869_v63, 0.0 }
 0x4e5   : > { %12777 = vst.msk [vmem:[#allocation2 + $0x388] sm:$0xff] %vm436_vm10, %v12745_v29  ;;  %v13868_v23 = vadd.f32 %v22648_v43, %v13836_v37  ;;  %v13899_v1 = vmax.f32 %v13867_v46, 0.0  ;;  %v12727_v29 = vld [vmem:[#allocation2 + $0x3f8] sm:$0xff] }
 0x4e6   : > { %v13902_v36 = vmax.f32 %v13870_v6, 0.0  ;;  %v12725_v6 = vld [vmem:[#allocation2 + $0x3e8] sm:$0xff] }
 0x4e7   : > { %v17388_v8 = vpop.f32.mrb[52].mxu1  ;;  %v13900_v34 = vmax.f32 %v13868_v23, 0.0 }
 0x4e8   : > { %v12750_v2 = vadd.f32 %v17388_v8, %v12718_v10  ;;  %v12616_v53 = vpop.f32.mrb[53].mxu1  ;;  %v13926_v19 = vpack.c.bf16 %v13902_v36, %v13901_v20 }
 0x4e9   : > { %v12748_v16 = vadd.f32 %v12716_v24, %v12616_v53  ;;  %v17389_v25 = vpop.f32.mrb[54].mxu1  ;;  %v13925_v3 = vpack.c.bf16 %v13900_v34, %v13899_v1  ;;  %v13841_v17 = vld [vmem:[#allocation2 + $0x390] sm:$0xff] }
 0x4ea   : > { %12782 = vst.msk [vmem:[#allocation2 + $0x3b0] sm:$0xff] %vm436_vm10, %v12750_v2  ;;  %v12751_v30 = vadd.f32 %v17389_v25, %v12719_v61  ;;  %v12619_v38 = vpop.f32.mrb[55].mxu1  ;;  %v13839_v9 = vld [vmem:[#allocation2 + $0x380] sm:$0xff]  ;;  %v13873_v45 = vadd.f32 %v22648_v43, %v13841_v17 }
 0x4eb   : > { %12780 = vst.msk [vmem:[#allocation2 + $0x3a0] sm:$0xff] %vm436_vm10, %v12748_v16  ;;  %v12749_v22 = vadd.f32 %v12717_v50, %v12619_v38  ;;  %17514 = vmatprep.mubr.msk.bf16.mxu0 %vm436_vm10, %v13925_v3  ;;  %v13871_v48 = vadd.f32 %v22648_v43, %v13839_v9  ;;  %v13842_v51 = vld [vmem:[#allocation2 + $0x398] sm:$0xff] }
 0x4ec   : > { %12783 = vst.msk [vmem:[#allocation2 + $0x3b8] sm:$0xff] %vm436_vm10, %v12751_v30  ;;  %17515 = vmatmul.mubr.msk.bf16.gmra.mrb[108].mxu0 %vm436_vm10, %v13926_v19  ;;  %v13840_v21 = vld [vmem:[#allocation2 + $0x388] sm:$0xff]  ;;  %v13874_v0 = vadd.f32 %v22648_v43, %v13842_v51  ;;  %v13905_v62 = vmax.f32 %v13873_v45, 0.0 }
 0x4ed   : > { %12781 = vst.msk [vmem:[#allocation2 + $0x3a8] sm:$0xff] %vm436_vm10, %v12749_v22  ;;  %v13872_v31 = vadd.f32 %v22648_v43, %v13840_v21  ;;  %v13903_v4 = vmax.f32 %v13871_v48, 0.0 }
 0x4ee   : > { %v13906_v60 = vmax.f32 %v13874_v0, 0.0 }
 0x4ef   : > { %v17392_v39 = vpop.f32.mrb[56].mxu1  ;;  %v13904_v56 = vmax.f32 %v13872_v31, 0.0 }
 0x4f0   : > { %v12754_v15 = vadd.f32 %v17392_v39, %v12722_v32  ;;  %v12632_v54 = vpop.f32.mrb[57].mxu1  ;;  %v13928_v35 = vpack.c.bf16 %v13906_v60, %v13905_v62 }
 0x4f1   : > { %v12752_v59 = vadd.f32 %v12720_v52, %v12632_v54  ;;  %v17393_v5 = vpop.f32.mrb[58].mxu1  ;;  %v13927_v26 = vpack.c.bf16 %v13904_v56, %v13903_v4  ;;  %v13845_v58 = vld [vmem:[#allocation2 + $0x3b0] sm:$0xff] }
 0x4f2   : > { %12786 = vst.msk [vmem:[#allocation2 + $0x3d0] sm:$0xff] %vm436_vm10, %v12754_v15  ;;  %v12755_v7 = vadd.f32 %v17393_v5, %v12723_v40  ;;  %v12635_v27 = vpop.f32.mrb[59].mxu1  ;;  %v13843_v12 = vld [vmem:[#allocation2 + $0x3a0] sm:$0xff]  ;;  %v13877_v18 = vadd.f32 %v22648_v43, %v13845_v58 }
 0x4f3   : > { %12784 = vst.msk [vmem:[#allocation2 + $0x3c0] sm:$0xff] %vm436_vm10, %v12752_v59  ;;  %v12753_v11 = vadd.f32 %v12721_v14, %v12635_v27  ;;  %17518 = vmatprep.mubr.msk.bf16.mxu0 %vm436_vm10, %v13927_v26  ;;  %v13875_v44 = vadd.f32 %v22648_v43, %v13843_v12  ;;  %v13846_v13 = vld [vmem:[#allocation2 + $0x3b8] sm:$0xff]  ;;  %v22869_v14 = vld [vmem:[%s425_s20] ss:$0 sm:$0xff] }
 0x4f4   : > { %12787 = vst.msk [vmem:[#allocation2 + $0x3d8] sm:$0xff] %vm436_vm10, %v12755_v7  ;;  %17519 = vmatmul.mubr.msk.bf16.gmra.mrb[112].mxu0 %vm436_vm10, %v13928_v35  ;;  %v13844_v47 = vld [vmem:[#allocation2 + $0x3a8] sm:$0xff]  ;;  %v13878_v28 = vadd.f32 %v22648_v43, %v13846_v13  ;;  %v13909_v10 = vmax.f32 %v13877_v18, 0.0 }
 0x4f5   : > { %12785 = vst.msk [vmem:[#allocation2 + $0x3c8] sm:$0xff] %vm436_vm10, %v12753_v11  ;;  %v13876_v41 = vadd.f32 %v22648_v43, %v13844_v47  ;;  %v13907_v46 = vmax.f32 %v13875_v44, 0.0 }
 0x4f6   : > { %v13910_v42 = vmax.f32 %v13878_v28, 0.0 }
 0x4f7   : > { %v17396_v57 = vpop.f32.mrb[60].mxu1  ;;  %v13908_v49 = vmax.f32 %v13876_v41, 0.0 }
 0x4f8   : > { %v12758_v37 = vadd.f32 %v17396_v57, %v12726_v33  ;;  %v12648_v63 = vpop.f32.mrb[61].mxu1  ;;  %v13930_v34 = vpack.c.bf16 %v13910_v42, %v13909_v10 }
 0x4f9   : > { %v12756_v23 = vadd.f32 %v12724_v55, %v12648_v63  ;;  %v17397_v24 = vpop.f32.mrb[62].mxu1  ;;  %v13929_v36 = vpack.c.bf16 %v13908_v49, %v13907_v46  ;;  %v13849_v8 = vld [vmem:[#allocation2 + $0x3d0] sm:$0xff] }
 0x4fa   : > { %12790 = vst.msk [vmem:[#allocation2 + $0x3f0] sm:$0xff] %vm436_vm10, %v12758_v37  ;;  %v12759_v61 = vadd.f32 %v17397_v24, %v12727_v29  ;;  %v12651_v1 = vpop.f32.mrb[63].mxu1  ;;  %v13847_v2 = vld [vmem:[#allocation2 + $0x3c0] sm:$0xff]  ;;  %v13881_v25 = vadd.f32 %v22648_v43, %v13849_v8 }
 0x4fb   : > { %12788 = vst.msk [vmem:[#allocation2 + $0x3e0] sm:$0xff] %vm436_vm10, %v12756_v23  ;;  %v12757_v53 = vadd.f32 %v12725_v6, %v12651_v1  ;;  %17522 = vmatprep.mubr.msk.bf16.mxu0 %vm436_vm10, %v13929_v36  ;;  %v13879_v50 = vadd.f32 %v22648_v43, %v13847_v2  ;;  %v13850_v20 = vld [vmem:[#allocation2 + $0x3d8] sm:$0xff] }
 0x4fc   : > { %12791 = vst.msk [vmem:[#allocation2 + $0x3f8] sm:$0xff] %vm436_vm10, %v12759_v61  ;;  %17523 = vmatmul.mubr.msk.bf16.gmra.mrb[116].mxu0 %vm436_vm10, %v13930_v34  ;;  %v13848_v16 = vld [vmem:[#allocation2 + $0x3c8] sm:$0xff]  ;;  %v13882_v3 = vadd.f32 %v22648_v43, %v13850_v20  ;;  %v13913_v9 = vmax.f32 %v13881_v25, 0.0 }
 0x4fd   : > { %12789 = vst.msk [vmem:[#allocation2 + $0x3e8] sm:$0xff] %vm436_vm10, %v12757_v53  ;;  %v13880_v17 = vadd.f32 %v22648_v43, %v13848_v16  ;;  %v13911_v38 = vmax.f32 %v13879_v50, 0.0 }
 0x4fe   : > { %v13914_v30 = vmax.f32 %v13882_v3, 0.0 }
 0x4ff   : > { %v13912_v19 = vmax.f32 %v13880_v17, 0.0 }
 0x500   : > { %v13932_v51 = vpack.c.bf16 %v13914_v30, %v13913_v9 }
 0x501   : > { %v13931_v22 = vpack.c.bf16 %v13912_v19, %v13911_v38  ;;  %v13853_v48 = vld [vmem:[#allocation2 + $0x3f0] sm:$0xff] }
 0x502   : > { %v13851_v21 = vld [vmem:[#allocation2 + $0x3e0] sm:$0xff]  ;;  %v13885_v31 = vadd.f32 %v22648_v43, %v13853_v48 }
 0x503   : > { %17526 = vmatprep.mubr.msk.bf16.mxu0 %vm436_vm10, %v13931_v22  ;;  %v13883_v45 = vadd.f32 %v22648_v43, %v13851_v21  ;;  %v13854_v0 = vld [vmem:[#allocation2 + $0x3f8] sm:$0xff] }
 0x504   : > { %17527 = vmatmul.mubr.msk.bf16.gmra.mrb[120].mxu0 %vm436_vm10, %v13932_v51  ;;  %v13852_v32 = vld [vmem:[#allocation2 + $0x3e8] sm:$0xff]  ;;  %v13886_v52 = vadd.f32 %v22648_v43, %v13854_v0  ;;  %v13917_v56 = vmax.f32 %v13885_v31, 0.0 }
 0x505   : > { %v13884_v60 = vadd.f32 %v22648_v43, %v13852_v32  ;;  %v13915_v40 = vmax.f32 %v13883_v45, 0.0 }
 0x506   : > { %v13918_v39 = vmax.f32 %v13886_v52, 0.0 }
 0x507   : > { %v13916_v4 = vmax.f32 %v13884_v60, 0.0 }
 0x508   : > { %v13934_v54 = vpack.c.bf16 %v13918_v39, %v13917_v56 }
 0x509   : > { %v13933_v15 = vpack.c.bf16 %v13916_v4, %v13915_v40 }
 0x50b   : > { %17530 = vmatprep.mubr.msk.bf16.mxu0 %vm436_vm10, %v13933_v15 }
 0x50c   : > { %17531 = vmatmul.mubr.msk.bf16.gmra.mrb[124].mxu0 %vm436_vm10, %v13934_v54 }
 0x5a7   : > { %v17504_v62 = vpop.f32.mrb[96].mxu0 }
 0x5a8   : > { %v14194_v43 = vadd.f32 %v17504_v62, %v22869_v14  ;;  %v14026_v59 = vpop.f32.mrb[97].mxu0 }
 0x5a9   : > { %v14192_v5 = vadd.f32 %v22869_v14, %v14026_v59  ;;  %v17505_v26 = vpop.f32.mrb[98].mxu0 }
 0x5aa   : > { %v14226_v58 = vmax.f32 %v14194_v43, 0.0  ;;  %v14195_v7 = vadd.f32 %v17505_v26, %v22869_v14  ;;  %v14029_v27 = vpop.f32.mrb[99].mxu0 }
 0x5ab   : > { %v14224_v35 = vmax.f32 %v14192_v5, 0.0  ;;  %v14193_v12 = vadd.f32 %v22869_v14, %v14029_v27 }
 0x5ac   : > { %14258 = vst.msk [vmem:[%s22876_s25 + $0x10] sm:$0xff] %vm436_vm10, %v14226_v58  ;;  %v14227_v11 = vmax.f32 %v14195_v7, 0.0 }
 0x5ad   : > { %14256 = vst.msk [vmem:[%s22876_s25] sm:$0xff] %vm436_vm10, %v14224_v35  ;;  %v14225_v44 = vmax.f32 %v14193_v12, 0.0 }
 0x5ae   : > { %14259 = vst.msk [vmem:[%s22876_s25 + $0x18] sm:$0xff] %vm436_vm10, %v14227_v11 }
 0x5af   : > { %14257 = vst.msk [vmem:[%s22876_s25 + $0x8] sm:$0xff] %vm436_vm10, %v14225_v44  ;;  %v17508_v13 = vpop.f32.mrb[100].mxu0 }
 0x5b0   : > { %v14198_v47 = vadd.f32 %v17508_v13, %v22869_v14  ;;  %v14042_v18 = vpop.f32.mrb[101].mxu0 }
 0x5b1   : > { %v14196_v28 = vadd.f32 %v22869_v14, %v14042_v18  ;;  %v17509_v33 = vpop.f32.mrb[102].mxu0 }
 0x5b2   : > { %v14230_v41 = vmax.f32 %v14198_v47, 0.0  ;;  %v14199_v55 = vadd.f32 %v17509_v33, %v22869_v14  ;;  %v14045_v42 = vpop.f32.mrb[103].mxu0 }
 0x5b3   : > { %v14228_v57 = vmax.f32 %v14196_v28, 0.0  ;;  %v14197_v29 = vadd.f32 %v22869_v14, %v14045_v42 }
 0x5b4   : > { %14262 = vst.msk [vmem:[%s22876_s25 + $0x30] sm:$0xff] %vm436_vm10, %v14230_v41  ;;  %v14231_v46 = vmax.f32 %v14199_v55, 0.0 }
 0x5b5   : > { %14260 = vst.msk [vmem:[%s22876_s25 + $0x20] sm:$0xff] %vm436_vm10, %v14228_v57  ;;  %v14229_v49 = vmax.f32 %v14197_v29, 0.0 }
 0x5b6   : > { %14263 = vst.msk [vmem:[%s22876_s25 + $0x38] sm:$0xff] %vm436_vm10, %v14231_v46 }
 0x5b7   : > { %14261 = vst.msk [vmem:[%s22876_s25 + $0x28] sm:$0xff] %vm436_vm10, %v14229_v49  ;;  %v17512_v37 = vpop.f32.mrb[104].mxu0 }
 0x5b8   : > { %v14202_v63 = vadd.f32 %v17512_v37, %v22869_v14  ;;  %v14058_v6 = vpop.f32.mrb[105].mxu0 }
 0x5b9   : > { %v14200_v10 = vadd.f32 %v22869_v14, %v14058_v6  ;;  %v17513_v23 = vpop.f32.mrb[106].mxu0 }
 0x5ba   : > { %v14234_v24 = vmax.f32 %v14202_v63, 0.0  ;;  %v14203_v36 = vadd.f32 %v17513_v23, %v22869_v14  ;;  %v14061_v8 = vpop.f32.mrb[107].mxu0 }
 0x5bb   : > { %v14232_v61 = vmax.f32 %v14200_v10, 0.0  ;;  %v14201_v1 = vadd.f32 %v22869_v14, %v14061_v8 }
 0x5bc   : > { %14266 = vst.msk [vmem:[%s22876_s25 + $0x50] sm:$0xff] %vm436_vm10, %v14234_v24  ;;  %v14235_v34 = vmax.f32 %v14203_v36, 0.0 }
 0x5bd   : > { %14264 = vst.msk [vmem:[%s22876_s25 + $0x40] sm:$0xff] %vm436_vm10, %v14232_v61  ;;  %v14233_v2 = vmax.f32 %v14201_v1, 0.0 }
 0x5be   : > { %14267 = vst.msk [vmem:[%s22876_s25 + $0x58] sm:$0xff] %vm436_vm10, %v14235_v34 }
 0x5bf   : > { %14265 = vst.msk [vmem:[%s22876_s25 + $0x48] sm:$0xff] %vm436_vm10, %v14233_v2  ;;  %v17516_v53 = vpop.f32.mrb[108].mxu0 }
 0x5c0   : > { %v14206_v50 = vadd.f32 %v17516_v53, %v22869_v14  ;;  %v14074_v20 = vpop.f32.mrb[109].mxu0 }
 0x5c1   : > { %v14204_v16 = vadd.f32 %v22869_v14, %v14074_v20  ;;  %v17517_v25 = vpop.f32.mrb[110].mxu0 }
 0x5c2   : > { %v14238_v3 = vmax.f32 %v14206_v50, 0.0  ;;  %v14207_v17 = vadd.f32 %v17517_v25, %v22869_v14  ;;  %v14077_v30 = vpop.f32.mrb[111].mxu0 }
 0x5c3   : > { %v14236_v38 = vmax.f32 %v14204_v16, 0.0  ;;  %v14205_v19 = vadd.f32 %v22869_v14, %v14077_v30 }
 0x5c4   : > { %14270 = vst.msk [vmem:[%s22876_s25 + $0x70] sm:$0xff] %vm436_vm10, %v14238_v3  ;;  %v14239_v9 = vmax.f32 %v14207_v17, 0.0 }
 0x5c5   : > { %14268 = vst.msk [vmem:[%s22876_s25 + $0x60] sm:$0xff] %vm436_vm10, %v14236_v38  ;;  %v14237_v22 = vmax.f32 %v14205_v19, 0.0 }
 0x5c6   : > { %14271 = vst.msk [vmem:[%s22876_s25 + $0x78] sm:$0xff] %vm436_vm10, %v14239_v9 }
 0x5c7   : > { %14269 = vst.msk [vmem:[%s22876_s25 + $0x68] sm:$0xff] %vm436_vm10, %v14237_v22  ;;  %v17520_v48 = vpop.f32.mrb[112].mxu0 }
 0x5c8   : > { %v14210_v51 = vadd.f32 %v17520_v48, %v22869_v14  ;;  %v14090_v21 = vpop.f32.mrb[113].mxu0 }
 0x5c9   : > { %v14208_v45 = vadd.f32 %v22869_v14, %v14090_v21  ;;  %v17521_v0 = vpop.f32.mrb[114].mxu0 }
 0x5ca   : > { %v14242_v32 = vmax.f32 %v14210_v51, 0.0  ;;  %v14211_v31 = vadd.f32 %v17521_v0, %v22869_v14  ;;  %v14093_v52 = vpop.f32.mrb[115].mxu0 }
 0x5cb   : > { %v14240_v60 = vmax.f32 %v14208_v45, 0.0  ;;  %v14209_v39 = vadd.f32 %v22869_v14, %v14093_v52 }
 0x5cc   : > { %14274 = vst.msk [vmem:[%s22876_s25 + $0x90] sm:$0xff] %vm436_vm10, %v14242_v32  ;;  %v14243_v40 = vmax.f32 %v14211_v31, 0.0 }
 0x5cd   : > { %14272 = vst.msk [vmem:[%s22876_s25 + $0x80] sm:$0xff] %vm436_vm10, %v14240_v60  ;;  %v14241_v4 = vmax.f32 %v14209_v39, 0.0 }
 0x5ce   : > { %14275 = vst.msk [vmem:[%s22876_s25 + $0x98] sm:$0xff] %vm436_vm10, %v14243_v40 }
 0x5cf   : > { %14273 = vst.msk [vmem:[%s22876_s25 + $0x88] sm:$0xff] %vm436_vm10, %v14241_v4  ;;  %v17524_v56 = vpop.f32.mrb[116].mxu0 }
 0x5d0   : > { %v14214_v15 = vadd.f32 %v17524_v56, %v22869_v14  ;;  %v14106_v54 = vpop.f32.mrb[117].mxu0 }
 0x5d1   : > { %v14212_v62 = vadd.f32 %v22869_v14, %v14106_v54  ;;  %v17525_v43 = vpop.f32.mrb[118].mxu0 }
 0x5d2   : > { %v14246_v59 = vmax.f32 %v14214_v15, 0.0  ;;  %v14215_v5 = vadd.f32 %v17525_v43, %v22869_v14  ;;  %v14109_v26 = vpop.f32.mrb[119].mxu0 }
 0x5d3   : > { %v14244_v58 = vmax.f32 %v14212_v62, 0.0  ;;  %v14213_v7 = vadd.f32 %v22869_v14, %v14109_v26 }
 0x5d4   : > { %14278 = vst.msk [vmem:[%s22876_s25 + $0xb0] sm:$0xff] %vm436_vm10, %v14246_v59  ;;  %v14247_v27 = vmax.f32 %v14215_v5, 0.0 }
 0x5d5   : > { %14276 = vst.msk [vmem:[%s22876_s25 + $0xa0] sm:$0xff] %vm436_vm10, %v14244_v58  ;;  %v14245_v35 = vmax.f32 %v14213_v7, 0.0 }
 0x5d6   : > { %14279 = vst.msk [vmem:[%s22876_s25 + $0xb8] sm:$0xff] %vm436_vm10, %v14247_v27 }
 0x5d7   : > { %14277 = vst.msk [vmem:[%s22876_s25 + $0xa8] sm:$0xff] %vm436_vm10, %v14245_v35  ;;  %v17528_v12 = vpop.f32.mrb[120].mxu0 }
 0x5d8   : > { %v14218_v11 = vadd.f32 %v17528_v12, %v22869_v14  ;;  %v14122_v44 = vpop.f32.mrb[121].mxu0 }
 0x5d9   : > { %v14216_v13 = vadd.f32 %v22869_v14, %v14122_v44  ;;  %v17529_v47 = vpop.f32.mrb[122].mxu0 }
 0x5da   : > { %v14250_v18 = vmax.f32 %v14218_v11, 0.0  ;;  %v14219_v28 = vadd.f32 %v17529_v47, %v22869_v14  ;;  %v14125_v33 = vpop.f32.mrb[123].mxu0 }
 0x5db   : > { %v14248_v41 = vmax.f32 %v14216_v13, 0.0  ;;  %v14217_v55 = vadd.f32 %v22869_v14, %v14125_v33 }
 0x5dc   : > { %14282 = vst.msk [vmem:[%s22876_s25 + $0xd0] sm:$0xff] %vm436_vm10, %v14250_v18  ;;  %v14251_v42 = vmax.f32 %v14219_v28, 0.0 }
 0x5dd   : > { %14280 = vst.msk [vmem:[%s22876_s25 + $0xc0] sm:$0xff] %vm436_vm10, %v14248_v41  ;;  %v14249_v57 = vmax.f32 %v14217_v55, 0.0 }
 0x5de   : > { %14283 = vst.msk [vmem:[%s22876_s25 + $0xd8] sm:$0xff] %vm436_vm10, %v14251_v42 }
 0x5df   : > { %14281 = vst.msk [vmem:[%s22876_s25 + $0xc8] sm:$0xff] %vm436_vm10, %v14249_v57  ;;  %v17532_v29 = vpop.f32.mrb[124].mxu0 }
 0x5e0   : > { %v14222_v46 = vadd.f32 %v17532_v29, %v22869_v14  ;;  %v14138_v49 = vpop.f32.mrb[125].mxu0 }
 0x5e1   : > { %v14220_v37 = vadd.f32 %v22869_v14, %v14138_v49  ;;  %v17533_v63 = vpop.f32.mrb[126].mxu0 }
 0x5e2   : > { %v14254_v6 = vmax.f32 %v14222_v46, 0.0  ;;  %v14223_v10 = vadd.f32 %v17533_v63, %v22869_v14  ;;  %v14141_v23 = vpop.f32.mrb[127].mxu0 }
 0x5e3   : > { %v14252_v24 = vmax.f32 %v14220_v37, 0.0  ;;  %v14221_v36 = vadd.f32 %v22869_v14, %v14141_v23 }
 0x5e4   : > { %14286 = vst.msk [vmem:[%s22876_s25 + $0xf0] sm:$0xff] %vm436_vm10, %v14254_v6  ;;  %v14255_v8 = vmax.f32 %v14223_v10, 0.0 }
 0x5e5   : > { %14284 = vst.msk [vmem:[%s22876_s25 + $0xe0] sm:$0xff] %vm436_vm10, %v14252_v24  ;;  %v14253_v61 = vmax.f32 %v14221_v36, 0.0 }
 0x5e6   : > { %14287 = vst.msk [vmem:[%s22876_s25 + $0xf8] sm:$0xff] %vm436_vm10, %v14255_v8 }
 0x5e7   : > { %14285 = vst.msk [vmem:[%s22876_s25 + $0xe8] sm:$0xff] %vm436_vm10, %v14253_v61 }
 0x5e8 PF: > { %s18_s29 = sadd.s32 1, %s18606_s29   ;;  %s23003_s27 = smov %s18602_s28 }
 0x5e9   : > { %p15_p5 = scmp.ge.s32.totalorder %s18_s29, 4   ;;  %s23004_s28 = smov %s23006_s30 }
 0x5eb   :  { %17 = sbr.rel (!%p15_p5) target bundleno = 2 (0x2), region = 136 }

</bundles_post_ra>
